<compile_context>
chip_gen: v5e
topology: v5e:2x2
jax: 0.10.0
libtpu: 0.0.40
codegen_flags: <defaults>
</compile_context>

<pallas_src>
import numpy as np
import jax
import jax.numpy as jnp
from jax import lax
from jax.experimental import pallas as pl
from jax.experimental.pallas import tpu as pltpu  # noqa: F401  (kept for TPU-specific tuning hooks)

F32 = jnp.float32
LN_EPS = 1e-5  # torch.nn.LayerNorm default


# --------------------------- in-kernel math helpers -------------------------

def _erf_approx(x):
    # Abramowitz & Stegun 7.1.26, |abs err| <= 1.5e-7.
    a1, a2, a3, a4, a5 = 0.254829592, -0.284496736, 1.421413741, -1.453152027, 1.061405429
    p = 0.3275911
    z = jnp.abs(x)
    t = 1.0 / (1.0 + p * z)
    poly = ((((a5 * t + a4) * t + a3) * t + a2) * t + a1) * t
    y = 1.0 - poly * jnp.exp(-z * z)
    return jnp.where(x < 0.0, -y, y)


def _gelu_exact(x):
    return 0.5 * x * (1.0 + _erf_approx(x * 0.7071067811865476))


def _ln(x, g, b):
    mean = jnp.mean(x, axis=-1, keepdims=True)
    cen = x - mean
    var = jnp.mean(cen * cen, axis=-1, keepdims=True)
    return cen * lax.rsqrt(var + LN_EPS) * g + b


# ------------------------------- architecture -------------------------------

def build_arch(cfg):
    Ph = cfg['img_size'] // cfg['patch_size']
    layers = []
    for i, depth in enumerate(cfg['depths']):
        dim = cfg['embed_dim'] * (2 ** i)
        res = (Ph // (2 ** i), Ph // (2 ** i))
        heads = cfg['num_heads'][i]
        blocks = []
        for bi in range(depth):
            ws = cfg['window_size']
            shift = 0 if bi % 2 == 0 else cfg['window_size'] // 2
            if min(res) <= ws:           # same rule as SwinMLPBlock.__init__
                shift = 0
                ws = min(res)
            blocks.append({'ws': ws, 'shift': shift, 'heads': heads,
                           'hidden': int(dim * cfg['mlp_ratio'])})
        layers.append({'dim': dim, 'res': res, 'blocks': blocks,
                       'downsample': i < len(cfg['depths']) - 1})
    return {'patches_resolution': (Ph, Ph), 'layers': layers,
            'num_features': cfg['embed_dim'] * (2 ** (len(cfg['depths']) - 1))}


def init_params(key, cfg, arch):
    cnt = [0]

    def nk():
        cnt[0] += 1
        return jax.random.fold_in(key, cnt[0])

    def wgt(shape, scale=0.02):
        return (scale * jax.random.normal(nk(), shape)).astype(F32)

    ps, ed, cin = cfg['patch_size'], cfg['embed_dim'], cfg['in_chans']
    params = {
        'patch_embed': {'w': wgt((cin * ps * ps, ed)), 'b': wgt((ed,)),
                        'ng': 1.0 + wgt((ed,)), 'nb': wgt((ed,))},
        'layers': [],
        'norm_g': 1.0 + wgt((arch['num_features'],)),
        'norm_b': wgt((arch['num_features'],)),
        'head_w': wgt((arch['num_features'], cfg['num_classes'])),
        'head_b': wgt((cfg['num_classes'],)),
    }
    for layer in arch['layers']:
        dim = layer['dim']
        blocks = []
        for blk in layer['blocks']:
            ws2 = blk['ws'] * blk['ws']
            heads, hidden = blk['heads'], blk['hidden']
            blocks.append({
                'n1g': 1.0 + wgt((dim,)), 'n1b': wgt((dim,)),
                'sw': wgt((heads, ws2, ws2)), 'sb': wgt((heads, ws2)),
                'n2g': 1.0 + wgt((dim,)), 'n2b': wgt((dim,)),
                'fc1w': wgt((dim, hidden)), 'fc1b': wgt((hidden,)),
                'fc2w': wgt((hidden, dim)), 'fc2b': wgt((dim,)),
            })
        lp = {'blocks': blocks}
        if layer['downsample']:
            lp['down'] = {'ng': 1.0 + wgt((4 * dim,)), 'nb': wgt((4 * dim,)),
                          'rw': wgt((4 * dim, 2 * dim))}
        params['layers'].append(lp)
    return params


# ------------------ one-time parameter folding (outside jit) -----------------

def _fold_spatial(sw, sb, H, W, ws, shift, heads, C, B):
    """Fold the shifted-window grouped spatial MLP (Conv1d, groups=heads) into
    per-head dense token-mixing matrices over the flattened (batch*token) axis.

    y[:, head-g cols] = Mbig[g] @ x[:, head-g cols] + bias_map[:, head-g cols]
    Zero padding of shifted windows is absorbed exactly (padded taps vanish).
    """
    sw = np.asarray(sw, dtype=np.float64)
    sb = np.asarray(sb, dtype=np.float64)
    A = ws * ws
    L = H * W
    ch = C // heads
    pad = (ws - shift) if shift > 0 else 0
    M = np.zeros((heads, L, L), dtype=np.float64)
    bias_map = np.zeros((L, C), dtype=np.float64)
    for hh in range(H):
        for ww in range(W):
            i = hh * W + ww
            ph, pw = hh + pad, ww + pad
            base_h = (ph // ws) * ws
            base_w = (pw // ws) * ws
            local = (ph - base_h) * ws + (pw - base_w)
            for g in range(heads):
                bias_map[i, g * ch:(g + 1) * ch] = sb[g, local]
                for k in range(A):
                    src_h = base_h + k // ws - pad
                    src_w = base_w + k % ws - pad
                    if 0 <= src_h < H and 0 <= src_w < W:
                        M[g, i, src_h * W + src_w] = sw[g, local, k]
    Mbig = np.zeros((heads, B * L, B * L), dtype=np.float32)
    for b in range(B):
        Mbig[:, b * L:(b + 1) * L, b * L:(b + 1) * L] = M
    bias_big = np.tile(bias_map, (B, 1)).astype(np.float32)
    mask = np.zeros((heads, C), dtype=np.float32)
    for g in range(heads):
        mask[g, g * ch:(g + 1) * ch] = 1.0
    return Mbig, bias_big, mask


def _fold_merge(H, W, C, B):
    """Patch-merging 2x2 gather + concat as matmuls: cat = sum_p G[p] @ x @ E[p]."""
    nH, nW = H // 2, W // 2
    L, nL = H * W, nH * nW
    G = np.zeros((4, B * nL, B * L), dtype=np.float32)
    E = np.zeros((4, C, 4 * C), dtype=np.float32)
    offs = [(0, 0), (1, 0), (0, 1), (1, 1)]   # x0, x1, x2, x3 in torch.cat order
    for p, (dh, dw) in enumerate(offs):
        E[p, np.arange(C), p * C + np.arange(C)] = 1.0
        for b in range(B):
            for i in range(nH):
                for j in range(nW):
                    G[p, b * nL + i * nW + j,
                      b * L + (2 * i + dh) * W + (2 * j + dw)] = 1.0
    return G, E


def prepare_operands(params, cfg, arch, B):
    """Flatten all (folded) parameters into the kernel's operand list + static plan."""
    ops = []
    pe = params['patch_embed']
    ops.append(pe['w'])
    ops.append(jnp.stack([pe['b'], pe['ng'], pe['nb']], axis=0))          # (3, ed)
    plan_blocks = []
    for li, layer in enumerate(arch['layers']):
        H, W = layer['res']
        dim = layer['dim']
        lp = params['layers'][li]
        nblk = len(layer['blocks'])
        for bi, blk in enumerate(layer['blocks']):
            p = lp['blocks'][bi]
            Mbig, bias_map, mask = _fold_spatial(p['sw'], p['sb'], H, W,
                                                 blk['ws'], blk['shift'],
                                                 blk['heads'], dim, B)
            ops += [jnp.asarray(Mbig), jnp.asarray(mask), jnp.asarray(bias_map),
                    jnp.stack([p['n1g'], p['n1b'], p['n2g'], p['n2b']], axis=0),
                    p['fc1w'], p['fc1b'].reshape(1, -1),
                    p['fc2w'], p['fc2b'].reshape(1, -1)]
            merge = bool(layer['downsample'] and bi == nblk - 1)
            plan_blocks.append({'heads': blk['heads'], 'merge': merge})
            if merge:
                d = lp['down']
                G, E = _fold_merge(H, W, dim, B)
                ops += [jnp.asarray(G), jnp.asarray(E),
                        jnp.stack([d['ng'], d['nb']], axis=0), d['rw']]
    Lf = arch['layers'][-1]['res'][0] * arch['layers'][-1]['res'][1]
    pool = np.zeros((B, B * Lf), dtype=np.float32)
    for b in range(B):
        pool[b, b * Lf:(b + 1) * Lf] = 1.0 / Lf                          # mean over tokens
    ops += [jnp.stack([params['norm_g'], params['norm_b']], axis=0),
            jnp.asarray(pool), params['head_w'], params['head_b'].reshape(1, -1)]
    ops = [jnp.asarray(o, dtype=F32) for o in ops]
    return ops, {'blocks': plan_blocks}


# --------------------------- the single fused kernel -------------------------

def _build_kernel(plan):
    blocks = plan['blocks']

    def kernel(*refs):
        out_ref = refs[-1]
        it = iter(refs[:-1])

        def nxt():
            return next(it)

        # ---- patch embed: LN(x @ W + b) ----
        xp = nxt()[...]
        pe_w = nxt()[...]
        pe_v = nxt()
        t = jnp.dot(xp, pe_w, preferred_element_type=F32) + pe_v[0:1, :]
        t = _ln(t, pe_v[1:2, :], pe_v[2:3, :])

        # ---- Swin-MLP blocks (+ patch merging after the stage's last block) ----
        for blk in blocks:
            mbig = nxt()
            mask = nxt()
            bias_map = nxt()
            lnv = nxt()
            fc1w = nxt()
            fc1b = nxt()
            fc2w = nxt()
            fc2b = nxt()
            # LN1 + folded shifted-window grouped spatial MLP + residual
            h = _ln(t, lnv[0:1, :], lnv[1:2, :])
            y = bias_map[...]
            for g in range(blk['heads']):
                y = y + jnp.dot(mbig[g], h * mask[g:g + 1, :],
                                preferred_element_type=F32)
            t = t + y
            # LN2 + fc1 + GELU + fc2 + residual
            h = _ln(t, lnv[2:3, :], lnv[3:4, :])
            h = _gelu_exact(jnp.dot(h, fc1w[...], preferred_element_type=F32)
                            + fc1b[...])
            h = jnp.dot(h, fc2w[...], preferred_element_type=F32) + fc2b[...]
            t = t + h
            if blk['merge']:
                gmat = nxt()
                emat = nxt()
                mnv = nxt()
                rw = nxt()
                cat = jnp.dot(jnp.dot(gmat[0], t, preferred_element_type=F32),
                              emat[0], preferred_element_type=F32)
                for p in range(1, 4):
                    cat = cat + jnp.dot(
                        jnp.dot(gmat[p], t, preferred_element_type=F32),
                        emat[p], preferred_element_type=F32)
                cat = _ln(cat, mnv[0:1, :], mnv[1:2, :])
                t = jnp.dot(cat, rw[...], preferred_element_type=F32)

        # ---- final LN + token-mean pool + classifier head ----
        hnv = nxt()
        pool = nxt()
        hw = nxt()
        hb = nxt()
        h = _ln(t, hnv[0:1, :], hnv[1:2, :])
        pooled = jnp.dot(pool[...], h, preferred_element_type=F32)
        out_ref[...] = (jnp.dot(pooled, hw[...], preferred_element_type=F32)
                        + hb[...])

    return kernel


def make_forward(cfg, operands, plan, B):
    kernel = _build_kernel(plan)
    ps, cin = cfg['patch_size'], cfg['in_chans']
    Ph = cfg['img_size'] // ps
    nc = cfg['num_classes']

    @jax.jit
    def forward(x, *ops):
        # NCHW -> (tokens, patch-pixels): single XLA transpose; everything else
        # (whole network) is ONE pallas_call with all operands resident in VMEM.
        xp = x.reshape(B, cin, Ph, ps, Ph, ps).transpose(0, 2, 4, 1, 3, 5)
        xp = xp.reshape(B * Ph * Ph, cin * ps * ps).astype(F32)
        return pl.pallas_call(
            kernel,
            out_shape=jax.ShapeDtypeStruct((B, nc), F32),
        )(xp, *ops)

    return lambda x: forward(x, *operands)


# ----------------------- pure-JAX reference (spec check) ---------------------

def _ln_ref(x, g, b):
    mean = jnp.mean(x, axis=-1, keepdims=True)
    cen = x - mean
    var = jnp.mean(cen * cen, axis=-1, keepdims=True)
    return cen * lax.rsqrt(var + LN_EPS) * g + b


def reference_forward(params, x, cfg, arch):
    HI = jax.lax.Precision.HIGHEST
    B, cin, Hi, Wi = x.shape
    ps = cfg['patch_size']
    Ph = Hi // ps
    xp = x.reshape(B, cin, Ph, ps, Ph, ps).transpose(0, 2, 4, 1, 3, 5)
    xp = xp.reshape(B, Ph * Ph, cin * ps * ps)
    pe = params['patch_embed']
    t = jnp.einsum('blk,kd->bld', xp, pe['w'], precision=HI) + pe['b']
    t = _ln_ref(t, pe['ng'], pe['nb'])

    for li, layer in enumerate(arch['layers']):
        H, W = layer['res']
        dim = layer['dim']
        lp = params['layers'][li]
        for bi, blk in enumerate(layer['blocks']):
            p = lp['blocks'][bi]
            heads, ws, shift = blk['heads'], blk['ws'], blk['shift']
            ch = dim // heads
            shortcut = t
            xb = _ln_ref(t, p['n1g'], p['n1b']).reshape(B, H, W, dim)
            pad = (ws - shift) if shift > 0 else 0
            Hp = -(-(H + pad) // ws) * ws
            Wp = -(-(W + pad) // ws) * ws
            xb = jnp.pad(xb, ((0, 0), (pad, Hp - H - pad), (pad, Wp - W - pad), (0, 0)))
            nh, nw = Hp // ws, Wp // ws
            xw = xb.reshape(B, nh, ws, nw, ws, heads, ch)
            xw = xw.transpose(0, 1, 3, 5, 2, 4, 6).reshape(B, nh, nw, heads, ws * ws, ch)
            yw = (jnp.einsum('glk,bijgkc->bijglc', p['sw'], xw, precision=HI)
                  + p['sb'][None, None, None, :, :, None])
            yw = yw.reshape(B, nh, nw, heads, ws, ws, ch).transpose(0, 1, 4, 2, 5, 3, 6)
            y = yw.reshape(B, Hp, Wp, dim)[:, pad:pad + H, pad:pad + W, :]
            t = shortcut + y.reshape(B, H * W, dim)
            h = _ln_ref(t, p['n2g'], p['n2b'])
            h = jax.nn.gelu(jnp.einsum('bld,dh->blh', h, p['fc1w'], precision=HI)
                            + p['fc1b'], approximate=False)
            h = jnp.einsum('blh,hd->bld', h, p['fc2w'], precision=HI) + p['fc2b']
            t = t + h
        if layer['downsample']:
            d = lp['down']
            xv = t.reshape(B, H, W, dim)
            x0 = xv[:, 0::2, 0::2, :]
            x1 = xv[:, 1::2, 0::2, :]
            x2 = xv[:, 0::2, 1::2, :]
            x3 = xv[:, 1::2, 1::2, :]
            cat = jnp.concatenate([x0, x1, x2, x3], axis=-1).reshape(B, -1, 4 * dim)
            cat = _ln_ref(cat, d['ng'], d['nb'])
            t = jnp.einsum('blk,kd->bld', cat, d['rw'], precision=HI)

    t = _ln_ref(t, params['norm_g'], params['norm_b'])
    pooled = jnp.mean(t, axis=1)
    return (jnp.einsum('bd,dc->bc', pooled, params['head_w'], precision=HI)
            + params['head_b'])


# --------------------------------- driver ------------------------------------

if __name__ == "__main__":
    cfg = dict(img_size=32, patch_size=4, in_chans=3, num_classes=10,
               embed_dim=16, depths=(2, 2), num_heads=(2, 4),
               window_size=4, mlp_ratio=2.0)
    arch = build_arch(cfg)

    key = jax.random.PRNGKey(0)
    pkey, xkey = jax.random.split(key)
    params = init_params(pkey, cfg, arch)

    B = 2
    x = jax.random.normal(xkey, (B, cfg['in_chans'], cfg['img_size'], cfg['img_size']),
                          dtype=F32)

    operands, plan = prepare_operands(params, cfg, arch, B)   # one-time folding
    fwd = make_forward(cfg, operands, plan, B)

    out = jax.block_until_ready(fwd(x))
    assert out.shape == (B, cfg['num_classes'])
    assert bool(jnp.all(jnp.isfinite(out)))

    # Verify the fused kernel against a pure-JAX reference of the PyTorch module.
    ref = jax.block_until_ready(
        jax.jit(lambda xi: reference_forward(params, xi, cfg, arch))(x))
    np.testing.assert_allclose(np.asarray(out), np.asarray(ref), rtol=5e-2, atol=5e-3)

    print("KERNEL_OK")
</pallas_src>

<mosaic_0001>
module attributes {stable_mosaic.version = 11 : i64} {
  func.func @kernel(%arg0: memref<128x48xf32, #tpu.memory_space<vmem>>, %arg1: memref<48x16xf32, #tpu.memory_space<vmem>>, %arg2: memref<3x16xf32, #tpu.memory_space<vmem>>, %arg3: memref<2x128x128xf32, #tpu.memory_space<vmem>>, %arg4: memref<2x16xf32, #tpu.memory_space<vmem>>, %arg5: memref<128x16xf32, #tpu.memory_space<vmem>>, %arg6: memref<4x16xf32, #tpu.memory_space<vmem>>, %arg7: memref<16x32xf32, #tpu.memory_space<vmem>>, %arg8: memref<1x32xf32, #tpu.memory_space<vmem>>, %arg9: memref<32x16xf32, #tpu.memory_space<vmem>>, %arg10: memref<1x16xf32, #tpu.memory_space<vmem>>, %arg11: memref<2x128x128xf32, #tpu.memory_space<vmem>>, %arg12: memref<2x16xf32, #tpu.memory_space<vmem>>, %arg13: memref<128x16xf32, #tpu.memory_space<vmem>>, %arg14: memref<4x16xf32, #tpu.memory_space<vmem>>, %arg15: memref<16x32xf32, #tpu.memory_space<vmem>>, %arg16: memref<1x32xf32, #tpu.memory_space<vmem>>, %arg17: memref<32x16xf32, #tpu.memory_space<vmem>>, %arg18: memref<1x16xf32, #tpu.memory_space<vmem>>, %arg19: memref<4x32x128xf32, #tpu.memory_space<vmem>>, %arg20: memref<4x16x64xf32, #tpu.memory_space<vmem>>, %arg21: memref<2x64xf32, #tpu.memory_space<vmem>>, %arg22: memref<64x32xf32, #tpu.memory_space<vmem>>, %arg23: memref<4x32x32xf32, #tpu.memory_space<vmem>>, %arg24: memref<4x32xf32, #tpu.memory_space<vmem>>, %arg25: memref<32x32xf32, #tpu.memory_space<vmem>>, %arg26: memref<4x32xf32, #tpu.memory_space<vmem>>, %arg27: memref<32x64xf32, #tpu.memory_space<vmem>>, %arg28: memref<1x64xf32, #tpu.memory_space<vmem>>, %arg29: memref<64x32xf32, #tpu.memory_space<vmem>>, %arg30: memref<1x32xf32, #tpu.memory_space<vmem>>, %arg31: memref<4x32x32xf32, #tpu.memory_space<vmem>>, %arg32: memref<4x32xf32, #tpu.memory_space<vmem>>, %arg33: memref<32x32xf32, #tpu.memory_space<vmem>>, %arg34: memref<4x32xf32, #tpu.memory_space<vmem>>, %arg35: memref<32x64xf32, #tpu.memory_space<vmem>>, %arg36: memref<1x64xf32, #tpu.memory_space<vmem>>, %arg37: memref<64x32xf32, #tpu.memory_space<vmem>>, %arg38: memref<1x32xf32, #tpu.memory_space<vmem>>, %arg39: memref<2x32xf32, #tpu.memory_space<vmem>>, %arg40: memref<2x32xf32, #tpu.memory_space<vmem>>, %arg41: memref<32x10xf32, #tpu.memory_space<vmem>>, %arg42: memref<1x10xf32, #tpu.memory_space<vmem>>, %arg43: memref<2x10xf32, #tpu.memory_space<vmem>>) attributes {dimension_semantics = [], scalar_prefetch = 0 : i64, scratch_operands = 0 : i64, tpu.core_type = #tpu.core_type<tc>} {
    %c0 = arith.constant 0 : index
    %c0_0 = arith.constant 0 : index
    %0 = vector.load %arg0[%c0, %c0_0] : memref<128x48xf32, #tpu.memory_space<vmem>>, vector<128x48xf32>
    %c0_1 = arith.constant 0 : index
    %c0_2 = arith.constant 0 : index
    %1 = vector.load %arg1[%c0_1, %c0_2] : memref<48x16xf32, #tpu.memory_space<vmem>>, vector<48x16xf32>
    %cst = arith.constant dense<0.000000e+00> : vector<128x16xf32>
    %2 = tpu.matmul %0, %1, %cst {dimension_numbers = #tpu.dot_dimension_numbers<[1], [0], [0], [1], [0, 0, 1, 1], [], []>} : vector<128x48xf32>, vector<48x16xf32>, vector<128x16xf32> -> vector<128x16xf32>
    %c0_3 = arith.constant 0 : index
    %c0_4 = arith.constant 0 : index
    %3 = vector.load %arg2[%c0_3, %c0_4] : memref<3x16xf32, #tpu.memory_space<vmem>>, vector<1x16xf32>
    %4 = vector.broadcast %3 : vector<1x16xf32> to vector<128x16xf32>
    %5 = arith.addf %2, %4 : vector<128x16xf32>
    %c1 = arith.constant 1 : index
    %c0_5 = arith.constant 0 : index
    %6 = vector.load %arg2[%c1, %c0_5] : memref<3x16xf32, #tpu.memory_space<vmem>>, vector<1x16xf32>
    %c2 = arith.constant 2 : index
    %c0_6 = arith.constant 0 : index
    %7 = vector.load %arg2[%c2, %c0_6] : memref<3x16xf32, #tpu.memory_space<vmem>>, vector<1x16xf32>
    %cst_7 = arith.constant dense<0.000000e+00> : vector<128xf32>
    %8 = vector.multi_reduction <add>, %5, %cst_7 [1] : vector<128x16xf32> to vector<128xf32>
    %9 = vector.shape_cast %8 : vector<128xf32> to vector<128x1xf32>
    %cst_8 = arith.constant 1.600000e+01 : f32
    %10 = vector.broadcast %cst_8 : f32 to vector<128x1xf32>
    %11 = arith.divf %9, %10 : vector<128x1xf32>
    %12 = vector.broadcast %11 : vector<128x1xf32> to vector<128x16xf32>
    %13 = arith.subf %5, %12 : vector<128x16xf32>
    %14 = arith.mulf %13, %13 : vector<128x16xf32>
    %cst_9 = arith.constant dense<0.000000e+00> : vector<128xf32>
    %15 = vector.multi_reduction <add>, %14, %cst_9 [1] : vector<128x16xf32> to vector<128xf32>
    %16 = vector.shape_cast %15 : vector<128xf32> to vector<128x1xf32>
    %cst_10 = arith.constant 1.600000e+01 : f32
    %17 = vector.broadcast %cst_10 : f32 to vector<128x1xf32>
    %18 = arith.divf %16, %17 : vector<128x1xf32>
    %cst_11 = arith.constant 9.99999974E-6 : f32
    %19 = vector.broadcast %cst_11 : f32 to vector<128x1xf32>
    %20 = arith.addf %18, %19 : vector<128x1xf32>
    %21 = math.rsqrt %20 : vector<128x1xf32>
    %22 = vector.broadcast %21 : vector<128x1xf32> to vector<128x16xf32>
    %23 = arith.mulf %13, %22 : vector<128x16xf32>
    %24 = vector.broadcast %6 : vector<1x16xf32> to vector<128x16xf32>
    %25 = arith.mulf %23, %24 : vector<128x16xf32>
    %26 = vector.broadcast %7 : vector<1x16xf32> to vector<128x16xf32>
    %27 = arith.addf %25, %26 : vector<128x16xf32>
    %c0_12 = arith.constant 0 : index
    %c0_13 = arith.constant 0 : index
    %28 = vector.load %arg6[%c0_12, %c0_13] : memref<4x16xf32, #tpu.memory_space<vmem>>, vector<1x16xf32>
    %c1_14 = arith.constant 1 : index
    %c0_15 = arith.constant 0 : index
    %29 = vector.load %arg6[%c1_14, %c0_15] : memref<4x16xf32, #tpu.memory_space<vmem>>, vector<1x16xf32>
    %cst_16 = arith.constant dense<0.000000e+00> : vector<128xf32>
    %30 = vector.multi_reduction <add>, %27, %cst_16 [1] : vector<128x16xf32> to vector<128xf32>
    %31 = vector.shape_cast %30 : vector<128xf32> to vector<128x1xf32>
    %cst_17 = arith.constant 1.600000e+01 : f32
    %32 = vector.broadcast %cst_17 : f32 to vector<128x1xf32>
    %33 = arith.divf %31, %32 : vector<128x1xf32>
    %34 = vector.broadcast %33 : vector<128x1xf32> to vector<128x16xf32>
    %35 = arith.subf %27, %34 : vector<128x16xf32>
    %36 = arith.mulf %35, %35 : vector<128x16xf32>
    %cst_18 = arith.constant dense<0.000000e+00> : vector<128xf32>
    %37 = vector.multi_reduction <add>, %36, %cst_18 [1] : vector<128x16xf32> to vector<128xf32>
    %38 = vector.shape_cast %37 : vector<128xf32> to vector<128x1xf32>
    %cst_19 = arith.constant 1.600000e+01 : f32
    %39 = vector.broadcast %cst_19 : f32 to vector<128x1xf32>
    %40 = arith.divf %38, %39 : vector<128x1xf32>
    %cst_20 = arith.constant 9.99999974E-6 : f32
    %41 = vector.broadcast %cst_20 : f32 to vector<128x1xf32>
    %42 = arith.addf %40, %41 : vector<128x1xf32>
    %43 = math.rsqrt %42 : vector<128x1xf32>
    %44 = vector.broadcast %43 : vector<128x1xf32> to vector<128x16xf32>
    %45 = arith.mulf %35, %44 : vector<128x16xf32>
    %46 = vector.broadcast %28 : vector<1x16xf32> to vector<128x16xf32>
    %47 = arith.mulf %45, %46 : vector<128x16xf32>
    %48 = vector.broadcast %29 : vector<1x16xf32> to vector<128x16xf32>
    %49 = arith.addf %47, %48 : vector<128x16xf32>
    %c0_21 = arith.constant 0 : index
    %c0_22 = arith.constant 0 : index
    %50 = vector.load %arg5[%c0_21, %c0_22] : memref<128x16xf32, #tpu.memory_space<vmem>>, vector<128x16xf32>
    %c0_23 = arith.constant 0 : index
    %c0_24 = arith.constant 0 : index
    %c0_25 = arith.constant 0 : index
    %51 = vector.load %arg3[%c0_23, %c0_24, %c0_25] : memref<2x128x128xf32, #tpu.memory_space<vmem>>, vector<1x128x128xf32>
    %52 = vector.shape_cast %51 : vector<1x128x128xf32> to vector<128x128xf32>
    %c0_26 = arith.constant 0 : index
    %c0_27 = arith.constant 0 : index
    %53 = vector.load %arg4[%c0_26, %c0_27] : memref<2x16xf32, #tpu.memory_space<vmem>>, vector<1x16xf32>
    %54 = vector.broadcast %53 : vector<1x16xf32> to vector<128x16xf32>
    %55 = arith.mulf %49, %54 : vector<128x16xf32>
    %cst_28 = arith.constant dense<0.000000e+00> : vector<128x16xf32>
    %56 = tpu.matmul %52, %55, %cst_28 {dimension_numbers = #tpu.dot_dimension_numbers<[1], [0], [0], [1], [0, 0, 1, 1], [], []>} : vector<128x128xf32>, vector<128x16xf32>, vector<128x16xf32> -> vector<128x16xf32>
    %57 = arith.addf %50, %56 : vector<128x16xf32>
    %c1_29 = arith.constant 1 : index
    %c0_30 = arith.constant 0 : index
    %c0_31 = arith.constant 0 : index
    %58 = vector.load %arg3[%c1_29, %c0_30, %c0_31] : memref<2x128x128xf32, #tpu.memory_space<vmem>>, vector<1x128x128xf32>
    %59 = vector.shape_cast %58 : vector<1x128x128xf32> to vector<128x128xf32>
    %c1_32 = arith.constant 1 : index
    %c0_33 = arith.constant 0 : index
    %60 = vector.load %arg4[%c1_32, %c0_33] : memref<2x16xf32, #tpu.memory_space<vmem>>, vector<1x16xf32>
    %61 = vector.broadcast %60 : vector<1x16xf32> to vector<128x16xf32>
    %62 = arith.mulf %49, %61 : vector<128x16xf32>
    %cst_34 = arith.constant dense<0.000000e+00> : vector<128x16xf32>
    %63 = tpu.matmul %59, %62, %cst_34 {dimension_numbers = #tpu.dot_dimension_numbers<[1], [0], [0], [1], [0, 0, 1, 1], [], []>} : vector<128x128xf32>, vector<128x16xf32>, vector<128x16xf32> -> vector<128x16xf32>
    %64 = arith.addf %57, %63 : vector<128x16xf32>
    %65 = arith.addf %27, %64 : vector<128x16xf32>
    %c2_35 = arith.constant 2 : index
    %c0_36 = arith.constant 0 : index
    %66 = vector.load %arg6[%c2_35, %c0_36] : memref<4x16xf32, #tpu.memory_space<vmem>>, vector<1x16xf32>
    %c3 = arith.constant 3 : index
    %c0_37 = arith.constant 0 : index
    %67 = vector.load %arg6[%c3, %c0_37] : memref<4x16xf32, #tpu.memory_space<vmem>>, vector<1x16xf32>
    %cst_38 = arith.constant dense<0.000000e+00> : vector<128xf32>
    %68 = vector.multi_reduction <add>, %65, %cst_38 [1] : vector<128x16xf32> to vector<128xf32>
    %69 = vector.shape_cast %68 : vector<128xf32> to vector<128x1xf32>
    %cst_39 = arith.constant 1.600000e+01 : f32
    %70 = vector.broadcast %cst_39 : f32 to vector<128x1xf32>
    %71 = arith.divf %69, %70 : vector<128x1xf32>
    %72 = vector.broadcast %71 : vector<128x1xf32> to vector<128x16xf32>
    %73 = arith.subf %65, %72 : vector<128x16xf32>
    %74 = arith.mulf %73, %73 : vector<128x16xf32>
    %cst_40 = arith.constant dense<0.000000e+00> : vector<128xf32>
    %75 = vector.multi_reduction <add>, %74, %cst_40 [1] : vector<128x16xf32> to vector<128xf32>
    %76 = vector.shape_cast %75 : vector<128xf32> to vector<128x1xf32>
    %cst_41 = arith.constant 1.600000e+01 : f32
    %77 = vector.broadcast %cst_41 : f32 to vector<128x1xf32>
    %78 = arith.divf %76, %77 : vector<128x1xf32>
    %cst_42 = arith.constant 9.99999974E-6 : f32
    %79 = vector.broadcast %cst_42 : f32 to vector<128x1xf32>
    %80 = arith.addf %78, %79 : vector<128x1xf32>
    %81 = math.rsqrt %80 : vector<128x1xf32>
    %82 = vector.broadcast %81 : vector<128x1xf32> to vector<128x16xf32>
    %83 = arith.mulf %73, %82 : vector<128x16xf32>
    %84 = vector.broadcast %66 : vector<1x16xf32> to vector<128x16xf32>
    %85 = arith.mulf %83, %84 : vector<128x16xf32>
    %86 = vector.broadcast %67 : vector<1x16xf32> to vector<128x16xf32>
    %87 = arith.addf %85, %86 : vector<128x16xf32>
    %c0_43 = arith.constant 0 : index
    %c0_44 = arith.constant 0 : index
    %88 = vector.load %arg7[%c0_43, %c0_44] : memref<16x32xf32, #tpu.memory_space<vmem>>, vector<16x32xf32>
    %cst_45 = arith.constant dense<0.000000e+00> : vector<128x32xf32>
    %89 = tpu.matmul %87, %88, %cst_45 {dimension_numbers = #tpu.dot_dimension_numbers<[1], [0], [0], [1], [0, 0, 1, 1], [], []>} : vector<128x16xf32>, vector<16x32xf32>, vector<128x32xf32> -> vector<128x32xf32>
    %c0_46 = arith.constant 0 : index
    %c0_47 = arith.constant 0 : index
    %90 = vector.load %arg8[%c0_46, %c0_47] : memref<1x32xf32, #tpu.memory_space<vmem>>, vector<1x32xf32>
    %91 = vector.broadcast %90 : vector<1x32xf32> to vector<128x32xf32>
    %92 = arith.addf %89, %91 : vector<128x32xf32>
    %cst_48 = arith.constant 5.000000e-01 : f32
    %93 = vector.broadcast %cst_48 : f32 to vector<128x32xf32>
    %94 = arith.mulf %93, %92 : vector<128x32xf32>
    %cst_49 = arith.constant 0.707106769 : f32
    %95 = vector.broadcast %cst_49 : f32 to vector<128x32xf32>
    %96 = arith.mulf %92, %95 : vector<128x32xf32>
    %97 = math.absf %96 : vector<128x32xf32>
    %cst_50 = arith.constant 0.327591091 : f32
    %98 = vector.broadcast %cst_50 : f32 to vector<128x32xf32>
    %99 = arith.mulf %98, %97 : vector<128x32xf32>
    %cst_51 = arith.constant 1.000000e+00 : f32
    %100 = vector.broadcast %cst_51 : f32 to vector<128x32xf32>
    %101 = arith.addf %100, %99 : vector<128x32xf32>
    %cst_52 = arith.constant 1.000000e+00 : f32
    %102 = vector.broadcast %cst_52 : f32 to vector<128x32xf32>
    %103 = arith.divf %102, %101 : vector<128x32xf32>
    %cst_53 = arith.constant 1.06140542 : f32
    %104 = vector.broadcast %cst_53 : f32 to vector<128x32xf32>
    %105 = arith.mulf %104, %103 : vector<128x32xf32>
    %cst_54 = arith.constant -1.45315206 : f32
    %106 = vector.broadcast %cst_54 : f32 to vector<128x32xf32>
    %107 = arith.addf %105, %106 : vector<128x32xf32>
    %108 = arith.mulf %107, %103 : vector<128x32xf32>
    %cst_55 = arith.constant 1.42141378 : f32
    %109 = vector.broadcast %cst_55 : f32 to vector<128x32xf32>
    %110 = arith.addf %108, %109 : vector<128x32xf32>
    %111 = arith.mulf %110, %103 : vector<128x32xf32>
    %cst_56 = arith.constant -0.284496725 : f32
    %112 = vector.broadcast %cst_56 : f32 to vector<128x32xf32>
    %113 = arith.addf %111, %112 : vector<128x32xf32>
    %114 = arith.mulf %113, %103 : vector<128x32xf32>
    %cst_57 = arith.constant 0.254829586 : f32
    %115 = vector.broadcast %cst_57 : f32 to vector<128x32xf32>
    %116 = arith.addf %114, %115 : vector<128x32xf32>
    %117 = arith.mulf %116, %103 : vector<128x32xf32>
    %cst_58 = arith.constant 0.000000e+00 : f32
    %118 = vector.broadcast %cst_58 : f32 to vector<128x32xf32>
    %119 = arith.subf %118, %97 : vector<128x32xf32>
    %120 = arith.mulf %119, %97 : vector<128x32xf32>
    %121 = math.exp %120 : vector<128x32xf32>
    %122 = arith.mulf %117, %121 : vector<128x32xf32>
    %cst_59 = arith.constant 1.000000e+00 : f32
    %123 = vector.broadcast %cst_59 : f32 to vector<128x32xf32>
    %124 = arith.subf %123, %122 : vector<128x32xf32>
    %cst_60 = arith.constant 0.000000e+00 : f32
    %125 = vector.broadcast %cst_60 : f32 to vector<128x32xf32>
    %126 = arith.cmpf olt, %96, %125 : vector<128x32xf32>
    %cst_61 = arith.constant 0.000000e+00 : f32
    %127 = vector.broadcast %cst_61 : f32 to vector<128x32xf32>
    %128 = arith.subf %127, %124 : vector<128x32xf32>
    %129 = arith.select %126, %128, %124 : vector<128x32xi1>, vector<128x32xf32>
    %cst_62 = arith.constant 1.000000e+00 : f32
    %130 = vector.broadcast %cst_62 : f32 to vector<128x32xf32>
    %131 = arith.addf %130, %129 : vector<128x32xf32>
    %132 = arith.mulf %94, %131 : vector<128x32xf32>
    %c0_63 = arith.constant 0 : index
    %c0_64 = arith.constant 0 : index
    %133 = vector.load %arg9[%c0_63, %c0_64] : memref<32x16xf32, #tpu.memory_space<vmem>>, vector<32x16xf32>
    %cst_65 = arith.constant dense<0.000000e+00> : vector<128x16xf32>
    %134 = tpu.matmul %132, %133, %cst_65 {dimension_numbers = #tpu.dot_dimension_numbers<[1], [0], [0], [1], [0, 0, 1, 1], [], []>} : vector<128x32xf32>, vector<32x16xf32>, vector<128x16xf32> -> vector<128x16xf32>
    %c0_66 = arith.constant 0 : index
    %c0_67 = arith.constant 0 : index
    %135 = vector.load %arg10[%c0_66, %c0_67] : memref<1x16xf32, #tpu.memory_space<vmem>>, vector<1x16xf32>
    %136 = vector.broadcast %135 : vector<1x16xf32> to vector<128x16xf32>
    %137 = arith.addf %134, %136 : vector<128x16xf32>
    %138 = arith.addf %65, %137 : vector<128x16xf32>
    %c0_68 = arith.constant 0 : index
    %c0_69 = arith.constant 0 : index
    %139 = vector.load %arg14[%c0_68, %c0_69] : memref<4x16xf32, #tpu.memory_space<vmem>>, vector<1x16xf32>
    %c1_70 = arith.constant 1 : index
    %c0_71 = arith.constant 0 : index
    %140 = vector.load %arg14[%c1_70, %c0_71] : memref<4x16xf32, #tpu.memory_space<vmem>>, vector<1x16xf32>
    %cst_72 = arith.constant dense<0.000000e+00> : vector<128xf32>
    %141 = vector.multi_reduction <add>, %138, %cst_72 [1] : vector<128x16xf32> to vector<128xf32>
    %142 = vector.shape_cast %141 : vector<128xf32> to vector<128x1xf32>
    %cst_73 = arith.constant 1.600000e+01 : f32
    %143 = vector.broadcast %cst_73 : f32 to vector<128x1xf32>
    %144 = arith.divf %142, %143 : vector<128x1xf32>
    %145 = vector.broadcast %144 : vector<128x1xf32> to vector<128x16xf32>
    %146 = arith.subf %138, %145 : vector<128x16xf32>
    %147 = arith.mulf %146, %146 : vector<128x16xf32>
    %cst_74 = arith.constant dense<0.000000e+00> : vector<128xf32>
    %148 = vector.multi_reduction <add>, %147, %cst_74 [1] : vector<128x16xf32> to vector<128xf32>
    %149 = vector.shape_cast %148 : vector<128xf32> to vector<128x1xf32>
    %cst_75 = arith.constant 1.600000e+01 : f32
    %150 = vector.broadcast %cst_75 : f32 to vector<128x1xf32>
    %151 = arith.divf %149, %150 : vector<128x1xf32>
    %cst_76 = arith.constant 9.99999974E-6 : f32
    %152 = vector.broadcast %cst_76 : f32 to vector<128x1xf32>
    %153 = arith.addf %151, %152 : vector<128x1xf32>
    %154 = math.rsqrt %153 : vector<128x1xf32>
    %155 = vector.broadcast %154 : vector<128x1xf32> to vector<128x16xf32>
    %156 = arith.mulf %146, %155 : vector<128x16xf32>
    %157 = vector.broadcast %139 : vector<1x16xf32> to vector<128x16xf32>
    %158 = arith.mulf %156, %157 : vector<128x16xf32>
    %159 = vector.broadcast %140 : vector<1x16xf32> to vector<128x16xf32>
    %160 = arith.addf %158, %159 : vector<128x16xf32>
    %c0_77 = arith.constant 0 : index
    %c0_78 = arith.constant 0 : index
    %161 = vector.load %arg13[%c0_77, %c0_78] : memref<128x16xf32, #tpu.memory_space<vmem>>, vector<128x16xf32>
    %c0_79 = arith.constant 0 : index
    %c0_80 = arith.constant 0 : index
    %c0_81 = arith.constant 0 : index
    %162 = vector.load %arg11[%c0_79, %c0_80, %c0_81] : memref<2x128x128xf32, #tpu.memory_space<vmem>>, vector<1x128x128xf32>
    %163 = vector.shape_cast %162 : vector<1x128x128xf32> to vector<128x128xf32>
    %c0_82 = arith.constant 0 : index
    %c0_83 = arith.constant 0 : index
    %164 = vector.load %arg12[%c0_82, %c0_83] : memref<2x16xf32, #tpu.memory_space<vmem>>, vector<1x16xf32>
    %165 = vector.broadcast %164 : vector<1x16xf32> to vector<128x16xf32>
    %166 = arith.mulf %160, %165 : vector<128x16xf32>
    %cst_84 = arith.constant dense<0.000000e+00> : vector<128x16xf32>
    %167 = tpu.matmul %163, %166, %cst_84 {dimension_numbers = #tpu.dot_dimension_numbers<[1], [0], [0], [1], [0, 0, 1, 1], [], []>} : vector<128x128xf32>, vector<128x16xf32>, vector<128x16xf32> -> vector<128x16xf32>
    %168 = arith.addf %161, %167 : vector<128x16xf32>
    %c1_85 = arith.constant 1 : index
    %c0_86 = arith.constant 0 : index
    %c0_87 = arith.constant 0 : index
    %169 = vector.load %arg11[%c1_85, %c0_86, %c0_87] : memref<2x128x128xf32, #tpu.memory_space<vmem>>, vector<1x128x128xf32>
    %170 = vector.shape_cast %169 : vector<1x128x128xf32> to vector<128x128xf32>
    %c1_88 = arith.constant 1 : index
    %c0_89 = arith.constant 0 : index
    %171 = vector.load %arg12[%c1_88, %c0_89] : memref<2x16xf32, #tpu.memory_space<vmem>>, vector<1x16xf32>
    %172 = vector.broadcast %171 : vector<1x16xf32> to vector<128x16xf32>
    %173 = arith.mulf %160, %172 : vector<128x16xf32>
    %cst_90 = arith.constant dense<0.000000e+00> : vector<128x16xf32>
    %174 = tpu.matmul %170, %173, %cst_90 {dimension_numbers = #tpu.dot_dimension_numbers<[1], [0], [0], [1], [0, 0, 1, 1], [], []>} : vector<128x128xf32>, vector<128x16xf32>, vector<128x16xf32> -> vector<128x16xf32>
    %175 = arith.addf %168, %174 : vector<128x16xf32>
    %176 = arith.addf %138, %175 : vector<128x16xf32>
    %c2_91 = arith.constant 2 : index
    %c0_92 = arith.constant 0 : index
    %177 = vector.load %arg14[%c2_91, %c0_92] : memref<4x16xf32, #tpu.memory_space<vmem>>, vector<1x16xf32>
    %c3_93 = arith.constant 3 : index
    %c0_94 = arith.constant 0 : index
    %178 = vector.load %arg14[%c3_93, %c0_94] : memref<4x16xf32, #tpu.memory_space<vmem>>, vector<1x16xf32>
    %cst_95 = arith.constant dense<0.000000e+00> : vector<128xf32>
    %179 = vector.multi_reduction <add>, %176, %cst_95 [1] : vector<128x16xf32> to vector<128xf32>
    %180 = vector.shape_cast %179 : vector<128xf32> to vector<128x1xf32>
    %cst_96 = arith.constant 1.600000e+01 : f32
    %181 = vector.broadcast %cst_96 : f32 to vector<128x1xf32>
    %182 = arith.divf %180, %181 : vector<128x1xf32>
    %183 = vector.broadcast %182 : vector<128x1xf32> to vector<128x16xf32>
    %184 = arith.subf %176, %183 : vector<128x16xf32>
    %185 = arith.mulf %184, %184 : vector<128x16xf32>
    %cst_97 = arith.constant dense<0.000000e+00> : vector<128xf32>
    %186 = vector.multi_reduction <add>, %185, %cst_97 [1] : vector<128x16xf32> to vector<128xf32>
    %187 = vector.shape_cast %186 : vector<128xf32> to vector<128x1xf32>
    %cst_98 = arith.constant 1.600000e+01 : f32
    %188 = vector.broadcast %cst_98 : f32 to vector<128x1xf32>
    %189 = arith.divf %187, %188 : vector<128x1xf32>
    %cst_99 = arith.constant 9.99999974E-6 : f32
    %190 = vector.broadcast %cst_99 : f32 to vector<128x1xf32>
    %191 = arith.addf %189, %190 : vector<128x1xf32>
    %192 = math.rsqrt %191 : vector<128x1xf32>
    %193 = vector.broadcast %192 : vector<128x1xf32> to vector<128x16xf32>
    %194 = arith.mulf %184, %193 : vector<128x16xf32>
    %195 = vector.broadcast %177 : vector<1x16xf32> to vector<128x16xf32>
    %196 = arith.mulf %194, %195 : vector<128x16xf32>
    %197 = vector.broadcast %178 : vector<1x16xf32> to vector<128x16xf32>
    %198 = arith.addf %196, %197 : vector<128x16xf32>
    %c0_100 = arith.constant 0 : index
    %c0_101 = arith.constant 0 : index
    %199 = vector.load %arg15[%c0_100, %c0_101] : memref<16x32xf32, #tpu.memory_space<vmem>>, vector<16x32xf32>
    %cst_102 = arith.constant dense<0.000000e+00> : vector<128x32xf32>
    %200 = tpu.matmul %198, %199, %cst_102 {dimension_numbers = #tpu.dot_dimension_numbers<[1], [0], [0], [1], [0, 0, 1, 1], [], []>} : vector<128x16xf32>, vector<16x32xf32>, vector<128x32xf32> -> vector<128x32xf32>
    %c0_103 = arith.constant 0 : index
    %c0_104 = arith.constant 0 : index
    %201 = vector.load %arg16[%c0_103, %c0_104] : memref<1x32xf32, #tpu.memory_space<vmem>>, vector<1x32xf32>
    %202 = vector.broadcast %201 : vector<1x32xf32> to vector<128x32xf32>
    %203 = arith.addf %200, %202 : vector<128x32xf32>
    %cst_105 = arith.constant 5.000000e-01 : f32
    %204 = vector.broadcast %cst_105 : f32 to vector<128x32xf32>
    %205 = arith.mulf %204, %203 : vector<128x32xf32>
    %cst_106 = arith.constant 0.707106769 : f32
    %206 = vector.broadcast %cst_106 : f32 to vector<128x32xf32>
    %207 = arith.mulf %203, %206 : vector<128x32xf32>
    %208 = math.absf %207 : vector<128x32xf32>
    %cst_107 = arith.constant 0.327591091 : f32
    %209 = vector.broadcast %cst_107 : f32 to vector<128x32xf32>
    %210 = arith.mulf %209, %208 : vector<128x32xf32>
    %cst_108 = arith.constant 1.000000e+00 : f32
    %211 = vector.broadcast %cst_108 : f32 to vector<128x32xf32>
    %212 = arith.addf %211, %210 : vector<128x32xf32>
    %cst_109 = arith.constant 1.000000e+00 : f32
    %213 = vector.broadcast %cst_109 : f32 to vector<128x32xf32>
    %214 = arith.divf %213, %212 : vector<128x32xf32>
    %cst_110 = arith.constant 1.06140542 : f32
    %215 = vector.broadcast %cst_110 : f32 to vector<128x32xf32>
    %216 = arith.mulf %215, %214 : vector<128x32xf32>
    %cst_111 = arith.constant -1.45315206 : f32
    %217 = vector.broadcast %cst_111 : f32 to vector<128x32xf32>
    %218 = arith.addf %216, %217 : vector<128x32xf32>
    %219 = arith.mulf %218, %214 : vector<128x32xf32>
    %cst_112 = arith.constant 1.42141378 : f32
    %220 = vector.broadcast %cst_112 : f32 to vector<128x32xf32>
    %221 = arith.addf %219, %220 : vector<128x32xf32>
    %222 = arith.mulf %221, %214 : vector<128x32xf32>
    %cst_113 = arith.constant -0.284496725 : f32
    %223 = vector.broadcast %cst_113 : f32 to vector<128x32xf32>
    %224 = arith.addf %222, %223 : vector<128x32xf32>
    %225 = arith.mulf %224, %214 : vector<128x32xf32>
    %cst_114 = arith.constant 0.254829586 : f32
    %226 = vector.broadcast %cst_114 : f32 to vector<128x32xf32>
    %227 = arith.addf %225, %226 : vector<128x32xf32>
    %228 = arith.mulf %227, %214 : vector<128x32xf32>
    %cst_115 = arith.constant 0.000000e+00 : f32
    %229 = vector.broadcast %cst_115 : f32 to vector<128x32xf32>
    %230 = arith.subf %229, %208 : vector<128x32xf32>
    %231 = arith.mulf %230, %208 : vector<128x32xf32>
    %232 = math.exp %231 : vector<128x32xf32>
    %233 = arith.mulf %228, %232 : vector<128x32xf32>
    %cst_116 = arith.constant 1.000000e+00 : f32
    %234 = vector.broadcast %cst_116 : f32 to vector<128x32xf32>
    %235 = arith.subf %234, %233 : vector<128x32xf32>
    %cst_117 = arith.constant 0.000000e+00 : f32
    %236 = vector.broadcast %cst_117 : f32 to vector<128x32xf32>
    %237 = arith.cmpf olt, %207, %236 : vector<128x32xf32>
    %cst_118 = arith.constant 0.000000e+00 : f32
    %238 = vector.broadcast %cst_118 : f32 to vector<128x32xf32>
    %239 = arith.subf %238, %235 : vector<128x32xf32>
    %240 = arith.select %237, %239, %235 : vector<128x32xi1>, vector<128x32xf32>
    %cst_119 = arith.constant 1.000000e+00 : f32
    %241 = vector.broadcast %cst_119 : f32 to vector<128x32xf32>
    %242 = arith.addf %241, %240 : vector<128x32xf32>
    %243 = arith.mulf %205, %242 : vector<128x32xf32>
    %c0_120 = arith.constant 0 : index
    %c0_121 = arith.constant 0 : index
    %244 = vector.load %arg17[%c0_120, %c0_121] : memref<32x16xf32, #tpu.memory_space<vmem>>, vector<32x16xf32>
    %cst_122 = arith.constant dense<0.000000e+00> : vector<128x16xf32>
    %245 = tpu.matmul %243, %244, %cst_122 {dimension_numbers = #tpu.dot_dimension_numbers<[1], [0], [0], [1], [0, 0, 1, 1], [], []>} : vector<128x32xf32>, vector<32x16xf32>, vector<128x16xf32> -> vector<128x16xf32>
    %c0_123 = arith.constant 0 : index
    %c0_124 = arith.constant 0 : index
    %246 = vector.load %arg18[%c0_123, %c0_124] : memref<1x16xf32, #tpu.memory_space<vmem>>, vector<1x16xf32>
    %247 = vector.broadcast %246 : vector<1x16xf32> to vector<128x16xf32>
    %248 = arith.addf %245, %247 : vector<128x16xf32>
    %249 = arith.addf %176, %248 : vector<128x16xf32>
    %c0_125 = arith.constant 0 : index
    %c0_126 = arith.constant 0 : index
    %c0_127 = arith.constant 0 : index
    %250 = vector.load %arg19[%c0_125, %c0_126, %c0_127] : memref<4x32x128xf32, #tpu.memory_space<vmem>>, vector<1x32x128xf32>
    %251 = vector.shape_cast %250 : vector<1x32x128xf32> to vector<32x128xf32>
    %cst_128 = arith.constant dense<0.000000e+00> : vector<32x16xf32>
    %252 = tpu.matmul %251, %249, %cst_128 {dimension_numbers = #tpu.dot_dimension_numbers<[1], [0], [0], [1], [0, 0, 1, 1], [], []>} : vector<32x128xf32>, vector<128x16xf32>, vector<32x16xf32> -> vector<32x16xf32>
    %c0_129 = arith.constant 0 : index
    %c0_130 = arith.constant 0 : index
    %c0_131 = arith.constant 0 : index
    %253 = vector.load %arg20[%c0_129, %c0_130, %c0_131] : memref<4x16x64xf32, #tpu.memory_space<vmem>>, vector<1x16x64xf32>
    %254 = vector.shape_cast %253 : vector<1x16x64xf32> to vector<16x64xf32>
    %cst_132 = arith.constant dense<0.000000e+00> : vector<32x64xf32>
    %255 = tpu.matmul %252, %254, %cst_132 {dimension_numbers = #tpu.dot_dimension_numbers<[1], [0], [0], [1], [0, 0, 1, 1], [], []>} : vector<32x16xf32>, vector<16x64xf32>, vector<32x64xf32> -> vector<32x64xf32>
    %c1_133 = arith.constant 1 : index
    %c0_134 = arith.constant 0 : index
    %c0_135 = arith.constant 0 : index
    %256 = vector.load %arg19[%c1_133, %c0_134, %c0_135] : memref<4x32x128xf32, #tpu.memory_space<vmem>>, vector<1x32x128xf32>
    %257 = vector.shape_cast %256 : vector<1x32x128xf32> to vector<32x128xf32>
    %cst_136 = arith.constant dense<0.000000e+00> : vector<32x16xf32>
    %258 = tpu.matmul %257, %249, %cst_136 {dimension_numbers = #tpu.dot_dimension_numbers<[1], [0], [0], [1], [0, 0, 1, 1], [], []>} : vector<32x128xf32>, vector<128x16xf32>, vector<32x16xf32> -> vector<32x16xf32>
    %c1_137 = arith.constant 1 : index
    %c0_138 = arith.constant 0 : index
    %c0_139 = arith.constant 0 : index
    %259 = vector.load %arg20[%c1_137, %c0_138, %c0_139] : memref<4x16x64xf32, #tpu.memory_space<vmem>>, vector<1x16x64xf32>
    %260 = vector.shape_cast %259 : vector<1x16x64xf32> to vector<16x64xf32>
    %cst_140 = arith.constant dense<0.000000e+00> : vector<32x64xf32>
    %261 = tpu.matmul %258, %260, %cst_140 {dimension_numbers = #tpu.dot_dimension_numbers<[1], [0], [0], [1], [0, 0, 1, 1], [], []>} : vector<32x16xf32>, vector<16x64xf32>, vector<32x64xf32> -> vector<32x64xf32>
    %262 = arith.addf %255, %261 : vector<32x64xf32>
    %c2_141 = arith.constant 2 : index
    %c0_142 = arith.constant 0 : index
    %c0_143 = arith.constant 0 : index
    %263 = vector.load %arg19[%c2_141, %c0_142, %c0_143] : memref<4x32x128xf32, #tpu.memory_space<vmem>>, vector<1x32x128xf32>
    %264 = vector.shape_cast %263 : vector<1x32x128xf32> to vector<32x128xf32>
    %cst_144 = arith.constant dense<0.000000e+00> : vector<32x16xf32>
    %265 = tpu.matmul %264, %249, %cst_144 {dimension_numbers = #tpu.dot_dimension_numbers<[1], [0], [0], [1], [0, 0, 1, 1], [], []>} : vector<32x128xf32>, vector<128x16xf32>, vector<32x16xf32> -> vector<32x16xf32>
    %c2_145 = arith.constant 2 : index
    %c0_146 = arith.constant 0 : index
    %c0_147 = arith.constant 0 : index
    %266 = vector.load %arg20[%c2_145, %c0_146, %c0_147] : memref<4x16x64xf32, #tpu.memory_space<vmem>>, vector<1x16x64xf32>
    %267 = vector.shape_cast %266 : vector<1x16x64xf32> to vector<16x64xf32>
    %cst_148 = arith.constant dense<0.000000e+00> : vector<32x64xf32>
    %268 = tpu.matmul %265, %267, %cst_148 {dimension_numbers = #tpu.dot_dimension_numbers<[1], [0], [0], [1], [0, 0, 1, 1], [], []>} : vector<32x16xf32>, vector<16x64xf32>, vector<32x64xf32> -> vector<32x64xf32>
    %269 = arith.addf %262, %268 : vector<32x64xf32>
    %c3_149 = arith.constant 3 : index
    %c0_150 = arith.constant 0 : index
    %c0_151 = arith.constant 0 : index
    %270 = vector.load %arg19[%c3_149, %c0_150, %c0_151] : memref<4x32x128xf32, #tpu.memory_space<vmem>>, vector<1x32x128xf32>
    %271 = vector.shape_cast %270 : vector<1x32x128xf32> to vector<32x128xf32>
    %cst_152 = arith.constant dense<0.000000e+00> : vector<32x16xf32>
    %272 = tpu.matmul %271, %249, %cst_152 {dimension_numbers = #tpu.dot_dimension_numbers<[1], [0], [0], [1], [0, 0, 1, 1], [], []>} : vector<32x128xf32>, vector<128x16xf32>, vector<32x16xf32> -> vector<32x16xf32>
    %c3_153 = arith.constant 3 : index
    %c0_154 = arith.constant 0 : index
    %c0_155 = arith.constant 0 : index
    %273 = vector.load %arg20[%c3_153, %c0_154, %c0_155] : memref<4x16x64xf32, #tpu.memory_space<vmem>>, vector<1x16x64xf32>
    %274 = vector.shape_cast %273 : vector<1x16x64xf32> to vector<16x64xf32>
    %cst_156 = arith.constant dense<0.000000e+00> : vector<32x64xf32>
    %275 = tpu.matmul %272, %274, %cst_156 {dimension_numbers = #tpu.dot_dimension_numbers<[1], [0], [0], [1], [0, 0, 1, 1], [], []>} : vector<32x16xf32>, vector<16x64xf32>, vector<32x64xf32> -> vector<32x64xf32>
    %276 = arith.addf %269, %275 : vector<32x64xf32>
    %c0_157 = arith.constant 0 : index
    %c0_158 = arith.constant 0 : index
    %277 = vector.load %arg21[%c0_157, %c0_158] : memref<2x64xf32, #tpu.memory_space<vmem>>, vector<1x64xf32>
    %c1_159 = arith.constant 1 : index
    %c0_160 = arith.constant 0 : index
    %278 = vector.load %arg21[%c1_159, %c0_160] : memref<2x64xf32, #tpu.memory_space<vmem>>, vector<1x64xf32>
    %cst_161 = arith.constant dense<0.000000e+00> : vector<32xf32>
    %279 = vector.multi_reduction <add>, %276, %cst_161 [1] : vector<32x64xf32> to vector<32xf32>
    %280 = vector.shape_cast %279 : vector<32xf32> to vector<32x1xf32>
    %cst_162 = arith.constant 6.400000e+01 : f32
    %281 = vector.broadcast %cst_162 : f32 to vector<32x1xf32>
    %282 = arith.divf %280, %281 : vector<32x1xf32>
    %283 = vector.broadcast %282 : vector<32x1xf32> to vector<32x64xf32>
    %284 = arith.subf %276, %283 : vector<32x64xf32>
    %285 = arith.mulf %284, %284 : vector<32x64xf32>
    %cst_163 = arith.constant dense<0.000000e+00> : vector<32xf32>
    %286 = vector.multi_reduction <add>, %285, %cst_163 [1] : vector<32x64xf32> to vector<32xf32>
    %287 = vector.shape_cast %286 : vector<32xf32> to vector<32x1xf32>
    %cst_164 = arith.constant 6.400000e+01 : f32
    %288 = vector.broadcast %cst_164 : f32 to vector<32x1xf32>
    %289 = arith.divf %287, %288 : vector<32x1xf32>
    %cst_165 = arith.constant 9.99999974E-6 : f32
    %290 = vector.broadcast %cst_165 : f32 to vector<32x1xf32>
    %291 = arith.addf %289, %290 : vector<32x1xf32>
    %292 = math.rsqrt %291 : vector<32x1xf32>
    %293 = vector.broadcast %292 : vector<32x1xf32> to vector<32x64xf32>
    %294 = arith.mulf %284, %293 : vector<32x64xf32>
    %295 = vector.broadcast %277 : vector<1x64xf32> to vector<32x64xf32>
    %296 = arith.mulf %294, %295 : vector<32x64xf32>
    %297 = vector.broadcast %278 : vector<1x64xf32> to vector<32x64xf32>
    %298 = arith.addf %296, %297 : vector<32x64xf32>
    %c0_166 = arith.constant 0 : index
    %c0_167 = arith.constant 0 : index
    %299 = vector.load %arg22[%c0_166, %c0_167] : memref<64x32xf32, #tpu.memory_space<vmem>>, vector<64x32xf32>
    %cst_168 = arith.constant dense<0.000000e+00> : vector<32x32xf32>
    %300 = tpu.matmul %298, %299, %cst_168 {dimension_numbers = #tpu.dot_dimension_numbers<[1], [0], [0], [1], [0, 0, 1, 1], [], []>} : vector<32x64xf32>, vector<64x32xf32>, vector<32x32xf32> -> vector<32x32xf32>
    %c0_169 = arith.constant 0 : index
    %c0_170 = arith.constant 0 : index
    %301 = vector.load %arg26[%c0_169, %c0_170] : memref<4x32xf32, #tpu.memory_space<vmem>>, vector<1x32xf32>
    %c1_171 = arith.constant 1 : index
    %c0_172 = arith.constant 0 : index
    %302 = vector.load %arg26[%c1_171, %c0_172] : memref<4x32xf32, #tpu.memory_space<vmem>>, vector<1x32xf32>
    %cst_173 = arith.constant dense<0.000000e+00> : vector<32xf32>
    %303 = vector.multi_reduction <add>, %300, %cst_173 [1] : vector<32x32xf32> to vector<32xf32>
    %304 = vector.shape_cast %303 : vector<32xf32> to vector<32x1xf32>
    %cst_174 = arith.constant 3.200000e+01 : f32
    %305 = vector.broadcast %cst_174 : f32 to vector<32x1xf32>
    %306 = arith.divf %304, %305 : vector<32x1xf32>
    %307 = vector.broadcast %306 : vector<32x1xf32> to vector<32x32xf32>
    %308 = arith.subf %300, %307 : vector<32x32xf32>
    %309 = arith.mulf %308, %308 : vector<32x32xf32>
    %cst_175 = arith.constant dense<0.000000e+00> : vector<32xf32>
    %310 = vector.multi_reduction <add>, %309, %cst_175 [1] : vector<32x32xf32> to vector<32xf32>
    %311 = vector.shape_cast %310 : vector<32xf32> to vector<32x1xf32>
    %cst_176 = arith.constant 3.200000e+01 : f32
    %312 = vector.broadcast %cst_176 : f32 to vector<32x1xf32>
    %313 = arith.divf %311, %312 : vector<32x1xf32>
    %cst_177 = arith.constant 9.99999974E-6 : f32
    %314 = vector.broadcast %cst_177 : f32 to vector<32x1xf32>
    %315 = arith.addf %313, %314 : vector<32x1xf32>
    %316 = math.rsqrt %315 : vector<32x1xf32>
    %317 = vector.broadcast %316 : vector<32x1xf32> to vector<32x32xf32>
    %318 = arith.mulf %308, %317 : vector<32x32xf32>
    %319 = vector.broadcast %301 : vector<1x32xf32> to vector<32x32xf32>
    %320 = arith.mulf %318, %319 : vector<32x32xf32>
    %321 = vector.broadcast %302 : vector<1x32xf32> to vector<32x32xf32>
    %322 = arith.addf %320, %321 : vector<32x32xf32>
    %c0_178 = arith.constant 0 : index
    %c0_179 = arith.constant 0 : index
    %323 = vector.load %arg25[%c0_178, %c0_179] : memref<32x32xf32, #tpu.memory_space<vmem>>, vector<32x32xf32>
    %c0_180 = arith.constant 0 : index
    %c0_181 = arith.constant 0 : index
    %c0_182 = arith.constant 0 : index
    %324 = vector.load %arg23[%c0_180, %c0_181, %c0_182] : memref<4x32x32xf32, #tpu.memory_space<vmem>>, vector<1x32x32xf32>
    %325 = vector.shape_cast %324 : vector<1x32x32xf32> to vector<32x32xf32>
    %c0_183 = arith.constant 0 : index
    %c0_184 = arith.constant 0 : index
    %326 = vector.load %arg24[%c0_183, %c0_184] : memref<4x32xf32, #tpu.memory_space<vmem>>, vector<1x32xf32>
    %327 = vector.broadcast %326 : vector<1x32xf32> to vector<32x32xf32>
    %328 = arith.mulf %322, %327 : vector<32x32xf32>
    %cst_185 = arith.constant dense<0.000000e+00> : vector<32x32xf32>
    %329 = tpu.matmul %325, %328, %cst_185 {dimension_numbers = #tpu.dot_dimension_numbers<[1], [0], [0], [1], [0, 0, 1, 1], [], []>} : vector<32x32xf32>, vector<32x32xf32>, vector<32x32xf32> -> vector<32x32xf32>
    %330 = arith.addf %323, %329 : vector<32x32xf32>
    %c1_186 = arith.constant 1 : index
    %c0_187 = arith.constant 0 : index
    %c0_188 = arith.constant 0 : index
    %331 = vector.load %arg23[%c1_186, %c0_187, %c0_188] : memref<4x32x32xf32, #tpu.memory_space<vmem>>, vector<1x32x32xf32>
    %332 = vector.shape_cast %331 : vector<1x32x32xf32> to vector<32x32xf32>
    %c1_189 = arith.constant 1 : index
    %c0_190 = arith.constant 0 : index
    %333 = vector.load %arg24[%c1_189, %c0_190] : memref<4x32xf32, #tpu.memory_space<vmem>>, vector<1x32xf32>
    %334 = vector.broadcast %333 : vector<1x32xf32> to vector<32x32xf32>
    %335 = arith.mulf %322, %334 : vector<32x32xf32>
    %cst_191 = arith.constant dense<0.000000e+00> : vector<32x32xf32>
    %336 = tpu.matmul %332, %335, %cst_191 {dimension_numbers = #tpu.dot_dimension_numbers<[1], [0], [0], [1], [0, 0, 1, 1], [], []>} : vector<32x32xf32>, vector<32x32xf32>, vector<32x32xf32> -> vector<32x32xf32>
    %337 = arith.addf %330, %336 : vector<32x32xf32>
    %c2_192 = arith.constant 2 : index
    %c0_193 = arith.constant 0 : index
    %c0_194 = arith.constant 0 : index
    %338 = vector.load %arg23[%c2_192, %c0_193, %c0_194] : memref<4x32x32xf32, #tpu.memory_space<vmem>>, vector<1x32x32xf32>
    %339 = vector.shape_cast %338 : vector<1x32x32xf32> to vector<32x32xf32>
    %c2_195 = arith.constant 2 : index
    %c0_196 = arith.constant 0 : index
    %340 = vector.load %arg24[%c2_195, %c0_196] : memref<4x32xf32, #tpu.memory_space<vmem>>, vector<1x32xf32>
    %341 = vector.broadcast %340 : vector<1x32xf32> to vector<32x32xf32>
    %342 = arith.mulf %322, %341 : vector<32x32xf32>
    %cst_197 = arith.constant dense<0.000000e+00> : vector<32x32xf32>
    %343 = tpu.matmul %339, %342, %cst_197 {dimension_numbers = #tpu.dot_dimension_numbers<[1], [0], [0], [1], [0, 0, 1, 1], [], []>} : vector<32x32xf32>, vector<32x32xf32>, vector<32x32xf32> -> vector<32x32xf32>
    %344 = arith.addf %337, %343 : vector<32x32xf32>
    %c3_198 = arith.constant 3 : index
    %c0_199 = arith.constant 0 : index
    %c0_200 = arith.constant 0 : index
    %345 = vector.load %arg23[%c3_198, %c0_199, %c0_200] : memref<4x32x32xf32, #tpu.memory_space<vmem>>, vector<1x32x32xf32>
    %346 = vector.shape_cast %345 : vector<1x32x32xf32> to vector<32x32xf32>
    %c3_201 = arith.constant 3 : index
    %c0_202 = arith.constant 0 : index
    %347 = vector.load %arg24[%c3_201, %c0_202] : memref<4x32xf32, #tpu.memory_space<vmem>>, vector<1x32xf32>
    %348 = vector.broadcast %347 : vector<1x32xf32> to vector<32x32xf32>
    %349 = arith.mulf %322, %348 : vector<32x32xf32>
    %cst_203 = arith.constant dense<0.000000e+00> : vector<32x32xf32>
    %350 = tpu.matmul %346, %349, %cst_203 {dimension_numbers = #tpu.dot_dimension_numbers<[1], [0], [0], [1], [0, 0, 1, 1], [], []>} : vector<32x32xf32>, vector<32x32xf32>, vector<32x32xf32> -> vector<32x32xf32>
    %351 = arith.addf %344, %350 : vector<32x32xf32>
    %352 = arith.addf %300, %351 : vector<32x32xf32>
    %c2_204 = arith.constant 2 : index
    %c0_205 = arith.constant 0 : index
    %353 = vector.load %arg26[%c2_204, %c0_205] : memref<4x32xf32, #tpu.memory_space<vmem>>, vector<1x32xf32>
    %c3_206 = arith.constant 3 : index
    %c0_207 = arith.constant 0 : index
    %354 = vector.load %arg26[%c3_206, %c0_207] : memref<4x32xf32, #tpu.memory_space<vmem>>, vector<1x32xf32>
    %cst_208 = arith.constant dense<0.000000e+00> : vector<32xf32>
    %355 = vector.multi_reduction <add>, %352, %cst_208 [1] : vector<32x32xf32> to vector<32xf32>
    %356 = vector.shape_cast %355 : vector<32xf32> to vector<32x1xf32>
    %cst_209 = arith.constant 3.200000e+01 : f32
    %357 = vector.broadcast %cst_209 : f32 to vector<32x1xf32>
    %358 = arith.divf %356, %357 : vector<32x1xf32>
    %359 = vector.broadcast %358 : vector<32x1xf32> to vector<32x32xf32>
    %360 = arith.subf %352, %359 : vector<32x32xf32>
    %361 = arith.mulf %360, %360 : vector<32x32xf32>
    %cst_210 = arith.constant dense<0.000000e+00> : vector<32xf32>
    %362 = vector.multi_reduction <add>, %361, %cst_210 [1] : vector<32x32xf32> to vector<32xf32>
    %363 = vector.shape_cast %362 : vector<32xf32> to vector<32x1xf32>
    %cst_211 = arith.constant 3.200000e+01 : f32
    %364 = vector.broadcast %cst_211 : f32 to vector<32x1xf32>
    %365 = arith.divf %363, %364 : vector<32x1xf32>
    %cst_212 = arith.constant 9.99999974E-6 : f32
    %366 = vector.broadcast %cst_212 : f32 to vector<32x1xf32>
    %367 = arith.addf %365, %366 : vector<32x1xf32>
    %368 = math.rsqrt %367 : vector<32x1xf32>
    %369 = vector.broadcast %368 : vector<32x1xf32> to vector<32x32xf32>
    %370 = arith.mulf %360, %369 : vector<32x32xf32>
    %371 = vector.broadcast %353 : vector<1x32xf32> to vector<32x32xf32>
    %372 = arith.mulf %370, %371 : vector<32x32xf32>
    %373 = vector.broadcast %354 : vector<1x32xf32> to vector<32x32xf32>
    %374 = arith.addf %372, %373 : vector<32x32xf32>
    %c0_213 = arith.constant 0 : index
    %c0_214 = arith.constant 0 : index
    %375 = vector.load %arg27[%c0_213, %c0_214] : memref<32x64xf32, #tpu.memory_space<vmem>>, vector<32x64xf32>
    %cst_215 = arith.constant dense<0.000000e+00> : vector<32x64xf32>
    %376 = tpu.matmul %374, %375, %cst_215 {dimension_numbers = #tpu.dot_dimension_numbers<[1], [0], [0], [1], [0, 0, 1, 1], [], []>} : vector<32x32xf32>, vector<32x64xf32>, vector<32x64xf32> -> vector<32x64xf32>
    %c0_216 = arith.constant 0 : index
    %c0_217 = arith.constant 0 : index
    %377 = vector.load %arg28[%c0_216, %c0_217] : memref<1x64xf32, #tpu.memory_space<vmem>>, vector<1x64xf32>
    %378 = vector.broadcast %377 : vector<1x64xf32> to vector<32x64xf32>
    %379 = arith.addf %376, %378 : vector<32x64xf32>
    %cst_218 = arith.constant 5.000000e-01 : f32
    %380 = vector.broadcast %cst_218 : f32 to vector<32x64xf32>
    %381 = arith.mulf %380, %379 : vector<32x64xf32>
    %cst_219 = arith.constant 0.707106769 : f32
    %382 = vector.broadcast %cst_219 : f32 to vector<32x64xf32>
    %383 = arith.mulf %379, %382 : vector<32x64xf32>
    %384 = math.absf %383 : vector<32x64xf32>
    %cst_220 = arith.constant 0.327591091 : f32
    %385 = vector.broadcast %cst_220 : f32 to vector<32x64xf32>
    %386 = arith.mulf %385, %384 : vector<32x64xf32>
    %cst_221 = arith.constant 1.000000e+00 : f32
    %387 = vector.broadcast %cst_221 : f32 to vector<32x64xf32>
    %388 = arith.addf %387, %386 : vector<32x64xf32>
    %cst_222 = arith.constant 1.000000e+00 : f32
    %389 = vector.broadcast %cst_222 : f32 to vector<32x64xf32>
    %390 = arith.divf %389, %388 : vector<32x64xf32>
    %cst_223 = arith.constant 1.06140542 : f32
    %391 = vector.broadcast %cst_223 : f32 to vector<32x64xf32>
    %392 = arith.mulf %391, %390 : vector<32x64xf32>
    %cst_224 = arith.constant -1.45315206 : f32
    %393 = vector.broadcast %cst_224 : f32 to vector<32x64xf32>
    %394 = arith.addf %392, %393 : vector<32x64xf32>
    %395 = arith.mulf %394, %390 : vector<32x64xf32>
    %cst_225 = arith.constant 1.42141378 : f32
    %396 = vector.broadcast %cst_225 : f32 to vector<32x64xf32>
    %397 = arith.addf %395, %396 : vector<32x64xf32>
    %398 = arith.mulf %397, %390 : vector<32x64xf32>
    %cst_226 = arith.constant -0.284496725 : f32
    %399 = vector.broadcast %cst_226 : f32 to vector<32x64xf32>
    %400 = arith.addf %398, %399 : vector<32x64xf32>
    %401 = arith.mulf %400, %390 : vector<32x64xf32>
    %cst_227 = arith.constant 0.254829586 : f32
    %402 = vector.broadcast %cst_227 : f32 to vector<32x64xf32>
    %403 = arith.addf %401, %402 : vector<32x64xf32>
    %404 = arith.mulf %403, %390 : vector<32x64xf32>
    %cst_228 = arith.constant 0.000000e+00 : f32
    %405 = vector.broadcast %cst_228 : f32 to vector<32x64xf32>
    %406 = arith.subf %405, %384 : vector<32x64xf32>
    %407 = arith.mulf %406, %384 : vector<32x64xf32>
    %408 = math.exp %407 : vector<32x64xf32>
    %409 = arith.mulf %404, %408 : vector<32x64xf32>
    %cst_229 = arith.constant 1.000000e+00 : f32
    %410 = vector.broadcast %cst_229 : f32 to vector<32x64xf32>
    %411 = arith.subf %410, %409 : vector<32x64xf32>
    %cst_230 = arith.constant 0.000000e+00 : f32
    %412 = vector.broadcast %cst_230 : f32 to vector<32x64xf32>
    %413 = arith.cmpf olt, %383, %412 : vector<32x64xf32>
    %cst_231 = arith.constant 0.000000e+00 : f32
    %414 = vector.broadcast %cst_231 : f32 to vector<32x64xf32>
    %415 = arith.subf %414, %411 : vector<32x64xf32>
    %416 = arith.select %413, %415, %411 : vector<32x64xi1>, vector<32x64xf32>
    %cst_232 = arith.constant 1.000000e+00 : f32
    %417 = vector.broadcast %cst_232 : f32 to vector<32x64xf32>
    %418 = arith.addf %417, %416 : vector<32x64xf32>
    %419 = arith.mulf %381, %418 : vector<32x64xf32>
    %c0_233 = arith.constant 0 : index
    %c0_234 = arith.constant 0 : index
    %420 = vector.load %arg29[%c0_233, %c0_234] : memref<64x32xf32, #tpu.memory_space<vmem>>, vector<64x32xf32>
    %cst_235 = arith.constant dense<0.000000e+00> : vector<32x32xf32>
    %421 = tpu.matmul %419, %420, %cst_235 {dimension_numbers = #tpu.dot_dimension_numbers<[1], [0], [0], [1], [0, 0, 1, 1], [], []>} : vector<32x64xf32>, vector<64x32xf32>, vector<32x32xf32> -> vector<32x32xf32>
    %c0_236 = arith.constant 0 : index
    %c0_237 = arith.constant 0 : index
    %422 = vector.load %arg30[%c0_236, %c0_237] : memref<1x32xf32, #tpu.memory_space<vmem>>, vector<1x32xf32>
    %423 = vector.broadcast %422 : vector<1x32xf32> to vector<32x32xf32>
    %424 = arith.addf %421, %423 : vector<32x32xf32>
    %425 = arith.addf %352, %424 : vector<32x32xf32>
    %c0_238 = arith.constant 0 : index
    %c0_239 = arith.constant 0 : index
    %426 = vector.load %arg34[%c0_238, %c0_239] : memref<4x32xf32, #tpu.memory_space<vmem>>, vector<1x32xf32>
    %c1_240 = arith.constant 1 : index
    %c0_241 = arith.constant 0 : index
    %427 = vector.load %arg34[%c1_240, %c0_241] : memref<4x32xf32, #tpu.memory_space<vmem>>, vector<1x32xf32>
    %cst_242 = arith.constant dense<0.000000e+00> : vector<32xf32>
    %428 = vector.multi_reduction <add>, %425, %cst_242 [1] : vector<32x32xf32> to vector<32xf32>
    %429 = vector.shape_cast %428 : vector<32xf32> to vector<32x1xf32>
    %cst_243 = arith.constant 3.200000e+01 : f32
    %430 = vector.broadcast %cst_243 : f32 to vector<32x1xf32>
    %431 = arith.divf %429, %430 : vector<32x1xf32>
    %432 = vector.broadcast %431 : vector<32x1xf32> to vector<32x32xf32>
    %433 = arith.subf %425, %432 : vector<32x32xf32>
    %434 = arith.mulf %433, %433 : vector<32x32xf32>
    %cst_244 = arith.constant dense<0.000000e+00> : vector<32xf32>
    %435 = vector.multi_reduction <add>, %434, %cst_244 [1] : vector<32x32xf32> to vector<32xf32>
    %436 = vector.shape_cast %435 : vector<32xf32> to vector<32x1xf32>
    %cst_245 = arith.constant 3.200000e+01 : f32
    %437 = vector.broadcast %cst_245 : f32 to vector<32x1xf32>
    %438 = arith.divf %436, %437 : vector<32x1xf32>
    %cst_246 = arith.constant 9.99999974E-6 : f32
    %439 = vector.broadcast %cst_246 : f32 to vector<32x1xf32>
    %440 = arith.addf %438, %439 : vector<32x1xf32>
    %441 = math.rsqrt %440 : vector<32x1xf32>
    %442 = vector.broadcast %441 : vector<32x1xf32> to vector<32x32xf32>
    %443 = arith.mulf %433, %442 : vector<32x32xf32>
    %444 = vector.broadcast %426 : vector<1x32xf32> to vector<32x32xf32>
    %445 = arith.mulf %443, %444 : vector<32x32xf32>
    %446 = vector.broadcast %427 : vector<1x32xf32> to vector<32x32xf32>
    %447 = arith.addf %445, %446 : vector<32x32xf32>
    %c0_247 = arith.constant 0 : index
    %c0_248 = arith.constant 0 : index
    %448 = vector.load %arg33[%c0_247, %c0_248] : memref<32x32xf32, #tpu.memory_space<vmem>>, vector<32x32xf32>
    %c0_249 = arith.constant 0 : index
    %c0_250 = arith.constant 0 : index
    %c0_251 = arith.constant 0 : index
    %449 = vector.load %arg31[%c0_249, %c0_250, %c0_251] : memref<4x32x32xf32, #tpu.memory_space<vmem>>, vector<1x32x32xf32>
    %450 = vector.shape_cast %449 : vector<1x32x32xf32> to vector<32x32xf32>
    %c0_252 = arith.constant 0 : index
    %c0_253 = arith.constant 0 : index
    %451 = vector.load %arg32[%c0_252, %c0_253] : memref<4x32xf32, #tpu.memory_space<vmem>>, vector<1x32xf32>
    %452 = vector.broadcast %451 : vector<1x32xf32> to vector<32x32xf32>
    %453 = arith.mulf %447, %452 : vector<32x32xf32>
    %cst_254 = arith.constant dense<0.000000e+00> : vector<32x32xf32>
    %454 = tpu.matmul %450, %453, %cst_254 {dimension_numbers = #tpu.dot_dimension_numbers<[1], [0], [0], [1], [0, 0, 1, 1], [], []>} : vector<32x32xf32>, vector<32x32xf32>, vector<32x32xf32> -> vector<32x32xf32>
    %455 = arith.addf %448, %454 : vector<32x32xf32>
    %c1_255 = arith.constant 1 : index
    %c0_256 = arith.constant 0 : index
    %c0_257 = arith.constant 0 : index
    %456 = vector.load %arg31[%c1_255, %c0_256, %c0_257] : memref<4x32x32xf32, #tpu.memory_space<vmem>>, vector<1x32x32xf32>
    %457 = vector.shape_cast %456 : vector<1x32x32xf32> to vector<32x32xf32>
    %c1_258 = arith.constant 1 : index
    %c0_259 = arith.constant 0 : index
    %458 = vector.load %arg32[%c1_258, %c0_259] : memref<4x32xf32, #tpu.memory_space<vmem>>, vector<1x32xf32>
    %459 = vector.broadcast %458 : vector<1x32xf32> to vector<32x32xf32>
    %460 = arith.mulf %447, %459 : vector<32x32xf32>
    %cst_260 = arith.constant dense<0.000000e+00> : vector<32x32xf32>
    %461 = tpu.matmul %457, %460, %cst_260 {dimension_numbers = #tpu.dot_dimension_numbers<[1], [0], [0], [1], [0, 0, 1, 1], [], []>} : vector<32x32xf32>, vector<32x32xf32>, vector<32x32xf32> -> vector<32x32xf32>
    %462 = arith.addf %455, %461 : vector<32x32xf32>
    %c2_261 = arith.constant 2 : index
    %c0_262 = arith.constant 0 : index
    %c0_263 = arith.constant 0 : index
    %463 = vector.load %arg31[%c2_261, %c0_262, %c0_263] : memref<4x32x32xf32, #tpu.memory_space<vmem>>, vector<1x32x32xf32>
    %464 = vector.shape_cast %463 : vector<1x32x32xf32> to vector<32x32xf32>
    %c2_264 = arith.constant 2 : index
    %c0_265 = arith.constant 0 : index
    %465 = vector.load %arg32[%c2_264, %c0_265] : memref<4x32xf32, #tpu.memory_space<vmem>>, vector<1x32xf32>
    %466 = vector.broadcast %465 : vector<1x32xf32> to vector<32x32xf32>
    %467 = arith.mulf %447, %466 : vector<32x32xf32>
    %cst_266 = arith.constant dense<0.000000e+00> : vector<32x32xf32>
    %468 = tpu.matmul %464, %467, %cst_266 {dimension_numbers = #tpu.dot_dimension_numbers<[1], [0], [0], [1], [0, 0, 1, 1], [], []>} : vector<32x32xf32>, vector<32x32xf32>, vector<32x32xf32> -> vector<32x32xf32>
    %469 = arith.addf %462, %468 : vector<32x32xf32>
    %c3_267 = arith.constant 3 : index
    %c0_268 = arith.constant 0 : index
    %c0_269 = arith.constant 0 : index
    %470 = vector.load %arg31[%c3_267, %c0_268, %c0_269] : memref<4x32x32xf32, #tpu.memory_space<vmem>>, vector<1x32x32xf32>
    %471 = vector.shape_cast %470 : vector<1x32x32xf32> to vector<32x32xf32>
    %c3_270 = arith.constant 3 : index
    %c0_271 = arith.constant 0 : index
    %472 = vector.load %arg32[%c3_270, %c0_271] : memref<4x32xf32, #tpu.memory_space<vmem>>, vector<1x32xf32>
    %473 = vector.broadcast %472 : vector<1x32xf32> to vector<32x32xf32>
    %474 = arith.mulf %447, %473 : vector<32x32xf32>
    %cst_272 = arith.constant dense<0.000000e+00> : vector<32x32xf32>
    %475 = tpu.matmul %471, %474, %cst_272 {dimension_numbers = #tpu.dot_dimension_numbers<[1], [0], [0], [1], [0, 0, 1, 1], [], []>} : vector<32x32xf32>, vector<32x32xf32>, vector<32x32xf32> -> vector<32x32xf32>
    %476 = arith.addf %469, %475 : vector<32x32xf32>
    %477 = arith.addf %425, %476 : vector<32x32xf32>
    %c2_273 = arith.constant 2 : index
    %c0_274 = arith.constant 0 : index
    %478 = vector.load %arg34[%c2_273, %c0_274] : memref<4x32xf32, #tpu.memory_space<vmem>>, vector<1x32xf32>
    %c3_275 = arith.constant 3 : index
    %c0_276 = arith.constant 0 : index
    %479 = vector.load %arg34[%c3_275, %c0_276] : memref<4x32xf32, #tpu.memory_space<vmem>>, vector<1x32xf32>
    %cst_277 = arith.constant dense<0.000000e+00> : vector<32xf32>
    %480 = vector.multi_reduction <add>, %477, %cst_277 [1] : vector<32x32xf32> to vector<32xf32>
    %481 = vector.shape_cast %480 : vector<32xf32> to vector<32x1xf32>
    %cst_278 = arith.constant 3.200000e+01 : f32
    %482 = vector.broadcast %cst_278 : f32 to vector<32x1xf32>
    %483 = arith.divf %481, %482 : vector<32x1xf32>
    %484 = vector.broadcast %483 : vector<32x1xf32> to vector<32x32xf32>
    %485 = arith.subf %477, %484 : vector<32x32xf32>
    %486 = arith.mulf %485, %485 : vector<32x32xf32>
    %cst_279 = arith.constant dense<0.000000e+00> : vector<32xf32>
    %487 = vector.multi_reduction <add>, %486, %cst_279 [1] : vector<32x32xf32> to vector<32xf32>
    %488 = vector.shape_cast %487 : vector<32xf32> to vector<32x1xf32>
    %cst_280 = arith.constant 3.200000e+01 : f32
    %489 = vector.broadcast %cst_280 : f32 to vector<32x1xf32>
    %490 = arith.divf %488, %489 : vector<32x1xf32>
    %cst_281 = arith.constant 9.99999974E-6 : f32
    %491 = vector.broadcast %cst_281 : f32 to vector<32x1xf32>
    %492 = arith.addf %490, %491 : vector<32x1xf32>
    %493 = math.rsqrt %492 : vector<32x1xf32>
    %494 = vector.broadcast %493 : vector<32x1xf32> to vector<32x32xf32>
    %495 = arith.mulf %485, %494 : vector<32x32xf32>
    %496 = vector.broadcast %478 : vector<1x32xf32> to vector<32x32xf32>
    %497 = arith.mulf %495, %496 : vector<32x32xf32>
    %498 = vector.broadcast %479 : vector<1x32xf32> to vector<32x32xf32>
    %499 = arith.addf %497, %498 : vector<32x32xf32>
    %c0_282 = arith.constant 0 : index
    %c0_283 = arith.constant 0 : index
    %500 = vector.load %arg35[%c0_282, %c0_283] : memref<32x64xf32, #tpu.memory_space<vmem>>, vector<32x64xf32>
    %cst_284 = arith.constant dense<0.000000e+00> : vector<32x64xf32>
    %501 = tpu.matmul %499, %500, %cst_284 {dimension_numbers = #tpu.dot_dimension_numbers<[1], [0], [0], [1], [0, 0, 1, 1], [], []>} : vector<32x32xf32>, vector<32x64xf32>, vector<32x64xf32> -> vector<32x64xf32>
    %c0_285 = arith.constant 0 : index
    %c0_286 = arith.constant 0 : index
    %502 = vector.load %arg36[%c0_285, %c0_286] : memref<1x64xf32, #tpu.memory_space<vmem>>, vector<1x64xf32>
    %503 = vector.broadcast %502 : vector<1x64xf32> to vector<32x64xf32>
    %504 = arith.addf %501, %503 : vector<32x64xf32>
    %cst_287 = arith.constant 5.000000e-01 : f32
    %505 = vector.broadcast %cst_287 : f32 to vector<32x64xf32>
    %506 = arith.mulf %505, %504 : vector<32x64xf32>
    %cst_288 = arith.constant 0.707106769 : f32
    %507 = vector.broadcast %cst_288 : f32 to vector<32x64xf32>
    %508 = arith.mulf %504, %507 : vector<32x64xf32>
    %509 = math.absf %508 : vector<32x64xf32>
    %cst_289 = arith.constant 0.327591091 : f32
    %510 = vector.broadcast %cst_289 : f32 to vector<32x64xf32>
    %511 = arith.mulf %510, %509 : vector<32x64xf32>
    %cst_290 = arith.constant 1.000000e+00 : f32
    %512 = vector.broadcast %cst_290 : f32 to vector<32x64xf32>
    %513 = arith.addf %512, %511 : vector<32x64xf32>
    %cst_291 = arith.constant 1.000000e+00 : f32
    %514 = vector.broadcast %cst_291 : f32 to vector<32x64xf32>
    %515 = arith.divf %514, %513 : vector<32x64xf32>
    %cst_292 = arith.constant 1.06140542 : f32
    %516 = vector.broadcast %cst_292 : f32 to vector<32x64xf32>
    %517 = arith.mulf %516, %515 : vector<32x64xf32>
    %cst_293 = arith.constant -1.45315206 : f32
    %518 = vector.broadcast %cst_293 : f32 to vector<32x64xf32>
    %519 = arith.addf %517, %518 : vector<32x64xf32>
    %520 = arith.mulf %519, %515 : vector<32x64xf32>
    %cst_294 = arith.constant 1.42141378 : f32
    %521 = vector.broadcast %cst_294 : f32 to vector<32x64xf32>
    %522 = arith.addf %520, %521 : vector<32x64xf32>
    %523 = arith.mulf %522, %515 : vector<32x64xf32>
    %cst_295 = arith.constant -0.284496725 : f32
    %524 = vector.broadcast %cst_295 : f32 to vector<32x64xf32>
    %525 = arith.addf %523, %524 : vector<32x64xf32>
    %526 = arith.mulf %525, %515 : vector<32x64xf32>
    %cst_296 = arith.constant 0.254829586 : f32
    %527 = vector.broadcast %cst_296 : f32 to vector<32x64xf32>
    %528 = arith.addf %526, %527 : vector<32x64xf32>
    %529 = arith.mulf %528, %515 : vector<32x64xf32>
    %cst_297 = arith.constant 0.000000e+00 : f32
    %530 = vector.broadcast %cst_297 : f32 to vector<32x64xf32>
    %531 = arith.subf %530, %509 : vector<32x64xf32>
    %532 = arith.mulf %531, %509 : vector<32x64xf32>
    %533 = math.exp %532 : vector<32x64xf32>
    %534 = arith.mulf %529, %533 : vector<32x64xf32>
    %cst_298 = arith.constant 1.000000e+00 : f32
    %535 = vector.broadcast %cst_298 : f32 to vector<32x64xf32>
    %536 = arith.subf %535, %534 : vector<32x64xf32>
    %cst_299 = arith.constant 0.000000e+00 : f32
    %537 = vector.broadcast %cst_299 : f32 to vector<32x64xf32>
    %538 = arith.cmpf olt, %508, %537 : vector<32x64xf32>
    %cst_300 = arith.constant 0.000000e+00 : f32
    %539 = vector.broadcast %cst_300 : f32 to vector<32x64xf32>
    %540 = arith.subf %539, %536 : vector<32x64xf32>
    %541 = arith.select %538, %540, %536 : vector<32x64xi1>, vector<32x64xf32>
    %cst_301 = arith.constant 1.000000e+00 : f32
    %542 = vector.broadcast %cst_301 : f32 to vector<32x64xf32>
    %543 = arith.addf %542, %541 : vector<32x64xf32>
    %544 = arith.mulf %506, %543 : vector<32x64xf32>
    %c0_302 = arith.constant 0 : index
    %c0_303 = arith.constant 0 : index
    %545 = vector.load %arg37[%c0_302, %c0_303] : memref<64x32xf32, #tpu.memory_space<vmem>>, vector<64x32xf32>
    %cst_304 = arith.constant dense<0.000000e+00> : vector<32x32xf32>
    %546 = tpu.matmul %544, %545, %cst_304 {dimension_numbers = #tpu.dot_dimension_numbers<[1], [0], [0], [1], [0, 0, 1, 1], [], []>} : vector<32x64xf32>, vector<64x32xf32>, vector<32x32xf32> -> vector<32x32xf32>
    %c0_305 = arith.constant 0 : index
    %c0_306 = arith.constant 0 : index
    %547 = vector.load %arg38[%c0_305, %c0_306] : memref<1x32xf32, #tpu.memory_space<vmem>>, vector<1x32xf32>
    %548 = vector.broadcast %547 : vector<1x32xf32> to vector<32x32xf32>
    %549 = arith.addf %546, %548 : vector<32x32xf32>
    %550 = arith.addf %477, %549 : vector<32x32xf32>
    %c0_307 = arith.constant 0 : index
    %c0_308 = arith.constant 0 : index
    %551 = vector.load %arg39[%c0_307, %c0_308] : memref<2x32xf32, #tpu.memory_space<vmem>>, vector<1x32xf32>
    %c1_309 = arith.constant 1 : index
    %c0_310 = arith.constant 0 : index
    %552 = vector.load %arg39[%c1_309, %c0_310] : memref<2x32xf32, #tpu.memory_space<vmem>>, vector<1x32xf32>
    %cst_311 = arith.constant dense<0.000000e+00> : vector<32xf32>
    %553 = vector.multi_reduction <add>, %550, %cst_311 [1] : vector<32x32xf32> to vector<32xf32>
    %554 = vector.shape_cast %553 : vector<32xf32> to vector<32x1xf32>
    %cst_312 = arith.constant 3.200000e+01 : f32
    %555 = vector.broadcast %cst_312 : f32 to vector<32x1xf32>
    %556 = arith.divf %554, %555 : vector<32x1xf32>
    %557 = vector.broadcast %556 : vector<32x1xf32> to vector<32x32xf32>
    %558 = arith.subf %550, %557 : vector<32x32xf32>
    %559 = arith.mulf %558, %558 : vector<32x32xf32>
    %cst_313 = arith.constant dense<0.000000e+00> : vector<32xf32>
    %560 = vector.multi_reduction <add>, %559, %cst_313 [1] : vector<32x32xf32> to vector<32xf32>
    %561 = vector.shape_cast %560 : vector<32xf32> to vector<32x1xf32>
    %cst_314 = arith.constant 3.200000e+01 : f32
    %562 = vector.broadcast %cst_314 : f32 to vector<32x1xf32>
    %563 = arith.divf %561, %562 : vector<32x1xf32>
    %cst_315 = arith.constant 9.99999974E-6 : f32
    %564 = vector.broadcast %cst_315 : f32 to vector<32x1xf32>
    %565 = arith.addf %563, %564 : vector<32x1xf32>
    %566 = math.rsqrt %565 : vector<32x1xf32>
    %567 = vector.broadcast %566 : vector<32x1xf32> to vector<32x32xf32>
    %568 = arith.mulf %558, %567 : vector<32x32xf32>
    %569 = vector.broadcast %551 : vector<1x32xf32> to vector<32x32xf32>
    %570 = arith.mulf %568, %569 : vector<32x32xf32>
    %571 = vector.broadcast %552 : vector<1x32xf32> to vector<32x32xf32>
    %572 = arith.addf %570, %571 : vector<32x32xf32>
    %c0_316 = arith.constant 0 : index
    %c0_317 = arith.constant 0 : index
    %573 = vector.load %arg40[%c0_316, %c0_317] : memref<2x32xf32, #tpu.memory_space<vmem>>, vector<2x32xf32>
    %cst_318 = arith.constant dense<0.000000e+00> : vector<2x32xf32>
    %574 = tpu.matmul %573, %572, %cst_318 {dimension_numbers = #tpu.dot_dimension_numbers<[1], [0], [0], [1], [0, 0, 1, 1], [], []>} : vector<2x32xf32>, vector<32x32xf32>, vector<2x32xf32> -> vector<2x32xf32>
    %c0_319 = arith.constant 0 : index
    %c0_320 = arith.constant 0 : index
    %575 = vector.load %arg41[%c0_319, %c0_320] : memref<32x10xf32, #tpu.memory_space<vmem>>, vector<32x10xf32>
    %cst_321 = arith.constant dense<0.000000e+00> : vector<2x10xf32>
    %576 = tpu.matmul %574, %575, %cst_321 {dimension_numbers = #tpu.dot_dimension_numbers<[1], [0], [0], [1], [0, 0, 1, 1], [], []>} : vector<2x32xf32>, vector<32x10xf32>, vector<2x10xf32> -> vector<2x10xf32>
    %c0_322 = arith.constant 0 : index
    %c0_323 = arith.constant 0 : index
    %577 = vector.load %arg42[%c0_322, %c0_323] : memref<1x10xf32, #tpu.memory_space<vmem>>, vector<1x10xf32>
    %578 = vector.broadcast %577 : vector<1x10xf32> to vector<2x10xf32>
    %579 = arith.addf %576, %578 : vector<2x10xf32>
    %c0_324 = arith.constant 0 : index
    %c0_325 = arith.constant 0 : index
    %580 = vector.load %arg43[%c0_324, %c0_325] : memref<2x10xf32, #tpu.memory_space<vmem>>, vector<2x10xf32>
    tpu.vector_store %arg43[%c0_324, %c0_325], %579 {strides = array<i32>} : memref<2x10xf32, #tpu.memory_space<vmem>>, vector<2x10xf32>,
    return
  }
}

</mosaic_0001>

<bundles_post_ra>
// kernel: forward.1
= control target key start
LH: loop header
LB: loop body
LE: loop exit
PB: predicated region body
PF: predicated region fallthrough
CT: control target
= control target key end

     0   :  { %s7481_s6 = smov 1   ;;  %s7482_s10 = smov 2   ;;  %s11613_s0 = inlined_call_operand.smem [shape: u32[44], index: -1, kind: input, shape index: {}] }
   0x1   :  { %s7538_s5 = sld [smem:[%s11613_s0]]   ;;  %s7483_s14 = smov 3  }
   0x2   :  { %s7543_s9 = sld [smem:[%s11613_s0 + %s7481_s6]]   ;;  %s7484_s18 = smov 4  }
   0x3   :  { %s7548_s13 = sld [smem:[%s11613_s0 + %s7482_s10]]   ;;  %s7485_s22 = smov 5  }
   0x4   :  { %s7553_s17 = sld [smem:[%s11613_s0 + %s7483_s14]]   ;;  %s7486_s26 = smov 6  }
   0x5   :  { %s7558_s21 = sld [smem:[%s11613_s0 + %s7484_s18]]   ;;  %s7487_s30 = smov 7  }
   0x6   :  { %s7563_s25 = sld [smem:[%s11613_s0 + %s7485_s22]]   ;;  %s7488_s4 = smov 8  }
   0x7   :  { %s7568_s29 = sld [smem:[%s11613_s0 + %s7486_s26]]   ;;  %s7489_s10 = smov 9  }
   0x8   :  { %s7573_s3 = sld [smem:[%s11613_s0 + %s7487_s30]]   ;;  %s7490_s15 = smov 10  }
   0x9   :  { %s7578_s8 = sld [smem:[%s11613_s0 + %s7488_s4]]   ;;  %s7491_s20 = smov 11  }
   0xa   :  { %s7583_s14 = sld [smem:[%s11613_s0 + %s7489_s10]]   ;;  %s7492_s26 = smov 12  }
   0xb   :  { %s7588_s19 = sld [smem:[%s11613_s0 + %s7490_s15]]   ;;  %s7493_s1 = smov 13  }
   0xc   :  { %s7593_s24 = sld [smem:[%s11613_s0 + %s7491_s20]]   ;;  %s7494_s7 = smov 14  }
   0xd   :  { %s7598_s30 = sld [smem:[%s11613_s0 + %s7492_s26]]   ;;  %s7495_s15 = smov 15  }
   0xe   :  { %s7603_s6 = sld [smem:[%s11613_s0 + %s7493_s1]]   ;;  %s7496_s22 = smov 16  }
   0xf   :  { %s7608_s12 = sld [smem:[%s11613_s0 + %s7494_s7]]   ;;  %s7497_s28 = smov 17  }
  0x10   :  { %s7613_s20 = sld [smem:[%s11613_s0 + %s7495_s15]]   ;;  %s7498_s7 = smov 18  }
  0x11   :  { %s7618_s27 = sld [smem:[%s11613_s0 + %s7496_s22]]   ;;  %s7499_s15 = smov 19  }
  0x12   :  { %11665 = sst [smem:[#allocation11_spill]] %s7593_s24  ;;  %s7500_s22 = smov 20  }
  0x13   :  { %s7623_s4 = sld [smem:[%s11613_s0 + %s7497_s28]]   ;;  %s7501_s28 = smov 21  }
  0x14   :  { %11666 = sst [smem:[#allocation12_spill]] %s7603_s6  ;;  %s7519_s16 = smov 39  }
  0x15   :  { %s7628_s6 = sld [smem:[%s11613_s0 + %s7498_s7]]   ;;  %s7502_s7 = smov 22  }
  0x16   :  { %11667 = sst [smem:[#allocation13_spill]] %s7613_s20  ;;  %s7520_s23 = smov 40  }
  0x17   :  { %11668 = sst [smem:[#allocation14_spill]] %s7618_s27  ;;  %s7521_s1 = smov 41  }
  0x18   :  { %s7633_s20 = sld [smem:[%s11613_s0 + %s7499_s15]]   ;;  %s7503_s15 = smov 23  }
  0x19   :  { %11669 = sst [smem:[#allocation15_spill]] %s7623_s4  ;;  %s7522_s10 = smov 42  }
  0x1a   :  { %s7638_s27 = sld [smem:[%s11613_s0 + %s7500_s22]]   ;;  %s7504_s22 = smov 24  }
  0x1b   :  { %11670 = sst [smem:[#allocation16_spill]] %s7628_s6 }
  0x1c   :  { %s7643_s4 = sld [smem:[%s11613_s0 + %s7501_s28]]   ;;  %s7505_s28 = smov 25  }
  0x1d   :  { %s7648_s6 = sld [smem:[%s11613_s0 + %s7502_s7]]   ;;  %s7506_s7 = smov 26  }
  0x1e   :  { %11671 = sst [smem:[#allocation17_spill]] %s7633_s20 }
  0x1f   :  { %s7653_s20 = sld [smem:[%s11613_s0 + %s7503_s15]]   ;;  %s7507_s15 = smov 27  }
  0x20   :  { %11672 = sst [smem:[#allocation18_spill]] %s7638_s27 }
  0x21   :  { %s7658_s27 = sld [smem:[%s11613_s0 + %s7504_s22]]   ;;  %s7508_s22 = smov 28  }
  0x22   :  { %11673 = sst [smem:[#allocation19_spill]] %s7643_s4 }
  0x23   :  { %11674 = sst [smem:[#allocation20_spill]] %s7648_s6 }
  0x24   :  { %s7663_s4 = sld [smem:[%s11613_s0 + %s7505_s28]]   ;;  %s7509_s28 = smov 29  }
  0x25   :  { %11675 = sst [smem:[#allocation21_spill]] %s7653_s20 }
  0x26   :  { %s7668_s6 = sld [smem:[%s11613_s0 + %s7506_s7]]   ;;  %s7510_s7 = smov 30  }
  0x27   :  { %11676 = sst [smem:[#allocation22_spill]] %s7658_s27 }
  0x28   :  { %s7673_s20 = sld [smem:[%s11613_s0 + %s7507_s15]]   ;;  %s7511_s15 = smov 31  }
  0x29   :  { %s7678_s27 = sld [smem:[%s11613_s0 + %s7508_s22]]   ;;  %s7512_s22 = smov 32  }
  0x2a   :  { %11677 = sst [smem:[#allocation23_spill]] %s7663_s4 }
  0x2b   :  { %s7683_s4 = sld [smem:[%s11613_s0 + %s7509_s28]]   ;;  %s7513_s28 = smov 33  }
  0x2c   :  { %11678 = sst [smem:[#allocation24_spill]] %s7668_s6 }
  0x2d   :  { %s7688_s6 = sld [smem:[%s11613_s0 + %s7510_s7]]   ;;  %s7514_s7 = smov 34  }
  0x2e   :  { %11679 = sst [smem:[#allocation25_spill]] %s7673_s20 }
  0x2f   :  { %11680 = sst [smem:[#allocation26_spill]] %s7678_s27 }
  0x30   :  { %s7693_s20 = sld [smem:[%s11613_s0 + %s7511_s15]]   ;;  %s7515_s15 = smov 35  }
  0x31   :  { %11681 = sst [smem:[#allocation27_spill]] %s7683_s4 }
  0x32   :  { %s7698_s27 = sld [smem:[%s11613_s0 + %s7512_s22]]   ;;  %s7516_s22 = smov 36  }
  0x33   :  { %11682 = sst [smem:[#allocation28_spill]] %s7688_s6 }
  0x34   :  { %s7703_s4 = sld [smem:[%s11613_s0 + %s7513_s28]]   ;;  %s7517_s28 = smov 37  }
  0x35   :  { %s7708_s6 = sld [smem:[%s11613_s0 + %s7514_s7]]   ;;  %s7518_s7 = smov 38  }
  0x36   :  { %11683 = sst [smem:[#allocation29_spill]] %s7693_s20 }
  0x37   :  { %s7713_s20 = sld [smem:[%s11613_s0 + %s7515_s15]]  }
  0x38   :  { %11684 = sst [smem:[#allocation30_spill]] %s7698_s27 }
  0x39   :  { %s7718_s27 = sld [smem:[%s11613_s0 + %s7516_s22]]  }
  0x3a   :  { %11685 = sst [smem:[#allocation31_spill]] %s7703_s4 }
  0x3b   :  { %11686 = sst [smem:[#allocation32_spill]] %s7708_s6 }
  0x3c   :  { %s7723_s4 = sld [smem:[%s11613_s0 + %s7517_s28]]  }
  0x3d   :  { %11687 = sst [smem:[#allocation33_spill]] %s7713_s20 }
  0x3e   :  { %s6700_s6 = sld [smem:[%s11613_s0 + %s7518_s7]]  }
  0x3f   :  { %11688 = sst [smem:[#allocation34_spill]] %s7718_s27 }
  0x40   :  { %s7731_s20 = sld [smem:[%s11613_s0 + %s7519_s16]]   ;;  %s7523_s16 = smov 43  }
  0x41   :  { %s7736_s27 = sld [smem:[%s11613_s0 + %s7520_s23]]  }
  0x42   :  { %11689 = sst [smem:[#allocation35_spill]] %s7723_s4 }
  0x43   :  { %s7741_s4 = sld [smem:[%s11613_s0 + %s7521_s1]]  }
  0x44   :  { %s7746_s24 = sld [smem:[%s11613_s0 + %s7522_s10]]  }
  0x46   :  { %11690 = sst [smem:[#allocation36_spill]] %s7731_s20 }
  0x47   :  { %s7751_s20 = sld [smem:[%s11613_s0 + %s7523_s16]]  }
  0x48   :  { %92 = vsyncpa [#allocation3], 0 }
  0x49   :  { %93 = vsyncpa [#allocation6], 0 }
  0x4a   :  { %94 = vsyncpa [#allocation4], 0  ;;  %s176_s23 = sshll.u32 %s6700_s6, 4  ;;  %s7524_s22 = smov [#allocation2]   ;;  %s177_s23 = int_to_ptr.hbm [resolvable:$true] %s176_s23 }
  0x4b   :  { %s178_s26 = sshll.u32 %s7524_s22, 4  ;;  %s193_s1 = sshll.u32 %s7746_s24, 4  ;;  %s179_s26 = int_to_ptr.vmem [resolvable:$true] %s178_s26  ;;  %s194_s1 = int_to_ptr.hbm [resolvable:$true] %s193_s1 }
  0x4c   :  { %s7403_s28 = sshra.s32 %s177_s23, 4  ;;  %s7407_s10 = scalar_lea.hbm %s6700_s6, 1  ;;  %s7404_s28 = int_to_ptr.hbm [resolvable:$true] %s7403_s28 }
  0x4d   :  { %s7405_s2 = scalar_lea.hbm %s7404_s28, 1  ;;  %p7408_p1 = scmp.lt.s32.totalorder %s7404_s28, %s6700_s6 }
  0x4e   :  { %p7406_p0 = scmp.ne.s32.totalorder %s7404_s28, %s7405_s2  ;;  %p7409_p2 = scmp.lt.s32.totalorder %s7407_s10, %s7405_s2 }
  0x50   :  { %p7410_p3 = por %p7409_p2, %p7408_p1 }
  0x52   :  { %p7411_p4 = pnand %p7410_p3, %p7406_p0 }
  0x54   :  { %7414 = shalt.err (!%p7411_p4)
}
  0x55   :  { %181 = dma.hbm_to_vmem [thread:$0]  %s177_s23, 16, %s179_s26, [#allocation3]  }
  0x56   :  { %s7525_s0 = smov [#allocation5]   ;;  %s7427_s11 = sshra.s32 %s194_s1, 4  ;;  %s7428_s11 = int_to_ptr.hbm [resolvable:$true] %s7427_s11 }
  0x57   :  { %s195_s7 = sshll.u32 %s7525_s0, 4  ;;  %s7429_s16 = scalar_lea.hbm %s7428_s11, 1  ;;  %s196_s7 = int_to_ptr.vmem [resolvable:$true] %s195_s7 }
  0x58   :  { %p7430_p5 = scmp.ne.s32.totalorder %s7428_s11, %s7429_s16  ;;  %s7431_s15 = scalar_lea.hbm %s7746_s24, 1 }
  0x59   :  { %p7432_p6 = scmp.lt.s32.totalorder %s7428_s11, %s7746_s24  ;;  %p7433_p7 = scmp.lt.s32.totalorder %s7431_s15, %s7429_s16 }
  0x5b   :  { %p7434_p8 = por %p7433_p7, %p7432_p6 }
  0x5d   :  { %p7435_p9 = pnand %p7434_p8, %p7430_p5 }
  0x5f   :  { %7438 = shalt.err (!%p7435_p9)
}
  0x60   :  { %198 = dma.hbm_to_vmem [thread:$0]  %s194_s1, 16, %s196_s7, [#allocation6]  }
  0x61   :  { %7475 = dma.done.wait [#allocation3], 16  }
  0x62   :  { %7476 = vsyncadd [#allocation3], 4294967280 }
  0x63   :  { %7477 = dma.done.wait [#allocation6], 16  }
  0x64   :  { %7478 = vsyncadd [#allocation6], 4294967280  ;;  %v228_v0 = vld [vmem:[%s7543_s9 + $0x28] sm:$0xff]  ;;  %v227_v1 = vld [vmem:[%s7543_s9 + $0x20] sm:$0xff]  ;;  %vm231_vm0 = vcmask 392192   ;;  %vm347_vm1 = vcmask 130048  }
  0x65   :  { %290 = vmatpush.msra.mxu0 %v228_v0  ;;  %v226_v2 = vld [vmem:[%s7543_s9 + $0x18] sm:$0xff]  ;;  %v225_v3 = vld [vmem:[%s7543_s9 + $0x10] sm:$0xff]  ;;  %v224_v4 = vld [vmem:[%s7543_s9 + $0x8] sm:$0xff]  ;;  %s11834_s24 = sld [smem:[#allocation22_spill]]  ;;  %s7529_s16 = smov [#allocation7]  }
  0x66   :  { %v223_v5 = vld [vmem:[%s7543_s9] sm:$0xff]  ;;  %v208_v7 = vld [vmem:[%s7538_s5 + $0x8] sm:$0xff]  ;;  %v209_v8 = vld [vmem:[%s7538_s5 + $0x10] sm:$0xff]  ;;  %s11805_s9 = sld [smem:[#allocation12_spill]]  ;;  %s6652_s15 = sshll.u32 %s7751_s20, 4  ;;  %s6653_s15 = int_to_ptr.hbm [resolvable:$true] %s6652_s15 }
  0x67   :  { %291 = vmatpush.msra.mxu0 %v227_v1  ;;  %v207_v6 = vld [vmem:[%s7538_s5] sm:$0xff]  ;;  %v210_v9 = vld [vmem:[%s7538_s5 + $0x18] sm:$0xff]  ;;  %v212_v11 = vld [vmem:[%s7538_s5 + $0x28] sm:$0xff]  ;;  %s11836_s6 = sld [smem:[#allocation23_spill]] }
  0x68   :  { %v211_v10 = vld [vmem:[%s7538_s5 + $0x20] sm:$0xff]  ;;  %v213_v12 = vld [vmem:[%s7538_s5 + $0x30] sm:$0xff]  ;;  %v214_v13 = vld [vmem:[%s7538_s5 + $0x38] sm:$0xff]  ;;  %s11838_s18 = sld [smem:[#allocation26_spill]] }
  0x69   :  { %292 = vmatpush.msra.mxu0 %v226_v2  ;;  %v215_v14 = vld [vmem:[%s7538_s5 + $0x40] sm:$0xff]  ;;  %v216_v15 = vld [vmem:[%s7538_s5 + $0x48] sm:$0xff]  ;;  %v217_v16 = vld [vmem:[%s7538_s5 + $0x50] sm:$0xff]  ;;  %s11839_s23 = sld [smem:[#allocation27_spill]] }
  0x6a   :  { %v218_v17 = vld [vmem:[%s7538_s5 + $0x58] sm:$0xff]  ;;  %v219_v18 = vld [vmem:[%s7538_s5 + $0x60] sm:$0xff]  ;;  %v220_v19 = vld [vmem:[%s7538_s5 + $0x68] sm:$0xff]  ;;  %s11840_s22 = sld [smem:[#allocation28_spill]] }
  0x6b   :  { %293 = vmatpush.msra.mxu0 %v225_v3  ;;  %v221_v20 = vld [vmem:[%s7538_s5 + $0x70] sm:$0xff]  ;;  %v222_v21 = vld [vmem:[%s7538_s5 + $0x78] sm:$0xff]  ;;  %v6979_v32 = vld [vmem:[%s7548_s13] ss:$0 sm:$0xff]  ;;  %s11804_s5 = sld [smem:[#allocation11_spill]] }
  0x6c   :  { %s11841_s26 = sld [smem:[#allocation32_spill]] }
  0x6d   :  { %294 = vmatpush.msra.mxu0 %v224_v4  ;;  %s11842_s1 = sld [smem:[#allocation30_spill]] }
  0x6e   :  { %s11843_s28 = sld [smem:[#allocation29_spill]] }
  0x6f   :  { %295 = vmatpush.msra.mxu0 %v223_v5  ;;  %s11844_s2 = sld [smem:[#allocation31_spill]] }
  0x70   :  { %6706 = vmatmul.msk.f32.vlgmr.msra.gmra.mxu0 %vm231_vm0, %v207_v6  ;;  %s11845_s10 = sld [smem:[#allocation33_spill]] }
  0x71   :  { %s11846_s0 = sld [smem:[#allocation34_spill]] }
  0x72   :  { %s11847_s7 = sld [smem:[#allocation35_spill]] }
  0x73   :  { %s11848_s11 = sld [smem:[#allocation36_spill]] }
  0x78   :  { %6707 = vmatmul.msk.f32.gmra.mxu0 %vm231_vm0, %v208_v7  ;;  %v7526_v7 = vmov 16.0  }
  0x79   :  { %7023 = vrcp.f32 %v7526_v7 }
  0x80   :  { %6708 = vmatmul.msk.f32.gmra.mxu0 %vm231_vm0, %v209_v8  ;;  %v7024_v8 = vpop.eup %7023 }
  0x81   :  { %vm401_vm2 = vweird.f32 %v7024_v8 }
  0x88   :  { %6709 = vmatmul.msk.f32.gmra.mxu0 %vm231_vm0, %v210_v9  ;;  %v397_v9 = vmul.f32 16.0, %v7024_v8 }
  0x90   :  { %6710 = vmatmul.msk.f32.gmra.mxu0 %vm231_vm0, %v211_v10  ;;  %v398_v10 = vsub.f32 1.0, %v397_v9 }
  0x98   :  { %6711 = vmatmul.msk.f32.gmra.mxu0 %vm231_vm0, %v212_v11  ;;  %v399_v11 = vmul.f32 %v7024_v8, %v398_v10 }
  0xa0   :  { %6712 = vmatmul.msk.f32.gmra.mxu0 %vm231_vm0, %v213_v12  ;;  %v400_v12 = vadd.f32 %v7024_v8, %v399_v11 }
  0xa8   :  { %6713 = vmatmul.msk.f32.gmra.mxu0 %vm231_vm0, %v214_v13  ;;  %v7862_v13 = vsel %vm401_vm2, %v7024_v8, %v400_v12 }
  0xb0   :  { %6714 = vmatmul.msk.f32.gmra.mxu0 %vm231_vm0, %v215_v14 }
  0xb8   :  { %6715 = vmatmul.msk.f32.gmra.mxu0 %vm231_vm0, %v216_v15 }
  0xc0   :  { %6716 = vmatmul.msk.f32.gmra.mxu0 %vm231_vm0, %v217_v16 }
  0xc8   :  { %6717 = vmatmul.msk.f32.gmra.mxu0 %vm231_vm0, %v218_v17 }
  0xd0   :  { %6718 = vmatmul.msk.f32.gmra.mxu0 %vm231_vm0, %v219_v18 }
  0xd8   :  { %6719 = vmatmul.msk.f32.gmra.mxu0 %vm231_vm0, %v220_v19 }
  0xe0   :  { %6720 = vmatmul.msk.f32.gmra.mxu0 %vm231_vm0, %v221_v20 }
  0xe8   :  { %6721 = vmatmul.msk.f32.gmra.mxu0 %vm231_vm0, %v222_v21 }
  0xed   :  { %v7794_v22 = vpop.f32.mrf.mxu0 }
  0xee   :  { %v7858_v5 = vadd.f32 %v6979_v32, %v7794_v22 }
  0xf0   :  { %v348_v6 = vsel %vm347_vm1, %v7858_v5, 0.0 }
  0xf5   :  { %v300_v23 = vpop.f32.mrf.mxu0 }
  0xf6   :  { %v7823_v50 = vadd.f32 %v6979_v32, %v300_v23 }
  0xf8   :  { %v351_v55 = vsel %vm347_vm1, %v7823_v50, 0.0 }
  0xfd   :  { %v303_v24 = vpop.f32.mrf.mxu0 }
  0xfe   :  { %v7841_v61 = vadd.f32 %v6979_v32, %v303_v24 }
 0x100   :  { %v354_v0 = vsel %vm347_vm1, %v7841_v61, 0.0 }
 0x105   :  { %v306_v25 = vpop.f32.mrf.mxu0 }
 0x106   :  { %v7853_v3 = vadd.f32 %v6979_v32, %v306_v25 }
 0x108   :  { %v357_v4 = vsel %vm347_vm1, %v7853_v3, 0.0 }
 0x10d   :  { %v309_v26 = vpop.f32.mrf.mxu0 }
 0x10e   :  { %v7813_v44 = vadd.f32 %v6979_v32, %v309_v26 }
 0x110   :  { %v360_v48 = vsel %vm347_vm1, %v7813_v44, 0.0 }
 0x115   :  { %v312_v27 = vpop.f32.mrf.mxu0 }
 0x116   :  { %v7833_v56 = vadd.f32 %v6979_v32, %v312_v27 }
 0x118   :  { %v363_v60 = vsel %vm347_vm1, %v7833_v56, 0.0 }
 0x11d   :  { %v315_v28 = vpop.f32.mrf.mxu0 }
 0x11e   :  { %v7849_v1 = vadd.f32 %v6979_v32, %v315_v28 }
 0x120   :  { %v366_v2 = vsel %vm347_vm1, %v7849_v1, 0.0 }
 0x125   :  { %v318_v29 = vpop.f32.mrf.mxu0 }
 0x126   :  { %v7805_v39 = vadd.f32 %v6979_v32, %v318_v29 }
 0x128   :  { %v369_v43 = vsel %vm347_vm1, %v7805_v39, 0.0 }
 0x12d   :  { %v321_v30 = vpop.f32.mrf.mxu0 }
 0x12e   :  { %v7821_v49 = vadd.f32 %v6979_v32, %v321_v30 }
 0x130   :  { %v372_v54 = vsel %vm347_vm1, %v7821_v49, 0.0 }
 0x135   :  { %v324_v31 = vpop.f32.mrf.mxu0 }
 0x136   :  { %v7843_v62 = vadd.f32 %v6979_v32, %v324_v31 }
 0x138   :  { %v375_v63 = vsel %vm347_vm1, %v7843_v62, 0.0 }
 0x13d   :  { %v327_v33 = vpop.f32.mrf.mxu0 }
 0x13e   :  { %v7797_v34 = vadd.f32 %v6979_v32, %v327_v33 }
 0x140   :  { %v378_v35 = vsel %vm347_vm1, %v7797_v34, 0.0 }
 0x141   :  { %379 = vadd.xlane.f32.xlu2 %v378_v35 }
 0x145   :  { %v330_v36 = vpop.f32.mrf.mxu0 }
 0x146   :  { %v7801_v37 = vadd.f32 %v6979_v32, %v330_v36 }
 0x148   :  { %v381_v38 = vsel %vm347_vm1, %v7801_v37, 0.0 }
 0x149   :  { %382 = vadd.xlane.f32.xlu2 %v381_v38 }
 0x14d   :  { %v333_v40 = vpop.f32.mrf.mxu0 }
 0x14e   :  { %v7807_v41 = vadd.f32 %v6979_v32, %v333_v40 }
 0x150   :  { %v384_v42 = vsel %vm347_vm1, %v7807_v41, 0.0 }
 0x151   :  { %385 = vadd.xlane.f32.xlu1 %v384_v42  ;;  %370 = vadd.xlane.f32.xlu2 %v369_v43 }
 0x155   :  { %v336_v45 = vpop.f32.mrf.mxu0 }
 0x156   :  { %v7815_v46 = vadd.f32 %v6979_v32, %v336_v45 }
 0x158   :  { %v387_v47 = vsel %vm347_vm1, %v7815_v46, 0.0 }
 0x159   :  { %388 = vadd.xlane.f32.xlu1 %v387_v47  ;;  %361 = vadd.xlane.f32.xlu2 %v360_v48 }
 0x15d   :  { %v339_v51 = vpop.f32.mrf.mxu0 }
 0x15e   :  { %v7825_v52 = vadd.f32 %v6979_v32, %v339_v51 }
 0x160   :  { %v390_v53 = vsel %vm347_vm1, %v7825_v52, 0.0 }
 0x161   :  { %391 = vadd.xlane.f32.xlu0 %v390_v53  ;;  %373 = vadd.xlane.f32.xlu1 %v372_v54 }
 0x162   :  { %352 = vadd.xlane.f32.xlu2 %v351_v55 }
 0x165   :  { %v342_v57 = vpop.f32.mrf.mxu0 }
 0x166   :  { %v7835_v58 = vadd.f32 %v6979_v32, %v342_v57 }
 0x168   :  { %v393_v59 = vsel %vm347_vm1, %v7835_v58, 0.0 }
 0x169   :  { %394 = vadd.xlane.f32.xlu0 %v393_v59  ;;  %364 = vadd.xlane.f32.xlu1 %v363_v60 }
 0x171   :  { %376 = vadd.xlane.f32.xlu0 %v375_v63  ;;  %355 = vadd.xlane.f32.xlu1 %v354_v0 }
 0x179   :  { %367 = vadd.xlane.f32.xlu0 %v366_v2 }
 0x181   :  { %358 = vadd.xlane.f32.xlu0 %v357_v4 }
 0x189   :  { %349 = vadd.xlane.f32.xlu0 %v348_v6 }
 0x1b4   :  { %v380_v14 = vpop.xlane.xlu2 %379 }
 0x1b5   :  { %v413_v15 = vmul.f32 %v7862_v13, %v380_v14 }
 0x1b7   :  { %v7866_v16 = vsub.f32 %v7797_v34, %v413_v15 }
 0x1b9   :  { %v445_v17 = vmul.f32 %v7866_v16, %v7866_v16 }
 0x1bb   :  { %v481_v18 = vsel %vm347_vm1, %v445_v17, 0.0 }
 0x1bc   :  { %v383_v19 = vpop.xlane.xlu2 %382  ;;  %482 = vadd.xlane.f32.xlu0 %v481_v18 }
 0x1bd   :  { %v414_v20 = vmul.f32 %v7862_v13, %v383_v19 }
 0x1bf   :  { %v7873_v21 = vsub.f32 %v7801_v37, %v414_v20 }
 0x1c1   :  { %v446_v22 = vmul.f32 %v7873_v21, %v7873_v21 }
 0x1c3   :  { %v484_v23 = vsel %vm347_vm1, %v446_v22, 0.0 }
 0x1c4   :  { %v386_v24 = vpop.xlane.xlu1 %385  ;;  %485 = vadd.xlane.f32.xlu2 %v484_v23  ;;  %v371_v27 = vpop.xlane.xlu2 %370 }
 0x1c5   :  { %v415_v25 = vmul.f32 %v7862_v13, %v386_v24  ;;  %v410_v32 = vmul.f32 %v7862_v13, %v371_v27 }
 0x1c7   :  { %v7880_v26 = vsub.f32 %v7807_v41, %v415_v25  ;;  %v7893_v35 = vsub.f32 %v7805_v39, %v410_v32 }
 0x1c9   :  { %v447_v28 = vmul.f32 %v7880_v26, %v7880_v26  ;;  %v442_v45 = vmul.f32 %v7893_v35, %v7893_v35 }
 0x1cb   :  { %v487_v29 = vsel %vm347_vm1, %v447_v28, 0.0  ;;  %v472_v51 = vsel %vm347_vm1, %v442_v45, 0.0 }
 0x1cc   :  { %v389_v30 = vpop.xlane.xlu1 %388  ;;  %488 = vadd.xlane.f32.xlu1 %v487_v29  ;;  %v362_v36 = vpop.xlane.xlu2 %361 }
 0x1cd   :  { %v416_v31 = vmul.f32 %v7862_v13, %v389_v30 }
 0x1cf   :  { %v7888_v33 = vsub.f32 %v7815_v46, %v416_v31  ;;  %v407_v46 = vmul.f32 %v7862_v13, %v362_v36 }
 0x1d1   :  { %v448_v34 = vmul.f32 %v7888_v33, %v7888_v33 }
 0x1d3   :  { %v490_v37 = vsel %vm347_vm1, %v448_v34, 0.0 }
 0x1d4   :  { %v392_v38 = vpop.xlane.xlu0 %391  ;;  %v374_v40 = vpop.xlane.xlu1 %373  ;;  %491 = vadd.xlane.f32.xlu0 %v490_v37 }
 0x1d5   :  { %v417_v41 = vmul.f32 %v7862_v13, %v392_v38  ;;  %v411_v43 = vmul.f32 %v7862_v13, %v374_v40  ;;  %v353_v55 = vpop.xlane.xlu2 %352 }
 0x1d6   :  { %v404_v63 = vmul.f32 %v7862_v13, %v353_v55 }
 0x1d7   :  { %v7898_v42 = vsub.f32 %v7825_v52, %v417_v41  ;;  %v7907_v47 = vsub.f32 %v7821_v49, %v411_v43  ;;  %v7912_v52 = vsub.f32 %v7813_v44, %v407_v46 }
 0x1d8   :  { %v7932_v6 = vsub.f32 %v7823_v50, %v404_v63  ;;  %v7980_v63 = vld [vmem:[%s7548_s13 + $0x1] ss:$0 sm:$0xff] }
 0x1d9   :  { %v449_v39 = vmul.f32 %v7898_v42, %v7898_v42  ;;  %v443_v60 = vmul.f32 %v7907_v47, %v7907_v47  ;;  %v439_v44 = vmul.f32 %v7912_v52, %v7912_v52 }
 0x1da   :  { %v436_v50 = vmul.f32 %v7932_v6, %v7932_v6 }
 0x1db   :  { %v493_v48 = vsel %vm347_vm1, %v449_v39, 0.0  ;;  %v463_v9 = vsel %vm347_vm1, %v439_v44, 0.0 }
 0x1dc   :  { %v395_v53 = vpop.xlane.xlu0 %394  ;;  %v365_v54 = vpop.xlane.xlu1 %364  ;;  %494 = vadd.xlane.f32.xlu2 %v493_v48  ;;  %473 = vadd.xlane.f32.xlu0 %v472_v51  ;;  %v454_v19 = vsel %vm347_vm1, %v436_v50, 0.0 }
 0x1dd   :  { %v418_v57 = vmul.f32 %v7862_v13, %v395_v53  ;;  %v408_v49 = vmul.f32 %v7862_v13, %v365_v54 }
 0x1df   :  { %v7916_v59 = vsub.f32 %v7835_v58, %v418_v57  ;;  %v7927_v2 = vsub.f32 %v7833_v56, %v408_v49  ;;  %v475_v58 = vsel %vm347_vm1, %v443_v60, 0.0 }
 0x1e1   :  { %v450_v0 = vmul.f32 %v7916_v59, %v7916_v59  ;;  %v440_v12 = vmul.f32 %v7927_v2, %v7927_v2 }
 0x1e3   :  { %v496_v4 = vsel %vm347_vm1, %v450_v0, 0.0  ;;  %v466_v18 = vsel %vm347_vm1, %v440_v12, 0.0 }
 0x1e4   :  { %v377_v7 = vpop.xlane.xlu0 %376  ;;  %497 = vadd.xlane.f32.xlu1 %v496_v4  ;;  %v356_v8 = vpop.xlane.xlu1 %355  ;;  %476 = vadd.xlane.f32.xlu2 %v475_v58  ;;  %v7984_v58 = vld [vmem:[%s7548_s13 + $0x2] ss:$0 sm:$0xff]  ;;  %s11813_s13 = sld [smem:[#allocation13_spill]] }
 0x1e5   :  { %v412_v10 = vmul.f32 %v7862_v13, %v377_v7  ;;  %464 = vadd.xlane.f32.xlu0 %v463_v9  ;;  %v405_v56 = vmul.f32 %v7862_v13, %v356_v8 }
 0x1e7   :  { %v7937_v11 = vsub.f32 %v7843_v62, %v412_v10  ;;  %v7947_v15 = vsub.f32 %v7841_v61, %v405_v56 }
 0x1e9   :  { %v444_v14 = vmul.f32 %v7937_v11, %v7937_v11  ;;  %v437_v23 = vmul.f32 %v7947_v15, %v7947_v15 }
 0x1eb   :  { %v478_v17 = vsel %vm347_vm1, %v444_v14, 0.0  ;;  %v457_v25 = vsel %vm347_vm1, %v437_v23, 0.0 }
 0x1ec   :  { %v368_v62 = vpop.xlane.xlu0 %367  ;;  %479 = vadd.xlane.f32.xlu1 %v478_v17  ;;  %467 = vadd.xlane.f32.xlu2 %v466_v18 }
 0x1ed   :  { %v409_v20 = vmul.f32 %v7862_v13, %v368_v62  ;;  %455 = vadd.xlane.f32.xlu0 %v454_v19 }
 0x1ef   :  { %v7954_v22 = vsub.f32 %v7849_v1, %v409_v20 }
 0x1f1   :  { %v441_v61 = vmul.f32 %v7954_v22, %v7954_v22 }
 0x1f3   :  { %v469_v24 = vsel %vm347_vm1, %v441_v61, 0.0 }
 0x1f4   :  { %v359_v27 = vpop.xlane.xlu0 %358  ;;  %470 = vadd.xlane.f32.xlu1 %v469_v24  ;;  %458 = vadd.xlane.f32.xlu2 %v457_v25 }
 0x1f5   :  { %v406_v28 = vmul.f32 %v7862_v13, %v359_v27 }
 0x1f7   :  { %v7964_v29 = vsub.f32 %v7853_v3, %v406_v28 }
 0x1f9   :  { %v438_v1 = vmul.f32 %v7964_v29, %v7964_v29 }
 0x1fb   :  { %v460_v30 = vsel %vm347_vm1, %v438_v1, 0.0 }
 0x1fc   :  { %461 = vadd.xlane.f32.xlu1 %v460_v30  ;;  %v350_v31 = vpop.xlane.xlu0 %349 }
 0x1fd   :  { %v403_v32 = vmul.f32 %v7862_v13, %v350_v31 }
 0x1ff   :  { %v7971_v34 = vsub.f32 %v7858_v5, %v403_v32 }
 0x201   :  { %v435_v36 = vmul.f32 %v7971_v34, %v7971_v34 }
 0x203   :  { %v451_v37 = vsel %vm347_vm1, %v435_v36, 0.0 }
 0x204   :  { %452 = vadd.xlane.f32.xlu1 %v451_v37 }
 0x22f   :  { %v483_v3 = vpop.xlane.xlu0 %482 }
 0x230   :  { %v509_v38 = vmul.f32 %v483_v3, %v7862_v13 }
 0x232   :  { %v525_v40 = vadd.f32 1e-05, %v509_v38 }
 0x234   :  { %7025 = vrsqrt.f32 %v525_v40  ;;  %vm637_vm4 = vweird.f32 %v525_v40 }
 0x237   :  { %v486_v41 = vpop.xlane.xlu2 %485 }
 0x238   :  { %v510_v43 = vmul.f32 %v486_v41, %v7862_v13 }
 0x23a   :  { %v7026_v45 = vpop.eup %7025  ;;  %v526_v46 = vadd.f32 1e-05, %v510_v43 }
 0x23b   :  { %v632_v39 = vmul.f32 %v7026_v45, %v525_v40  ;;  %vm638_vm3 = vweird.f32 %v7026_v45 }
 0x23c   :  { %7027 = vrsqrt.f32 %v526_v46  ;;  %vm639_vm5 = vmor %vm637_vm4, %vm638_vm3  ;;  %vm647_vm7 = vweird.f32 %v526_v46 }
 0x23d   :  { %v633_v5 = vmul.f32 %v7026_v45, %v632_v39 }
 0x23f   :  { %v634_v48 = vmul.f32 0.5, %v633_v5  ;;  %v489_v51 = vpop.xlane.xlu1 %488 }
 0x240   :  { %v511_v53 = vmul.f32 %v489_v51, %v7862_v13 }
 0x241   :  { %v635_v54 = vsub.f32 1.5, %v634_v48 }
 0x242   :  { %v7028_v55 = vpop.eup %7027  ;;  %v527_v57 = vadd.f32 1e-05, %v511_v53 }
 0x243   :  { %v636_v49 = vmul.f32 %v7026_v45, %v635_v54  ;;  %v642_v60 = vmul.f32 %v7028_v55, %v526_v46  ;;  %vm648_vm6 = vweird.f32 %v7028_v55 }
 0x244   :  { %7029 = vrsqrt.f32 %v527_v57  ;;  %vm649_vm8 = vmor %vm647_vm7, %vm648_vm6  ;;  %vm657_vm10 = vweird.f32 %v527_v57 }
 0x245   :  { %v643_v44 = vmul.f32 %v7028_v55, %v642_v60  ;;  %v640_v0 = vsel %vm639_vm5, %v7026_v45, %v636_v49 }
 0x246   :  { %v701_v4 = vmul.f32 %v640_v0, %v7866_v16 }
 0x247   :  { %v644_v7 = vmul.f32 0.5, %v643_v44  ;;  %v492_v8 = vpop.xlane.xlu0 %491 }
 0x248   :  { %v512_v9 = vmul.f32 %v492_v8, %v7862_v13  ;;  %v718_v10 = vmul.f32 %v7980_v63, %v701_v4 }
 0x249   :  { %v645_v56 = vsub.f32 1.5, %v644_v7 }
 0x24a   :  { %v7030_v12 = vpop.eup %7029  ;;  %v528_v50 = vadd.f32 1e-05, %v512_v9  ;;  %v7989_v14 = vadd.f32 %v7984_v58, %v718_v10 }
 0x24b   :  { %v646_v17 = vmul.f32 %v7028_v55, %v645_v56  ;;  %v652_v18 = vmul.f32 %v7030_v12, %v527_v57  ;;  %vm658_vm9 = vweird.f32 %v7030_v12 }
 0x24c   :  { %11691 = vst [vmem:[#allocation37_spill] sm:$0xff] %v7989_v14  ;;  %7031 = vrsqrt.f32 %v528_v50  ;;  %v773_v16 = vsel %vm347_vm1, %v7989_v14, 0.0  ;;  %vm659_vm11 = vmor %vm657_vm10, %vm658_vm9  ;;  %vm667_vm13 = vweird.f32 %v528_v50 }
 0x24d   :  { %v653_v62 = vmul.f32 %v7030_v12, %v652_v18  ;;  %774 = vadd.xlane.f32.xlu1 %v773_v16  ;;  %v650_v19 = vsel %vm649_vm8, %v7028_v55, %v646_v17 }
 0x24e   :  { %v702_v20 = vmul.f32 %v650_v19, %v7873_v21 }
 0x24f   :  { %v654_v23 = vmul.f32 0.5, %v653_v62  ;;  %v495_v61 = vpop.xlane.xlu2 %494  ;;  %v474_v24 = vpop.xlane.xlu0 %473 }
 0x250   :  { %v513_v25 = vmul.f32 %v495_v61, %v7862_v13  ;;  %v506_v27 = vmul.f32 %v474_v24, %v7862_v13  ;;  %v719_v28 = vmul.f32 %v7980_v63, %v702_v20 }
 0x251   :  { %v655_v1 = vsub.f32 1.5, %v654_v23 }
 0x252   :  { %v7032_v30 = vpop.eup %7031  ;;  %v7997_v31 = vadd.f32 1e-05, %v513_v25  ;;  %v7999_v32 = vadd.f32 1e-05, %v506_v27  ;;  %v8002_v36 = vadd.f32 %v7984_v58, %v719_v28 }
 0x253   :  { %v656_v21 = vmul.f32 %v7030_v12, %v655_v1  ;;  %v662_v37 = vmul.f32 %v7032_v30, %v528_v50  ;;  %vm668_vm12 = vweird.f32 %v7032_v30 }
 0x254   :  { %11692 = vst [vmem:[#allocation38_spill] sm:$0xff] %v8002_v36  ;;  %7033 = vrsqrt.f32 %v7997_v31  ;;  %v776_v3 = vsel %vm347_vm1, %v8002_v36, 0.0  ;;  %vm669_vm14 = vmor %vm667_vm13, %vm668_vm12  ;;  %vm677_vm15 = vweird.f32 %v7997_v31  ;;  %vm607_vm2 = vweird.f32 %v7999_v32 }
 0x255   :  { %v663_v38 = vmul.f32 %v7032_v30, %v662_v37  ;;  %7035 = vrsqrt.f32 %v7999_v32  ;;  %777 = vadd.xlane.f32.xlu0 %v776_v3  ;;  %v660_v40 = vsel %vm659_vm11, %v7030_v12, %v656_v21 }
 0x256   :  { %v703_v41 = vmul.f32 %v660_v40, %v7880_v26 }
 0x257   :  { %v664_v43 = vmul.f32 0.5, %v663_v38  ;;  %v498_v45 = vpop.xlane.xlu1 %497  ;;  %v477_v46 = vpop.xlane.xlu2 %476 }
 0x258   :  { %v514_v39 = vmul.f32 %v498_v45, %v7862_v13  ;;  %v507_v5 = vmul.f32 %v477_v46, %v7862_v13  ;;  %v465_v48 = vpop.xlane.xlu0 %464  ;;  %v720_v51 = vmul.f32 %v7980_v63, %v703_v41 }
 0x259   :  { %v665_v53 = vsub.f32 1.5, %v664_v43  ;;  %v503_v54 = vmul.f32 %v465_v48, %v7862_v13 }
 0x25a   :  { %v8013_v55 = vpop.eup %7033  ;;  %v8015_v57 = vadd.f32 1e-05, %v514_v39  ;;  %v8017_v49 = vadd.f32 1e-05, %v507_v5  ;;  %v8020_v26 = vadd.f32 %v7984_v58, %v720_v51 }
 0x25b   :  { %v8022_v60 = vpop.eup %7035  ;;  %v666_v44 = vmul.f32 %v7032_v30, %v665_v53  ;;  %v672_v0 = vmul.f32 %v8013_v55, %v7997_v31  ;;  %v8026_v4 = vadd.f32 1e-05, %v503_v54  ;;  %vm678_vm0 = vweird.f32 %v8013_v55 }
 0x25c   :  { %11693 = vst [vmem:[#allocation39_spill] sm:$0xff] %v8020_v26  ;;  %v602_v7 = vmul.f32 %v8022_v60, %v7999_v32  ;;  %7037 = vrsqrt.f32 %v8015_v57  ;;  %v779_v10 = vsel %vm347_vm1, %v8020_v26, 0.0  ;;  %vm608_vm3 = vweird.f32 %v8022_v60  ;;  %vm8073_vm5 = vmor %vm677_vm15, %vm678_vm0 }
 0x25d   :  { %v673_v8 = vmul.f32 %v8013_v55, %v672_v0  ;;  %7039 = vrsqrt.f32 %v8017_v49  ;;  %v670_v56 = vsel %vm669_vm14, %v7032_v30, %v666_v44  ;;  %780 = vadd.xlane.f32.xlu2 %v779_v10  ;;  %vm687_vm4 = vweird.f32 %v8015_v57  ;;  %vm8101_vm7 = vmor %vm607_vm2, %vm608_vm3 }
 0x25e   :  { %v603_v9 = vmul.f32 %v8022_v60, %v602_v7  ;;  %7041 = vrsqrt.f32 %v8026_v4  ;;  %v704_v18 = vmul.f32 %v670_v56, %v7888_v33  ;;  %vm617_vm6 = vweird.f32 %v8017_v49 }
 0x25f   :  { %v674_v12 = vmul.f32 0.5, %v673_v8  ;;  %v480_v50 = vpop.xlane.xlu1 %479  ;;  %v468_v17 = vpop.xlane.xlu2 %467  ;;  %vm577_vm10 = vweird.f32 %v8026_v4 }
 0x260   :  { %v604_v16 = vmul.f32 0.5, %v603_v9  ;;  %v508_v62 = vmul.f32 %v480_v50, %v7862_v13  ;;  %v504_v19 = vmul.f32 %v468_v17, %v7862_v13  ;;  %v456_v20 = vpop.xlane.xlu0 %455  ;;  %v721_v21 = vmul.f32 %v7980_v63, %v704_v18 }
 0x261   :  { %v675_v23 = vsub.f32 1.5, %v674_v12  ;;  %v500_v61 = vmul.f32 %v456_v20, %v7862_v13 }
 0x262   :  { %v8041_v24 = vpop.eup %7037  ;;  %v605_v25 = vsub.f32 1.5, %v604_v16  ;;  %v8043_v27 = vadd.f32 1e-05, %v508_v62  ;;  %v8045_v28 = vadd.f32 1e-05, %v504_v19  ;;  %v8080_v48 = vadd.f32 %v7984_v58, %v721_v21 }
 0x263   :  { %v8047_v1 = vpop.eup %7039  ;;  %v682_v33 = vmul.f32 %v8041_v24, %v8015_v57  ;;  %v8052_v30 = vadd.f32 1e-05, %v500_v61  ;;  %v676_v3 = vmul.f32 %v8013_v55, %v675_v23  ;;  %vm688_vm8 = vweird.f32 %v8041_v24 }
 0x264   :  { %v8055_v37 = vpop.eup %7041  ;;  %v612_v38 = vmul.f32 %v8047_v1, %v8017_v49  ;;  %7043 = vrsqrt.f32 %v8043_v27  ;;  %v606_v43 = vmul.f32 %v8022_v60, %v605_v25  ;;  %11696 = vst [vmem:[#allocation40_spill] sm:$0xff] %v8080_v48  ;;  %v782_v9 = vsel %vm347_vm1, %v8080_v48, 0.0  ;;  %vm689_vm14 = vmor %vm687_vm4, %vm688_vm8 }
 0x265   :  { %v683_v40 = vmul.f32 %v8041_v24, %v682_v33  ;;  %v572_v41 = vmul.f32 %v8055_v37, %v8026_v4  ;;  %7045 = vrsqrt.f32 %v8045_v28  ;;  %v680_v31 = vsel %vm8073_vm5, %v8013_v55, %v676_v3  ;;  %783 = vadd.xlane.f32.xlu1 %v782_v9 }
 0x266   :  { %v613_v45 = vmul.f32 %v8047_v1, %v612_v38  ;;  %7047 = vrsqrt.f32 %v8052_v30  ;;  %v705_v17 = vmul.f32 %v680_v31, %v7898_v42  ;;  %vm618_vm9 = vweird.f32 %v8047_v1 }
 0x267   :  { %v684_v39 = vmul.f32 0.5, %v683_v40  ;;  %v573_v5 = vmul.f32 %v8055_v37, %v572_v41  ;;  %v471_v51 = vpop.xlane.xlu1 %470  ;;  %v459_v53 = vpop.xlane.xlu2 %458  ;;  %vm578_vm11 = vweird.f32 %v8055_v37  ;;  %v610_v42 = vsel %vm8101_vm7, %v8022_v60, %v606_v43  ;;  %vm8153_vm2 = vmor %vm617_vm6, %vm618_vm9 }
 0x268   :  { %v614_v54 = vmul.f32 0.5, %v613_v45  ;;  %v505_v44 = vmul.f32 %v471_v51, %v7862_v13  ;;  %v501_v0 = vmul.f32 %v459_v53, %v7862_v13  ;;  %vm627_vm12 = vweird.f32 %v8043_v27  ;;  %vm8180_vm5 = vmor %vm577_vm10, %vm578_vm11 }
 0x269   :  { %v685_v7 = vsub.f32 1.5, %v684_v39  ;;  %v574_v8 = vmul.f32 0.5, %v573_v5  ;;  %v722_v33 = vmul.f32 %v7980_v63, %v705_v17  ;;  %vm587_vm15 = vweird.f32 %v8045_v28 }
 0x26a   :  { %v8090_v10 = vpop.eup %7043  ;;  %v615_v56 = vsub.f32 1.5, %v614_v54  ;;  %v8092_v12 = vadd.f32 1e-05, %v505_v44  ;;  %v8094_v50 = vadd.f32 1e-05, %v501_v0  ;;  %v698_v38 = vmul.f32 %v610_v42, %v7893_v35 }
 0x26b   :  { %v686_v18 = vmul.f32 %v8041_v24, %v685_v7  ;;  %v575_v16 = vsub.f32 1.5, %v574_v8  ;;  %v622_v62 = vmul.f32 %v8090_v10, %v8043_v27  ;;  %v8109_v19 = vpop.eup %7045  ;;  %vm628_vm13 = vweird.f32 %v8090_v10 }
 0x26c   :  { %7049 = vrsqrt.f32 %v8092_v12  ;;  %v8118_v32 = vpop.eup %7047  ;;  %v616_v20 = vmul.f32 %v8047_v1, %v615_v56  ;;  %v582_v61 = vmul.f32 %v8109_v19, %v8045_v28  ;;  %v8141_v43 = vadd.f32 %v7984_v58, %v722_v33  ;;  %vm8193_vm7 = vmor %vm627_vm12, %vm628_vm13 }
 0x26d   :  { %v623_v23 = vmul.f32 %v8090_v10, %v622_v62  ;;  %v576_v60 = vmul.f32 %v8055_v37, %v575_v16  ;;  %v542_v25 = vmul.f32 %v8118_v32, %v8052_v30  ;;  %7051 = vrsqrt.f32 %v8094_v50 }
 0x26e   :  { %v583_v3 = vmul.f32 %v8109_v19, %v582_v61  ;;  %v690_v57 = vsel %vm689_vm14, %v8041_v24, %v686_v18  ;;  %11699 = vst [vmem:[#allocation41_spill] sm:$0xff] %v8141_v43  ;;  %vm588_vm0 = vweird.f32 %v8109_v19  ;;  %v715_v51 = vmul.f32 %v7980_v63, %v698_v38 }
 0x26f   :  { %v624_v21 = vmul.f32 0.5, %v623_v23  ;;  %v462_v40 = vpop.xlane.xlu1 %461  ;;  %v543_v41 = vmul.f32 %v8118_v32, %v542_v25  ;;  %v706_v46 = vmul.f32 %v690_v57, %v7916_v59  ;;  %v785_v59 = vsel %vm347_vm1, %v8141_v43, 0.0  ;;  %vm589_vm8 = vmor %vm587_vm15, %vm588_vm0 }
 0x270   :  { %v502_v45 = vmul.f32 %v462_v40, %v7862_v13  ;;  %v584_v5 = vmul.f32 0.5, %v583_v3  ;;  %vm547_vm3 = vweird.f32 %v8052_v30  ;;  %786 = vadd.xlane.f32.xlu0 %v785_v59  ;;  %v620_v7 = vsel %vm8153_vm2, %v8047_v1, %v616_v20 }
 0x271   :  { %v625_v39 = vsub.f32 1.5, %v624_v21  ;;  %v544_v24 = vmul.f32 0.5, %v543_v41  ;;  %v723_v44 = vmul.f32 %v7980_v63, %v706_v46  ;;  %vm548_vm4 = vweird.f32 %v8118_v32 }
 0x272   :  { %v8147_v53 = vpop.eup %7049  ;;  %v8159_v54 = vadd.f32 1e-05, %v502_v45  ;;  %v585_v31 = vsub.f32 1.5, %v584_v5  ;;  %v8173_v56 = vadd.f32 %v7984_v58, %v715_v51  ;;  %v699_v20 = vmul.f32 %v620_v7, %v7907_v47  ;;  %vm8234_vm10 = vmor %vm547_vm3, %vm548_vm4 }
 0x273   :  { %v626_v0 = vmul.f32 %v8090_v10, %v625_v39  ;;  %v592_v49 = vmul.f32 %v8147_v53, %v8092_v12  ;;  %v8169_v8 = vpop.eup %7051  ;;  %v545_v9 = vsub.f32 1.5, %v544_v24  ;;  %vm598_vm6 = vweird.f32 %v8147_v53 }
 0x274   :  { %11702 = vst [vmem:[#allocation42_spill] sm:$0xff] %v8173_v56  ;;  %7053 = vrsqrt.f32 %v8159_v54  ;;  %v586_v1 = vmul.f32 %v8109_v19, %v585_v31  ;;  %v552_v18 = vmul.f32 %v8169_v8, %v8094_v50  ;;  %v764_v62 = vsel %vm347_vm1, %v8173_v56, 0.0 }
 0x275   :  { %v593_v55 = vmul.f32 %v8147_v53, %v592_v49  ;;  %v546_v4 = vmul.f32 %v8118_v32, %v545_v9  ;;  %v8201_v42 = vadd.f32 %v7984_v58, %v723_v44  ;;  %765 = vadd.xlane.f32.xlu1 %v764_v62  ;;  %v580_v27 = vsel %vm8180_vm5, %v8055_v37, %v576_v60 }
 0x276   :  { %v553_v61 = vmul.f32 %v8169_v8, %v552_v18  ;;  %v630_v33 = vsel %vm8193_vm7, %v8090_v10, %v626_v0  ;;  %v716_v21 = vmul.f32 %v7980_v63, %v699_v20  ;;  %v695_v3 = vmul.f32 %v580_v27, %v7912_v52 }
 0x277   :  { %11707 = vst [vmem:[#allocation43_spill] sm:$0xff] %v8201_v42  ;;  %v594_v23 = vmul.f32 0.5, %v593_v55  ;;  %v453_v25 = vpop.xlane.xlu1 %452  ;;  %v788_v47 = vsel %vm347_vm1, %v8201_v42, 0.0  ;;  %v700_v40 = vmul.f32 %v630_v33, %v7937_v11  ;;  %v590_v10 = vsel %vm589_vm8, %v8109_v19, %v586_v1 }
 0x278   :  { %v499_v38 = vmul.f32 %v453_v25, %v7862_v13  ;;  %v554_v60 = vmul.f32 0.5, %v553_v61  ;;  %789 = vadd.xlane.f32.xlu2 %v788_v47  ;;  %v8223_v28 = vadd.f32 %v7984_v58, %v716_v21  ;;  %v712_v41 = vmul.f32 %v7980_v63, %v695_v3 }
 0x279   :  { %v595_v37 = vsub.f32 1.5, %v594_v23  ;;  %v696_v46 = vmul.f32 %v590_v10, %v7927_v2  ;;  %vm597_vm9 = vweird.f32 %v8092_v12  ;;  %vm558_vm11 = vweird.f32 %v8169_v8 }
 0x27a   :  { %v7054_v57 = vpop.eup %7053  ;;  %11708 = vst [vmem:[#allocation44_spill] sm:$0xff] %v8223_v28  ;;  %v515_v45 = vadd.f32 1e-05, %v499_v38  ;;  %v555_v39 = vsub.f32 1.5, %v554_v60  ;;  %v767_v2 = vsel %vm347_vm1, %v8223_v28, 0.0  ;;  %v8242_v19 = vadd.f32 %v7984_v58, %v712_v41  ;;  %vm8246_vm12 = vmor %vm597_vm9, %vm598_vm6 }
 0x27b   :  { %v596_v52 = vmul.f32 %v8147_v53, %v595_v37  ;;  %v562_v5 = vmul.f32 %v7054_v57, %v8159_v54  ;;  %768 = vadd.xlane.f32.xlu0 %v767_v2  ;;  %v717_v35 = vmul.f32 %v7980_v63, %v700_v40  ;;  %v713_v24 = vmul.f32 %v7980_v63, %v696_v46 }
 0x27c   :  { %7055 = vrsqrt.f32 %v515_v45  ;;  %v556_v30 = vmul.f32 %v8169_v8, %v555_v39  ;;  %vm557_vm13 = vweird.f32 %v8094_v50  ;;  %v755_v59 = vsel %vm347_vm1, %v8242_v19, 0.0 }
 0x27d   :  { %v563_v51 = vmul.f32 %v7054_v57, %v562_v5  ;;  %v550_v44 = vsel %vm8234_vm10, %v8118_v32, %v546_v4  ;;  %v600_v0 = vsel %vm8246_vm12, %v8147_v53, %v596_v52  ;;  %vm8262_vm14 = vmor %vm557_vm13, %vm558_vm11  ;;  %756 = vadd.xlane.f32.xlu1 %v755_v59  ;;  %v8267_v7 = vadd.f32 %v7984_v58, %v717_v35 }
 0x27e   :  { %v8270_v50 = vadd.f32 %v7984_v58, %v713_v24  ;;  %v692_v9 = vmul.f32 %v550_v44, %v7932_v6  ;;  %v697_v32 = vmul.f32 %v600_v0, %v7954_v22  ;;  %v560_v53 = vsel %vm8262_vm14, %v8169_v8, %v556_v30 }
 0x27f   :  { %v564_v49 = vmul.f32 0.5, %v563_v51  ;;  %11715 = vst [vmem:[#allocation45_spill] sm:$0xff] %v8267_v7  ;;  %vm568_vm15 = vweird.f32 %v7054_v57  ;;  %v770_v1 = vsel %vm347_vm1, %v8267_v7, 0.0  ;;  %v693_v22 = vmul.f32 %v560_v53, %v7947_v15 }
 0x280   :  { %v709_v55 = vmul.f32 %v7980_v63, %v692_v9  ;;  %771 = vadd.xlane.f32.xlu2 %v770_v1  ;;  %v758_v16 = vsel %vm347_vm1, %v8270_v50, 0.0  ;;  %v714_v6 = vmul.f32 %v7980_v63, %v697_v32  ;;  %vm567_vm0 = vweird.f32 %v8159_v54 }
 0x281   :  { %v565_v17 = vsub.f32 1.5, %v564_v49  ;;  %vm569_vm2 = vmor %vm567_vm0, %vm568_vm15  ;;  %v710_v23 = vmul.f32 %v7980_v63, %v693_v22  ;;  %vm537_vm4 = vweird.f32 %v515_v45 }
 0x282   :  { %v7056_v18 = vpop.eup %7055  ;;  %v8286_v62 = vadd.f32 %v7984_v58, %v709_v55  ;;  %v8289_v20 = vadd.f32 %v7984_v58, %v714_v6 }
 0x283   :  { %v566_v4 = vmul.f32 %v7054_v57, %v565_v17  ;;  %v532_v8 = vmul.f32 %v7056_v18, %v515_v45  ;;  %759 = vadd.xlane.f32.xlu0 %v758_v16  ;;  %v8295_v15 = vadd.f32 %v7984_v58, %v710_v23  ;;  %vm538_vm3 = vweird.f32 %v7056_v18 }
 0x284   :  { %11716 = vst [vmem:[#allocation46_spill] sm:$0xff] %v8289_v20  ;;  %v746_v27 = vsel %vm347_vm1, %v8286_v62, 0.0  ;;  %v761_v47 = vsel %vm347_vm1, %v8289_v20, 0.0  ;;  %vm539_vm5 = vmor %vm537_vm4, %vm538_vm3 }
 0x285   :  { %v533_v61 = vmul.f32 %v7056_v18, %v532_v8  ;;  %v570_v25 = vsel %vm569_vm2, %v7054_v57, %v566_v4  ;;  %747 = vadd.xlane.f32.xlu1 %v746_v27  ;;  %v749_v38 = vsel %vm347_vm1, %v8295_v15, 0.0 }
 0x286   :  { %v694_v54 = vmul.f32 %v570_v25, %v7964_v29 }
 0x287   :  { %v534_v33 = vmul.f32 0.5, %v533_v61 }
 0x288   :  { %v711_v21 = vmul.f32 %v7980_v63, %v694_v54  ;;  %762 = vadd.xlane.f32.xlu2 %v761_v47 }
 0x289   :  { %v535_v3 = vsub.f32 1.5, %v534_v33 }
 0x28a   :  { %v8304_v60 = vadd.f32 %v7984_v58, %v711_v21 }
 0x28b   :  { %v536_v37 = vmul.f32 %v7056_v18, %v535_v3  ;;  %750 = vadd.xlane.f32.xlu0 %v749_v38 }
 0x28c   :  { %v752_v10 = vsel %vm347_vm1, %v8304_v60, 0.0 }
 0x28d   :  { %v540_v29 = vsel %vm539_vm5, %v7056_v18, %v536_v37 }
 0x28e   :  { %v691_v40 = vmul.f32 %v540_v29, %v7971_v34 }
 0x290   :  { %v708_v57 = vmul.f32 %v7980_v63, %v691_v40  ;;  %753 = vadd.xlane.f32.xlu2 %v752_v10 }
 0x292   :  { %v8311_v41 = vadd.f32 %v7984_v58, %v708_v57 }
 0x294   :  { %v743_v45 = vsel %vm347_vm1, %v8311_v41, 0.0 }
 0x298   :  { %744 = vadd.xlane.f32.xlu2 %v743_v45 }
 0x2c0   :  { %v775_v46 = vpop.xlane.xlu1 %774 }
 0x2c1   :  { %v801_v52 = vmul.f32 %v775_v46, %v7862_v13 }
 0x2c3   :  { %v8317_v39 = vsub.f32 %v7989_v14, %v801_v52 }
 0x2c5   :  { %v833_v34 = vmul.f32 %v8317_v39, %v8317_v39 }
 0x2c7   :  { %v869_v5 = vsel %vm347_vm1, %v833_v34, 0.0 }
 0x2c8   :  { %870 = vadd.xlane.f32.xlu2 %v869_v5  ;;  %v778_v63 = vpop.xlane.xlu0 %777 }
 0x2c9   :  { %v802_v58 = vmul.f32 %v778_v63, %v7862_v13 }
 0x2cb   :  { %v8324_v11 = vsub.f32 %v8002_v36, %v802_v58 }
 0x2cd   :  { %v834_v2 = vmul.f32 %v8324_v11, %v8324_v11 }
 0x2cf   :  { %v872_v12 = vsel %vm347_vm1, %v834_v2, 0.0 }
 0x2d0   :  { %873 = vadd.xlane.f32.xlu1 %v872_v12  ;;  %v781_v30 = vpop.xlane.xlu2 %780 }
 0x2d1   :  { %v803_v51 = vmul.f32 %v781_v30, %v7862_v13 }
 0x2d3   :  { %v8331_v35 = vsub.f32 %v8020_v26, %v803_v51 }
 0x2d5   :  { %v835_v24 = vmul.f32 %v8331_v35, %v8331_v35 }
 0x2d7   :  { %v875_v59 = vsel %vm347_vm1, %v835_v24, 0.0 }
 0x2d8   :  { %876 = vadd.xlane.f32.xlu0 %v875_v59  ;;  %v784_v44 = vpop.xlane.xlu1 %783 }
 0x2d9   :  { %v804_v0 = vmul.f32 %v784_v44, %v7862_v13 }
 0x2db   :  { %v8338_v31 = vsub.f32 %v8080_v48, %v804_v0 }
 0x2dd   :  { %v836_v49 = vmul.f32 %v8338_v31, %v8338_v31 }
 0x2df   :  { %v878_v9 = vsel %vm347_vm1, %v836_v49, 0.0 }
 0x2e0   :  { %879 = vadd.xlane.f32.xlu2 %v878_v9 }
 0x2e3   :  { %v787_v32 = vpop.xlane.xlu0 %786 }
 0x2e4   :  { %v805_v53 = vmul.f32 %v787_v32, %v7862_v13 }
 0x2e6   :  { %v8345_v17 = vsub.f32 %v8141_v43, %v805_v53 }
 0x2e8   :  { %v766_v1 = vpop.xlane.xlu1 %765  ;;  %v837_v18 = vmul.f32 %v8345_v17, %v8345_v17 }
 0x2e9   :  { %v798_v55 = vmul.f32 %v766_v1, %v7862_v13 }
 0x2ea   :  { %v881_v4 = vsel %vm347_vm1, %v837_v18, 0.0 }
 0x2eb   :  { %v790_v16 = vpop.xlane.xlu2 %789  ;;  %v8351_v6 = vsub.f32 %v8173_v56, %v798_v55  ;;  %882 = vadd.xlane.f32.xlu1 %v881_v4 }
 0x2ec   :  { %v806_v22 = vmul.f32 %v790_v16, %v7862_v13 }
 0x2ed   :  { %v830_v23 = vmul.f32 %v8351_v6, %v8351_v6 }
 0x2ee   :  { %v8356_v8 = vsub.f32 %v8201_v42, %v806_v22  ;;  %v769_v61 = vpop.xlane.xlu0 %768 }
 0x2ef   :  { %v860_v27 = vsel %vm347_vm1, %v830_v23, 0.0  ;;  %v799_v25 = vmul.f32 %v769_v61, %v7862_v13 }
 0x2f0   :  { %v838_v54 = vmul.f32 %v8356_v8, %v8356_v8  ;;  %861 = vadd.xlane.f32.xlu2 %v860_v27  ;;  %v757_v33 = vpop.xlane.xlu1 %756 }
 0x2f1   :  { %v795_v47 = vmul.f32 %v757_v33, %v7862_v13  ;;  %v8366_v21 = vsub.f32 %v8223_v28, %v799_v25 }
 0x2f2   :  { %v884_v3 = vsel %vm347_vm1, %v838_v54, 0.0 }
 0x2f3   :  { %885 = vadd.xlane.f32.xlu0 %v884_v3  ;;  %v8370_v38 = vsub.f32 %v8242_v19, %v795_v47  ;;  %v772_v37 = vpop.xlane.xlu2 %771  ;;  %v831_v29 = vmul.f32 %v8366_v21, %v8366_v21 }
 0x2f4   :  { %v800_v40 = vmul.f32 %v772_v37, %v7862_v13 }
 0x2f5   :  { %v827_v10 = vmul.f32 %v8370_v38, %v8370_v38  ;;  %v863_v57 = vsel %vm347_vm1, %v831_v29, 0.0 }
 0x2f6   :  { %v8379_v45 = vsub.f32 %v8267_v7, %v800_v40  ;;  %864 = vadd.xlane.f32.xlu1 %v863_v57  ;;  %v760_v46 = vpop.xlane.xlu0 %759 }
 0x2f7   :  { %v851_v52 = vsel %vm347_vm1, %v827_v10, 0.0  ;;  %v796_v34 = vmul.f32 %v760_v46, %v7862_v13 }
 0x2f8   :  { %852 = vadd.xlane.f32.xlu2 %v851_v52  ;;  %v748_v5 = vpop.xlane.xlu1 %747  ;;  %v832_v63 = vmul.f32 %v8379_v45, %v8379_v45 }
 0x2f9   :  { %v792_v58 = vmul.f32 %v748_v5, %v7862_v13  ;;  %v8387_v2 = vsub.f32 %v8270_v50, %v796_v34 }
 0x2fa   :  { %v866_v12 = vsel %vm347_vm1, %v832_v63, 0.0 }
 0x2fb   :  { %v8391_v30 = vsub.f32 %v8286_v62, %v792_v58  ;;  %v763_v51 = vpop.xlane.xlu2 %762  ;;  %867 = vadd.xlane.f32.xlu0 %v866_v12  ;;  %v828_v24 = vmul.f32 %v8387_v2, %v8387_v2 }
 0x2fc   :  { %v797_v59 = vmul.f32 %v763_v51, %v7862_v13 }
 0x2fd   :  { %v824_v44 = vmul.f32 %v8391_v30, %v8391_v30  ;;  %v854_v0 = vsel %vm347_vm1, %v828_v24, 0.0 }
 0x2fe   :  { %v8400_v49 = vsub.f32 %v8289_v20, %v797_v59  ;;  %855 = vadd.xlane.f32.xlu1 %v854_v0  ;;  %v751_v9 = vpop.xlane.xlu0 %750 }
 0x2ff   :  { %v842_v32 = vsel %vm347_vm1, %v824_v44, 0.0  ;;  %v793_v53 = vmul.f32 %v751_v9, %v7862_v13 }
 0x300   :  { %843 = vadd.xlane.f32.xlu2 %v842_v32  ;;  %v829_v1 = vmul.f32 %v8400_v49, %v8400_v49 }
 0x301   :  { %v8407_v55 = vsub.f32 %v8295_v15, %v793_v53 }
 0x302   :  { %v857_v18 = vsel %vm347_vm1, %v829_v1, 0.0 }
 0x303   :  { %v754_v16 = vpop.xlane.xlu2 %753  ;;  %858 = vadd.xlane.f32.xlu0 %v857_v18  ;;  %v825_v22 = vmul.f32 %v8407_v55, %v8407_v55 }
 0x304   :  { %v794_v4 = vmul.f32 %v754_v16, %v7862_v13 }
 0x305   :  { %v845_v23 = vsel %vm347_vm1, %v825_v22, 0.0 }
 0x306   :  { %v8415_v61 = vsub.f32 %v8304_v60, %v794_v4  ;;  %846 = vadd.xlane.f32.xlu1 %v845_v23 }
 0x308   :  { %v826_v27 = vmul.f32 %v8415_v61, %v8415_v61 }
 0x30a   :  { %v848_v25 = vsel %vm347_vm1, %v826_v27, 0.0 }
 0x30b   :  { %849 = vadd.xlane.f32.xlu0 %v848_v25  ;;  %v745_v54 = vpop.xlane.xlu2 %744 }
 0x30c   :  { %v791_v33 = vmul.f32 %v745_v54, %v7862_v13 }
 0x30e   :  { %v8422_v47 = vsub.f32 %v8311_v41, %v791_v33 }
 0x310   :  { %v823_v3 = vmul.f32 %v8422_v47, %v8422_v47 }
 0x312   :  { %v839_v37 = vsel %vm347_vm1, %v823_v3, 0.0 }
 0x313   :  { %840 = vadd.xlane.f32.xlu0 %v839_v37 }
 0x33b   :  { %v871_v29 = vpop.xlane.xlu2 %870 }
 0x33c   :  { %v897_v40 = vmul.f32 %v871_v29, %v7862_v13 }
 0x33e   :  { %v913_v10 = vadd.f32 1e-05, %v897_v40 }
 0x340   :  { %7057 = vrsqrt.f32 %v913_v10  ;;  %vm1025_vm8 = vweird.f32 %v913_v10 }
 0x343   :  { %v874_v57 = vpop.xlane.xlu1 %873 }
 0x344   :  { %v898_v46 = vmul.f32 %v874_v57, %v7862_v13 }
 0x346   :  { %v914_v52 = vadd.f32 1e-05, %v898_v46  ;;  %v7058_v34 = vpop.eup %7057 }
 0x347   :  { %v1020_v12 = vmul.f32 %v7058_v34, %v913_v10  ;;  %vm1026_vm6 = vweird.f32 %v7058_v34 }
 0x348   :  { %7059 = vrsqrt.f32 %v914_v52  ;;  %vm8437_vm9 = vmor %vm1025_vm8, %vm1026_vm6  ;;  %vm1035_vm10 = vweird.f32 %v914_v52 }
 0x349   :  { %v1021_v59 = vmul.f32 %v7058_v34, %v1020_v12 }
 0x34b   :  { %v877_v5 = vpop.xlane.xlu0 %876  ;;  %v1022_v9 = vmul.f32 0.5, %v1021_v59 }
 0x34c   :  { %v899_v58 = vmul.f32 %v877_v5, %v7862_v13 }
 0x34d   :  { %v1023_v4 = vsub.f32 1.5, %v1022_v9  ;;  %v8457_v9 = vld [vmem:[%s7568_s29] ss:$0 sm:$0xff] }
 0x34e   :  { %v7060_v63 = vpop.eup %7059  ;;  %v915_v51 = vadd.f32 1e-05, %v899_v58 }
 0x34f   :  { %v1030_v24 = vmul.f32 %v7060_v63, %v914_v52  ;;  %v1024_v25 = vmul.f32 %v7058_v34, %v1023_v4  ;;  %vm1036_vm7 = vweird.f32 %v7060_v63 }
 0x350   :  { %7061 = vrsqrt.f32 %v915_v51  ;;  %vm8441_vm11 = vmor %vm1035_vm10, %vm1036_vm7  ;;  %vm1045_vm13 = vweird.f32 %v915_v51 }
 0x351   :  { %v1031_v44 = vmul.f32 %v7060_v63, %v1030_v24  ;;  %v1028_v10 = vsel %vm8437_vm9, %v7058_v34, %v1024_v25 }
 0x353   :  { %v880_v32 = vpop.xlane.xlu2 %879  ;;  %v1032_v53 = vmul.f32 0.5, %v1031_v44 }
 0x354   :  { %v900_v18 = vmul.f32 %v880_v32, %v7862_v13  ;;  %v1089_v32 = vmul.f32 %v1028_v10, %v8317_v39 }
 0x355   :  { %v1033_v23 = vsub.f32 1.5, %v1032_v53 }
 0x356   :  { %v7062_v0 = vpop.eup %7061  ;;  %v8431_v22 = vadd.f32 1e-05, %v900_v18  ;;  %v1106_v39 = vmul.f32 %v8457_v9, %v1089_v32 }
 0x357   :  { %v1040_v1 = vmul.f32 %v7062_v0, %v915_v51  ;;  %v1034_v54 = vmul.f32 %v7060_v63, %v1033_v23  ;;  %vm1046_vm12 = vweird.f32 %v7062_v0  ;;  %v8469_v23 = vld [vmem:[%s7568_s29 + $0x1] ss:$0 sm:$0xff] }
 0x358   :  { %7063 = vrsqrt.f32 %v8431_v22  ;;  %vm1047_vm14 = vmor %vm1045_vm13, %vm1046_vm12  ;;  %v1123_v10 = vadd.f32 %v8469_v23, %v1106_v39  ;;  %vm1055_vm0 = vweird.f32 %v8431_v22 }
 0x359   :  { %v1041_v16 = vmul.f32 %v7062_v0, %v1040_v1  ;;  %v1038_v12 = vsel %vm8441_vm11, %v7060_v63, %v1034_v54 }
 0x35a   :  { %v1090_v63 = vmul.f32 %v1038_v12, %v8324_v11 }
 0x35b   :  { %v1042_v27 = vmul.f32 0.5, %v1041_v16 }
 0x35c   :  { %v1107_v11 = vmul.f32 %v8457_v9, %v1090_v63 }
 0x35d   :  { %v1043_v3 = vsub.f32 1.5, %v1042_v27 }
 0x35e   :  { %v883_v33 = vpop.xlane.xlu1 %882  ;;  %v8435_v29 = vpop.eup %7063 }
 0x35f   :  { %v901_v37 = vmul.f32 %v883_v33, %v7862_v13  ;;  %v1050_v46 = vmul.f32 %v8435_v29, %v8431_v22  ;;  %v1044_v24 = vmul.f32 %v7062_v0, %v1043_v3  ;;  %vm1056_vm15 = vweird.f32 %v8435_v29 }
 0x360   :  { %vm8500_vm2 = vmor %vm1055_vm0, %vm1056_vm15 }
 0x361   :  { %v8447_v5 = vadd.f32 1e-05, %v901_v37  ;;  %v1051_v52 = vmul.f32 %v8435_v29, %v1050_v46  ;;  %v1048_v51 = vsel %vm1047_vm14, %v7062_v0, %v1044_v24  ;;  %v8487_v46 = vld [vmem:[%s7558_s21] ss:$0 sm:$0xff]  ;;  %v8497_v24 = vld [vmem:[%s7558_s21 + $0x1] ss:$0 sm:$0xff] }
 0x362   :  { %v1091_v0 = vmul.f32 %v1048_v51, %v8331_v35  ;;  %v8517_v39 = vmul.f32 %v8487_v46, %v1123_v10  ;;  %s11821_s21 = sld [smem:[#allocation15_spill]] }
 0x363   :  { %v862_v58 = vpop.xlane.xlu2 %861  ;;  %7065 = vrsqrt.f32 %v8447_v5  ;;  %v1052_v34 = vmul.f32 0.5, %v1051_v52  ;;  %v1124_v52 = vadd.f32 %v8469_v23, %v1107_v11  ;;  %vm1065_vm4 = vweird.f32 %v8447_v5 }
 0x364   :  { %v894_v59 = vmul.f32 %v862_v58, %v7862_v13  ;;  %v1108_v22 = vmul.f32 %v8457_v9, %v1091_v0 }
 0x365   :  { %v1053_v18 = vsub.f32 1.5, %v1052_v34 }
 0x366   :  { %v886_v44 = vpop.xlane.xlu0 %885  ;;  %v8460_v53 = vadd.f32 1e-05, %v894_v59 }
 0x367   :  { %v902_v1 = vmul.f32 %v886_v44, %v7862_v13  ;;  %v1054_v3 = vmul.f32 %v8435_v29, %v1053_v18 }
 0x368   :  { %7067 = vrsqrt.f32 %v8460_v53  ;;  %vm995_vm8 = vweird.f32 %v8460_v53 }
 0x369   :  { %v8466_v16 = vadd.f32 1e-05, %v902_v1  ;;  %v865_v4 = vpop.xlane.xlu1 %864  ;;  %v8472_v27 = vpop.eup %7065  ;;  %v1058_v63 = vsel %vm8500_vm2, %v8435_v29, %v1054_v3 }
 0x36a   :  { %v895_v25 = vmul.f32 %v865_v4, %v7862_v13  ;;  %v1060_v54 = vmul.f32 %v8472_v27, %v8447_v5  ;;  %v1092_v3 = vmul.f32 %v1058_v63, %v8338_v31  ;;  %vm1066_vm3 = vweird.f32 %v8472_v27 }
 0x36b   :  { %7069 = vrsqrt.f32 %v8466_v16  ;;  %v853_v33 = vpop.xlane.xlu2 %852  ;;  %vm8558_vm5 = vmor %vm1065_vm4, %vm1066_vm3  ;;  %vm1075_vm7 = vweird.f32 %v8466_v16 }
 0x36c   :  { %v891_v37 = vmul.f32 %v853_v33, %v7862_v13  ;;  %v8483_v40 = vadd.f32 1e-05, %v895_v25  ;;  %v1061_v57 = vmul.f32 %v8472_v27, %v1060_v54  ;;  %v8524_v33 = vmul.f32 %v8497_v24, %v1123_v10 }
 0x36d   :  { %v8539_v10 = vmul.f32 %v8497_v24, %v1124_v52 }
 0x36e   :  { %v8490_v58 = vpop.eup %7067  ;;  %v8493_v12 = vadd.f32 1e-05, %v891_v37  ;;  %7071 = vrsqrt.f32 %v8483_v40  ;;  %v868_v35 = vpop.xlane.xlu0 %867  ;;  %v1062_v32 = vmul.f32 0.5, %v1061_v57  ;;  %v1125_v37 = vadd.f32 %v8469_v23, %v1108_v22 }
 0x36f   :  { %v990_v44 = vmul.f32 %v8490_v58, %v8460_v53  ;;  %v896_v34 = vmul.f32 %v868_v35, %v7862_v13  ;;  %v8530_v57 = vmul.f32 %v8487_v46, %v1124_v52  ;;  %vm996_vm9 = vweird.f32 %v8490_v58 }
 0x370   :  { %7073 = vrsqrt.f32 %v8493_v12  ;;  %v1063_v18 = vsub.f32 1.5, %v1062_v32  ;;  %v8570_v42 = vmul.f32 %v8497_v24, %v1125_v37  ;;  %vm1005_vm10 = vweird.f32 %v8483_v40  ;;  %vm8632_vm0 = vmor %vm995_vm8, %vm996_vm9 }
 0x371   :  { %v8508_v1 = vpop.eup %7069  ;;  %v856_v4 = vpop.xlane.xlu1 %855  ;;  %v991_v25 = vmul.f32 %v8490_v58, %v990_v44  ;;  %v8521_v54 = vadd.f32 1e-05, %v896_v34  ;;  %vm965_vm2 = vweird.f32 %v8493_v12 }
 0x372   :  { %v1070_v51 = vmul.f32 %v8508_v1, %v8466_v16  ;;  %v892_v11 = vmul.f32 %v856_v4, %v7862_v13  ;;  %v1064_v32 = vmul.f32 %v8472_v27, %v1063_v18  ;;  %vm1076_vm6 = vweird.f32 %v8508_v1 }
 0x373   :  { %v844_v29 = vpop.xlane.xlu2 %843  ;;  %7075 = vrsqrt.f32 %v8521_v54  ;;  %v992_v63 = vmul.f32 0.5, %v991_v25  ;;  %vm8584_vm11 = vmor %vm1075_vm7, %vm1076_vm6  ;;  %vm1015_vm13 = vweird.f32 %v8521_v54 }
 0x374   :  { %v1071_v0 = vmul.f32 %v8508_v1, %v1070_v51  ;;  %v8532_v35 = vpop.eup %7071  ;;  %v888_v59 = vmul.f32 %v844_v29, %v7862_v13  ;;  %v8535_v44 = vadd.f32 1e-05, %v892_v11  ;;  %v1109_v11 = vmul.f32 %v8457_v9, %v1092_v3 }
 0x375   :  { %v1000_v31 = vmul.f32 %v8532_v35, %v8483_v40  ;;  %v8556_v29 = vmul.f32 %v8487_v46, %v1125_v37  ;;  %v1068_v3 = vsel %vm8558_vm5, %v8472_v27, %v1064_v32  ;;  %vm1006_vm12 = vweird.f32 %v8532_v35 }
 0x376   :  { %v1072_v34 = vmul.f32 0.5, %v1071_v0  ;;  %v8545_v22 = vpop.eup %7073  ;;  %v8548_v51 = vadd.f32 1e-05, %v888_v59  ;;  %7077 = vrsqrt.f32 %v8535_v44  ;;  %v859_v4 = vpop.xlane.xlu0 %858  ;;  %v1126_v32 = vadd.f32 %v8469_v23, %v1109_v11  ;;  %vm8646_vm4 = vmor %vm1005_vm10, %vm1006_vm12 }
 0x377   :  { %v960_v52 = vmul.f32 %v8545_v22, %v8493_v12  ;;  %v1001_v18 = vmul.f32 %v8532_v35, %v1000_v31  ;;  %v893_v25 = vmul.f32 %v859_v4, %v7862_v13  ;;  %v1093_v0 = vmul.f32 %v1068_v3, %v8345_v17 }
 0x378   :  { %v1073_v5 = vsub.f32 1.5, %v1072_v34  ;;  %7079 = vrsqrt.f32 %v8548_v51  ;;  %v993_v34 = vsub.f32 1.5, %v992_v63  ;;  %vm975_vm14 = vweird.f32 %v8535_v44 }
 0x379   :  { %v1002_v59 = vmul.f32 0.5, %v1001_v18  ;;  %v847_v31 = vpop.xlane.xlu1 %846  ;;  %v8572_v43 = vpop.eup %7075  ;;  %v8576_v26 = vadd.f32 1e-05, %v893_v25  ;;  %v961_v16 = vmul.f32 %v8545_v22, %v960_v52  ;;  %v1110_v14 = vmul.f32 %v8457_v9, %v1093_v0 }
 0x37a   :  { %v889_v48 = vmul.f32 %v847_v31, %v7862_v13  ;;  %v1074_v4 = vmul.f32 %v8508_v1, %v1073_v5  ;;  %v1010_v37 = vmul.f32 %v8572_v43, %v8521_v54  ;;  %vm966_vm15 = vweird.f32 %v8545_v22 }
 0x37b   :  { %7081 = vrsqrt.f32 %v8576_v26  ;;  %v1003_v5 = vsub.f32 1.5, %v1002_v59  ;;  %v962_v17 = vmul.f32 0.5, %v961_v16  ;;  %vm1016_vm3 = vweird.f32 %v8572_v43  ;;  %vm8702_vm9 = vmor %vm965_vm2, %vm966_vm15 }
 0x37c   :  { %v8591_v63 = vpop.eup %7077  ;;  %v8593_v18 = vadd.f32 1e-05, %v889_v48  ;;  %v1078_v52 = vsel %vm8584_vm11, %v8508_v1, %v1074_v4  ;;  %v994_v48 = vmul.f32 %v8490_v58, %v993_v34  ;;  %v1011_v31 = vmul.f32 %v8572_v43, %v1010_v37  ;;  %vm1017_vm6 = vmor %vm1015_vm13, %vm1016_vm3 }
 0x37d   :  { %v970_v25 = vmul.f32 %v8591_v63, %v8535_v44  ;;  %v1094_v1 = vmul.f32 %v1078_v52, %v8356_v8  ;;  %v1176_v4 = vmul.f32 %v8487_v46, %v1126_v32  ;;  %v1004_v8 = vmul.f32 %v8532_v35, %v1003_v5 }
 0x37e   :  { %v8604_v11 = vpop.eup %7079  ;;  %7083 = vrsqrt.f32 %v8593_v18  ;;  %v850_v27 = vpop.xlane.xlu0 %849  ;;  %v1012_v36 = vmul.f32 0.5, %v1011_v31  ;;  %v963_v5 = vsub.f32 1.5, %v962_v17  ;;  %vm976_vm5 = vweird.f32 %v8591_v63 }
 0x37f   :  { %v930_v59 = vmul.f32 %v8604_v11, %v8548_v51  ;;  %v971_v3 = vmul.f32 %v8591_v63, %v970_v25  ;;  %v890_v34 = vmul.f32 %v850_v27, %v7862_v13  ;;  %v1111_v37 = vmul.f32 %v8457_v9, %v1094_v1  ;;  %vm8681_vm8 = vmor %vm975_vm14, %vm976_vm5 }
 0x380   :  { %v1292_v25 = vmul.f32 %v8497_v24, %v1126_v32  ;;  %v1013_v28 = vsub.f32 1.5, %v1012_v36  ;;  %v1127_v27 = vadd.f32 %v8469_v23, %v1110_v14  ;;  %v1008_v40 = vsel %vm8646_vm4, %v8532_v35, %v1004_v8 }
 0x381   :  { %v931_v16 = vmul.f32 %v8604_v11, %v930_v59  ;;  %v972_v52 = vmul.f32 0.5, %v971_v3  ;;  %v8622_v7 = vpop.eup %7081  ;;  %v8624_v56 = vadd.f32 1e-05, %v890_v34  ;;  %v1128_v31 = vadd.f32 %v8469_v23, %v1111_v37 }
 0x382   :  { %v980_v36 = vmul.f32 %v8622_v7, %v8576_v26  ;;  %v1014_v53 = vmul.f32 %v8572_v43, %v1013_v28  ;;  %v998_v34 = vsel %vm8632_vm0, %v8490_v58, %v994_v48  ;;  %v1177_v20 = vmul.f32 %v8487_v46, %v1127_v27 }
 0x383   :  { %v973_v32 = vsub.f32 1.5, %v972_v52  ;;  %7085 = vrsqrt.f32 %v8624_v56  ;;  %v1178_v17 = vmul.f32 %v8487_v46, %v1128_v31  ;;  %v932_v59 = vmul.f32 0.5, %v931_v16 }
 0x384   :  { %v8640_v1 = vpop.eup %7083  ;;  %v981_v28 = vmul.f32 %v8622_v7, %v980_v36  ;;  %v1294_v16 = vmul.f32 %v8497_v24, %v1128_v31  ;;  %v1293_v8 = vmul.f32 %v8497_v24, %v1127_v27  ;;  %v1018_v58 = vsel %vm1017_vm6, %v8572_v43, %v1014_v53 }
 0x385   :  { %v940_v3 = vmul.f32 %v8640_v1, %v8593_v18  ;;  %v974_v37 = vmul.f32 %v8591_v63, %v973_v32  ;;  %1179 = vmatpush.msra.mxu1 %v1178_v17  ;;  %vm935_vm7 = vweird.f32 %v8548_v51  ;;  %v1088_v48 = vmul.f32 %v1018_v58, %v8379_v45 }
 0x386   :  { %v841_v52 = vpop.xlane.xlu0 %840  ;;  %v982_v54 = vmul.f32 0.5, %v981_v28  ;;  %1295 = vmatpush.msra.mxu2 %v1294_v16  ;;  %v1087_v31 = vmul.f32 %v1008_v40, %v8366_v21  ;;  %v1086_v0 = vmul.f32 %v998_v34, %v8351_v6  ;;  %v964_v32 = vmul.f32 %v8545_v22, %v963_v5 }
 0x387   :  { %v941_v14 = vmul.f32 %v8640_v1, %v940_v3  ;;  %v887_v35 = vmul.f32 %v841_v52, %v7862_v13  ;;  %1180 = vmatpush.msra.mxu1 %v1177_v20  ;;  %v933_v36 = vsub.f32 1.5, %v932_v59  ;;  %v1105_v6 = vmul.f32 %v8457_v9, %v1088_v48  ;;  %v1149_v52 = vld [vmem:[%s7553_s17 + $0x20] sm:$0xff] }
 0x388   :  { %v983_v45 = vsub.f32 1.5, %v982_v54  ;;  %1296 = vmatpush.msra.mxu2 %v1293_v8  ;;  %v1104_v21 = vmul.f32 %v8457_v9, %v1087_v31  ;;  %v978_v44 = vsel %vm8681_vm8, %v8591_v63, %v974_v37  ;;  %v1103_v59 = vmul.f32 %v8457_v9, %v1086_v0 }
 0x389   :  { %v942_v27 = vmul.f32 0.5, %v941_v14  ;;  %v8685_v53 = vadd.f32 1e-05, %v887_v35  ;;  %v8687_v20 = vpop.eup %7085  ;;  %1181 = vmatpush.msra.mxu1 %v1176_v4  ;;  %vm946_vm10 = vweird.f32 %v8640_v1  ;;  %vm986_vm11 = vweird.f32 %v8622_v7 }
 0x38a   :  { %v950_v17 = vmul.f32 %v8687_v20, %v8624_v56  ;;  %v984_v63 = vmul.f32 %v8622_v7, %v983_v45  ;;  %1297 = vmatpush.msra.mxu2 %v1292_v25  ;;  %v1122_v3 = vadd.f32 %v8469_v23, %v1105_v6  ;;  %v1084_v12 = vmul.f32 %v978_v44, %v8387_v2 }
 0x38b   :  { %v943_v5 = vsub.f32 1.5, %v942_v27  ;;  %7087 = vrsqrt.f32 %v8685_v53  ;;  %1182 = vmatpush.msra.mxu1 %v8556_v29  ;;  %v968_v37 = vsel %vm8702_vm9, %v8545_v22, %v964_v32  ;;  %v934_v28 = vmul.f32 %v8604_v11, %v933_v36 }
 0x38c   :  { %v951_v34 = vmul.f32 %v8687_v20, %v950_v17  ;;  %vm936_vm12 = vweird.f32 %v8604_v11  ;;  %vm985_vm13 = vweird.f32 %v8576_v26  ;;  %1298 = vmatpush.msra.mxu2 %v8570_v42  ;;  %v1121_v29 = vadd.f32 %v8469_v23, %v1104_v21  ;;  %v1145_v26 = vld [vmem:[%s7553_s17] sm:$0xff] }
 0x38d   :  { %v944_v40 = vmul.f32 %v8640_v1, %v943_v5  ;;  %1183 = vmatpush.msra.mxu1 %v8530_v57  ;;  %vm945_vm14 = vweird.f32 %v8593_v18  ;;  %vm987_vm15 = vmor %vm985_vm13, %vm986_vm11  ;;  %v1172_v22 = vmul.f32 %v8487_v46, %v1122_v3  ;;  %v1120_v25 = vadd.f32 %v8469_v23, %v1103_v59 }
 0x38e   :  { %v952_v2 = vmul.f32 0.5, %v951_v34  ;;  %vm8730_vm0 = vmor %vm945_vm14, %vm946_vm10  ;;  %vm956_vm2 = vweird.f32 %v8687_v20  ;;  %1299 = vmatpush.msra.mxu2 %v8539_v10  ;;  %v1288_v42 = vmul.f32 %v8497_v24, %v1122_v3  ;;  %v988_v57 = vsel %vm987_vm15, %v8622_v7, %v984_v63 }
 0x38f   :  { %1184 = vmatpush.msra.mxu1 %v8517_v39  ;;  %v1083_v18 = vmul.f32 %v968_v37, %v8370_v38  ;;  %vm8744_vm3 = vmor %vm935_vm7, %vm936_vm12  ;;  %v1085_v10 = vmul.f32 %v988_v57, %v8400_v49  ;;  %v1101_v39 = vmul.f32 %v8457_v9, %v1084_v12  ;;  %v948_v7 = vsel %vm8730_vm0, %v8640_v1, %v944_v40  ;;  %v6723_v57 = vld [vmem:[%s7553_s17 + $0x88] sm:$0xff] }
 0x390   :  { %v953_v14 = vsub.f32 1.5, %v952_v2  ;;  %vm955_vm4 = vweird.f32 %v8624_v56  ;;  %1300 = vmatpush.msra.mxu2 %v8524_v33  ;;  %v1171_v51 = vmul.f32 %v8487_v46, %v1121_v29  ;;  %v938_v35 = vsel %vm8744_vm3, %v8604_v11, %v934_v28 }
 0x391   :  { %v7088_v16 = vpop.eup %7087  ;;  %1185 = vmatpush.msra.mxu1 %v1172_v22  ;;  %v1102_v8 = vmul.f32 %v8457_v9, %v1085_v10  ;;  %v1100_v58 = vmul.f32 %v8457_v9, %v1083_v18  ;;  %v1081_v1 = vmul.f32 %v948_v7, %v8407_v55  ;;  %vm957_vm5 = vmor %vm955_vm4, %vm956_vm2  ;;  %v1287_v33 = vmul.f32 %v8497_v24, %v1121_v29  ;;  %v1148_v18 = vld [vmem:[%s7553_s17 + $0x18] sm:$0xff]  ;;  %v1150_v10 = vld [vmem:[%s7553_s17 + $0x28] sm:$0xff] }
 0x392   :  { %v920_v38 = vmul.f32 %v7088_v16, %v8685_v53  ;;  %v954_v49 = vmul.f32 %v8687_v20, %v953_v14  ;;  %1301 = vmatpush.msra.mxu2 %v1288_v42  ;;  %v1170_v54 = vmul.f32 %v8487_v46, %v1120_v25  ;;  %v1118_v48 = vadd.f32 %v8469_v23, %v1101_v39  ;;  %v6722_v42 = vld [vmem:[%s7553_s17 + $0x80] sm:$0xff]  ;;  %v6727_v39 = vld [vmem:[%s7553_s17 + $0xa8] sm:$0xff]  ;;  %v1151_v7 = vld [vmem:[%s7553_s17 + $0x30] sm:$0xff] }
 0x393   :  { %1186 = vmatpush.msra.mxu1 %v1171_v51  ;;  %v1119_v11 = vadd.f32 %v8469_v23, %v1102_v8  ;;  %v1080_v0 = vmul.f32 %v938_v35, %v8391_v30  ;;  %v1286_v55 = vmul.f32 %v8497_v24, %v1120_v25  ;;  %v1117_v27 = vadd.f32 %v8469_v23, %v1100_v58  ;;  %v6726_v14 = vld [vmem:[%s7553_s17 + $0xa0] sm:$0xff]  ;;  %v1152_v51 = vld [vmem:[%s7553_s17 + $0x38] sm:$0xff]  ;;  %v1154_v58 = vld [vmem:[%s7553_s17 + $0x48] sm:$0xff] }
 0x394   :  { %v921_v56 = vmul.f32 %v7088_v16, %v920_v38  ;;  %v958_v31 = vsel %vm957_vm5, %v8687_v20, %v954_v49  ;;  %1302 = vmatpush.msra.mxu2 %v1287_v33  ;;  %v1098_v45 = vmul.f32 %v8457_v9, %v1081_v1  ;;  %vm926_vm6 = vweird.f32 %v7088_v16  ;;  %v6728_v38 = vld [vmem:[%s7553_s17 + $0xb0] sm:$0xff]  ;;  %v6729_v35 = vld [vmem:[%s7553_s17 + $0xb8] sm:$0xff]  ;;  %v1153_v49 = vld [vmem:[%s7553_s17 + $0x40] sm:$0xff] }
 0x395   :  { %1187 = vmatpush.msra.mxu1 %v1170_v54  ;;  %v1082_v36 = vmul.f32 %v958_v31, %v8415_v61  ;;  %v1169_v43 = vmul.f32 %v8487_v46, %v1119_v11  ;;  %v1285_v20 = vmul.f32 %v8497_v24, %v1119_v11  ;;  %v1168_v21 = vmul.f32 %v8487_v46, %v1118_v48  ;;  %v6730_v8 = vld [vmem:[%s7553_s17 + $0xc0] sm:$0xff]  ;;  %v6731_v1 = vld [vmem:[%s7553_s17 + $0xc8] sm:$0xff]  ;;  %v6732_v33 = vld [vmem:[%s7553_s17 + $0xd0] sm:$0xff] }
 0x396   :  { %v922_v32 = vmul.f32 0.5, %v921_v56  ;;  %1303 = vmatpush.msra.mxu2 %v1286_v55  ;;  %v1097_v44 = vmul.f32 %v8457_v9, %v1080_v0  ;;  %vm925_vm7 = vweird.f32 %v8685_v53  ;;  %v1284_v61 = vmul.f32 %v8497_v24, %v1118_v48  ;;  %v1155_v56 = vld [vmem:[%s7553_s17 + $0x50] sm:$0xff]  ;;  %v1156_v54 = vld [vmem:[%s7553_s17 + $0x58] sm:$0xff]  ;;  %v1157_v48 = vld [vmem:[%s7553_s17 + $0x60] sm:$0xff] }
 0x397   :  { %v1099_v30 = vmul.f32 %v8457_v9, %v1082_v36  ;;  %1188 = vmatpush.msra.mxu1 %v1169_v43  ;;  %vm927_vm8 = vmor %vm925_vm7, %vm926_vm6  ;;  %v1167_v59 = vmul.f32 %v8487_v46, %v1117_v27  ;;  %v1115_v4 = vadd.f32 %v8469_v23, %v1098_v45  ;;  %v1283_v63 = vmul.f32 %v8497_v24, %v1117_v27  ;;  %v6733_v11 = vld [vmem:[%s7553_s17 + $0xd8] sm:$0xff]  ;;  %v6734_v31 = vld [vmem:[%s7553_s17 + $0xe0] sm:$0xff] }
 0x398   :  { %v923_v6 = vsub.f32 1.5, %v922_v32  ;;  %1304 = vmatpush.msra.mxu2 %v1285_v20  ;;  %v1114_v53 = vadd.f32 %v8469_v23, %v1097_v44  ;;  %v1158_v0 = vld [vmem:[%s7553_s17 + $0x68] sm:$0xff]  ;;  %v1159_v55 = vld [vmem:[%s7553_s17 + $0x70] sm:$0xff]  ;;  %v1160_v43 = vld [vmem:[%s7553_s17 + $0x78] sm:$0xff] }
 0x399   :  { %v1116_v17 = vadd.f32 %v8469_v23, %v1099_v30  ;;  %1189 = vmatpush.msra.mxu1 %v1168_v21  ;;  %v1165_v37 = vmul.f32 %v8487_v46, %v1115_v4  ;;  %v1281_v29 = vmul.f32 %v8497_v24, %v1115_v4  ;;  %v6735_v32 = vld [vmem:[%s7553_s17 + $0xe8] sm:$0xff]  ;;  %v6736_v36 = vld [vmem:[%s7553_s17 + $0xf0] sm:$0xff]  ;;  %v6737_v27 = vld [vmem:[%s7553_s17 + $0xf8] sm:$0xff] }
 0x39a   :  { %v924_v5 = vmul.f32 %v7088_v16, %v923_v6  ;;  %1305 = vmatpush.msra.mxu2 %v1284_v61  ;;  %v1164_v2 = vmul.f32 %v8487_v46, %v1114_v53  ;;  %v1129_v6 = vld [vmem:[%s7563_s25] sm:$0xff] }
 0x39b   :  { %v1166_v3 = vmul.f32 %v8487_v46, %v1116_v17  ;;  %v1282_v40 = vmul.f32 %v8497_v24, %v1116_v17  ;;  %1190 = vmatpush.msra.mxu1 %v1167_v59 }
 0x39c   :  { %v928_v34 = vsel %vm927_vm8, %v7088_v16, %v924_v5  ;;  %1306 = vmatpush.msra.mxu2 %v1283_v63  ;;  %v6725_v16 = vld [vmem:[%s7553_s17 + $0x98] sm:$0xff]  ;;  %v1130_v5 = vld [vmem:[%s7563_s25 + $0x8] sm:$0xff] }
 0x39d   :  { %v1079_v12 = vmul.f32 %v928_v34, %v8422_v47  ;;  %1191 = vmatpush.msra.mxu1 %v1166_v3  ;;  %v1280_v47 = vmul.f32 %v8497_v24, %v1114_v53 }
 0x39e   :  { %1307 = vmatpush.msra.mxu2 %v1282_v40  ;;  %v1131_v40 = vld [vmem:[%s7563_s25 + $0x10] sm:$0xff] }
 0x39f   :  { %v1096_v28 = vmul.f32 %v8457_v9, %v1079_v12  ;;  %1192 = vmatpush.msra.mxu1 %v1165_v37 }
 0x3a0   :  { %1308 = vmatpush.msra.mxu2 %v1281_v29  ;;  %v1132_v29 = vld [vmem:[%s7563_s25 + $0x18] sm:$0xff] }
 0x3a1   :  { %v1113_v22 = vadd.f32 %v8469_v23, %v1096_v28  ;;  %1193 = vmatpush.msra.mxu1 %v1164_v2  ;;  %v1146_v23 = vld [vmem:[%s7553_s17 + $0x8] sm:$0xff] }
 0x3a2   :  { %1309 = vmatpush.msra.mxu2 %v1280_v47 }
 0x3a3   :  { %v1163_v25 = vmul.f32 %v8487_v46, %v1113_v22  ;;  %v1279_v9 = vmul.f32 %v8497_v24, %v1113_v22  ;;  %v1147_v46 = vld [vmem:[%s7553_s17 + $0x10] sm:$0xff] }
 0x3a4   :  { %v6724_v24 = vld [vmem:[%s7553_s17 + $0x90] sm:$0xff]  ;;  %s11816_s17 = sld [smem:[#allocation14_spill]] }
 0x3a5   :  { %1194 = vmatpush.msra.mxu1 %v1163_v25  ;;  %1310 = vmatpush.msra.mxu2 %v1279_v9 }
 0x3a6   :  { %1195 = vmatmul.f32.vlgmr.msra.gmra.mxu1 %v1145_v26  ;;  %1311 = vmatmul.f32.vlgmr.msra.gmra.mxu2 %v6722_v42  ;;  %v1133_v26 = vld [vmem:[%s7563_s25 + $0x20] sm:$0xff] }
 0x3ae   :  { %1198 = vmatmul.f32.gmra.mxu1 %v1146_v23  ;;  %1314 = vmatmul.f32.gmra.mxu2 %v6723_v57 }
 0x3b6   :  { %1201 = vmatmul.f32.gmra.mxu1 %v1147_v46  ;;  %1317 = vmatmul.f32.gmra.mxu2 %v6724_v24 }
 0x3be   :  { %1204 = vmatmul.f32.gmra.mxu1 %v1148_v18  ;;  %1320 = vmatmul.f32.gmra.mxu2 %v6725_v16  ;;  %v1134_v18 = vld [vmem:[%s7563_s25 + $0x28] sm:$0xff] }
 0x3c6   :  { %1207 = vmatmul.f32.gmra.mxu1 %v1149_v52  ;;  %1323 = vmatmul.f32.gmra.mxu2 %v6726_v14 }
 0x3ce   :  { %1210 = vmatmul.f32.gmra.mxu1 %v1150_v10  ;;  %1326 = vmatmul.f32.gmra.mxu2 %v6727_v39  ;;  %v1135_v39 = vld [vmem:[%s7563_s25 + $0x30] sm:$0xff] }
 0x3d6   :  { %1213 = vmatmul.f32.gmra.mxu1 %v1151_v7  ;;  %1329 = vmatmul.f32.gmra.mxu2 %v6728_v38 }
 0x3de   :  { %1216 = vmatmul.f32.gmra.mxu1 %v1152_v51  ;;  %1332 = vmatmul.f32.gmra.mxu2 %v6729_v35 }
 0x3e6   :  { %1219 = vmatmul.f32.gmra.mxu1 %v1153_v49  ;;  %1335 = vmatmul.f32.gmra.mxu2 %v6730_v8  ;;  %v11744_v8 = vld [vmem:[#allocation46_spill] sm:$0xff] }
 0x3ee   :  { %1222 = vmatmul.f32.gmra.mxu1 %v1154_v58  ;;  %1338 = vmatmul.f32.gmra.mxu2 %v6731_v1 }
 0x3f6   :  { %1225 = vmatmul.f32.gmra.mxu1 %v1155_v56  ;;  %1341 = vmatmul.f32.gmra.mxu2 %v6732_v33 }
 0x3fe   :  { %1228 = vmatmul.f32.gmra.mxu1 %v1156_v54  ;;  %1344 = vmatmul.f32.gmra.mxu2 %v6733_v11 }
 0x406   :  { %1231 = vmatmul.f32.gmra.mxu1 %v1157_v48  ;;  %1347 = vmatmul.f32.gmra.mxu2 %v6734_v31 }
 0x40e   :  { %1234 = vmatmul.f32.gmra.mxu1 %v1158_v0  ;;  %1350 = vmatmul.f32.gmra.mxu2 %v6735_v32 }
 0x416   :  { %1237 = vmatmul.f32.gmra.mxu1 %v1159_v55  ;;  %1353 = vmatmul.f32.gmra.mxu2 %v6736_v36 }
 0x41e   :  { %1240 = vmatmul.f32.gmra.mxu1 %v1160_v43  ;;  %1356 = vmatmul.f32.gmra.mxu2 %v6737_v27  ;;  %v1137_v27 = vld [vmem:[%s7563_s25 + $0x40] sm:$0xff] }
 0x423   :  { %v1196_v45 = vpop.f32.mrf.mxu1 }
 0x424   :  { %v1244_v20 = vadd.f32 %v1196_v45, %v1129_v6 }
 0x429   :  { %v1312_v30 = vpop.f32.mrf.mxu2 }
 0x42a   :  { %v1360_v21 = vadd.f32 %v1312_v30, %v1244_v20  ;;  %v11746_v30 = vld [vmem:[#allocation42_spill] sm:$0xff] }
 0x42b   :  { %v1199_v44 = vpop.f32.mrf.mxu1 }
 0x42c   :  { %v8834_v61 = vadd.f32 %v1360_v21, %v8311_v41  ;;  %v1245_v59 = vadd.f32 %v1199_v44, %v1130_v5 }
 0x42e   :  { %11739 = vst [vmem:[#allocation47_spill] sm:$0xff] %v8834_v61  ;;  %v1394_v17 = vsel %vm347_vm1, %v8834_v61, 0.0 }
 0x42f   :  { %1395 = vadd.xlane.f32.xlu1 %v1394_v17 }
 0x431   :  { %v1315_v4 = vpop.f32.mrf.mxu2 }
 0x432   :  { %v1361_v63 = vadd.f32 %v1315_v4, %v1245_v59 }
 0x433   :  { %v1202_v3 = vpop.f32.mrf.mxu1 }
 0x434   :  { %v8840_v34 = vadd.f32 %v1361_v63, %v8286_v62  ;;  %v1246_v12 = vadd.f32 %v1202_v3, %v1131_v40  ;;  %v1138_v40 = vld [vmem:[%s7563_s25 + $0x48] sm:$0xff] }
 0x436   :  { %11740 = vst [vmem:[#allocation48_spill] sm:$0xff] %v8840_v34  ;;  %v1397_v53 = vsel %vm347_vm1, %v8840_v34, 0.0 }
 0x437   :  { %1398 = vadd.xlane.f32.xlu2 %v1397_v53 }
 0x439   :  { %v1318_v41 = vpop.f32.mrf.mxu2 }
 0x43a   :  { %v1362_v37 = vadd.f32 %v1318_v41, %v1246_v12 }
 0x43b   :  { %v1205_v28 = vpop.f32.mrf.mxu1 }
 0x43c   :  { %v8846_v2 = vadd.f32 %v1362_v37, %v8295_v15  ;;  %v1247_v47 = vadd.f32 %v1205_v28, %v1132_v29  ;;  %v11747_v37 = vld [vmem:[#allocation44_spill] sm:$0xff] }
 0x43e   :  { %11741 = vst [vmem:[#allocation49_spill] sm:$0xff] %v8846_v2  ;;  %v1400_v22 = vsel %vm347_vm1, %v8846_v2, 0.0 }
 0x43f   :  { %1401 = vadd.xlane.f32.xlu0 %v1400_v22 }
 0x441   :  { %v1321_v62 = vpop.f32.mrf.mxu2 }
 0x442   :  { %v1363_v25 = vadd.f32 %v1321_v62, %v1247_v47 }
 0x443   :  { %v1208_v9 = vpop.f32.mrf.mxu1 }
 0x444   :  { %v8852_v42 = vadd.f32 %v1363_v25, %v8304_v60  ;;  %v1248_v57 = vadd.f32 %v1208_v9, %v1133_v26 }
 0x446   :  { %11742 = vst [vmem:[#allocation50_spill] sm:$0xff] %v8852_v42  ;;  %v1403_v23 = vsel %vm347_vm1, %v8852_v42, 0.0 }
 0x447   :  { %1404 = vadd.xlane.f32.xlu1 %v1403_v23  ;;  %v1139_v23 = vld [vmem:[%s7563_s25 + $0x50] sm:$0xff] }
 0x449   :  { %v1324_v15 = vpop.f32.mrf.mxu2 }
 0x44a   :  { %v1364_v46 = vadd.f32 %v1324_v15, %v1248_v57 }
 0x44b   :  { %v1211_v24 = vpop.f32.mrf.mxu1 }
 0x44c   :  { %v8858_v16 = vadd.f32 %v1364_v46, %v8242_v19  ;;  %v1249_v14 = vadd.f32 %v1211_v24, %v1134_v18  ;;  %v11749_v46 = vld [vmem:[#allocation45_spill] sm:$0xff] }
 0x44e   :  { %v1406_v52 = vsel %vm347_vm1, %v8858_v16, 0.0 }
 0x44f   :  { %1407 = vadd.xlane.f32.xlu2 %v1406_v52 }
 0x451   :  { %v1327_v10 = vpop.f32.mrf.mxu2 }
 0x452   :  { %v1365_v60 = vadd.f32 %v1327_v10, %v1249_v14 }
 0x453   :  { %v1214_v7 = vpop.f32.mrf.mxu1 }
 0x454   :  { %v8864_v38 = vadd.f32 %v1365_v60, %v8270_v50  ;;  %v1250_v35 = vadd.f32 %v1214_v7, %v1135_v39  ;;  %v1136_v50 = vld [vmem:[%s7563_s25 + $0x38] sm:$0xff] }
 0x456   :  { %11743 = vst [vmem:[#allocation51_spill] sm:$0xff] %v8864_v38  ;;  %v1409_v51 = vsel %vm347_vm1, %v8864_v38, 0.0 }
 0x457   :  { %1410 = vadd.xlane.f32.xlu0 %v1409_v51  ;;  %v1140_v51 = vld [vmem:[%s7563_s25 + $0x58] sm:$0xff] }
 0x459   :  { %v1330_v19 = vpop.f32.mrf.mxu2 }
 0x45a   :  { %v1366_v49 = vadd.f32 %v1330_v19, %v1250_v35 }
 0x45b   :  { %v1217_v56 = vpop.f32.mrf.mxu1 }
 0x45c   :  { %v8869_v58 = vadd.f32 %v1366_v49, %v11744_v8  ;;  %v1251_v0 = vadd.f32 %v1217_v56, %v1136_v50  ;;  %v11751_v8 = vld [vmem:[#allocation37_spill] sm:$0xff] }
 0x45e   :  { %11745 = vst [vmem:[#allocation46_spill] sm:$0xff] %v8869_v58  ;;  %v1412_v1 = vsel %vm347_vm1, %v8869_v58, 0.0 }
 0x45f   :  { %1413 = vadd.xlane.f32.xlu2 %v1412_v1 }
 0x461   :  { %v1333_v33 = vpop.f32.mrf.mxu2 }
 0x462   :  { %v1367_v36 = vadd.f32 %v1333_v33, %v1251_v0  ;;  %v1141_v0 = vld [vmem:[%s7563_s25 + $0x60] sm:$0xff] }
 0x463   :  { %v1220_v54 = vpop.f32.mrf.mxu1 }
 0x464   :  { %v8884_v21 = vadd.f32 %v1367_v36, %v11746_v30  ;;  %v1252_v44 = vadd.f32 %v1220_v54, %v1137_v27  ;;  %v11752_v27 = vld [vmem:[#allocation38_spill] sm:$0xff] }
 0x466   :  { %v1415_v3 = vsel %vm347_vm1, %v8884_v21, 0.0 }
 0x469   :  { %v1336_v31 = vpop.f32.mrf.mxu2 }
 0x46a   :  { %v1368_v4 = vadd.f32 %v1336_v31, %v1252_v44 }
 0x46b   :  { %v1223_v45 = vpop.f32.mrf.mxu1 }
 0x46c   :  { %v8897_v28 = vadd.f32 %v1368_v4, %v11747_v37  ;;  %v1253_v29 = vadd.f32 %v1223_v45, %v1138_v40  ;;  %v1142_v4 = vld [vmem:[%s7563_s25 + $0x68] sm:$0xff] }
 0x46e   :  { %11748 = vst [vmem:[#allocation42_spill] sm:$0xff] %v8897_v28  ;;  %v1418_v26 = vsel %vm347_vm1, %v8897_v28, 0.0 }
 0x471   :  { %v1339_v17 = vpop.f32.mrf.mxu2 }
 0x472   :  { %v1369_v25 = vadd.f32 %v1339_v17, %v1253_v29 }
 0x473   :  { %v1226_v41 = vpop.f32.mrf.mxu1 }
 0x474   :  { %v8910_v24 = vadd.f32 %v1369_v25, %v11749_v46  ;;  %v1254_v18 = vadd.f32 %v1226_v41, %v1139_v23 }
 0x476   :  { %11750 = vst [vmem:[#allocation44_spill] sm:$0xff] %v8910_v24  ;;  %v1421_v7 = vsel %vm347_vm1, %v8910_v24, 0.0 }
 0x479   :  { %v1342_v62 = vpop.f32.mrf.mxu2 }
 0x47a   :  { %v1370_v60 = vadd.f32 %v1342_v62, %v1254_v18 }
 0x47b   :  { %v1229_v14 = vpop.f32.mrf.mxu1 }
 0x47c   :  { %v8923_v1 = vadd.f32 %v1370_v60, %v11751_v8  ;;  %v1255_v56 = vadd.f32 %v1229_v14, %v1140_v51 }
 0x47e   :  { %v1424_v31 = vsel %vm347_vm1, %v8923_v1, 0.0 }
 0x481   :  { %v1345_v35 = vpop.f32.mrf.mxu2 }
 0x483   :  { %v1232_v50 = vpop.f32.mrf.mxu1 }
 0x4a2   :  { %v1396_v11 = vpop.xlane.xlu1 %1395 }
 0x4a3   :  { %v1442_v48 = vmul.f32 %v1396_v11, %v7862_v13  ;;  %v1371_v11 = vadd.f32 %v1345_v35, %v1255_v56 }
 0x4a5   :  { %v8876_v32 = vsub.f32 %v8834_v61, %v1442_v48  ;;  %v8936_v45 = vadd.f32 %v1371_v11, %v11752_v27 }
 0x4a7   :  { %v1474_v55 = vmul.f32 %v8876_v32, %v8876_v32 }
 0x4a9   :  { %v1490_v43 = vsel %vm347_vm1, %v1474_v55, 0.0 }
 0x4aa   :  { %v1399_v6 = vpop.xlane.xlu2 %1398  ;;  %1491 = vadd.xlane.f32.xlu1 %v1490_v43  ;;  %v1348_v43 = vpop.f32.mrf.mxu2 }
 0x4ab   :  { %v1443_v20 = vmul.f32 %v1399_v6, %v7862_v13  ;;  %v1256_v6 = vadd.f32 %v1232_v50, %v1141_v0  ;;  %v1781_v50 = vld [vmem:[%s7573_s3 + $0x8] sm:$0xff] }
 0x4ac   :  { %1848 = vmatpush.msra.mxu3 %v1781_v50  ;;  %v11757_v50 = vld [vmem:[#allocation43_spill] sm:$0xff] }
 0x4ad   :  { %v8887_v5 = vsub.f32 %v8840_v34, %v1443_v20  ;;  %v1372_v44 = vadd.f32 %v1348_v43, %v1256_v6  ;;  %v1144_v43 = vld [vmem:[%s7563_s25 + $0x78] sm:$0xff] }
 0x4af   :  { %v1475_v59 = vmul.f32 %v8887_v5, %v8887_v5 }
 0x4b1   :  { %v1493_v63 = vsel %vm347_vm1, %v1475_v59, 0.0  ;;  %v1427_v59 = vsel %vm347_vm1, %v8936_v45, 0.0 }
 0x4b2   :  { %v1402_v53 = vpop.xlane.xlu0 %1401  ;;  %1494 = vadd.xlane.f32.xlu0 %v1493_v63  ;;  %1416 = vadd.xlane.f32.xlu1 %v1415_v3  ;;  %v1235_v63 = vpop.f32.mrf.mxu1 }
 0x4b3   :  { %v1444_v12 = vmul.f32 %v1402_v53, %v7862_v13  ;;  %v11753_v53 = vld [vmem:[#allocation39_spill] sm:$0xff]  ;;  %v1257_v41 = vadd.f32 %v1235_v63, %v1142_v4  ;;  %v1351_v29 = vpop.f32.mrf.mxu2  ;;  %v11755_v63 = vld [vmem:[#allocation41_spill] sm:$0xff] }
 0x4b5   :  { %v8900_v22 = vsub.f32 %v8846_v2, %v1444_v12  ;;  %v8949_v12 = vadd.f32 %v1372_v44, %v11753_v53  ;;  %v1373_v62 = vadd.f32 %v1351_v29, %v1257_v41 }
 0x4b7   :  { %v1476_v47 = vmul.f32 %v8900_v22, %v8900_v22 }
 0x4b9   :  { %v1496_v9 = vsel %vm347_vm1, %v1476_v47, 0.0 }
 0x4ba   :  { %v1405_v57 = vpop.xlane.xlu1 %1404  ;;  %1497 = vadd.xlane.f32.xlu2 %v1496_v9  ;;  %1419 = vadd.xlane.f32.xlu0 %v1418_v26  ;;  %v1430_v9 = vsel %vm347_vm1, %v8949_v12, 0.0  ;;  %v11754_v26 = vld [vmem:[#allocation40_spill] sm:$0xff]  ;;  %v1238_v14 = vpop.f32.mrf.mxu1 }
 0x4bb   :  { %v1445_v15 = vmul.f32 %v1405_v57, %v7862_v13  ;;  %v8960_v23 = vadd.f32 %v1373_v62, %v11754_v26  ;;  %v1354_v35 = vpop.f32.mrf.mxu2 }
 0x4bd   :  { %v8913_v52 = vsub.f32 %v8852_v42, %v1445_v15  ;;  %v1433_v57 = vsel %vm347_vm1, %v8960_v23, 0.0 }
 0x4bf   :  { %v1477_v10 = vmul.f32 %v8913_v52, %v8913_v52 }
 0x4c1   :  { %v1499_v39 = vsel %vm347_vm1, %v1477_v10, 0.0  ;;  %v1143_v10 = vld [vmem:[%s7563_s25 + $0x70] sm:$0xff]  ;;  %s11826_s25 = sld [smem:[#allocation16_spill]] }
 0x4c2   :  { %v1408_v19 = vpop.xlane.xlu2 %1407  ;;  %1500 = vadd.xlane.f32.xlu1 %v1499_v39  ;;  %1422 = vadd.xlane.f32.xlu2 %v1421_v7 }
 0x4c3   :  { %v1446_v49 = vmul.f32 %v1408_v19, %v7862_v13  ;;  %v1357_v29 = vpop.f32.mrf.mxu2 }
 0x4c5   :  { %v8926_v33 = vsub.f32 %v8858_v16, %v1446_v49  ;;  %v1258_v49 = vadd.f32 %v1238_v14, %v1143_v10 }
 0x4c7   :  { %v1478_v54 = vmul.f32 %v8926_v33, %v8926_v33  ;;  %v1374_v0 = vadd.f32 %v1354_v35, %v1258_v49 }
 0x4c9   :  { %v1502_v48 = vsel %vm347_vm1, %v1478_v54, 0.0 }
 0x4ca   :  { %v1411_v55 = vpop.xlane.xlu0 %1410  ;;  %1503 = vadd.xlane.f32.xlu0 %v1502_v48  ;;  %1425 = vadd.xlane.f32.xlu1 %v1424_v31  ;;  %v1780_v31 = vld [vmem:[%s7573_s3] sm:$0xff]  ;;  %s11828_s3 = sld [smem:[#allocation18_spill]] }
 0x4cb   :  { %v1447_v36 = vmul.f32 %v1411_v55, %v7862_v13  ;;  %v1241_v55 = vpop.f32.mrf.mxu1  ;;  %1849 = vmatpush.msra.mxu3 %v1780_v31 }
 0x4cd   :  { %v8939_v20 = vsub.f32 %v8864_v38, %v1447_v36 }
 0x4cf   :  { %v1479_v30 = vmul.f32 %v8939_v20, %v8939_v20 }
 0x4d1   :  { %v1505_v17 = vsel %vm347_vm1, %v1479_v30, 0.0 }
 0x4d2   :  { %v1414_v3 = vpop.xlane.xlu2 %1413  ;;  %1506 = vadd.xlane.f32.xlu2 %v1505_v17  ;;  %1428 = vadd.xlane.f32.xlu0 %v1427_v59 }
 0x4d3   :  { %v1448_v40 = vmul.f32 %v1414_v3, %v7862_v13  ;;  %v8980_v3 = vadd.f32 %v1374_v0, %v11755_v63 }
 0x4d5   :  { %v8952_v37 = vsub.f32 %v8869_v58, %v1448_v40  ;;  %11756 = vst [vmem:[#allocation45_spill] sm:$0xff] %v8980_v3  ;;  %v1259_v40 = vadd.f32 %v1241_v55, %v1144_v43  ;;  %v1436_v14 = vsel %vm347_vm1, %v8980_v3, 0.0 }
 0x4d7   :  { %v1480_v47 = vmul.f32 %v8952_v37, %v8952_v37 }
 0x4d9   :  { %v1508_v25 = vsel %vm347_vm1, %v1480_v47, 0.0 }
 0x4da   :  { %1509 = vadd.xlane.f32.xlu1 %v1508_v25  ;;  %1431 = vadd.xlane.f32.xlu2 %v1430_v9  ;;  %v8988_v9 = vld [vmem:[%s7568_s29 + $0x2] ss:$0 sm:$0xff] }
 0x4e2   :  { %1434 = vadd.xlane.f32.xlu1 %v1433_v57 }
 0x51d   :  { %v1492_v15 = vpop.xlane.xlu1 %1491 }
 0x51e   :  { %v1538_v46 = vmul.f32 %v1492_v15, %v7862_v13  ;;  %v1375_v15 = vadd.f32 %v1357_v29, %v1259_v40 }
 0x520   :  { %v1554_v18 = vadd.f32 1e-05, %v1538_v46 }
 0x522   :  { %7089 = vrsqrt.f32 %v1554_v18  ;;  %vm1576_vm10 = vweird.f32 %v1554_v18 }
 0x525   :  { %v1495_v60 = vpop.xlane.xlu0 %1494  ;;  %v1417_v39 = vpop.xlane.xlu1 %1416 }
 0x526   :  { %v1539_v7 = vmul.f32 %v1495_v60, %v7862_v13  ;;  %v1449_v51 = vmul.f32 %v1417_v39, %v7862_v13  ;;  %v8995_v60 = vld [vmem:[%s7568_s29 + $0x3] ss:$0 sm:$0xff] }
 0x528   :  { %v7090_v19 = vpop.eup %7089  ;;  %v1555_v8 = vadd.f32 1e-05, %v1539_v7  ;;  %v8969_v56 = vsub.f32 %v8884_v21, %v1449_v51 }
 0x529   :  { %v1571_v54 = vmul.f32 %v7090_v19, %v1554_v18  ;;  %vm1577_vm9 = vweird.f32 %v7090_v19 }
 0x52a   :  { %7091 = vrsqrt.f32 %v1555_v8  ;;  %v1481_v11 = vmul.f32 %v8969_v56, %v8969_v56  ;;  %vm1578_vm11 = vmor %vm1576_vm10, %vm1577_vm9  ;;  %vm1586_vm13 = vweird.f32 %v1555_v8 }
 0x52b   :  { %v1572_v48 = vmul.f32 %v7090_v19, %v1571_v54 }
 0x52c   :  { %v1511_v36 = vsel %vm347_vm1, %v1481_v11, 0.0  ;;  %v9001_v11 = vadd.f32 %v1375_v15, %v11757_v50 }
 0x52d   :  { %v1573_v27 = vmul.f32 0.5, %v1572_v48  ;;  %v1498_v6 = vpop.xlane.xlu2 %1497  ;;  %v1420_v30 = vpop.xlane.xlu0 %1419  ;;  %1512 = vadd.xlane.f32.xlu0 %v1511_v36 }
 0x52e   :  { %v1540_v44 = vmul.f32 %v1498_v6, %v7862_v13  ;;  %v1450_v17 = vmul.f32 %v1420_v30, %v7862_v13  ;;  %11758 = vst [vmem:[#allocation37_spill] sm:$0xff] %v9001_v11  ;;  %v1439_v30 = vsel %vm347_vm1, %v9001_v11, 0.0 }
 0x52f   :  { %v1574_v59 = vsub.f32 1.5, %v1573_v27 }
 0x530   :  { %v7092_v4 = vpop.eup %7091  ;;  %v1556_v53 = vadd.f32 1e-05, %v1540_v44  ;;  %v8983_v41 = vsub.f32 %v8897_v28, %v1450_v17 }
 0x531   :  { %v1575_v47 = vmul.f32 %v7090_v19, %v1574_v59  ;;  %v1581_v62 = vmul.f32 %v7092_v4, %v1555_v8  ;;  %vm1587_vm12 = vweird.f32 %v7092_v4 }
 0x532   :  { %7093 = vrsqrt.f32 %v1556_v53  ;;  %v1482_v25 = vmul.f32 %v8983_v41, %v8983_v41  ;;  %vm1588_vm14 = vmor %vm1586_vm13, %vm1587_vm12  ;;  %vm1596_vm0 = vweird.f32 %v1556_v53 }
 0x533   :  { %v1579_v26 = vsel %vm1578_vm11, %v7090_v19, %v1575_v47  ;;  %v1582_v57 = vmul.f32 %v7092_v4, %v1581_v62 }
 0x534   :  { %v1514_v46 = vsel %vm347_vm1, %v1482_v25, 0.0  ;;  %v1730_v10 = vmul.f32 %v1579_v26, %v8876_v32 }
 0x535   :  { %v1583_v18 = vmul.f32 0.5, %v1582_v57  ;;  %v1501_v39 = vpop.xlane.xlu1 %1500  ;;  %v1423_v7 = vpop.xlane.xlu2 %1422  ;;  %1515 = vadd.xlane.f32.xlu2 %v1514_v46  ;;  %1437 = vadd.xlane.f32.xlu0 %v1436_v14 }
 0x536   :  { %v1541_v51 = vmul.f32 %v1501_v39, %v7862_v13  ;;  %v1451_v35 = vmul.f32 %v1423_v7, %v7862_v13  ;;  %v1747_v19 = vmul.f32 %v8988_v9, %v1730_v10 }
 0x537   :  { %v1584_v49 = vsub.f32 1.5, %v1583_v18 }
 0x538   :  { %v7094_v54 = vpop.eup %7093  ;;  %v1557_v32 = vadd.f32 1e-05, %v1541_v51  ;;  %v9004_v48 = vsub.f32 %v8910_v24, %v1451_v35  ;;  %v1764_v31 = vadd.f32 %v8995_v60, %v1747_v19 }
 0x539   :  { %v1585_v0 = vmul.f32 %v7092_v4, %v1584_v49  ;;  %v1591_v55 = vmul.f32 %v7094_v54, %v1556_v53  ;;  %vm1597_vm15 = vweird.f32 %v7094_v54 }
 0x53a   :  { %7095 = vrsqrt.f32 %v1557_v32  ;;  %6738 = vmatmul.msk.f32.vlgmr.msra.gmra.mxu3 %vm347_vm1, %v1764_v31  ;;  %v1483_v36 = vmul.f32 %v9004_v48, %v9004_v48  ;;  %vm1598_vm2 = vmor %vm1596_vm0, %vm1597_vm15  ;;  %vm1606_vm4 = vweird.f32 %v1557_v32 }
 0x53b   :  { %v1589_v43 = vsel %vm1588_vm14, %v7092_v4, %v1585_v0  ;;  %v1592_v27 = vmul.f32 %v7094_v54, %v1591_v55 }
 0x53c   :  { %v1517_v6 = vsel %vm347_vm1, %v1483_v36, 0.0  ;;  %v1731_v44 = vmul.f32 %v1589_v43, %v8887_v5 }
 0x53d   :  { %v1593_v17 = vmul.f32 0.5, %v1592_v27  ;;  %v1504_v59 = vpop.xlane.xlu0 %1503  ;;  %v1426_v8 = vpop.xlane.xlu1 %1425  ;;  %1518 = vadd.xlane.f32.xlu1 %v1517_v6  ;;  %1440 = vadd.xlane.f32.xlu2 %v1439_v30 }
 0x53e   :  { %v1542_v63 = vmul.f32 %v1504_v59, %v7862_v13  ;;  %v1452_v40 = vmul.f32 %v1426_v8, %v7862_v13  ;;  %v1748_v29 = vmul.f32 %v8988_v9, %v1731_v44 }
 0x53f   :  { %v1594_v4 = vsub.f32 1.5, %v1593_v17 }
 0x540   :  { %v7096_v47 = vpop.eup %7095  ;;  %v1558_v62 = vadd.f32 1e-05, %v1542_v63  ;;  %v9018_v25 = vsub.f32 %v8923_v1, %v1452_v40  ;;  %v1765_v5 = vadd.f32 %v8995_v60, %v1748_v29 }
 0x541   :  { %v1595_v26 = vmul.f32 %v7094_v54, %v1594_v4  ;;  %v1601_v57 = vmul.f32 %v7096_v47, %v1557_v32  ;;  %vm1607_vm3 = vweird.f32 %v7096_v47 }
 0x542   :  { %7097 = vrsqrt.f32 %v1558_v62  ;;  %6739 = vmatmul.msk.f32.gmra.mxu3 %vm347_vm1, %v1765_v5  ;;  %v1484_v15 = vmul.f32 %v9018_v25, %v9018_v25  ;;  %vm1608_vm5 = vmor %vm1606_vm4, %vm1607_vm3  ;;  %vm1616_vm7 = vweird.f32 %v1558_v62 }
 0x543   :  { %v1599_v46 = vsel %vm1598_vm2, %v7094_v54, %v1595_v26  ;;  %v1602_v14 = vmul.f32 %v7096_v47, %v1601_v57 }
 0x544   :  { %v1520_v10 = vsel %vm347_vm1, %v1484_v15, 0.0  ;;  %v1732_v18 = vmul.f32 %v1599_v46, %v8900_v22 }
 0x545   :  { %v1603_v39 = vmul.f32 0.5, %v1602_v14  ;;  %v1507_v7 = vpop.xlane.xlu2 %1506  ;;  %v1429_v51 = vpop.xlane.xlu0 %1428  ;;  %1521 = vadd.xlane.f32.xlu0 %v1520_v10 }
 0x546   :  { %v1543_v53 = vmul.f32 %v1507_v7, %v7862_v13  ;;  %v1453_v35 = vmul.f32 %v1429_v51, %v7862_v13  ;;  %v1749_v19 = vmul.f32 %v8988_v9, %v1732_v18 }
 0x547   :  { %v1604_v49 = vsub.f32 1.5, %v1603_v39 }
 0x548   :  { %v7098_v50 = vpop.eup %7097  ;;  %v1559_v31 = vadd.f32 1e-05, %v1543_v53  ;;  %v9030_v54 = vsub.f32 %v8936_v45, %v1453_v35  ;;  %v1766_v0 = vadd.f32 %v8995_v60, %v1749_v19 }
 0x549   :  { %v1605_v22 = vmul.f32 %v7096_v47, %v1604_v49  ;;  %v1611_v55 = vmul.f32 %v7098_v50, %v1558_v62  ;;  %vm1617_vm6 = vweird.f32 %v7098_v50 }
 0x54a   :  { %7099 = vrsqrt.f32 %v1559_v31  ;;  %6740 = vmatmul.msk.f32.gmra.mxu3 %vm347_vm1, %v1766_v0  ;;  %v1485_v36 = vmul.f32 %v9030_v54, %v9030_v54  ;;  %vm1618_vm8 = vmor %vm1616_vm7, %vm1617_vm6  ;;  %vm1626_vm10 = vweird.f32 %v1559_v31 }
 0x54b   :  { %v1609_v43 = vsel %vm1608_vm5, %v7096_v47, %v1605_v22  ;;  %v1612_v27 = vmul.f32 %v7098_v50, %v1611_v55 }
 0x54c   :  { %v1523_v6 = vsel %vm347_vm1, %v1485_v36, 0.0  ;;  %v1733_v30 = vmul.f32 %v1609_v43, %v8913_v52 }
 0x54d   :  { %v1613_v44 = vmul.f32 0.5, %v1612_v27  ;;  %v1510_v17 = vpop.xlane.xlu1 %1509  ;;  %v1432_v59 = vpop.xlane.xlu2 %1431  ;;  %1524 = vadd.xlane.f32.xlu1 %v1523_v6 }
 0x54e   :  { %v1544_v32 = vmul.f32 %v1510_v17, %v7862_v13  ;;  %v1454_v8 = vmul.f32 %v1432_v59, %v7862_v13  ;;  %v1750_v63 = vmul.f32 %v8988_v9, %v1733_v30 }
 0x54f   :  { %v1614_v40 = vsub.f32 1.5, %v1613_v44 }
 0x550   :  { %v7100_v29 = vpop.eup %7099  ;;  %v1560_v4 = vadd.f32 1e-05, %v1544_v32  ;;  %v9042_v47 = vsub.f32 %v8949_v12, %v1454_v8  ;;  %v1767_v5 = vadd.f32 %v8995_v60, %v1750_v63 }
 0x551   :  { %v1615_v52 = vmul.f32 %v7098_v50, %v1614_v40  ;;  %v1621_v26 = vmul.f32 %v7100_v29, %v1559_v31  ;;  %vm1627_vm9 = vweird.f32 %v7100_v29 }
 0x552   :  { %7101 = vrsqrt.f32 %v1560_v4  ;;  %6741 = vmatmul.msk.f32.gmra.mxu3 %vm347_vm1, %v1767_v5  ;;  %v1486_v57 = vmul.f32 %v9042_v47, %v9042_v47  ;;  %vm1628_vm11 = vmor %vm1626_vm10, %vm1627_vm9  ;;  %vm1636_vm13 = vweird.f32 %v1560_v4 }
 0x553   :  { %v1619_v15 = vsel %vm1618_vm8, %v7098_v50, %v1615_v52  ;;  %v1622_v46 = vmul.f32 %v7100_v29, %v1621_v26 }
 0x554   :  { %v1526_v14 = vsel %vm347_vm1, %v1486_v57, 0.0  ;;  %v1734_v10 = vmul.f32 %v1619_v15, %v8926_v33 }
 0x555   :  { %v1623_v18 = vmul.f32 0.5, %v1622_v46  ;;  %v1435_v39 = vpop.xlane.xlu1 %1434  ;;  %1527 = vadd.xlane.f32.xlu2 %v1526_v14 }
 0x556   :  { %v1455_v7 = vmul.f32 %v1435_v39, %v7862_v13  ;;  %v1751_v62 = vmul.f32 %v8988_v9, %v1734_v10 }
 0x557   :  { %v1624_v51 = vsub.f32 1.5, %v1623_v18 }
 0x558   :  { %v7102_v53 = vpop.eup %7101  ;;  %v9053_v35 = vsub.f32 %v8960_v23, %v1455_v7  ;;  %v1768_v19 = vadd.f32 %v8995_v60, %v1751_v62 }
 0x559   :  { %v1625_v49 = vmul.f32 %v7100_v29, %v1624_v51  ;;  %v1631_v50 = vmul.f32 %v7102_v53, %v1560_v4  ;;  %vm1637_vm12 = vweird.f32 %v7102_v53 }
 0x55a   :  { %6742 = vmatmul.msk.f32.gmra.mxu3 %vm347_vm1, %v1768_v19  ;;  %v1487_v33 = vmul.f32 %v9053_v35, %v9053_v35  ;;  %vm1638_vm14 = vmor %vm1636_vm13, %vm1637_vm12 }
 0x55b   :  { %v1629_v0 = vsel %vm1628_vm11, %v7100_v29, %v1625_v49  ;;  %v1632_v22 = vmul.f32 %v7102_v53, %v1631_v50 }
 0x55c   :  { %v1529_v55 = vsel %vm347_vm1, %v1487_v33, 0.0  ;;  %v1735_v36 = vmul.f32 %v1629_v0, %v8939_v20 }
 0x55d   :  { %v1633_v43 = vmul.f32 0.5, %v1632_v22  ;;  %1530 = vadd.xlane.f32.xlu0 %v1529_v55 }
 0x55e   :  { %v1752_v27 = vmul.f32 %v8988_v9, %v1735_v36 }
 0x55f   :  { %v1634_v6 = vsub.f32 1.5, %v1633_v43 }
 0x560   :  { %v1769_v31 = vadd.f32 %v8995_v60, %v1752_v27 }
 0x561   :  { %v1635_v30 = vmul.f32 %v7102_v53, %v1634_v6 }
 0x562   :  { %6743 = vmatmul.msk.f32.gmra.mxu3 %vm347_vm1, %v1769_v31 }
 0x563   :  { %v1639_v44 = vsel %vm1638_vm14, %v7102_v53, %v1635_v30 }
 0x564   :  { %v1736_v17 = vmul.f32 %v1639_v44, %v8952_v37 }
 0x566   :  { %v1753_v59 = vmul.f32 %v8988_v9, %v1736_v17 }
 0x568   :  { %v1770_v20 = vadd.f32 %v8995_v60, %v1753_v59 }
 0x56a   :  { %6744 = vmatmul.msk.f32.gmra.mxu3 %vm347_vm1, %v1770_v20 }
 0x5a0   :  { %v1513_v32 = vpop.xlane.xlu0 %1512 }
 0x5a1   :  { %v1545_v8 = vmul.f32 %v1513_v32, %v7862_v13 }
 0x5a3   :  { %v1561_v63 = vadd.f32 1e-05, %v1545_v8 }
 0x5a5   :  { %7103 = vrsqrt.f32 %v1561_v63  ;;  %vm1646_vm0 = vweird.f32 %v1561_v63 }
 0x5a8   :  { %v1516_v40 = vpop.xlane.xlu2 %1515  ;;  %v1438_v29 = vpop.xlane.xlu0 %1437 }
 0x5a9   :  { %v1546_v4 = vmul.f32 %v1516_v40, %v7862_v13  ;;  %v1456_v5 = vmul.f32 %v1438_v29, %v7862_v13 }
 0x5ab   :  { %v7104_v52 = vpop.eup %7103  ;;  %v1562_v26 = vadd.f32 1e-05, %v1546_v4  ;;  %v9072_v37 = vsub.f32 %v8980_v3, %v1456_v5 }
 0x5ac   :  { %v1641_v57 = vmul.f32 %v7104_v52, %v1561_v63  ;;  %vm1647_vm15 = vweird.f32 %v7104_v52 }
 0x5ad   :  { %7105 = vrsqrt.f32 %v1562_v26  ;;  %v1488_v15 = vmul.f32 %v9072_v37, %v9072_v37  ;;  %vm1648_vm2 = vmor %vm1646_vm0, %vm1647_vm15  ;;  %vm1656_vm4 = vweird.f32 %v1562_v26 }
 0x5ae   :  { %v1642_v46 = vmul.f32 %v7104_v52, %v1641_v57 }
 0x5af   :  { %v1532_v14 = vsel %vm347_vm1, %v1488_v15, 0.0 }
 0x5b0   :  { %v1643_v10 = vmul.f32 0.5, %v1642_v46  ;;  %v1519_v18 = vpop.xlane.xlu1 %1518  ;;  %1533 = vadd.xlane.f32.xlu1 %v1532_v14  ;;  %v1441_v39 = vpop.xlane.xlu2 %1440 }
 0x5b1   :  { %v1547_v7 = vmul.f32 %v1519_v18, %v7862_v13  ;;  %v1457_v62 = vmul.f32 %v1441_v39, %v7862_v13 }
 0x5b2   :  { %v1644_v51 = vsub.f32 1.5, %v1643_v10 }
 0x5b3   :  { %v7106_v53 = vpop.eup %7105  ;;  %v1563_v19 = vadd.f32 1e-05, %v1547_v7  ;;  %v9080_v49 = vsub.f32 %v9001_v11, %v1457_v62 }
 0x5b4   :  { %v1645_v50 = vmul.f32 %v7104_v52, %v1644_v51  ;;  %v1651_v33 = vmul.f32 %v7106_v53, %v1562_v26  ;;  %vm1657_vm3 = vweird.f32 %v7106_v53 }
 0x5b5   :  { %7107 = vrsqrt.f32 %v1563_v19  ;;  %v1489_v0 = vmul.f32 %v9080_v49, %v9080_v49  ;;  %vm1658_vm5 = vmor %vm1656_vm4, %vm1657_vm3  ;;  %vm1666_vm7 = vweird.f32 %v1563_v19 }
 0x5b6   :  { %v1649_v22 = vsel %vm1648_vm2, %v7104_v52, %v1645_v50  ;;  %v1652_v55 = vmul.f32 %v7106_v53, %v1651_v33 }
 0x5b7   :  { %v1535_v36 = vsel %vm347_vm1, %v1489_v0, 0.0  ;;  %v1737_v43 = vmul.f32 %v1649_v22, %v8969_v56 }
 0x5b8   :  { %v1653_v27 = vmul.f32 0.5, %v1652_v55  ;;  %v1522_v6 = vpop.xlane.xlu0 %1521  ;;  %1536 = vadd.xlane.f32.xlu2 %v1535_v36 }
 0x5b9   :  { %v1548_v31 = vmul.f32 %v1522_v6, %v7862_v13  ;;  %v1754_v30 = vmul.f32 %v8988_v9, %v1737_v43 }
 0x5ba   :  { %v1654_v44 = vsub.f32 1.5, %v1653_v27 }
 0x5bb   :  { %v7108_v17 = vpop.eup %7107  ;;  %v1564_v59 = vadd.f32 1e-05, %v1548_v31  ;;  %v1771_v20 = vadd.f32 %v8995_v60, %v1754_v30 }
 0x5bc   :  { %v1655_v32 = vmul.f32 %v7106_v53, %v1654_v44  ;;  %v1661_v8 = vmul.f32 %v7108_v17, %v1563_v19  ;;  %vm1667_vm6 = vweird.f32 %v7108_v17 }
 0x5bd   :  { %7109 = vrsqrt.f32 %v1564_v59  ;;  %6745 = vmatmul.msk.f32.gmra.mxu3 %vm347_vm1, %v1771_v20  ;;  %vm1668_vm8 = vmor %vm1666_vm7, %vm1667_vm6  ;;  %vm1676_vm10 = vweird.f32 %v1564_v59  ;;  %v1851_v31 = vpop.f32.mrf.mxu3 }
 0x5be   :  { %v1659_v56 = vsel %vm1658_vm5, %v7106_v53, %v1655_v32  ;;  %v1662_v63 = vmul.f32 %v7108_v17, %v1661_v8 }
 0x5bf   :  { %v1738_v40 = vmul.f32 %v1659_v56, %v8983_v41 }
 0x5c0   :  { %v1663_v29 = vmul.f32 0.5, %v1662_v63  ;;  %v1525_v4 = vpop.xlane.xlu1 %1524 }
 0x5c1   :  { %v1549_v5 = vmul.f32 %v1525_v4, %v7862_v13  ;;  %v1755_v52 = vmul.f32 %v8988_v9, %v1738_v40 }
 0x5c2   :  { %v1664_v57 = vsub.f32 1.5, %v1663_v29  ;;  %v9104_v29 = vld [vmem:[%s7578_s8] ss:$0 sm:$0xff] }
 0x5c3   :  { %v7110_v15 = vpop.eup %7109  ;;  %v1565_v46 = vadd.f32 1e-05, %v1549_v5  ;;  %v1772_v26 = vadd.f32 %v8995_v60, %v1755_v52 }
 0x5c4   :  { %v1665_v14 = vmul.f32 %v7108_v17, %v1664_v57  ;;  %v1671_v10 = vmul.f32 %v7110_v15, %v1564_v59  ;;  %vm1677_vm9 = vweird.f32 %v7110_v15 }
 0x5c5   :  { %7111 = vrsqrt.f32 %v1565_v46  ;;  %6746 = vmatmul.msk.f32.gmra.mxu3 %vm347_vm1, %v1772_v26  ;;  %vm1678_vm11 = vmor %vm1676_vm10, %vm1677_vm9  ;;  %vm1686_vm13 = vweird.f32 %v1565_v46 }
 0x5c6   :  { %v1669_v41 = vsel %vm1668_vm8, %v7108_v17, %v1665_v14  ;;  %v1672_v18 = vmul.f32 %v7110_v15, %v1671_v10 }
 0x5c7   :  { %v1739_v39 = vmul.f32 %v1669_v41, %v9004_v48 }
 0x5c8   :  { %v1673_v7 = vmul.f32 0.5, %v1672_v18  ;;  %v1528_v62 = vpop.xlane.xlu2 %1527 }
 0x5c9   :  { %v1550_v53 = vmul.f32 %v1528_v62, %v7862_v13  ;;  %v1756_v50 = vmul.f32 %v8988_v9, %v1739_v39 }
 0x5ca   :  { %v1674_v51 = vsub.f32 1.5, %v1673_v7 }
 0x5cb   :  { %v7112_v33 = vpop.eup %7111  ;;  %v1566_v22 = vadd.f32 1e-05, %v1550_v53  ;;  %v1773_v55 = vadd.f32 %v8995_v60, %v1756_v50 }
 0x5cc   :  { %v1681_v0 = vmul.f32 %v7112_v33, %v1565_v46  ;;  %v1675_v19 = vmul.f32 %v7110_v15, %v1674_v51  ;;  %vm1687_vm12 = vweird.f32 %v7112_v33  ;;  %v9110_v46 = vadd.f32 %v9104_v29, %v1851_v31 }
 0x5cd   :  { %7113 = vrsqrt.f32 %v1566_v22  ;;  %6747 = vmatmul.msk.f32.gmra.mxu3 %vm347_vm1, %v1773_v55  ;;  %vm1688_vm14 = vmor %vm1686_vm13, %vm1687_vm12  ;;  %vm1696_vm0 = vweird.f32 %v1566_v22 }
 0x5ce   :  { %v1682_v36 = vmul.f32 %v7112_v33, %v1681_v0  ;;  %v1679_v27 = vsel %vm1678_vm11, %v7110_v15, %v1675_v19  ;;  %v9115_v7 = vmul.f32 0.70710677, %v9110_v46 }
 0x5cf   :  { %v1740_v17 = vmul.f32 %v1679_v27, %v9018_v25  ;;  %v1854_v25 = vpop.f32.mrf.mxu3 }
 0x5d0   :  { %v1683_v48 = vmul.f32 0.5, %v1682_v36  ;;  %v1531_v43 = vpop.xlane.xlu0 %1530  ;;  %v9121_v50 = vand.u32 2147483647, %v9115_v7  ;;  %v9127_v55 = vadd.f32 %v9104_v29, %v1854_v25 }
 0x5d1   :  { %v1551_v30 = vmul.f32 %v1531_v43, %v7862_v13  ;;  %v1757_v59 = vmul.f32 %v8988_v9, %v1740_v17 }
 0x5d2   :  { %v1684_v6 = vsub.f32 1.5, %v1683_v48  ;;  %v1947_v19 = vmul.f32 0.3275911, %v9121_v50  ;;  %v9132_v43 = vmul.f32 0.70710677, %v9127_v55  ;;  %v2363_v38 = vsub.f32 0.0, %v9121_v50 }
 0x5d3   :  { %v7114_v44 = vpop.eup %7113  ;;  %v1567_v32 = vadd.f32 1e-05, %v1551_v30  ;;  %v1774_v5 = vadd.f32 %v8995_v60, %v1757_v59 }
 0x5d4   :  { %v1691_v20 = vmul.f32 %v7114_v44, %v1566_v22  ;;  %v1685_v8 = vmul.f32 %v7112_v33, %v1684_v6  ;;  %vm1697_vm15 = vweird.f32 %v7114_v44  ;;  %v1963_v48 = vadd.f32 1.0, %v1947_v19 }
 0x5d5   :  { %7115 = vrsqrt.f32 %v1567_v32  ;;  %vm1698_vm2 = vmor %vm1696_vm0, %vm1697_vm15  ;;  %6748 = vmatmul.msk.f32.gmra.mxu3 %vm347_vm1, %v1774_v5  ;;  %vm1706_vm4 = vweird.f32 %v1567_v32 }
 0x5d6   :  { %v1692_v56 = vmul.f32 %v7114_v44, %v1691_v20  ;;  %v1689_v40 = vsel %vm1688_vm14, %v7112_v33, %v1685_v8  ;;  %7117 = vrcp.f32 %v1963_v48  ;;  %vm1984_vm7 = vweird.f32 %v1963_v48 }
 0x5d7   :  { %v1741_v15 = vmul.f32 %v1689_v40, %v9030_v54  ;;  %v1857_v33 = vpop.f32.mrf.mxu3 }
 0x5d8   :  { %v1693_v63 = vmul.f32 0.5, %v1692_v56  ;;  %v9135_v6 = vadd.f32 %v9104_v29, %v1857_v33 }
 0x5d9   :  { %v1758_v41 = vmul.f32 %v8988_v9, %v1741_v15 }
 0x5da   :  { %v1694_v4 = vsub.f32 1.5, %v1693_v63  ;;  %v9142_v30 = vmul.f32 0.70710677, %v9135_v6 }
 0x5db   :  { %v7116_v52 = vpop.eup %7115  ;;  %v1775_v54 = vadd.f32 %v8995_v60, %v1758_v41 }
 0x5dc   :  { %v1695_v57 = vmul.f32 %v7114_v44, %v1694_v4  ;;  %v1701_v26 = vmul.f32 %v7116_v52, %v1567_v32  ;;  %vm1707_vm3 = vweird.f32 %v7116_v52  ;;  %v7118_v17 = vpop.eup %7117  ;;  %v9147_v20 = vand.u32 2147483647, %v9142_v30 }
 0x5dd   :  { %6749 = vmatmul.msk.f32.gmra.mxu3 %vm347_vm1, %v1775_v54  ;;  %vm1708_vm5 = vmor %vm1706_vm4, %vm1707_vm3  ;;  %v1980_v59 = vmul.f32 %v7118_v17, %v1963_v48  ;;  %vm1985_vm6 = vweird.f32 %v7118_v17 }
 0x5de   :  { %v1699_v14 = vsel %vm1698_vm2, %v7114_v44, %v1695_v57  ;;  %v1702_v10 = vmul.f32 %v7116_v52, %v1701_v26  ;;  %v1949_v63 = vmul.f32 0.3275911, %v9147_v20  ;;  %vm1986_vm8 = vmor %vm1984_vm7, %vm1985_vm6 }
 0x5df   :  { %v1742_v39 = vmul.f32 %v1699_v14, %v9042_v47  ;;  %v1860_v27 = vpop.f32.mrf.mxu3  ;;  %v1981_v5 = vsub.f32 1.0, %v1980_v59 }
 0x5e0   :  { %v1703_v18 = vmul.f32 0.5, %v1702_v10  ;;  %v9150_v32 = vadd.f32 %v9104_v29, %v1860_v27 }
 0x5e1   :  { %v1759_v53 = vmul.f32 %v8988_v9, %v1742_v39  ;;  %v1982_v15 = vmul.f32 %v7118_v17, %v1981_v5 }
 0x5e2   :  { %v1704_v62 = vsub.f32 1.5, %v1703_v18  ;;  %v9154_v40 = vmul.f32 0.70710677, %v9150_v32 }
 0x5e3   :  { %v1776_v47 = vadd.f32 %v8995_v60, %v1759_v53  ;;  %v1983_v18 = vadd.f32 %v7118_v17, %v1982_v15 }
 0x5e4   :  { %v1705_v51 = vmul.f32 %v7116_v52, %v1704_v62  ;;  %v9162_v25 = vand.u32 2147483647, %v9154_v40  ;;  %v1990_v62 = vand.u32 2147483648, %v1963_v48 }
 0x5e5   :  { %6750 = vmatmul.msk.f32.gmra.mxu3 %vm347_vm1, %v1776_v47  ;;  %v1987_v47 = vsel %vm1986_vm8, %v7118_v17, %v1983_v18 }
 0x5e6   :  { %v1709_v0 = vsel %vm1708_vm5, %v7116_v52, %v1705_v51  ;;  %v9159_v52 = vadd.f32 1.0, %v1949_v63  ;;  %v1950_v10 = vmul.f32 0.3275911, %v9162_v25  ;;  %v1988_v51 = vand.u32 2147483647, %v1963_v48 }
 0x5e7   :  { %v1743_v22 = vmul.f32 %v1709_v0, %v9053_v35  ;;  %v9139_v35 = vand.u32 2147483647, %v9132_v43  ;;  %v1863_v56 = vpop.f32.mrf.mxu3  ;;  %v1991_v19 = vor.u32 1.1754944e-38, %v1990_v62 }
 0x5e8   :  { %v9157_v4 = vadd.f32 %v9104_v29, %v1863_v56  ;;  %v9175_v53 = vadd.f32 1.0, %v1950_v10  ;;  %vm1989_vm9 = vcmp.eq.f32.partialorder %v1988_v51, 8.507059e+37  ;;  %vm2014_vm15 = vweird.f32 %v9159_v52 }
 0x5e9   :  { %v1760_v36 = vmul.f32 %v8988_v9, %v1743_v22  ;;  %v1948_v44 = vmul.f32 0.3275911, %v9139_v35  ;;  %v9182_v27 = vsel %vm1989_vm9, %v1991_v19, %v1987_v47 }
 0x5ea   :  { %v9165_v57 = vmul.f32 0.70710677, %v9157_v4  ;;  %v2219_v17 = vmul.f32 1.0614054, %v9182_v27  ;;  %vm2029_vm4 = vweird.f32 %v9175_v53 }
 0x5eb   :  { %v1777_v31 = vadd.f32 %v8995_v60, %v1760_v36  ;;  %v1964_v8 = vadd.f32 1.0, %v1948_v44 }
 0x5ec   :  { %v9170_v41 = vand.u32 2147483647, %v9165_v57 }
 0x5ed   :  { %6751 = vmatmul.msk.f32.gmra.mxu3 %vm347_vm1, %v1777_v31  ;;  %7119 = vrcp.f32 %v1964_v8  ;;  %v2005_v10 = vand.u32 2147483648, %v1964_v8  ;;  %vm1999_vm11 = vweird.f32 %v1964_v8  ;;  %v2003_v51 = vand.u32 2147483647, %v1964_v8 }
 0x5ee   :  { %7121 = vrcp.f32 %v9159_v52  ;;  %v1951_v33 = vmul.f32 0.3275911, %v9170_v41 }
 0x5ef   :  { %v1866_v14 = vpop.f32.mrf.mxu3  ;;  %7123 = vrcp.f32 %v9175_v53  ;;  %vm2004_vm13 = vcmp.eq.f32.partialorder %v2003_v51, 8.507059e+37 }
 0x5f0   :  { %v9173_v54 = vadd.f32 %v9104_v29, %v1866_v14  ;;  %v9185_v48 = vadd.f32 1.0, %v1951_v33 }
 0x5f2   :  { %v9179_v36 = vmul.f32 0.70710677, %v9173_v54  ;;  %7125 = vrcp.f32 %v9185_v48  ;;  %vm2044_vm7 = vweird.f32 %v9185_v48 }
 0x5f3   :  { %v7120_v26 = vpop.eup %7119 }
 0x5f4   :  { %v1995_v39 = vmul.f32 %v7120_v26, %v1964_v8  ;;  %v7122_v0 = vpop.eup %7121  ;;  %v9188_v59 = vand.u32 2147483647, %v9179_v36  ;;  %vm2000_vm10 = vweird.f32 %v7120_v26 }
 0x5f5   :  { %v2010_v31 = vmul.f32 %v7122_v0, %v9159_v52  ;;  %v9195_v15 = vpop.eup %7123  ;;  %vm2001_vm12 = vmor %vm1999_vm11, %vm2000_vm10  ;;  %vm2015_vm14 = vweird.f32 %v7122_v0 }
 0x5f6   :  { %v1996_v22 = vsub.f32 1.0, %v1995_v39  ;;  %v1952_v18 = vmul.f32 0.3275911, %v9188_v59  ;;  %v2235_v39 = vadd.f32 -1.4531521, %v2219_v17  ;;  %v2025_v47 = vmul.f32 %v9195_v15, %v9175_v53  ;;  %vm2016_vm0 = vmor %vm2014_vm15, %vm2015_vm14 }
 0x5f7   :  { %v1869_v44 = vpop.f32.mrf.mxu3  ;;  %v2011_v5 = vsub.f32 1.0, %v2010_v31  ;;  %v2006_v31 = vor.u32 1.1754944e-38, %v2005_v10  ;;  %vm2030_vm3 = vweird.f32 %v9195_v15 }
 0x5f8   :  { %v1997_v56 = vmul.f32 %v7120_v26, %v1996_v22  ;;  %v9192_v63 = vadd.f32 %v9104_v29, %v1869_v44  ;;  %v9203_v19 = vpop.eup %7125  ;;  %v9205_v44 = vadd.f32 1.0, %v1952_v18  ;;  %v2026_v61 = vsub.f32 1.0, %v2025_v47  ;;  %vm2031_vm5 = vmor %vm2029_vm4, %vm2030_vm3 }
 0x5f9   :  { %v2012_v33 = vmul.f32 %v7122_v0, %v2011_v5  ;;  %v2020_v5 = vand.u32 2147483648, %v9159_v52  ;;  %vm2045_vm6 = vweird.f32 %v9203_v19 }
 0x5fa   :  { %v1998_v14 = vadd.f32 %v7120_v26, %v1997_v56  ;;  %v9199_v62 = vmul.f32 0.70710677, %v9192_v63  ;;  %v2251_v56 = vmul.f32 %v2235_v39, %v9182_v27  ;;  %7127 = vrcp.f32 %v9205_v44  ;;  %vm9255_vm9 = vmor %vm2044_vm7, %vm2045_vm6 }
 0x5fb   :  { %v2013_v8 = vadd.f32 %v7122_v0, %v2012_v33  ;;  %v2027_v51 = vmul.f32 %v9195_v15, %v2026_v61  ;;  %v2021_v47 = vor.u32 1.1754944e-38, %v2020_v5  ;;  %v2035_v61 = vand.u32 2147483648, %v9175_v53 }
 0x5fc   :  { %v2002_v22 = vsel %vm2001_vm12, %v7120_v26, %v1998_v14  ;;  %v9209_v17 = vand.u32 2147483647, %v9199_v62  ;;  %v2040_v26 = vmul.f32 %v9203_v19, %v9185_v48  ;;  %v2018_v14 = vand.u32 2147483647, %v9159_v52 }
 0x5fd   :  { %v9211_v42 = vsel %vm2004_vm13, %v2006_v31, %v2002_v22  ;;  %v2267_v39 = vadd.f32 1.4214138, %v2251_v56  ;;  %v2017_v33 = vsel %vm2016_vm0, %v7122_v0, %v2013_v8  ;;  %v2028_v56 = vadd.f32 %v9195_v15, %v2027_v51 }
 0x5fe   :  { %v1953_v10 = vmul.f32 0.3275911, %v9209_v17  ;;  %v2220_v18 = vmul.f32 1.0614054, %v9211_v42  ;;  %v2041_v22 = vsub.f32 1.0, %v2040_v26  ;;  %vm2019_vm2 = vcmp.eq.f32.partialorder %v2018_v14, 8.507059e+37 }
 0x5ff   :  { %v9224_v2 = vsel %vm2019_vm2, %v2021_v47, %v2017_v33  ;;  %v2283_v52 = vmul.f32 %v2267_v39, %v9182_v27  ;;  %v2033_v26 = vand.u32 2147483647, %v9175_v53  ;;  %v2379_v51 = vmul.f32 %v2363_v38, %v9121_v50 }
 0x600   :  { %v9222_v31 = vadd.f32 1.0, %v1953_v10  ;;  %v2236_v58 = vadd.f32 -1.4531521, %v2220_v18  ;;  %v9226_v24 = vpop.eup %7127  ;;  %v2042_v0 = vmul.f32 %v9203_v19, %v2041_v22  ;;  %v2221_v5 = vmul.f32 1.0614054, %v9224_v2 }
 0x601   :  { %v2055_v14 = vmul.f32 %v9226_v24, %v9205_v44  ;;  %v2299_v39 = vadd.f32 -0.28449672, %v2283_v52  ;;  %v2036_v33 = vor.u32 1.1754944e-38, %v2035_v61  ;;  %v2050_v47 = vand.u32 2147483648, %v9185_v48 }
 0x602   :  { %7129 = vrcp.f32 %v9222_v31  ;;  %v2252_v18 = vmul.f32 %v2236_v58, %v9211_v42  ;;  %v2043_v53 = vadd.f32 %v9203_v19, %v2042_v0  ;;  %v2237_v22 = vadd.f32 -1.4531521, %v2221_v5 }
 0x603   :  { %vm2034_vm8 = vcmp.eq.f32.partialorder %v2033_v26, 8.507059e+37  ;;  %v2056_v58 = vsub.f32 1.0, %v2055_v14  ;;  %v2048_v38 = vand.u32 2147483647, %v9185_v48  ;;  %v2364_v50 = vsub.f32 0.0, %v9139_v35 }
 0x604   :  { %v2315_v0 = vmul.f32 %v2299_v39, %v9182_v27  ;;  %v2047_v26 = vsel %vm9255_vm9, %v9203_v19, %v2043_v53  ;;  %v2395_v14 = vmul.f32 1.442695, %v2379_v51  ;;  %v2253_v48 = vmul.f32 %v2237_v22, %v9224_v2 }
 0x605   :  { %v2057_v28 = vmul.f32 %v9226_v24, %v2056_v58  ;;  %vm2049_vm10 = vcmp.eq.f32.partialorder %v2048_v38, 8.507059e+37  ;;  %v2380_v39 = vmul.f32 %v2364_v50, %v9139_v35  ;;  %vm2060_vm11 = vweird.f32 %v9226_v24 }
 0x606   :  { %v2331_v53 = vadd.f32 0.2548296, %v2315_v0  ;;  %v2269_v58 = vadd.f32 1.4214138, %v2253_v48  ;;  %vm2059_vm12 = vweird.f32 %v9205_v44  ;;  %v2063_v48 = vand.u32 2147483647, %v9205_v44 }
 0x607   :  { %v2058_v35 = vadd.f32 %v9226_v24, %v2057_v28  ;;  %v2397_v38 = vmul.f32 1.442695, %v2380_v39  ;;  %vm9288_vm14 = vmor %vm2059_vm12, %vm2060_vm11  ;;  %vm2074_vm4 = vweird.f32 %v9222_v31  ;;  %vm2547_vm11 = vcmask 261120  }
 0x608   :  { %v9259_v61 = vpop.eup %7129  ;;  %v2347_v0 = vmul.f32 %v2331_v53, %v9182_v27  ;;  %v2285_v27 = vmul.f32 %v2269_v58, %v9224_v2  ;;  %vm2064_vm2 = vcmp.eq.f32.partialorder %v2063_v48, 8.507059e+37  ;;  %vm2460_vm12 = vcmp.lt.f32.partialorder %v9132_v43, 0.0 }
 0x609   :  { %vm2075_vm3 = vweird.f32 %v9259_v61  ;;  %v1900_v43 = vmul.f32 0.5, %v9127_v55 }
 0x60a   :  { %vm9332_vm6 = vmor %vm2074_vm4, %vm2075_vm3  ;;  %vm2462_vm3 = vcmp.lt.f32.partialorder %v9154_v40, 0.0 }
 0x623   :  { %v1534_v11 = vpop.xlane.xlu1 %1533 }
 0x624   :  { %v1552_v8 = vmul.f32 %v1534_v11, %v7862_v13  ;;  %v2032_v11 = vsel %vm2031_vm5, %v9195_v15, %v2028_v56 }
 0x625   :  { %v9251_v52 = vsel %vm2034_vm8, %v2036_v33, %v2032_v11 }
 0x626   :  { %v9241_v10 = vadd.f32 1e-05, %v1552_v8  ;;  %v2268_v8 = vadd.f32 1.4214138, %v2252_v18  ;;  %v2051_v18 = vor.u32 1.1754944e-38, %v2050_v47  ;;  %v2065_v47 = vand.u32 2147483648, %v9205_v44 }
 0x627   :  { %v2222_v11 = vmul.f32 1.0614054, %v9251_v52  ;;  %v2062_v44 = vsel %vm9288_vm14, %v9226_v24, %v2058_v35 }
 0x628   :  { %7131 = vrsqrt.f32 %v9241_v10  ;;  %v2284_v34 = vmul.f32 %v2268_v8, %v9211_v42  ;;  %v9276_v51 = vsel %vm2049_vm10, %v2051_v18, %v2047_v26  ;;  %v2365_v18 = vsub.f32 0.0, %v9147_v20 }
 0x629   :  { %v2238_v56 = vadd.f32 -1.4531521, %v2222_v11  ;;  %v2223_v8 = vmul.f32 1.0614054, %v9276_v51  ;;  %v2066_v11 = vor.u32 1.1754944e-38, %v2065_v47  ;;  %vm1716_vm15 = vweird.f32 %v9241_v10 }
 0x62a   :  { %vm2459_vm10 = vcmp.lt.f32.partialorder %v9115_v7, 0.0 }
 0x62b   :  { %v1537_v15 = vpop.xlane.xlu2 %1536 }
 0x62c   :  { %v1553_v5 = vmul.f32 %v1537_v15, %v7862_v13  ;;  %v2070_v15 = vmul.f32 %v9259_v61, %v9222_v31 }
 0x62e   :  { %v7132_v33 = vpop.eup %7131  ;;  %v9269_v3 = vadd.f32 1e-05, %v1553_v5  ;;  %v2300_v5 = vadd.f32 -0.28449672, %v2284_v34  ;;  %v2071_v50 = vsub.f32 1.0, %v2070_v15 }
 0x62f   :  { %v1711_v19 = vmul.f32 %v7132_v33, %v9241_v10  ;;  %vm1717_vm13 = vweird.f32 %v7132_v33  ;;  %v2239_v15 = vadd.f32 -1.4531521, %v2223_v8 }
 0x630   :  { %7133 = vrsqrt.f32 %v9269_v3  ;;  %v2316_v39 = vmul.f32 %v2300_v5, %v9211_v42  ;;  %v2072_v53 = vmul.f32 %v9259_v61, %v2071_v50  ;;  %v2366_v5 = vsub.f32 0.0, %v9162_v25  ;;  %vm1718_vm0 = vmor %vm1716_vm15, %vm1717_vm13 }
 0x631   :  { %v1712_v22 = vmul.f32 %v7132_v33, %v1711_v19  ;;  %7135 = vpow2.f32 %v2395_v14  ;;  %v2254_v19 = vmul.f32 %v2238_v56, %v9251_v52  ;;  %v2381_v56 = vmul.f32 %v2365_v18, %v9147_v20  ;;  %v2542_v18 = vld [vmem:[%s7583_s14 + $0x18] sm:$0xff] }
 0x632   :  { %7137 = vpow2.f32 %v2397_v38  ;;  %v9307_v50 = vsel %vm2064_vm2, %v2066_v11, %v2062_v44  ;;  %v2332_v38 = vadd.f32 0.2548296, %v2316_v39  ;;  %v2255_v28 = vmul.f32 %v2239_v15, %v9276_v51  ;;  %2608 = vmatpush.msrb.mxu3 %v2542_v18 }
 0x633   :  { %v1713_v26 = vmul.f32 0.5, %v1712_v22  ;;  %v2270_v35 = vadd.f32 1.4214138, %v2254_v19  ;;  %v2073_v48 = vadd.f32 %v9259_v61, %v2072_v53  ;;  %v2541_v19 = vld [vmem:[%s7583_s14 + $0x10] sm:$0xff]  ;;  %vm1726_vm7 = vweird.f32 %v9269_v3 }
 0x634   :  { %2609 = vmatpush.msrb.mxu3 %v2541_v19  ;;  %vm2461_vm13 = vcmp.lt.f32.partialorder %v9142_v30, 0.0  ;;  %v1901_v30 = vmul.f32 0.5, %v9135_v6 }
 0x635   :  { %v1714_v34 = vsub.f32 1.5, %v1713_v26  ;;  %v2286_v39 = vmul.f32 %v2270_v35, %v9251_v52 }
 0x636   :  { %v9292_v14 = vpop.eup %7133 }
 0x637   :  { %v1715_v47 = vmul.f32 %v7132_v33, %v1714_v34  ;;  %v1721_v22 = vmul.f32 %v9292_v14, %v9269_v3  ;;  %v7136_v58 = vpop.eup %7135  ;;  %v2301_v34 = vadd.f32 -0.28449672, %v2285_v27  ;;  %vm1727_vm5 = vweird.f32 %v9292_v14  ;;  %v2539_v3 = vld [vmem:[%s7583_s14] sm:$0xff] }
 0x638   :  { %v9309_v10 = vmul.f32 %v7136_v58, %v2347_v0  ;;  %v2078_v27 = vand.u32 2147483647, %v9222_v31  ;;  %v7138_v15 = vpop.eup %7137  ;;  %vm1728_vm8 = vmor %vm1726_vm7, %vm1727_vm5  ;;  %vm2463_vm5 = vcmp.lt.f32.partialorder %v9165_v57, 0.0 }
 0x639   :  { %v1719_v8 = vsel %vm1718_vm0, %v7132_v33, %v1715_v47  ;;  %v1722_v24 = vmul.f32 %v9292_v14, %v1721_v22  ;;  %v2080_v33 = vand.u32 2147483648, %v9222_v31  ;;  %v2317_v47 = vmul.f32 %v2301_v34, %v9224_v2 }
 0x63a   :  { %v1744_v26 = vmul.f32 %v1719_v8, %v9072_v37  ;;  %v2224_v37 = vmul.f32 1.0614054, %v9307_v50  ;;  %v2443_v44 = vsub.f32 1.0, %v9309_v10  ;;  %v2540_v8 = vld [vmem:[%s7583_s14 + $0x8] sm:$0xff]  ;;  %v2302_v34 = vadd.f32 -0.28449672, %v2286_v39 }
 0x63b   :  { %v1723_v20 = vmul.f32 0.5, %v1722_v24  ;;  %v2399_v24 = vmul.f32 1.442695, %v2381_v56  ;;  %v2081_v35 = vor.u32 1.1754944e-38, %v2080_v33  ;;  %2610 = vmatpush.msrb.mxu3 %v2540_v8  ;;  %vm2079_vm9 = vcmp.eq.f32.partialorder %v2078_v27, 8.507059e+37  ;;  %s11832_s14 = sld [smem:[#allocation19_spill]] }
 0x63c   :  { %v1761_v0 = vmul.f32 %v8988_v9, %v1744_v26  ;;  %v2348_v9 = vmul.f32 %v2332_v38, %v9211_v42  ;;  %v2077_v42 = vsel %vm9332_vm6, %v9259_v61, %v2073_v48  ;;  %v2240_v10 = vadd.f32 -1.4531521, %v2224_v37  ;;  %v7397_v37 = vld [vmem:[%s7568_s29 + $0x2] ss:$0 sm:$0xff] }
 0x63d   :  { %v1724_v11 = vsub.f32 1.5, %v1723_v20  ;;  %v2475_v61 = vsub.f32 0.0, %v2443_v44  ;;  %v2382_v56 = vmul.f32 %v2366_v5, %v9162_v25  ;;  %v9352_v18 = vsel %vm2079_vm9, %v2081_v35, %v2077_v42  ;;  %2611 = vmatpush.msrb.mxu3 %v2539_v3 }
 0x63e   :  { %v1778_v53 = vadd.f32 %v8995_v60, %v1761_v0  ;;  %v2271_v60 = vadd.f32 1.4214138, %v2255_v28  ;;  %v2333_v48 = vadd.f32 0.2548296, %v2317_v47  ;;  %7139 = vpow2.f32 %v2399_v24 }
 0x63f   :  { %v1725_v58 = vmul.f32 %v9292_v14, %v1724_v11  ;;  %v2367_v0 = vsub.f32 0.0, %v9170_v41  ;;  %v2256_v25 = vmul.f32 %v2240_v10, %v9307_v50  ;;  %v2318_v5 = vmul.f32 %v2302_v34, %v9251_v52 }
 0x640   :  { %v1872_v31 = vpop.f32.mrf.mxu3  ;;  %6752 = vmatmul.msk.f32.gmra.mxu3 %vm347_vm1, %v1778_v53  ;;  %v2287_v33 = vmul.f32 %v2271_v60, %v9276_v51  ;;  %v2225_v19 = vmul.f32 1.0614054, %v9352_v18  ;;  %v2491_v39 = vsel %vm2459_vm10, %v2475_v61, %v2443_v44  ;;  %v2401_v27 = vmul.f32 1.442695, %v2382_v56 }
 0x641   :  { %v1729_v26 = vsel %vm1728_vm8, %v9292_v14, %v1725_v58  ;;  %v9347_v38 = vadd.f32 %v9104_v29, %v1872_v31  ;;  %v2428_v14 = vmul.f32 %v7138_v15, %v2348_v9  ;;  %v7398_v15 = vld [vmem:[%s7568_s29 + $0x3] ss:$0 sm:$0xff]  ;;  %v2349_v22 = vmul.f32 %v2333_v48, %v9224_v2  ;;  %s11827_s29 = sld [smem:[#allocation17_spill]] }
 0x642   :  { %v1745_v20 = vmul.f32 %v1729_v26, %v9080_v49  ;;  %v2303_v58 = vadd.f32 -0.28449672, %v2287_v33  ;;  %v2383_v8 = vmul.f32 %v2367_v0, %v9170_v41  ;;  %v2272_v60 = vadd.f32 1.4214138, %v2256_v25 }
 0x643   :  { %v9355_v28 = vmul.f32 0.70710677, %v9347_v38  ;;  %v2444_v47 = vsub.f32 1.0, %v2428_v14  ;;  %v2334_v44 = vadd.f32 0.2548296, %v2318_v5  ;;  %v2507_v10 = vadd.f32 1.0, %v2491_v39 }
 0x644   :  { %v1762_v11 = vmul.f32 %v7397_v37, %v1745_v20  ;;  %v2241_v35 = vadd.f32 -1.4531521, %v2225_v19  ;;  %v7140_v31 = vpop.eup %7139  ;;  %7141 = vpow2.f32 %v2401_v27  ;;  %v2319_v41 = vmul.f32 %v2303_v58, %v9276_v51 }
 0x645   :  { %v9363_v49 = vand.u32 2147483647, %v9355_v28  ;;  %v2476_v2 = vsub.f32 0.0, %v2444_v47  ;;  %v2429_v26 = vmul.f32 %v7140_v31, %v2349_v22  ;;  %v1899_v3 = vmul.f32 0.5, %v9110_v46 }
 0x646   :  { %v1779_v53 = vadd.f32 %v7398_v15, %v1762_v11  ;;  %v2403_v34 = vmul.f32 1.442695, %v2383_v8  ;;  %v2288_v56 = vmul.f32 %v2272_v60, %v9307_v50  ;;  %v2368_v20 = vsub.f32 0.0, %v9188_v59 }
 0x647   :  { %v1954_v9 = vmul.f32 0.3275911, %v9363_v49  ;;  %v2350_v14 = vmul.f32 %v2334_v44, %v9251_v52  ;;  %v2257_v48 = vmul.f32 %v2241_v35, %v9352_v18  ;;  %v2523_v33 = vmul.f32 %v2507_v10, %v1899_v3 }
 0x648   :  { %v1875_v7 = vpop.f32.mrf.mxu3  ;;  %6753 = vmatmul.msk.f32.gmra.mxu3 %vm347_vm1, %v1779_v53  ;;  %v2492_v46 = vsel %vm2460_vm12, %v2476_v2, %v2444_v47  ;;  %v2445_v37 = vsub.f32 1.0, %v2429_v26  ;;  %v2335_v11 = vadd.f32 0.2548296, %v2319_v41  ;;  %v2304_v19 = vadd.f32 -0.28449672, %v2288_v56 }
 0x649   :  { %v9372_v42 = vadd.f32 1.0, %v1954_v9  ;;  %v9375_v24 = vadd.f32 %v9104_v29, %v1875_v7  ;;  %v2384_v52 = vmul.f32 %v2368_v20, %v9188_v59  ;;  %v2273_v15 = vadd.f32 1.4214138, %v2257_v48 }
 0x64a   :  { %v7142_v25 = vpop.eup %7141  ;;  %v2508_v22 = vadd.f32 1.0, %v2492_v46  ;;  %v2477_v8 = vsub.f32 0.0, %v2445_v37  ;;  %v2351_v7 = vmul.f32 %v2335_v11, %v9276_v51  ;;  %v2369_v59 = vsub.f32 0.0, %v9209_v17 }
 0x64b   :  { %7143 = vrcp.f32 %v9372_v42  ;;  %v9381_v61 = vmul.f32 0.70710677, %v9375_v24  ;;  %v2430_v27 = vmul.f32 %v7142_v25, %v2350_v14  ;;  %v2320_v55 = vmul.f32 %v2304_v19, %v9307_v50 }
 0x64c   :  { %7145 = vpow2.f32 %v2403_v34  ;;  %v2405_v44 = vmul.f32 1.442695, %v2384_v52  ;;  %v2289_v10 = vmul.f32 %v2273_v15, %v9352_v18  ;;  %v2095_v41 = vand.u32 2147483648, %v9372_v42 }
 0x64d   :  { %v9389_v0 = vand.u32 2147483647, %v9381_v61  ;;  %v2446_v31 = vsub.f32 1.0, %v2430_v27  ;;  %v2524_v3 = vmul.f32 %v2508_v22, %v1900_v43  ;;  %v2493_v34 = vsel %vm2461_vm13, %v2477_v8, %v2445_v37 }
 0x64e   :  { %v2093_v20 = vand.u32 2147483647, %v9372_v42  ;;  %v2385_v14 = vmul.f32 %v2369_v59, %v9209_v17  ;;  %vm2089_vm15 = vweird.f32 %v9372_v42  ;;  %v2336_v48 = vadd.f32 0.2548296, %v2320_v55 }
 0x64f   :  { %v1955_v5 = vmul.f32 0.3275911, %v9389_v0  ;;  %v2478_v11 = vsub.f32 0.0, %v2446_v31  ;;  %v2305_v25 = vadd.f32 -0.28449672, %v2289_v10  ;;  %v2096_v37 = vor.u32 1.1754944e-38, %v2095_v41 }
 0x650   :  { %6754 = vmatmul.msk.f32.vlgmr.msrb.gmra.mxu3 %vm2547_vm11, %v2523_v33  ;;  %v1878_v47 = vpop.f32.mrf.mxu3  ;;  %v2509_v19 = vadd.f32 1.0, %v2493_v34  ;;  %vm2094_vm2 = vcmp.eq.f32.partialorder %v2093_v20, 8.507059e+37  ;;  %v2407_v15 = vmul.f32 1.442695, %v2385_v14  ;;  %v2352_v43 = vmul.f32 %v2336_v48, %v9307_v50 }
 0x651   :  { %v7144_v39 = vpop.eup %7143  ;;  %v9396_v9 = vadd.f32 1.0, %v1955_v5  ;;  %v9400_v58 = vadd.f32 %v9104_v29, %v1878_v47  ;;  %v2494_v6 = vsel %vm2462_vm3, %v2478_v11, %v2446_v31  ;;  %v2321_v22 = vmul.f32 %v2305_v25, %v9352_v18 }
 0x652   :  { %v2085_v53 = vmul.f32 %v7144_v39, %v9372_v42  ;;  %v7146_v2 = vpop.eup %7145  ;;  %vm2090_vm14 = vweird.f32 %v7144_v39  ;;  %v2370_v41 = vsub.f32 0.0, %v9363_v49  ;;  %v1903_v14 = vmul.f32 0.5, %v9157_v4 }
 0x653   :  { %7147 = vrcp.f32 %v9396_v9  ;;  %v9407_v35 = vmul.f32 0.70710677, %v9400_v58  ;;  %v2431_v56 = vmul.f32 %v7146_v2, %v2351_v7  ;;  %vm2091_vm0 = vmor %vm2089_vm15, %vm2090_vm14  ;;  %v2110_v8 = vand.u32 2147483648, %v9396_v9 }
 0x654   :  { %v2086_v60 = vsub.f32 1.0, %v2085_v53  ;;  %7149 = vpow2.f32 %v2405_v44  ;;  %v2525_v7 = vmul.f32 %v2509_v19, %v1901_v30  ;;  %v2108_v50 = vand.u32 2147483647, %v9396_v9 }
 0x655   :  { %v9412_v51 = vand.u32 2147483647, %v9407_v35  ;;  %v2447_v42 = vsub.f32 1.0, %v2431_v56  ;;  %v2510_v44 = vadd.f32 1.0, %v2494_v6  ;;  %vm2104_vm6 = vweird.f32 %v9396_v9 }
 0x656   :  { %v2087_v26 = vmul.f32 %v7144_v39, %v2086_v60  ;;  %vm2109_vm8 = vcmp.eq.f32.partialorder %v2108_v50, 8.507059e+37  ;;  %vm2464_vm9 = vcmp.lt.f32.partialorder %v9179_v36, 0.0  ;;  %v2386_v57 = vmul.f32 %v2370_v41, %v9363_v49 }
 0x657   :  { %v1956_v46 = vmul.f32 0.3275911, %v9412_v51  ;;  %v2479_v55 = vsub.f32 0.0, %v2447_v42  ;;  %v2371_v19 = vsub.f32 0.0, %v9389_v0  ;;  %v1904_v36 = vmul.f32 0.5, %v9173_v54 }
 0x658   :  { %6755 = vmatmul.msk.f32.gmra.mxu3 %vm2547_vm11, %v2524_v3  ;;  %v2088_v33 = vadd.f32 %v7144_v39, %v2087_v26  ;;  %v1881_v2 = vpop.f32.mrf.mxu3  ;;  %v2337_v26 = vadd.f32 0.2548296, %v2321_v22  ;;  %v2111_v3 = vor.u32 1.1754944e-38, %v2110_v8  ;;  %vm2465_vm15 = vcmp.lt.f32.partialorder %v9199_v62, 0.0 }
 0x659   :  { %v7148_v5 = vpop.eup %7147  ;;  %v9423_v27 = vadd.f32 1.0, %v1956_v46  ;;  %v9442_v34 = vadd.f32 %v9104_v29, %v1881_v2 }
 0x65a   :  { %v2092_v52 = vsel %vm2091_vm0, %v7144_v39, %v2088_v33  ;;  %v2100_v17 = vmul.f32 %v7148_v5, %v9396_v9  ;;  %v1902_v39 = vmul.f32 0.5, %v9150_v32  ;;  %v7150_v60 = vpop.eup %7149  ;;  %vm2105_vm4 = vweird.f32 %v7148_v5 }
 0x65b   :  { %v9427_v53 = vsel %vm2094_vm2, %v2096_v37, %v2092_v52  ;;  %7151 = vrcp.f32 %v9423_v27  ;;  %v9437_v31 = vmul.f32 %v7150_v60, %v2352_v43  ;;  %vm2106_vm7 = vmor %vm2104_vm6, %vm2105_vm4  ;;  %v2495_v33 = vsel %vm2463_vm5, %v2479_v55, %v2447_v42 }
 0x65c   :  { %v2101_v47 = vsub.f32 1.0, %v2100_v17  ;;  %v2226_v59 = vmul.f32 1.0614054, %v9427_v53  ;;  %7153 = vpow2.f32 %v2407_v15  ;;  %v2526_v11 = vmul.f32 %v2510_v44, %v1902_v39 }
 0x65d   :  { %v2448_v25 = vsub.f32 1.0, %v9437_v31  ;;  %v9455_v37 = vmul.f32 0.70710677, %v9442_v34  ;;  %v2353_v4 = vmul.f32 %v2337_v26, %v9352_v18  ;;  %v2511_v17 = vadd.f32 1.0, %v2495_v33 }
 0x65e   :  { %v2102_v40 = vmul.f32 %v7148_v5, %v2101_v47  ;;  %v2242_v10 = vadd.f32 -1.4531521, %v2226_v59  ;;  %v2125_v43 = vand.u32 2147483648, %v9423_v27  ;;  %v2123_v18 = vand.u32 2147483647, %v9423_v27 }
 0x65f   :  { %v9462_v47 = vand.u32 2147483647, %v9455_v37  ;;  %v2480_v49 = vsub.f32 0.0, %v2448_v25  ;;  %vm2119_vm12 = vweird.f32 %v9423_v27  ;;  %v2387_v31 = vmul.f32 %v2371_v19, %v9389_v0 }
 0x660   :  { %6756 = vmatmul.msk.f32.gmra.mxu3 %vm2547_vm11, %v2525_v7  ;;  %v2103_v32 = vadd.f32 %v7148_v5, %v2102_v40  ;;  %v2258_v56 = vmul.f32 %v2242_v10, %v9427_v53  ;;  %v1884_v7 = vpop.f32.mrf.mxu3  ;;  %v2409_v40 = vmul.f32 1.442695, %v2386_v57  ;;  %v2126_v10 = vor.u32 1.1754944e-38, %v2125_v43 }
 0x661   :  { %v7152_v20 = vpop.eup %7151  ;;  %v1957_v8 = vmul.f32 0.3275911, %v9462_v47  ;;  %v9471_v55 = vadd.f32 %v9104_v29, %v1884_v7  ;;  %vm2124_vm14 = vcmp.eq.f32.partialorder %v2123_v18, 8.507059e+37  ;;  %vm2466_vm6 = vcmp.lt.f32.partialorder %v9355_v28, 0.0 }
 0x662   :  { %v2107_v48 = vsel %vm2106_vm7, %v7148_v5, %v2103_v32  ;;  %v2115_v46 = vmul.f32 %v7152_v20, %v9423_v27  ;;  %v2274_v5 = vadd.f32 1.4214138, %v2258_v56  ;;  %v7154_v42 = vpop.eup %7153  ;;  %vm2120_vm10 = vweird.f32 %v7152_v20 }
 0x663   :  { %v9448_v9 = vsel %vm2109_vm8, %v2111_v3, %v2107_v48  ;;  %v2433_v59 = vmul.f32 %v7154_v42, %v2353_v4  ;;  %vm2121_vm13 = vmor %vm2119_vm12, %vm2120_vm10  ;;  %v9475_v32 = vadd.f32 1.0, %v1957_v8  ;;  %v9478_v26 = vmul.f32 0.70710677, %v9471_v55 }
 0x664   :  { %v2227_v30 = vmul.f32 1.0614054, %v9448_v9  ;;  %v2116_v52 = vsub.f32 1.0, %v2115_v46  ;;  %v2290_v6 = vmul.f32 %v2274_v5, %v9427_v53  ;;  %v2527_v56 = vmul.f32 %v2511_v17, %v1903_v14 }
 0x665   :  { %7155 = vrcp.f32 %v9475_v32  ;;  %v2372_v48 = vsub.f32 0.0, %v9412_v51  ;;  %v2449_v33 = vsub.f32 1.0, %v2433_v59  ;;  %v2138_v62 = vand.u32 2147483647, %v9475_v32 }
 0x666   :  { %v2243_v15 = vadd.f32 -1.4531521, %v2227_v30  ;;  %v2117_v22 = vmul.f32 %v7152_v20, %v2116_v52  ;;  %v2306_v60 = vadd.f32 -0.28449672, %v2290_v6  ;;  %7157 = vpow2.f32 %v2409_v40 }
 0x667   :  { %v2411_v30 = vmul.f32 1.442695, %v2387_v31  ;;  %v2388_v17 = vmul.f32 %v2372_v48, %v9412_v51  ;;  %v2481_v42 = vsub.f32 0.0, %v2449_v33  ;;  %v2140_v40 = vand.u32 2147483648, %v9475_v32 }
 0x668   :  { %6757 = vmatmul.msk.f32.gmra.mxu3 %vm2547_vm11, %v2526_v11  ;;  %v2259_v39 = vmul.f32 %v2243_v15, %v9448_v9  ;;  %v2118_v50 = vadd.f32 %v7152_v20, %v2117_v22  ;;  %v2322_v41 = vmul.f32 %v2306_v60, %v9427_v53  ;;  %v9490_v11 = vand.u32 2147483647, %v9478_v26  ;;  %v1887_v19 = vpop.f32.mrf.mxu3 }
 0x669   :  { %v9501_v22 = vadd.f32 %v9104_v29, %v1887_v19  ;;  %7159 = vpow2.f32 %v2411_v30  ;;  %v2413_v7 = vmul.f32 1.442695, %v2388_v17  ;;  %v2497_v60 = vsel %vm2465_vm15, %v2481_v42, %v2449_v33  ;;  %v9532_v42 = vld [vmem:[%s7578_s8] ss:$0 sm:$0xff]  ;;  %s11831_s8 = sld [smem:[#allocation20_spill]] }
 0x66a   :  { %v2275_v44 = vadd.f32 1.4214138, %v2259_v39  ;;  %v2122_v2 = vsel %vm2121_vm13, %v7152_v20, %v2118_v50  ;;  %v2496_v20 = vsel %vm2464_vm9, %v2480_v49, %v2448_v25  ;;  %v2338_v5 = vadd.f32 0.2548296, %v2322_v41 }
 0x66b   :  { %v9482_v3 = vsel %vm2124_vm14, %v2126_v10, %v2122_v2  ;;  %v1958_v57 = vmul.f32 0.3275911, %v9490_v11  ;;  %v2512_v52 = vadd.f32 1.0, %v2496_v20  ;;  %v7156_v15 = vpop.eup %7155  ;;  %v1905_v10 = vmul.f32 0.5, %v9192_v63 }
 0x66c   :  { %v2291_v27 = vmul.f32 %v2275_v44, %v9448_v9  ;;  %v2228_v0 = vmul.f32 1.0614054, %v9482_v3  ;;  %v2354_v18 = vmul.f32 %v2338_v5, %v9427_v53  ;;  %v2130_v39 = vmul.f32 %v7156_v15, %v9475_v32  ;;  %v7158_v51 = vpop.eup %7157 }
 0x66d   :  { %v9498_v6 = vadd.f32 1.0, %v1958_v57  ;;  %v2528_v54 = vmul.f32 %v2512_v52, %v1904_v36  ;;  %v9511_v53 = vmul.f32 0.70710677, %v9501_v22  ;;  %vm2135_vm0 = vweird.f32 %v7156_v15 }
 0x66e   :  { %v2307_v46 = vadd.f32 -0.28449672, %v2291_v27  ;;  %v2244_v4 = vadd.f32 -1.4531521, %v2228_v0  ;;  %v2131_v59 = vsub.f32 1.0, %v2130_v39  ;;  %v2434_v50 = vmul.f32 %v7158_v51, %v2354_v18 }
 0x66f   :  { %7161 = vrcp.f32 %v9498_v6  ;;  %v2373_v2 = vsub.f32 0.0, %v9462_v47  ;;  %v9518_v41 = vand.u32 2147483647, %v9511_v53  ;;  %v7160_v27 = vpop.eup %7159  ;;  %vm2134_vm2 = vweird.f32 %v9475_v32 }
 0x670   :  { %6758 = vmatmul.msk.f32.gmra.mxu3 %vm2547_vm11, %v2527_v56  ;;  %v2323_v14 = vmul.f32 %v2307_v46, %v9448_v9  ;;  %v2260_v25 = vmul.f32 %v2244_v4, %v9482_v3  ;;  %v2132_v31 = vmul.f32 %v7156_v15, %v2131_v59  ;;  %7163 = vpow2.f32 %v2413_v7  ;;  %vm2136_vm3 = vmor %vm2134_vm2, %vm2135_vm0  ;;  %v1890_v46 = vpop.f32.mrf.mxu3 }
 0x671   :  { %v2141_v33 = vor.u32 1.1754944e-38, %v2140_v40  ;;  %v1959_v63 = vmul.f32 0.3275911, %v9518_v41  ;;  %v2450_v30 = vsub.f32 1.0, %v2434_v50  ;;  %vm2139_vm4 = vcmp.eq.f32.partialorder %v2138_v62, 8.507059e+37 }
 0x672   :  { %v2339_v43 = vadd.f32 0.2548296, %v2323_v14  ;;  %v2276_v49 = vadd.f32 1.4214138, %v2260_v25  ;;  %v2133_v0 = vadd.f32 %v7156_v15, %v2132_v31  ;;  %v2389_v19 = vmul.f32 %v2373_v2, %v9462_v47 }
 0x673   :  { %v9527_v52 = vadd.f32 1.0, %v1959_v63  ;;  %v2155_v17 = vand.u32 2147483648, %v9498_v6  ;;  %v2153_v51 = vand.u32 2147483647, %v9498_v6  ;;  %vm2149_vm7 = vweird.f32 %v9498_v6 }
 0x674   :  { %v2292_v8 = vmul.f32 %v2276_v49, %v9482_v3  ;;  %v2355_v29 = vmul.f32 %v2339_v43, %v9448_v9  ;;  %v2513_v9 = vadd.f32 1.0, %v2497_v60  ;;  %v2137_v5 = vsel %vm2136_vm3, %v7156_v15, %v2133_v0 }
 0x675   :  { %v7162_v48 = vpop.eup %7161  ;;  %v9524_v57 = vsel %vm2139_vm4, %v2141_v33, %v2137_v5  ;;  %v9535_v43 = vadd.f32 %v9532_v42, %v1890_v46  ;;  %7165 = vrcp.f32 %v9527_v52  ;;  %v2482_v49 = vsub.f32 0.0, %v2450_v30 }
 0x676   :  { %v2308_v44 = vadd.f32 -0.28449672, %v2292_v8  ;;  %v2435_v20 = vmul.f32 %v7160_v27, %v2355_v29  ;;  %v2145_v14 = vmul.f32 %v7162_v48, %v9498_v6  ;;  %v2529_v32 = vmul.f32 %v2513_v9, %v1905_v10  ;;  %v7164_v47 = vpop.eup %7163 }
 0x677   :  { %v2229_v36 = vmul.f32 1.0614054, %v9524_v57  ;;  %vm2150_vm5 = vweird.f32 %v7162_v48  ;;  %v2415_v8 = vmul.f32 1.442695, %v2389_v19  ;;  %v2156_v40 = vor.u32 1.1754944e-38, %v2155_v17 }
 0x678   :  { %6759 = vmatmul.msk.f32.gmra.mxu3 %vm2547_vm11, %v2528_v54  ;;  %v2324_v56 = vmul.f32 %v2308_v44, %v9482_v3  ;;  %v2146_v25 = vsub.f32 1.0, %v2145_v14  ;;  %v2451_v15 = vsub.f32 1.0, %v2435_v20  ;;  %vm2151_vm8 = vmor %vm2149_vm7, %vm2150_vm5  ;;  %v2498_v50 = vsel %vm2466_vm6, %v2482_v49, %v2450_v30 }
 0x679   :  { %v2245_v39 = vadd.f32 -1.4531521, %v2229_v36  ;;  %vm2154_vm9 = vcmp.eq.f32.partialorder %v2153_v51, 8.507059e+37  ;;  %v1906_v10 = vmul.f32 0.5, %v9347_v38  ;;  %v2374_v6 = vsub.f32 0.0, %v9490_v11 }
 0x67a   :  { %v2340_v4 = vadd.f32 0.2548296, %v2324_v56  ;;  %v2147_v54 = vmul.f32 %v7162_v48, %v2146_v25  ;;  %v2483_v60 = vsub.f32 0.0, %v2451_v15  ;;  %v2514_v9 = vadd.f32 1.0, %v2498_v50 }
 0x67b   :  { %v2261_v7 = vmul.f32 %v2245_v39, %v9524_v57  ;;  %v7166_v28 = vpop.eup %7165  ;;  %vm2467_vm10 = vcmp.lt.f32.partialorder %v9381_v61, 0.0  ;;  %7167 = vpow2.f32 %v2415_v8  ;;  %v2168_v5 = vand.u32 2147483647, %v9527_v52 }
 0x67c   :  { %v2356_v18 = vmul.f32 %v2340_v4, %v9482_v3  ;;  %v2148_v59 = vadd.f32 %v7162_v48, %v2147_v54  ;;  %v9545_v3 = vmul.f32 0.70710677, %v9535_v43  ;;  %v2160_v0 = vmul.f32 %v7166_v28, %v9527_v52 }
 0x67d   :  { %v2277_v44 = vadd.f32 1.4214138, %v2261_v7  ;;  %v2530_v30 = vmul.f32 %v2514_v9, %v1906_v10  ;;  %v2390_v4 = vmul.f32 %v2374_v6, %v9490_v11  ;;  %v2170_v61 = vand.u32 2147483648, %v9527_v52 }
 0x67e   :  { %v2436_v29 = vmul.f32 %v7164_v47, %v2356_v18  ;;  %v2152_v31 = vsel %vm2151_vm8, %v7162_v48, %v2148_v59  ;;  %v9548_v62 = vand.u32 2147483647, %v9545_v3  ;;  %v2499_v48 = vsel %vm2467_vm10, %v2483_v60, %v2451_v15 }
 0x67f   :  { %v9551_v2 = vsel %vm2154_vm9, %v2156_v40, %v2152_v31  ;;  %v2293_v27 = vmul.f32 %v2277_v44, %v9524_v57  ;;  %v2161_v46 = vsub.f32 1.0, %v2160_v0  ;;  %vm2165_vm12 = vweird.f32 %v7166_v28 }
 0x680   :  { %6760 = vmatmul.msk.f32.gmra.mxu3 %vm2547_vm11, %v2529_v32  ;;  %v2230_v56 = vmul.f32 1.0614054, %v9551_v2  ;;  %v2452_v20 = vsub.f32 1.0, %v2436_v29  ;;  %v1960_v33 = vmul.f32 0.3275911, %v9548_v62  ;;  %v2515_v25 = vadd.f32 1.0, %v2499_v48 }
 0x681   :  { %v2309_v63 = vadd.f32 -0.28449672, %v2293_v27  ;;  %v2162_v36 = vmul.f32 %v7166_v28, %v2161_v46  ;;  %vm2164_vm13 = vweird.f32 %v9527_v52  ;;  %v7168_v49 = vpop.eup %7167  ;;  %v1907_v47 = vmul.f32 0.5, %v9375_v24 }
 0x682   :  { %v2246_v38 = vadd.f32 -1.4531521, %v2230_v56  ;;  %v9562_v14 = vadd.f32 1.0, %v1960_v33  ;;  %v2484_v11 = vsub.f32 0.0, %v2452_v20  ;;  %v2417_v39 = vmul.f32 1.442695, %v2390_v4  ;;  %vm2166_vm14 = vmor %vm2164_vm13, %vm2165_vm12 }
 0x683   :  { %v2325_v19 = vmul.f32 %v2309_v63, %v9524_v57  ;;  %v2163_v18 = vadd.f32 %v7166_v28, %v2162_v36  ;;  %v2171_v54 = vor.u32 1.1754944e-38, %v2170_v61  ;;  %vm2169_vm15 = vcmp.eq.f32.partialorder %v2168_v5, 8.507059e+37 }
 0x684   :  { %v2262_v32 = vmul.f32 %v2246_v38, %v9551_v2  ;;  %7169 = vrcp.f32 %v9562_v14  ;;  %v2531_v59 = vmul.f32 %v2515_v25, %v1907_v47  ;;  %vm2468_vm0 = vcmp.lt.f32.partialorder %v9407_v35, 0.0 }
 0x685   :  { %v2341_v17 = vadd.f32 0.2548296, %v2325_v19  ;;  %v2167_v7 = vsel %vm2166_vm14, %v7166_v28, %v2163_v18  ;;  %v2375_v60 = vsub.f32 0.0, %v9518_v41  ;;  %v2500_v29 = vsel %vm2468_vm0, %v2484_v11, %v2452_v20 }
 0x686   :  { %v2278_v15 = vadd.f32 1.4214138, %v2262_v32  ;;  %v2172_v52 = vsel %vm2169_vm15, %v2171_v54, %v2167_v7  ;;  %7171 = vpow2.f32 %v2417_v39  ;;  %v2516_v28 = vadd.f32 1.0, %v2500_v29 }
 0x687   :  { %v2357_v51 = vmul.f32 %v2341_v17, %v9524_v57  ;;  %v2231_v44 = vmul.f32 1.0614054, %v2172_v52  ;;  %v2391_v35 = vmul.f32 %v2375_v60, %v9518_v41  ;;  %v1908_v0 = vmul.f32 0.5, %v9400_v58 }
 0x688   :  { %6761 = vmatmul.msk.f32.gmra.mxu3 %vm2547_vm11, %v2530_v30  ;;  %v2294_v8 = vmul.f32 %v2278_v15, %v9551_v2  ;;  %v2183_v20 = vand.u32 2147483647, %v9562_v14  ;;  %v2185_v33 = vand.u32 2147483648, %v9562_v14  ;;  %vm2469_vm3 = vcmp.lt.f32.partialorder %v9455_v37, 0.0 }
 0x689   :  { %v2437_v40 = vmul.f32 %v7168_v49, %v2357_v51  ;;  %v2247_v57 = vadd.f32 -1.4531521, %v2231_v44  ;;  %v2532_v4 = vmul.f32 %v2516_v28, %v1908_v0  ;;  %v2419_v41 = vmul.f32 1.442695, %v2391_v35 }
 0x68a   :  { %v2310_v50 = vadd.f32 -0.28449672, %v2294_v8  ;;  %v7170_v24 = vpop.eup %7169  ;;  %vm2179_vm4 = vweird.f32 %v9562_v14  ;;  %v2186_v32 = vor.u32 1.1754944e-38, %v2185_v33  ;;  %vm2184_vm6 = vcmp.eq.f32.partialorder %v2183_v20, 8.507059e+37 }
 0x68b   :  { %v2453_v31 = vsub.f32 1.0, %v2437_v40  ;;  %v2175_v6 = vmul.f32 %v7170_v24, %v9562_v14  ;;  %v2263_v27 = vmul.f32 %v2247_v57, %v2172_v52  ;;  %vm2180_vm2 = vweird.f32 %v7170_v24 }
 0x68c   :  { %v2326_v10 = vmul.f32 %v2310_v50, %v9551_v2  ;;  %v7172_v30 = vpop.eup %7171  ;;  %vm2181_vm5 = vmor %vm2179_vm4, %vm2180_vm2  ;;  %7173 = vpow2.f32 %v2419_v41  ;;  %v2376_v17 = vsub.f32 0.0, %v9548_v62  ;;  %v1909_v47 = vmul.f32 0.5, %v9442_v34 }
 0x68d   :  { %v2176_v56 = vsub.f32 1.0, %v2175_v6  ;;  %v2485_v48 = vsub.f32 0.0, %v2453_v31  ;;  %v2279_v38 = vadd.f32 1.4214138, %v2263_v27  ;;  %vm2470_vm7 = vcmp.lt.f32.partialorder %v9478_v26, 0.0 }
 0x68e   :  { %v2342_v9 = vadd.f32 0.2548296, %v2326_v10  ;;  %v2392_v54 = vmul.f32 %v2376_v17, %v9548_v62  ;;  %v1910_v34 = vmul.f32 0.5, %v9471_v55  ;;  %vm2471_vm8 = vcmp.lt.f32.partialorder %v9511_v53, 0.0 }
 0x68f   :  { %v2177_v46 = vmul.f32 %v7170_v24, %v2176_v56  ;;  %v2295_v61 = vmul.f32 %v2279_v38, %v2172_v52  ;;  %v2501_v58 = vsel %vm2469_vm3, %v2485_v48, %v2453_v31  ;;  %v1911_v27 = vmul.f32 0.5, %v9501_v22 }
 0x690   :  { %6762 = vmatmul.msk.f32.gmra.mxu3 %vm2547_vm11, %v2531_v59  ;;  %v2358_v63 = vmul.f32 %v2342_v9, %v9551_v2  ;;  %v2517_v37 = vadd.f32 1.0, %v2501_v58  ;;  %v2421_v50 = vmul.f32 1.442695, %v2392_v54  ;;  %vm2472_vm9 = vcmp.lt.f32.partialorder %v9545_v3, 0.0 }
 0x691   :  { %v2178_v19 = vadd.f32 %v7170_v24, %v2177_v46  ;;  %v2311_v25 = vadd.f32 -0.28449672, %v2295_v61  ;;  %v1912_v33 = vmul.f32 0.5, %v9535_v43 }
 0x692   :  { %v2438_v5 = vmul.f32 %v7172_v30, %v2358_v63  ;;  %v2533_v51 = vmul.f32 %v2517_v37, %v1909_v47  ;;  %v7174_v59 = vpop.eup %7173  ;;  %7175 = vpow2.f32 %v2421_v50 }
 0x693   :  { %v2182_v11 = vsel %vm2181_vm5, %v7170_v24, %v2178_v19  ;;  %v2327_v15 = vmul.f32 %v2311_v25, %v2172_v52 }
 0x694   :  { %v2454_v36 = vsub.f32 1.0, %v2438_v5  ;;  %v2187_v2 = vsel %vm2184_vm6, %v2186_v32, %v2182_v11 }
 0x695   :  { %v2232_v18 = vmul.f32 1.0614054, %v2187_v2  ;;  %v2343_v14 = vadd.f32 0.2548296, %v2327_v15 }
 0x696   :  { %v2486_v49 = vsub.f32 0.0, %v2454_v36 }
 0x697   :  { %v2248_v39 = vadd.f32 -1.4531521, %v2232_v18  ;;  %v2359_v8 = vmul.f32 %v2343_v14, %v2172_v52 }
 0x698   :  { %6763 = vmatmul.msk.f32.gmra.mxu3 %vm2547_vm11, %v2532_v4  ;;  %v2502_v60 = vsel %vm2470_vm7, %v2486_v49, %v2454_v36  ;;  %v7176_v9 = vpop.eup %7175 }
 0x699   :  { %v2264_v7 = vmul.f32 %v2248_v39, %v2187_v2  ;;  %v2439_v29 = vmul.f32 %v7174_v59, %v2359_v8  ;;  %v2518_v44 = vadd.f32 1.0, %v2502_v60 }
 0x69b   :  { %v2280_v40 = vadd.f32 1.4214138, %v2264_v7  ;;  %v2455_v24 = vsub.f32 1.0, %v2439_v29  ;;  %v2534_v62 = vmul.f32 %v2518_v44, %v1910_v34 }
 0x69d   :  { %v2296_v31 = vmul.f32 %v2280_v40, %v2187_v2  ;;  %v2487_v10 = vsub.f32 0.0, %v2455_v24 }
 0x69f   :  { %v2312_v57 = vadd.f32 -0.28449672, %v2296_v31  ;;  %v2503_v52 = vsel %vm2471_vm8, %v2487_v10, %v2455_v24 }
 0x6a0   :  { %6764 = vmatmul.msk.f32.gmra.mxu3 %vm2547_vm11, %v2533_v51  ;;  %v2519_v28 = vadd.f32 1.0, %v2503_v52 }
 0x6a1   :  { %v2328_v26 = vmul.f32 %v2312_v57, %v2187_v2 }
 0x6a2   :  { %v2535_v0 = vmul.f32 %v2519_v28, %v1911_v27 }
 0x6a3   :  { %v2344_v6 = vadd.f32 0.2548296, %v2328_v26 }
 0x6a5   :  { %v2360_v35 = vmul.f32 %v2344_v6, %v2187_v2 }
 0x6a7   :  { %v2440_v56 = vmul.f32 %v7176_v9, %v2360_v35 }
 0x6a8   :  { %6765 = vmatmul.msk.f32.gmra.mxu3 %vm2547_vm11, %v2534_v62 }
 0x6a9   :  { %v2456_v48 = vsub.f32 1.0, %v2440_v56 }
 0x6ab   :  { %v2488_v55 = vsub.f32 0.0, %v2456_v48 }
 0x6ad   :  { %v2504_v20 = vsel %vm2472_vm9, %v2488_v55, %v2456_v48 }
 0x6ae   :  { %v2520_v53 = vadd.f32 1.0, %v2504_v20 }
 0x6b0   :  { %6766 = vmatmul.msk.f32.gmra.mxu3 %vm2547_vm11, %v2535_v0  ;;  %v2536_v63 = vmul.f32 %v2520_v53, %v1912_v33 }
 0x6b8   :  { %6767 = vmatmul.msk.f32.gmra.mxu3 %vm2547_vm11, %v2536_v63 }
 0x6c3   :  { %v1893_v38 = vpop.f32.mrf.mxu3 }
 0x6c4   :  { %v9599_v46 = vadd.f32 %v9532_v42, %v1893_v38 }
 0x6c6   :  { %v9602_v22 = vmul.f32 0.70710677, %v9599_v46 }
 0x6c8   :  { %v1945_v30 = vand.u32 2147483647, %v9602_v22  ;;  %vm2473_vm4 = vcmp.lt.f32.partialorder %v9602_v22, 0.0 }
 0x6ca   :  { %v1961_v4 = vmul.f32 0.3275911, %v1945_v30  ;;  %v2377_v39 = vsub.f32 0.0, %v1945_v30 }
 0x6cb   :  { %v1896_v41 = vpop.f32.mrf.mxu3 }
 0x6cc   :  { %v1977_v5 = vadd.f32 1.0, %v1961_v4  ;;  %v9606_v3 = vadd.f32 %v9532_v42, %v1896_v41  ;;  %v2393_v60 = vmul.f32 %v2377_v39, %v1945_v30 }
 0x6ce   :  { %7177 = vrcp.f32 %v1977_v5  ;;  %v9609_v43 = vmul.f32 0.70710677, %v9606_v3  ;;  %v2200_v2 = vand.u32 2147483648, %v1977_v5  ;;  %v2198_v37 = vand.u32 2147483647, %v1977_v5 }
 0x6cf   :  { %vm2194_vm12 = vweird.f32 %v1977_v5  ;;  %v2423_v10 = vmul.f32 1.442695, %v2393_v60  ;;  %v1914_v22 = vmul.f32 0.5, %v9606_v3 }
 0x6d0   :  { %v1946_v61 = vand.u32 2147483647, %v9609_v43  ;;  %v2201_v18 = vor.u32 1.1754944e-38, %v2200_v2  ;;  %vm2199_vm14 = vcmp.eq.f32.partialorder %v2198_v37, 8.507059e+37  ;;  %vm2474_vm5 = vcmp.lt.f32.partialorder %v9609_v43, 0.0 }
 0x6d2   :  { %v1962_v19 = vmul.f32 0.3275911, %v1946_v61  ;;  %v2378_v52 = vsub.f32 0.0, %v1946_v61 }
 0x6d3   :  { %v9612_v58 = vpop.f32.mrf.mxu3 }
 0x6d4   :  { %v7178_v32 = vpop.eup %7177  ;;  %v1978_v25 = vadd.f32 1.0, %v1962_v19  ;;  %v2394_v27 = vmul.f32 %v2378_v52, %v1946_v61 }
 0x6d5   :  { %v2190_v36 = vmul.f32 %v7178_v32, %v1977_v5  ;;  %vm2195_vm10 = vweird.f32 %v7178_v32 }
 0x6d6   :  { %7179 = vrcp.f32 %v1978_v25  ;;  %vm2196_vm13 = vmor %vm2194_vm12, %vm2195_vm10  ;;  %v2215_v59 = vand.u32 2147483648, %v1978_v25  ;;  %v2213_v40 = vand.u32 2147483647, %v1978_v25  ;;  %vm2209_vm0 = vweird.f32 %v1978_v25 }
 0x6d7   :  { %v2191_v11 = vsub.f32 1.0, %v2190_v36  ;;  %7181 = vpow2.f32 %v2423_v10  ;;  %v2425_v53 = vmul.f32 1.442695, %v2394_v27  ;;  %v1913_v36 = vmul.f32 0.5, %v9599_v46  ;;  %v11769_v27 = vld [vmem:[#allocation48_spill] sm:$0xff] }
 0x6d8   :  { %v2216_v34 = vor.u32 1.1754944e-38, %v2215_v59  ;;  %vm2214_vm3 = vcmp.eq.f32.partialorder %v2213_v40, 8.507059e+37 }
 0x6d9   :  { %v2192_v17 = vmul.f32 %v7178_v32, %v2191_v11  ;;  %7183 = vpow2.f32 %v2425_v53 }
 0x6db   :  { %v2193_v42 = vadd.f32 %v7178_v32, %v2192_v17  ;;  %v9614_v15 = vpop.f32.mrf.mxu3 }
 0x6dc   :  { %v7180_v49 = vpop.eup %7179 }
 0x6dd   :  { %v2197_v47 = vsel %vm2196_vm13, %v7178_v32, %v2193_v42  ;;  %v2205_v54 = vmul.f32 %v7180_v49, %v1978_v25  ;;  %vm2210_vm15 = vweird.f32 %v7180_v49  ;;  %v7182_v33 = vpop.eup %7181 }
 0x6de   :  { %v2202_v14 = vsel %vm2199_vm14, %v2201_v18, %v2197_v47  ;;  %vm2211_vm2 = vmor %vm2209_vm0, %vm2210_vm15 }
 0x6df   :  { %v2233_v51 = vmul.f32 1.0614054, %v2202_v14  ;;  %v2206_v8 = vsub.f32 1.0, %v2205_v54  ;;  %v7184_v2 = vpop.eup %7183 }
 0x6e1   :  { %v2249_v7 = vadd.f32 -1.4531521, %v2233_v51  ;;  %v2207_v29 = vmul.f32 %v7180_v49, %v2206_v8 }
 0x6e3   :  { %v2265_v50 = vmul.f32 %v2249_v7, %v2202_v14  ;;  %v9616_v44 = vpop.f32.mrf.mxu3  ;;  %v2208_v24 = vadd.f32 %v7180_v49, %v2207_v29  ;;  %v9627_v7 = vld [vmem:[%s7588_s19] ss:$0 sm:$0xff]  ;;  %s11833_s19 = sld [smem:[#allocation24_spill]] }
 0x6e5   :  { %v2281_v31 = vadd.f32 1.4214138, %v2265_v50  ;;  %v2212_v57 = vsel %vm2211_vm2, %v7180_v49, %v2208_v24 }
 0x6e6   :  { %v2217_v26 = vsel %vm2214_vm3, %v2216_v34, %v2212_v57 }
 0x6e7   :  { %v2297_v62 = vmul.f32 %v2281_v31, %v2202_v14  ;;  %v2234_v6 = vmul.f32 1.0614054, %v2217_v26 }
 0x6e9   :  { %v2313_v28 = vadd.f32 -0.28449672, %v2297_v62  ;;  %v2250_v35 = vadd.f32 -1.4531521, %v2234_v6 }
 0x6eb   :  { %v2329_v9 = vmul.f32 %v2313_v28, %v2202_v14  ;;  %v9618_v56 = vpop.f32.mrf.mxu3  ;;  %v2266_v0 = vmul.f32 %v2250_v35, %v2217_v26 }
 0x6ed   :  { %v2345_v48 = vadd.f32 0.2548296, %v2329_v9  ;;  %v2282_v55 = vadd.f32 1.4214138, %v2266_v0 }
 0x6ef   :  { %v2361_v20 = vmul.f32 %v2345_v48, %v2202_v14  ;;  %v2298_v63 = vmul.f32 %v2282_v55, %v2217_v26 }
 0x6f1   :  { %v2441_v38 = vmul.f32 %v7182_v33, %v2361_v20  ;;  %v2314_v30 = vadd.f32 -0.28449672, %v2298_v63  ;;  %v11770_v20 = vld [vmem:[#allocation45_spill] sm:$0xff]  ;;  %v11772_v33 = vld [vmem:[#allocation42_spill] sm:$0xff] }
 0x6f3   :  { %v2457_v4 = vsub.f32 1.0, %v2441_v38  ;;  %v2625_v41 = vpop.f32.mrf.mxu3  ;;  %v2330_v5 = vmul.f32 %v2314_v30, %v2217_v26 }
 0x6f5   :  { %v2489_v19 = vsub.f32 0.0, %v2457_v4  ;;  %v2346_v32 = vadd.f32 0.2548296, %v2330_v5 }
 0x6f7   :  { %v2505_v61 = vsel %vm2473_vm4, %v2489_v19, %v2457_v4  ;;  %v2362_v11 = vmul.f32 %v2346_v32, %v2217_v26  ;;  %v11773_v4 = vld [vmem:[#allocation37_spill] sm:$0xff] }
 0x6f8   :  { %v2521_v25 = vadd.f32 1.0, %v2505_v61 }
 0x6f9   :  { %v2442_v37 = vmul.f32 %v7184_v2, %v2362_v11  ;;  %v11776_v11 = vld [vmem:[#allocation44_spill] sm:$0xff] }
 0x6fa   :  { %v2537_v17 = vmul.f32 %v2521_v25, %v1913_v36  ;;  %v11775_v36 = vld [vmem:[#allocation51_spill] sm:$0xff] }
 0x6fb   :  { %v2628_v42 = vpop.f32.mrf.mxu3  ;;  %v2458_v18 = vsub.f32 1.0, %v2442_v37 }
 0x6fc   :  { %6768 = vmatmul.msk.f32.gmra.mxu3 %vm2547_vm11, %v2537_v17  ;;  %v2629_v5 = vadd.f32 %v9627_v7, %v2628_v42  ;;  %v2620_v17 = vadd.f32 %v9627_v7, %v9616_v44  ;;  %v2623_v44 = vadd.f32 %v9627_v7, %v9618_v56  ;;  %v11781_v56 = vld [vmem:[#allocation47_spill] sm:$0xff] }
 0x6fd   :  { %v2490_v49 = vsub.f32 0.0, %v2458_v18 }
 0x6fe   :  { %v9693_v25 = vadd.f32 %v2629_v5, %v11775_v36 }
 0x6ff   :  { %v2506_v47 = vsel %vm2474_vm5, %v2490_v49, %v2458_v18  ;;  %v11778_v49 = vld [vmem:[#allocation49_spill] sm:$0xff] }
 0x700   :  { %v2522_v14 = vadd.f32 1.0, %v2506_v47  ;;  %v2694_v37 = vsel %vm347_vm1, %v9693_v25, 0.0  ;;  %v9706_v47 = vadd.f32 %v2620_v17, %v11778_v49 }
 0x702   :  { %v2538_v39 = vmul.f32 %v2522_v14, %v1914_v22  ;;  %v11779_v22 = vld [vmem:[#allocation46_spill] sm:$0xff] }
 0x703   :  { %v2631_v54 = vpop.f32.mrf.mxu3 }
 0x704   :  { %6769 = vmatmul.msk.f32.gmra.mxu3 %vm2547_vm11, %v2538_v39  ;;  %v2632_v42 = vadd.f32 %v9627_v7, %v2631_v54  ;;  %v2685_v39 = vsel %vm347_vm1, %v9706_v47, 0.0 }
 0x706   :  { %v9709_v14 = vadd.f32 %v2632_v42, %v11779_v22 }
 0x708   :  { %v2697_v54 = vsel %vm347_vm1, %v9709_v14, 0.0 }
 0x70b   :  { %v2634_v46 = vpop.f32.mrf.mxu3 }
 0x70c   :  { %v2635_v26 = vadd.f32 %v9627_v7, %v2634_v46  ;;  %v11780_v46 = vld [vmem:[#allocation50_spill] sm:$0xff] }
 0x70e   :  { %v9655_v6 = vadd.f32 %v2635_v26, %v8884_v21 }
 0x710   :  { %v2700_v28 = vsel %vm347_vm1, %v9655_v6, 0.0 }
 0x713   :  { %v2637_v51 = vpop.f32.mrf.mxu3 }
 0x714   :  { %v2638_v53 = vadd.f32 %v9627_v7, %v2637_v51  ;;  %v9718_v51 = vadd.f32 %v2623_v44, %v11780_v46 }
 0x716   :  { %v9680_v63 = vadd.f32 %v2638_v53, %v11772_v33 }
 0x718   :  { %v2703_v19 = vsel %vm347_vm1, %v9680_v63, 0.0 }
 0x71b   :  { %v2640_v8 = vpop.f32.mrf.mxu3 }
 0x71c   :  { %v2641_v32 = vadd.f32 %v9627_v7, %v2640_v8  ;;  %v2614_v8 = vadd.f32 %v9627_v7, %v9612_v58 }
 0x71e   :  { %v9696_v2 = vadd.f32 %v2641_v32, %v11776_v11 }
 0x720   :  { %11777 = vst [vmem:[#allocation45_spill] sm:$0xff] %v9696_v2  ;;  %v2706_v18 = vsel %vm347_vm1, %v9696_v2, 0.0 }
 0x723   :  { %v2643_v59 = vpop.f32.mrf.mxu3 }
 0x724   :  { %v2644_v60 = vadd.f32 %v9627_v7, %v2643_v59  ;;  %v2688_v59 = vsel %vm347_vm1, %v9718_v51, 0.0 }
 0x726   :  { %v9631_v29 = vadd.f32 %v2644_v60, %v8923_v1 }
 0x728   :  { %11765 = vst [vmem:[#allocation38_spill] sm:$0xff] %v9631_v29  ;;  %v2709_v43 = vsel %vm347_vm1, %v9631_v29, 0.0 }
 0x729   :  { %2710 = vadd.xlane.f32.xlu2 %v2709_v43 }
 0x72b   :  { %v2646_v3 = vpop.f32.mrf.mxu3 }
 0x72c   :  { %v2647_v40 = vadd.f32 %v9627_v7, %v2646_v3 }
 0x72e   :  { %v9637_v50 = vadd.f32 %v2647_v40, %v8936_v45  ;;  %v9726_v40 = vadd.f32 %v2614_v8, %v11781_v56 }
 0x730   :  { %11766 = vst [vmem:[#allocation39_spill] sm:$0xff] %v9637_v50  ;;  %v2712_v24 = vsel %vm347_vm1, %v9637_v50, 0.0 }
 0x731   :  { %2713 = vadd.xlane.f32.xlu1 %v2712_v24 }
 0x733   :  { %v2649_v31 = vpop.f32.mrf.mxu3 }
 0x734   :  { %v2650_v34 = vadd.f32 %v9627_v7, %v2649_v31 }
 0x736   :  { %v9643_v1 = vadd.f32 %v2650_v34, %v8949_v12  ;;  %v2626_v12 = vadd.f32 %v9627_v7, %v2625_v41 }
 0x738   :  { %11767 = vst [vmem:[#allocation40_spill] sm:$0xff] %v9643_v1  ;;  %v2715_v10 = vsel %vm347_vm1, %v9643_v1, 0.0  ;;  %v9661_v35 = vadd.f32 %v2626_v12, %v8858_v16 }
 0x739   :  { %2716 = vadd.xlane.f32.xlu0 %v2715_v10  ;;  %v2679_v10 = vsel %vm347_vm1, %v9726_v40, 0.0 }
 0x73a   :  { %v2691_v9 = vsel %vm347_vm1, %v9661_v35, 0.0 }
 0x73b   :  { %v2652_v57 = vpop.f32.mrf.mxu3 }
 0x73c   :  { %v2653_v62 = vadd.f32 %v9627_v7, %v2652_v57 }
 0x73e   :  { %v9649_v45 = vadd.f32 %v2653_v62, %v8960_v23  ;;  %v2617_v23 = vadd.f32 %v9627_v7, %v9614_v15 }
 0x740   :  { %11768 = vst [vmem:[#allocation41_spill] sm:$0xff] %v9649_v45  ;;  %v2718_v52 = vsel %vm347_vm1, %v9649_v45, 0.0  ;;  %v9668_v0 = vadd.f32 %v2617_v23, %v11769_v27 }
 0x741   :  { %2719 = vadd.xlane.f32.xlu2 %v2718_v52 }
 0x742   :  { %v2682_v21 = vsel %vm347_vm1, %v9668_v0, 0.0 }
 0x749   :  { %2701 = vadd.xlane.f32.xlu2 %v2700_v28 }
 0x751   :  { %2692 = vadd.xlane.f32.xlu2 %v2691_v9 }
 0x759   :  { %2683 = vadd.xlane.f32.xlu2 %v2682_v21 }
 0x77f   :  { %v2655_v48 = vpop.f32.mrf.mxu3 }
 0x780   :  { %v2656_v55 = vadd.f32 %v9627_v7, %v2655_v48 }
 0x782   :  { %v9674_v16 = vadd.f32 %v2656_v55, %v11770_v20 }
 0x784   :  { %11771 = vst [vmem:[#allocation43_spill] sm:$0xff] %v9674_v16  ;;  %v2721_v15 = vsel %vm347_vm1, %v9674_v16, 0.0 }
 0x785   :  { %2722 = vadd.xlane.f32.xlu1 %v2721_v15 }
 0x787   :  { %v2658_v38 = vpop.f32.mrf.mxu3 }
 0x788   :  { %v2659_v30 = vadd.f32 %v9627_v7, %v2658_v38 }
 0x78a   :  { %v9684_v41 = vadd.f32 %v2659_v30, %v11773_v4 }
 0x78c   :  { %11774 = vst [vmem:[#allocation48_spill] sm:$0xff] %v9684_v41  ;;  %v2724_v61 = vsel %vm347_vm1, %v9684_v41, 0.0 }
 0x78d   :  { %2704 = vadd.xlane.f32.xlu1 %v2703_v19  ;;  %2725 = vadd.xlane.f32.xlu0 %v2724_v61 }
 0x795   :  { %2695 = vadd.xlane.f32.xlu1 %v2694_v37  ;;  %2707 = vadd.xlane.f32.xlu0 %v2706_v18 }
 0x79c   :  { %v2711_v60 = vpop.xlane.xlu2 %2710 }
 0x79d   :  { %2686 = vadd.xlane.f32.xlu1 %v2685_v39  ;;  %2698 = vadd.xlane.f32.xlu0 %v2697_v54  ;;  %v2737_v24 = vmul.f32 %v2711_v60, %v7862_v13 }
 0x79f   :  { %v9735_v58 = vsub.f32 %v9631_v29, %v2737_v24 }
 0x7a1   :  { %v2769_v52 = vmul.f32 %v9735_v58, %v9735_v58 }
 0x7a3   :  { %v2805_v23 = vsel %vm347_vm1, %v2769_v52, 0.0 }
 0x7a4   :  { %v2714_v43 = vpop.xlane.xlu1 %2713 }
 0x7a5   :  { %2689 = vadd.xlane.f32.xlu0 %v2688_v59  ;;  %v2738_v3 = vmul.f32 %v2714_v43, %v7862_v13 }
 0x7a7   :  { %v9730_v31 = vsub.f32 %v9637_v50, %v2738_v3 }
 0x7a9   :  { %v2770_v34 = vmul.f32 %v9730_v31, %v9730_v31 }
 0x7ab   :  { %v2808_v7 = vsel %vm347_vm1, %v2770_v34, 0.0 }
 0x7ac   :  { %v2717_v57 = vpop.xlane.xlu0 %2716  ;;  %2809 = vadd.xlane.f32.xlu2 %v2808_v7 }
 0x7ad   :  { %2680 = vadd.xlane.f32.xlu0 %v2679_v10  ;;  %v2739_v62 = vmul.f32 %v2717_v57, %v7862_v13 }
 0x7af   :  { %v9742_v26 = vsub.f32 %v9643_v1, %v2739_v62 }
 0x7b1   :  { %v2771_v12 = vmul.f32 %v9742_v26, %v9742_v26 }
 0x7b3   :  { %v2811_v28 = vsel %vm347_vm1, %v2771_v12, 0.0 }
 0x7b4   :  { %v2720_v9 = vpop.xlane.xlu2 %2719  ;;  %2812 = vadd.xlane.f32.xlu1 %v2811_v28 }
 0x7b5   :  { %2806 = vadd.xlane.f32.xlu0 %v2805_v23  ;;  %v2740_v27 = vmul.f32 %v2720_v9, %v7862_v13 }
 0x7b7   :  { %v9752_v21 = vsub.f32 %v9649_v45, %v2740_v27 }
 0x7b9   :  { %v2772_v48 = vmul.f32 %v9752_v21, %v9752_v21 }
 0x7bb   :  { %v2814_v55 = vsel %vm347_vm1, %v2772_v48, 0.0 }
 0x7bc   :  { %v2702_v20 = vpop.xlane.xlu2 %2701 }
 0x7bd   :  { %2815 = vadd.xlane.f32.xlu0 %v2814_v55  ;;  %v2734_v53 = vmul.f32 %v2702_v20, %v7862_v13 }
 0x7bf   :  { %v9759_v15 = vsub.f32 %v9655_v6, %v2734_v53 }
 0x7c1   :  { %v2766_v33 = vmul.f32 %v9759_v15, %v9759_v15 }
 0x7c3   :  { %v2796_v38 = vsel %vm347_vm1, %v2766_v33, 0.0 }
 0x7c4   :  { %v2693_v30 = vpop.xlane.xlu2 %2692 }
 0x7c5   :  { %2797 = vadd.xlane.f32.xlu0 %v2796_v38  ;;  %v2731_v4 = vmul.f32 %v2693_v30, %v7862_v13 }
 0x7c7   :  { %v9766_v5 = vsub.f32 %v9661_v35, %v2731_v4 }
 0x7c9   :  { %v2763_v19 = vmul.f32 %v9766_v5, %v9766_v5 }
 0x7cb   :  { %v2787_v32 = vsel %vm347_vm1, %v2763_v19, 0.0 }
 0x7cc   :  { %v2684_v61 = vpop.xlane.xlu2 %2683 }
 0x7cd   :  { %2788 = vadd.xlane.f32.xlu0 %v2787_v32  ;;  %v2728_v36 = vmul.f32 %v2684_v61, %v7862_v13 }
 0x7cf   :  { %v9773_v11 = vsub.f32 %v9668_v0, %v2728_v36 }
 0x7d1   :  { %v2760_v17 = vmul.f32 %v9773_v11, %v9773_v11 }
 0x7d3   :  { %v2778_v37 = vsel %vm347_vm1, %v2760_v17, 0.0 }
 0x7d5   :  { %2779 = vadd.xlane.f32.xlu0 %v2778_v37 }
 0x7f8   :  { %v2723_v42 = vpop.xlane.xlu1 %2722 }
 0x7f9   :  { %v2741_v18 = vmul.f32 %v2723_v42, %v7862_v13 }
 0x7fb   :  { %v9780_v49 = vsub.f32 %v9674_v16, %v2741_v18 }
 0x7fd   :  { %v2773_v22 = vmul.f32 %v9780_v49, %v9780_v49 }
 0x7ff   :  { %v2817_v39 = vsel %vm347_vm1, %v2773_v22, 0.0 }
 0x800   :  { %v2705_v44 = vpop.xlane.xlu1 %2704  ;;  %2818 = vadd.xlane.f32.xlu2 %v2817_v39  ;;  %v2726_v46 = vpop.xlane.xlu0 %2725 }
 0x801   :  { %v2735_v54 = vmul.f32 %v2705_v44, %v7862_v13  ;;  %v2742_v8 = vmul.f32 %v2726_v46, %v7862_v13 }
 0x803   :  { %v9788_v59 = vsub.f32 %v9680_v63, %v2735_v54  ;;  %v9791_v60 = vsub.f32 %v9684_v41, %v2742_v8 }
 0x805   :  { %v2767_v43 = vmul.f32 %v9788_v59, %v9788_v59  ;;  %v2774_v3 = vmul.f32 %v9791_v60, %v9791_v60 }
 0x807   :  { %v2799_v56 = vsel %vm347_vm1, %v2767_v43, 0.0  ;;  %v2820_v34 = vsel %vm347_vm1, %v2774_v3, 0.0 }
 0x808   :  { %v2696_v24 = vpop.xlane.xlu1 %2695  ;;  %2800 = vadd.xlane.f32.xlu2 %v2799_v56  ;;  %2821 = vadd.xlane.f32.xlu1 %v2820_v34  ;;  %v2708_v10 = vpop.xlane.xlu0 %2707 }
 0x809   :  { %v2732_v7 = vmul.f32 %v2696_v24, %v7862_v13  ;;  %v2736_v57 = vmul.f32 %v2708_v10, %v7862_v13 }
 0x80b   :  { %v9802_v62 = vsub.f32 %v9693_v25, %v2732_v7  ;;  %v9805_v52 = vsub.f32 %v9696_v2, %v2736_v57 }
 0x80d   :  { %v2764_v12 = vmul.f32 %v9802_v62, %v9802_v62  ;;  %v2768_v28 = vmul.f32 %v9805_v52, %v9805_v52 }
 0x80f   :  { %v2790_v23 = vsel %vm347_vm1, %v2764_v12, 0.0  ;;  %v2802_v27 = vsel %vm347_vm1, %v2768_v28, 0.0 }
 0x810   :  { %v2687_v9 = vpop.xlane.xlu1 %2686  ;;  %2791 = vadd.xlane.f32.xlu2 %v2790_v23  ;;  %2803 = vadd.xlane.f32.xlu1 %v2802_v27  ;;  %v2699_v55 = vpop.xlane.xlu0 %2698 }
 0x811   :  { %v2729_v48 = vmul.f32 %v2687_v9, %v7862_v13  ;;  %v2733_v20 = vmul.f32 %v2699_v55, %v7862_v13 }
 0x813   :  { %v9816_v53 = vsub.f32 %v9706_v47, %v2729_v48  ;;  %v9819_v33 = vsub.f32 %v9709_v14, %v2733_v20 }
 0x815   :  { %v2761_v38 = vmul.f32 %v9816_v53, %v9816_v53  ;;  %v2765_v30 = vmul.f32 %v9819_v33, %v9819_v33 }
 0x817   :  { %v2781_v4 = vsel %vm347_vm1, %v2761_v38, 0.0  ;;  %v2793_v19 = vsel %vm347_vm1, %v2765_v30, 0.0 }
 0x818   :  { %2782 = vadd.xlane.f32.xlu2 %v2781_v4  ;;  %2794 = vadd.xlane.f32.xlu1 %v2793_v19  ;;  %v2690_v32 = vpop.xlane.xlu0 %2689 }
 0x819   :  { %v2730_v61 = vmul.f32 %v2690_v32, %v7862_v13 }
 0x81b   :  { %v9829_v36 = vsub.f32 %v9718_v51, %v2730_v61 }
 0x81d   :  { %v2762_v17 = vmul.f32 %v9829_v36, %v9829_v36 }
 0x81f   :  { %v2784_v37 = vsel %vm347_vm1, %v2762_v17, 0.0  ;;  %v2810_v46 = vpop.xlane.xlu2 %2809 }
 0x820   :  { %2785 = vadd.xlane.f32.xlu1 %v2784_v37  ;;  %v2681_v42 = vpop.xlane.xlu0 %2680  ;;  %v2834_v43 = vmul.f32 %v2810_v46, %v7862_v13 }
 0x821   :  { %v2727_v18 = vmul.f32 %v2681_v42, %v7862_v13 }
 0x822   :  { %v2850_v24 = vadd.f32 1e-05, %v2834_v43 }
 0x823   :  { %v9836_v22 = vsub.f32 %v9726_v40, %v2727_v18 }
 0x824   :  { %7185 = vrsqrt.f32 %v2850_v24  ;;  %vm2971_vm8 = vweird.f32 %v2850_v24 }
 0x825   :  { %v2759_v39 = vmul.f32 %v9836_v22, %v9836_v22 }
 0x827   :  { %v2775_v44 = vsel %vm347_vm1, %v2759_v39, 0.0  ;;  %v2813_v8 = vpop.xlane.xlu1 %2812 }
 0x828   :  { %2776 = vadd.xlane.f32.xlu1 %v2775_v44  ;;  %v2807_v54 = vpop.xlane.xlu0 %2806  ;;  %v2835_v3 = vmul.f32 %v2813_v8, %v7862_v13 }
 0x829   :  { %v2833_v7 = vmul.f32 %v2807_v54, %v7862_v13 }
 0x82a   :  { %v2851_v34 = vadd.f32 1e-05, %v2835_v3  ;;  %v7186_v28 = vpop.eup %7185 }
 0x82b   :  { %v2849_v57 = vadd.f32 1e-05, %v2833_v7  ;;  %v2966_v9 = vmul.f32 %v7186_v28, %v2850_v24  ;;  %vm2972_vm6 = vweird.f32 %v7186_v28 }
 0x82c   :  { %7187 = vrsqrt.f32 %v2851_v34  ;;  %vm9866_vm9 = vmor %vm2971_vm8, %vm2972_vm6  ;;  %vm2981_vm10 = vweird.f32 %v2851_v34 }
 0x82d   :  { %7189 = vrsqrt.f32 %v2849_v57  ;;  %v2967_v38 = vmul.f32 %v7186_v28, %v2966_v9  ;;  %vm2961_vm15 = vweird.f32 %v2849_v57 }
 0x82f   :  { %v2968_v61 = vmul.f32 0.5, %v2967_v38  ;;  %v9929_v38 = vld [vmem:[%s7608_s12 + $0x1] ss:$0 sm:$0xff] }
 0x830   :  { %v2816_v56 = vpop.xlane.xlu0 %2815 }
 0x831   :  { %v2836_v10 = vmul.f32 %v2816_v56, %v7862_v13  ;;  %v2969_v44 = vsub.f32 1.5, %v2968_v61 }
 0x832   :  { %v7188_v23 = vpop.eup %7187 }
 0x833   :  { %v9845_v12 = vadd.f32 1e-05, %v2836_v10  ;;  %v2976_v48 = vmul.f32 %v7188_v23, %v2851_v34  ;;  %v9848_v55 = vpop.eup %7189  ;;  %v2970_v56 = vmul.f32 %v7186_v28, %v2969_v44  ;;  %vm2982_vm7 = vweird.f32 %v7188_v23 }
 0x834   :  { %v2956_v4 = vmul.f32 %v9848_v55, %v2849_v57  ;;  %vm9872_vm12 = vmor %vm2981_vm10, %vm2982_vm7  ;;  %vm2962_vm13 = vweird.f32 %v9848_v55  ;;  %v9903_v57 = vld [vmem:[%s7608_s12] ss:$0 sm:$0xff] }
 0x835   :  { %7191 = vrsqrt.f32 %v9845_v12  ;;  %v2977_v30 = vmul.f32 %v7188_v23, %v2976_v48  ;;  %v2974_v34 = vsel %vm9866_vm9, %v7186_v28, %v2970_v56  ;;  %vm9895_vm0 = vmor %vm2961_vm15, %vm2962_vm13  ;;  %vm2991_vm2 = vweird.f32 %v9845_v12 }
 0x836   :  { %v2957_v37 = vmul.f32 %v9848_v55, %v2956_v4 }
 0x837   :  { %v2978_v17 = vmul.f32 0.5, %v2977_v30 }
 0x838   :  { %v2798_v27 = vpop.xlane.xlu0 %2797  ;;  %v2958_v46 = vmul.f32 0.5, %v2957_v37 }
 0x839   :  { %v2830_v32 = vmul.f32 %v2798_v27, %v7862_v13  ;;  %v2979_v54 = vsub.f32 1.5, %v2978_v17 }
 0x83a   :  { %v2959_v9 = vsub.f32 1.5, %v2958_v46 }
 0x83b   :  { %v9850_v20 = vpop.eup %7191  ;;  %v9858_v18 = vadd.f32 1e-05, %v2830_v32  ;;  %v2980_v10 = vmul.f32 %v7188_v23, %v2979_v54 }
 0x83c   :  { %v2986_v19 = vmul.f32 %v9850_v20, %v9845_v12  ;;  %v2960_v32 = vmul.f32 %v9848_v55, %v2959_v9  ;;  %vm2992_vm14 = vweird.f32 %v9850_v20 }
 0x83d   :  { %7193 = vrsqrt.f32 %v9858_v18  ;;  %v2984_v17 = vsel %vm9872_vm12, %v7188_v23, %v2980_v10  ;;  %vm9907_vm3 = vmor %vm2991_vm2, %vm2992_vm14  ;;  %vm2931_vm4 = vweird.f32 %v9858_v18 }
 0x83e   :  { %v2987_v42 = vmul.f32 %v9850_v20, %v2986_v19  ;;  %v2964_v12 = vsel %vm9895_vm0, %v9848_v55, %v2960_v32 }
 0x83f   :  { %v3025_v55 = vmul.f32 %v2964_v12, %v9735_v58 }
 0x840   :  { %v2789_v39 = vpop.xlane.xlu0 %2788  ;;  %v2988_v43 = vmul.f32 0.5, %v2987_v42 }
 0x841   :  { %v2827_v27 = vmul.f32 %v2789_v39, %v7862_v13 }
 0x842   :  { %v2989_v48 = vsub.f32 1.5, %v2988_v43  ;;  %v3027_v43 = vmul.f32 %v2984_v17, %v9742_v26 }
 0x843   :  { %v9870_v30 = vpop.eup %7193  ;;  %v9878_v24 = vadd.f32 1e-05, %v2827_v27 }
 0x844   :  { %v2990_v37 = vmul.f32 %v9850_v20, %v2989_v48  ;;  %v2926_v44 = vmul.f32 %v9870_v30, %v9858_v18  ;;  %vm2932_vm7 = vweird.f32 %v9870_v30 }
 0x845   :  { %vm10014_vm12 = vmor %vm2931_vm4, %vm2932_vm7  ;;  %vm2901_vm0 = vweird.f32 %v9878_v24 }
 0x846   :  { %v2927_v26 = vmul.f32 %v9870_v30, %v2926_v44 }
 0x848   :  { %v2780_v19 = vpop.xlane.xlu0 %2779 }
 0x849   :  { %v2824_v54 = vmul.f32 %v2780_v19, %v7862_v13 }
 0x84b   :  { %v9924_v27 = vadd.f32 1e-05, %v2824_v54 }
 0x873   :  { %v2819_v8 = vpop.xlane.xlu2 %2818 }
 0x874   :  { %v2837_v3 = vmul.f32 %v2819_v8, %v7862_v13 }
 0x876   :  { %v9862_v7 = vadd.f32 1e-05, %v2837_v3  ;;  %v3026_v3 = vmul.f32 %v2974_v34, %v9730_v31  ;;  %v2994_v31 = vsel %vm9907_vm3, %v9850_v20, %v2990_v37 }
 0x877   :  { %v3028_v20 = vmul.f32 %v2994_v31, %v9752_v21  ;;  %v9948_v21 = vld [vmem:[%s7598_s30 + $0x1] ss:$0 sm:$0xff] }
 0x878   :  { %7195 = vrsqrt.f32 %v9862_v7  ;;  %v3043_v4 = vmul.f32 %v9903_v57, %v3026_v3  ;;  %vm3001_vm6 = vweird.f32 %v9862_v7 }
 0x879   :  { %7197 = vrsqrt.f32 %v9878_v24  ;;  %v3045_v12 = vmul.f32 %v9903_v57, %v3028_v20 }
 0x87a   :  { %v3060_v28 = vadd.f32 %v9929_v38, %v3043_v4 }
 0x87b   :  { %v2801_v61 = vpop.xlane.xlu2 %2800  ;;  %v2822_v39 = vpop.xlane.xlu1 %2821 }
 0x87c   :  { %v2831_v42 = vmul.f32 %v2801_v61, %v7862_v13  ;;  %v2838_v46 = vmul.f32 %v2822_v39, %v7862_v13  ;;  %v3044_v61 = vmul.f32 %v9903_v57, %v3027_v43  ;;  %v3042_v43 = vmul.f32 %v9903_v57, %v3025_v55 }
 0x87e   :  { %v9891_v8 = vpop.eup %7195  ;;  %v9900_v23 = vadd.f32 1e-05, %v2831_v42  ;;  %v9914_v9 = vadd.f32 1e-05, %v2838_v46  ;;  %v2928_v42 = vmul.f32 0.5, %v2927_v26  ;;  %v3061_v31 = vadd.f32 %v9929_v38, %v3044_v61 }
 0x87f   :  { %v2996_v10 = vmul.f32 %v9891_v8, %v9862_v7  ;;  %v9936_v37 = vpop.eup %7197  ;;  %v9945_v46 = vld [vmem:[%s7598_s30] ss:$0 sm:$0xff]  ;;  %vm3002_vm5 = vweird.f32 %v9891_v8  ;;  %v9972_v61 = vmul.f32 %v9948_v21, %v3060_v28  ;;  %s11835_s30 = sld [smem:[#allocation21_spill]] }
 0x880   :  { %7199 = vrsqrt.f32 %v9900_v23  ;;  %v2929_v4 = vsub.f32 1.5, %v2928_v42  ;;  %v2896_v55 = vmul.f32 %v9936_v37, %v9878_v24  ;;  %v9969_v20 = vmul.f32 %v9945_v46, %v3060_v28  ;;  %vm9977_vm8 = vmor %vm3001_vm6, %vm3002_vm5 }
 0x881   :  { %v2997_v48 = vmul.f32 %v9891_v8, %v2996_v10  ;;  %7201 = vrsqrt.f32 %v9914_v9  ;;  %v9985_v7 = vmul.f32 %v9948_v21, %v3061_v31  ;;  %vm3011_vm10 = vweird.f32 %v9914_v9 }
 0x882   :  { %7203 = vrsqrt.f32 %v9924_v27  ;;  %v2930_v45 = vmul.f32 %v9870_v30, %v2929_v4  ;;  %v2897_v1 = vmul.f32 %v9936_v37, %v2896_v55  ;;  %vm2902_vm14 = vweird.f32 %v9936_v37 }
 0x883   :  { %v2998_v19 = vmul.f32 0.5, %v2997_v48  ;;  %v2792_v32 = vpop.xlane.xlu2 %2791  ;;  %v2804_v34 = vpop.xlane.xlu1 %2803  ;;  %vm2941_vm2 = vweird.f32 %v9900_v23 }
 0x884   :  { %v2828_v17 = vmul.f32 %v2792_v32, %v7862_v13  ;;  %v2832_v44 = vmul.f32 %v2804_v34, %v7862_v13 }
 0x885   :  { %v2999_v39 = vsub.f32 1.5, %v2998_v19 }
 0x886   :  { %v9940_v54 = vpop.eup %7199  ;;  %v9942_v58 = vadd.f32 1e-05, %v2828_v17  ;;  %v9955_v10 = vadd.f32 1e-05, %v2832_v44  ;;  %v9988_v44 = vadd.f32 %v9929_v38, %v3042_v43 }
 0x887   :  { %v7202_v3 = vpop.eup %7201  ;;  %v2936_v56 = vmul.f32 %v9940_v54, %v9900_v23  ;;  %v3000_v26 = vmul.f32 %v9891_v8, %v2999_v39  ;;  %v9982_v39 = vmul.f32 %v9945_v46, %v3061_v31  ;;  %v3062_v31 = vadd.f32 %v9929_v38, %v3045_v12 }
 0x888   :  { %v3006_v48 = vmul.f32 %v7202_v3, %v9914_v9  ;;  %7205 = vrsqrt.f32 %v9942_v58  ;;  %v9974_v17 = vpop.eup %7203  ;;  %vm3012_vm9 = vweird.f32 %v7202_v3  ;;  %v2898_v9 = vmul.f32 0.5, %v2897_v1 }
 0x889   :  { %v2937_v19 = vmul.f32 %v9940_v54, %v2936_v56  ;;  %7207 = vrsqrt.f32 %v9955_v10  ;;  %v3004_v16 = vsel %vm9977_vm8, %v9891_v8, %v3000_v26  ;;  %v2866_v43 = vmul.f32 %v9974_v17, %v9924_v27  ;;  %vm3013_vm13 = vmor %vm3011_vm10, %vm3012_vm9 }
 0x88a   :  { %v3007_v32 = vmul.f32 %v7202_v3, %v3006_v48  ;;  %vm2942_vm15 = vweird.f32 %v9940_v54  ;;  %vm2951_vm5 = vweird.f32 %v9955_v10  ;;  %vm2911_vm8 = vweird.f32 %v9942_v58  ;;  %vm10089_vm10 = vmor %vm2901_vm0, %vm2902_vm14 }
 0x88b   :  { %v2783_v42 = vpop.xlane.xlu2 %2782  ;;  %v2938_v28 = vmul.f32 0.5, %v2937_v19  ;;  %v2795_v41 = vpop.xlane.xlu1 %2794  ;;  %vm10048_vm4 = vmor %vm2941_vm2, %vm2942_vm15  ;;  %vm2872_vm15 = vweird.f32 %v9974_v17 }
 0x88c   :  { %v3008_v56 = vmul.f32 0.5, %v3007_v32  ;;  %v2825_v48 = vmul.f32 %v2783_v42, %v7862_v13  ;;  %v2829_v50 = vmul.f32 %v2795_v41, %v7862_v13  ;;  %v3029_v41 = vmul.f32 %v3004_v16, %v9780_v49 }
 0x88d   :  { %v2939_v4 = vsub.f32 1.5, %v2938_v28  ;;  %v2934_v16 = vsel %vm10014_vm12, %v9870_v30, %v2930_v45  ;;  %v2867_v49 = vmul.f32 %v9974_v17, %v2866_v43  ;;  %v10027_v28 = vmul.f32 %v9945_v46, %v3062_v31 }
 0x88e   :  { %v9998_v29 = vpop.eup %7205  ;;  %v3009_v19 = vsub.f32 1.5, %v3008_v56  ;;  %v10002_v32 = vadd.f32 1e-05, %v2825_v48  ;;  %v10007_v26 = vadd.f32 1e-05, %v2829_v50  ;;  %v2899_v43 = vsub.f32 1.5, %v2898_v9 }
 0x88f   :  { %v7208_v42 = vpop.eup %7207  ;;  %v2906_v8 = vmul.f32 %v9998_v29, %v9942_v58  ;;  %v2940_v12 = vmul.f32 %v9940_v54, %v2939_v4  ;;  %vm2912_vm6 = vweird.f32 %v9998_v29 }
 0x890   :  { %v3010_v55 = vmul.f32 %v7202_v3, %v3009_v19  ;;  %v2946_v34 = vmul.f32 %v7208_v42, %v9955_v10  ;;  %7209 = vrsqrt.f32 %v10002_v32  ;;  %v3046_v19 = vmul.f32 %v9903_v57, %v3029_v41  ;;  %vm10079_vm9 = vmor %vm2911_vm8, %vm2912_vm6 }
 0x891   :  { %v2907_v50 = vmul.f32 %v9998_v29, %v2906_v8  ;;  %7211 = vrsqrt.f32 %v10007_v26  ;;  %v10033_v8 = vmul.f32 %v9948_v21, %v3062_v31  ;;  %v2868_v31 = vmul.f32 0.5, %v2867_v49 }
 0x892   :  { %v2947_v18 = vmul.f32 %v7208_v42, %v2946_v34  ;;  %v3014_v56 = vsel %vm3013_vm13, %v7202_v3, %v3010_v55  ;;  %v3022_v3 = vmul.f32 %v2934_v16, %v9759_v15  ;;  %vm2952_vm3 = vweird.f32 %v7208_v42 }
 0x893   :  { %v2908_v48 = vmul.f32 0.5, %v2907_v50  ;;  %v3030_v1 = vmul.f32 %v3014_v56, %v9791_v60  ;;  %v2786_v30 = vpop.xlane.xlu1 %2785  ;;  %v3063_v49 = vadd.f32 %v9929_v38, %v3046_v19  ;;  %vm2953_vm7 = vmor %vm2951_vm5, %vm2952_vm3  ;;  %v2869_v2 = vsub.f32 1.5, %v2868_v31 }
 0x894   :  { %v2948_v45 = vmul.f32 0.5, %v2947_v18  ;;  %v2826_v34 = vmul.f32 %v2786_v30, %v7862_v13  ;;  %v3039_v58 = vmul.f32 %v9903_v57, %v3022_v3  ;;  %vm2921_vm13 = vweird.f32 %v10007_v26 }
 0x895   :  { %v2909_v55 = vsub.f32 1.5, %v2908_v48  ;;  %v3047_v60 = vmul.f32 %v9903_v57, %v3030_v1  ;;  %v2944_v48 = vsel %vm10048_vm4, %v9940_v54, %v2940_v12  ;;  %vm2881_vm2 = vweird.f32 %v10002_v32 }
 0x896   :  { %v10041_v41 = vpop.eup %7209  ;;  %v2949_v4 = vsub.f32 1.5, %v2948_v45  ;;  %v10055_v16 = vadd.f32 1e-05, %v2826_v34  ;;  %v3023_v12 = vmul.f32 %v2944_v48, %v9788_v59  ;;  %vm2871_vm3 = vweird.f32 %v9924_v27 }
 0x897   :  { %v10044_v50 = vpop.eup %7211  ;;  %v2876_v9 = vmul.f32 %v10041_v41, %v10002_v32  ;;  %v3064_v56 = vadd.f32 %v9929_v38, %v3047_v60  ;;  %v2910_v1 = vmul.f32 %v9998_v29, %v2909_v55  ;;  %v2900_v60 = vmul.f32 %v9936_v37, %v2899_v43  ;;  %vm10138_vm5 = vmor %vm2871_vm3, %vm2872_vm15 }
 0x898   :  { %v2950_v23 = vmul.f32 %v7208_v42, %v2949_v4  ;;  %v2916_v18 = vmul.f32 %v10044_v50, %v10007_v26  ;;  %7213 = vrsqrt.f32 %v10055_v16  ;;  %vm2922_vm12 = vweird.f32 %v10044_v50 }
 0x899   :  { %v2877_v10 = vmul.f32 %v10041_v41, %v2876_v9  ;;  %v3114_v45 = vmul.f32 %v9945_v46, %v3064_v56  ;;  %v3230_v30 = vmul.f32 %v9948_v21, %v3064_v56  ;;  %v3113_v9 = vmul.f32 %v9945_v46, %v3063_v49  ;;  %vm2923_vm0 = vmor %vm2921_vm13, %vm2922_vm12 }
 0x89a   :  { %v2917_v19 = vmul.f32 %v10044_v50, %v2916_v18  ;;  %v2954_v34 = vsel %vm2953_vm7, %v7208_v42, %v2950_v23  ;;  %v3229_v18 = vmul.f32 %v9948_v21, %v3063_v49  ;;  %v2914_v23 = vsel %vm10079_vm9, %v9998_v29, %v2910_v1 }
 0x89b   :  { %v2878_v4 = vmul.f32 0.5, %v2877_v10  ;;  %v3024_v54 = vmul.f32 %v2954_v34, %v9805_v52  ;;  %3115 = vmatpush.msrb.mxu0 %v3114_v45  ;;  %3231 = vmatpush.msrb.mxu1 %v3230_v30  ;;  %v2777_v15 = vpop.xlane.xlu1 %2776  ;;  %v3040_v56 = vmul.f32 %v9903_v57, %v3023_v12  ;;  %v2904_v48 = vsel %vm10089_vm10, %v9936_v37, %v2900_v60 }
 0x89c   :  { %v2918_v55 = vmul.f32 0.5, %v2917_v19  ;;  %v2823_v59 = vmul.f32 %v2777_v15, %v7862_v13  ;;  %vm2882_vm14 = vweird.f32 %v10041_v41  ;;  %v2870_v26 = vmul.f32 %v9974_v17, %v2869_v2 }
 0x89d   :  { %v2879_v52 = vsub.f32 1.5, %v2878_v4  ;;  %3116 = vmatpush.msrb.mxu0 %v3113_v9  ;;  %3232 = vmatpush.msrb.mxu1 %v3229_v18  ;;  %v3041_v49 = vmul.f32 %v9903_v57, %v3024_v54  ;;  %v3020_v37 = vmul.f32 %v2914_v23, %v9802_v62  ;;  %vm10129_vm4 = vmor %vm2881_vm2, %vm2882_vm14  ;;  %v3057_v62 = vadd.f32 %v9929_v38, %v3040_v56 }
 0x89e   :  { %v2919_v31 = vsub.f32 1.5, %v2918_v55  ;;  %v10098_v3 = vpop.eup %7213  ;;  %v10101_v24 = vadd.f32 1e-05, %v2823_v59  ;;  %v3109_v27 = vmul.f32 %v9945_v46, %v9988_v44  ;;  %v3225_v45 = vmul.f32 %v9948_v21, %v9988_v44 }
 0x89f   :  { %v2880_v10 = vmul.f32 %v10041_v41, %v2879_v52  ;;  %v2886_v29 = vmul.f32 %v10098_v3, %v10055_v16  ;;  %3117 = vmatpush.msrb.mxu0 %v10027_v28  ;;  %3233 = vmatpush.msrb.mxu1 %v10033_v8  ;;  %v3058_v28 = vadd.f32 %v9929_v38, %v3041_v49  ;;  %vm2892_vm6 = vweird.f32 %v10098_v3 }
 0x8a0   :  { %v2920_v19 = vmul.f32 %v10044_v50, %v2919_v31  ;;  %7215 = vrsqrt.f32 %v10101_v24  ;;  %v3037_v34 = vmul.f32 %v9903_v57, %v3020_v37  ;;  %v3107_v4 = vmul.f32 %v9945_v46, %v3057_v62 }
 0x8a1   :  { %v2887_v1 = vmul.f32 %v10098_v3, %v2886_v29  ;;  %3118 = vmatpush.msrb.mxu0 %v9982_v39  ;;  %3234 = vmatpush.msrb.mxu1 %v9985_v7  ;;  %v3019_v39 = vmul.f32 %v2904_v48, %v9766_v5  ;;  %v2884_v5 = vsel %vm10129_vm4, %v10041_v41, %v2880_v10  ;;  %vm2891_vm7 = vweird.f32 %v10055_v16 }
 0x8a2   :  { %v2924_v2 = vsel %vm2923_vm0, %v10044_v50, %v2920_v19  ;;  %v3108_v44 = vmul.f32 %v9945_v46, %v3058_v28  ;;  %v3224_v60 = vmul.f32 %v9948_v21, %v3058_v28  ;;  %v3223_v54 = vmul.f32 %v9948_v21, %v3057_v62  ;;  %vm2893_vm8 = vmor %vm2891_vm7, %vm2892_vm6 }
 0x8a3   :  { %v3021_v32 = vmul.f32 %v2924_v2, %v9819_v33  ;;  %v2888_v50 = vmul.f32 0.5, %v2887_v1  ;;  %3119 = vmatpush.msrb.mxu0 %v9969_v20  ;;  %3235 = vmatpush.msrb.mxu1 %v9972_v61  ;;  %v3056_v33 = vadd.f32 %v9929_v38, %v3039_v58  ;;  %v2874_v20 = vsel %vm10138_vm5, %v9974_v17, %v2870_v26 }
 0x8a4   :  { %v3036_v12 = vmul.f32 %v9903_v57, %v3019_v39  ;;  %v3017_v55 = vmul.f32 %v2884_v5, %v9816_v53  ;;  %v3016_v52 = vmul.f32 %v2874_v20, %v9773_v11  ;;  %v3054_v16 = vadd.f32 %v9929_v38, %v3037_v34  ;;  %v3083_v34 = vld [vmem:[%s11804_s5 + $0x10] sm:$0xff]  ;;  %v6773_v20 = vld [vmem:[%s11804_s5 + $0x98] sm:$0xff] }
 0x8a5   :  { %v3038_v30 = vmul.f32 %v9903_v57, %v3021_v32  ;;  %v2889_v61 = vsub.f32 1.5, %v2888_v50  ;;  %3120 = vmatpush.msrb.mxu0 %v3109_v27  ;;  %3236 = vmatpush.msrb.mxu1 %v3225_v45  ;;  %v3106_v18 = vmul.f32 %v9945_v46, %v3056_v33  ;;  %v3222_v42 = vmul.f32 %v9948_v21, %v3056_v33  ;;  %v6770_v33 = vld [vmem:[%s11804_s5 + $0x80] sm:$0xff] }
 0x8a6   :  { %v7216_v41 = vpop.eup %7215  ;;  %v3053_v58 = vadd.f32 %v9929_v38, %v3036_v12  ;;  %v3034_v11 = vmul.f32 %v9903_v57, %v3017_v55  ;;  %v3033_v48 = vmul.f32 %v9903_v57, %v3016_v52  ;;  %vm2861_vm10 = vweird.f32 %v10101_v24  ;;  %v3088_v12 = vld [vmem:[%s11804_s5 + $0x38] sm:$0xff]  ;;  %v6780_v52 = vld [vmem:[%s11804_s5 + $0xd0] sm:$0xff] }
 0x8a7   :  { %v2890_v17 = vmul.f32 %v10098_v3, %v2889_v61  ;;  %v2856_v15 = vmul.f32 %v7216_v41, %v10101_v24  ;;  %3121 = vmatpush.msrb.mxu0 %v3108_v44  ;;  %3237 = vmatpush.msrb.mxu1 %v3224_v60  ;;  %v3055_v9 = vadd.f32 %v9929_v38, %v3038_v30  ;;  %vm2862_vm9 = vweird.f32 %v7216_v41  ;;  %v3082_v30 = vld [vmem:[%s11804_s5 + $0x8] sm:$0xff]  ;;  %v3085_v61 = vld [vmem:[%s11804_s5 + $0x20] sm:$0xff]  ;;  %v6777_v55 = vld [vmem:[%s11804_s5 + $0xb8] sm:$0xff] }
 0x8a8   :  { %v3103_v19 = vmul.f32 %v9945_v46, %v3053_v58  ;;  %v3219_v37 = vmul.f32 %v9948_v21, %v3053_v58  ;;  %v3051_v1 = vadd.f32 %v9929_v38, %v3034_v11  ;;  %vm2863_vm12 = vmor %vm2861_vm10, %vm2862_vm9  ;;  %v3050_v8 = vadd.f32 %v9929_v38, %v3033_v48  ;;  %v6774_v44 = vld [vmem:[%s11804_s5 + $0xa0] sm:$0xff]  ;;  %v3086_v60 = vld [vmem:[%s11804_s5 + $0x28] sm:$0xff] }
 0x8a9   :  { %v2857_v53 = vmul.f32 %v7216_v41, %v2856_v15  ;;  %3122 = vmatpush.msrb.mxu0 %v3107_v4  ;;  %3238 = vmatpush.msrb.mxu1 %v3223_v54  ;;  %v2894_v59 = vsel %vm2893_vm8, %v10098_v3, %v2890_v17  ;;  %v3105_v49 = vmul.f32 %v9945_v46, %v3055_v9  ;;  %v3087_v4 = vld [vmem:[%s11804_s5 + $0x30] sm:$0xff]  ;;  %v3089_v17 = vld [vmem:[%s11804_s5 + $0x40] sm:$0xff]  ;;  %v3096_v11 = vld [vmem:[%s11804_s5 + $0x78] sm:$0xff] }
 0x8aa   :  { %v3018_v43 = vmul.f32 %v2894_v59, %v9829_v36  ;;  %v3221_v23 = vmul.f32 %v9948_v21, %v3055_v9  ;;  %v3104_v3 = vmul.f32 %v9945_v46, %v3054_v16  ;;  %v3220_v36 = vmul.f32 %v9948_v21, %v3054_v16  ;;  %v6776_v54 = vld [vmem:[%s11804_s5 + $0xb0] sm:$0xff]  ;;  %v6778_v15 = vld [vmem:[%s11804_s5 + $0xc0] sm:$0xff]  ;;  %v3090_v9 = vld [vmem:[%s11804_s5 + $0x48] sm:$0xff] }
 0x8ab   :  { %v2858_v31 = vmul.f32 0.5, %v2857_v53  ;;  %3123 = vmatpush.msrb.mxu0 %v3106_v18  ;;  %3239 = vmatpush.msrb.mxu1 %v3222_v42  ;;  %v3101_v24 = vmul.f32 %v9945_v46, %v3051_v1  ;;  %v3217_v39 = vmul.f32 %v9948_v21, %v3051_v1  ;;  %v3100_v50 = vmul.f32 %v9945_v46, %v3050_v8  ;;  %v6779_v18 = vld [vmem:[%s11804_s5 + $0xc8] sm:$0xff]  ;;  %v3091_v42 = vld [vmem:[%s11804_s5 + $0x50] sm:$0xff]  ;;  %v3092_v53 = vld [vmem:[%s11804_s5 + $0x58] sm:$0xff] }
 0x8ac   :  { %v3035_v56 = vmul.f32 %v9903_v57, %v3018_v43  ;;  %v3216_v27 = vmul.f32 %v9948_v21, %v3050_v8  ;;  %v6781_v16 = vld [vmem:[%s11804_s5 + $0xd8] sm:$0xff]  ;;  %v3093_v59 = vld [vmem:[%s11804_s5 + $0x60] sm:$0xff]  ;;  %v3094_v43 = vld [vmem:[%s11804_s5 + $0x68] sm:$0xff] }
 0x8ad   :  { %v2859_v10 = vsub.f32 1.5, %v2858_v31  ;;  %3124 = vmatpush.msrb.mxu0 %v3105_v49  ;;  %3240 = vmatpush.msrb.mxu1 %v3221_v23  ;;  %v6782_v58 = vld [vmem:[%s11804_s5 + $0xe0] sm:$0xff]  ;;  %v6783_v31 = vld [vmem:[%s11804_s5 + $0xe8] sm:$0xff]  ;;  %v3095_v49 = vld [vmem:[%s11804_s5 + $0x70] sm:$0xff] }
 0x8ae   :  { %v3052_v29 = vadd.f32 %v9929_v38, %v3035_v56  ;;  %v6784_v23 = vld [vmem:[%s11804_s5 + $0xf0] sm:$0xff]  ;;  %v6785_v56 = vld [vmem:[%s11804_s5 + $0xf8] sm:$0xff]  ;;  %v3065_v48 = vld [vmem:[%s11805_s9] sm:$0xff] }
 0x8af   :  { %v2860_v26 = vmul.f32 %v7216_v41, %v2859_v10  ;;  %3125 = vmatpush.msrb.mxu0 %v3104_v3  ;;  %3241 = vmatpush.msrb.mxu1 %v3220_v36 }
 0x8b0   :  { %v3102_v28 = vmul.f32 %v9945_v46, %v3052_v29  ;;  %v3218_v2 = vmul.f32 %v9948_v21, %v3052_v29 }
 0x8b1   :  { %3126 = vmatpush.msrb.mxu0 %v3103_v19  ;;  %3242 = vmatpush.msrb.mxu1 %v3219_v37  ;;  %v2864_v62 = vsel %vm2863_vm12, %v7216_v41, %v2860_v26  ;;  %v6775_v41 = vld [vmem:[%s11804_s5 + $0xa8] sm:$0xff] }
 0x8b2   :  { %v3015_v32 = vmul.f32 %v2864_v62, %v9836_v22  ;;  %v3066_v26 = vld [vmem:[%s11805_s9 + $0x8] sm:$0xff] }
 0x8b3   :  { %3127 = vmatpush.msrb.mxu0 %v3102_v28  ;;  %3243 = vmatpush.msrb.mxu1 %v3218_v2 }
 0x8b4   :  { %v3032_v7 = vmul.f32 %v9903_v57, %v3015_v32  ;;  %v3081_v57 = vld [vmem:[%s11804_s5] sm:$0xff]  ;;  %v3067_v32 = vld [vmem:[%s11805_s9 + $0x10] sm:$0xff] }
 0x8b5   :  { %3128 = vmatpush.msrb.mxu0 %v3101_v24  ;;  %3244 = vmatpush.msrb.mxu1 %v3217_v39 }
 0x8b6   :  { %v3049_v22 = vadd.f32 %v9929_v38, %v3032_v7  ;;  %v6771_v38 = vld [vmem:[%s11804_s5 + $0x88] sm:$0xff] }
 0x8b7   :  { %3129 = vmatpush.msrb.mxu0 %v3100_v50  ;;  %3245 = vmatpush.msrb.mxu1 %v3216_v27 }
 0x8b8   :  { %v3099_v45 = vmul.f32 %v9945_v46, %v3049_v22  ;;  %v3215_v5 = vmul.f32 %v9948_v21, %v3049_v22  ;;  %v6772_v46 = vld [vmem:[%s11804_s5 + $0x90] sm:$0xff]  ;;  %v3084_v21 = vld [vmem:[%s11804_s5 + $0x18] sm:$0xff]  ;;  %s7463_s5 = sshra.s32 %s6653_s15, 4  ;;  %s7464_s5 = int_to_ptr.hbm [resolvable:$true] %s7463_s5 }
 0x8b9   :  { %v3068_v22 = vld [vmem:[%s11805_s9 + $0x18] sm:$0xff]  ;;  %p7468_p11 = scmp.lt.s32.totalorder %s7464_s5, %s7751_s20 }
 0x8ba   :  { %3130 = vmatpush.msrb.mxu0 %v3099_v45  ;;  %3246 = vmatpush.msrb.mxu1 %v3215_v5 }
 0x8bb   :  { %3131 = vmatmul.f32.vlgmr.msrb.gmra.mxu0 %v3081_v57  ;;  %3247 = vmatmul.f32.vlgmr.msrb.gmra.mxu1 %v6770_v33 }
 0x8c3   :  { %3134 = vmatmul.f32.gmra.mxu0 %v3082_v30  ;;  %3250 = vmatmul.f32.gmra.mxu1 %v6771_v38  ;;  %v3069_v38 = vld [vmem:[%s11805_s9 + $0x20] sm:$0xff] }
 0x8cb   :  { %3137 = vmatmul.f32.gmra.mxu0 %v3083_v34  ;;  %3253 = vmatmul.f32.gmra.mxu1 %v6772_v46 }
 0x8d3   :  { %3140 = vmatmul.f32.gmra.mxu0 %v3084_v21  ;;  %3256 = vmatmul.f32.gmra.mxu1 %v6773_v20 }
 0x8db   :  { %3143 = vmatmul.f32.gmra.mxu0 %v3085_v61  ;;  %3259 = vmatmul.f32.gmra.mxu1 %v6774_v44  ;;  %v3070_v44 = vld [vmem:[%s11805_s9 + $0x28] sm:$0xff] }
 0x8e3   :  { %3146 = vmatmul.f32.gmra.mxu0 %v3086_v60  ;;  %3262 = vmatmul.f32.gmra.mxu1 %v6775_v41 }
 0x8eb   :  { %3149 = vmatmul.f32.gmra.mxu0 %v3087_v4  ;;  %3265 = vmatmul.f32.gmra.mxu1 %v6776_v54 }
 0x8f3   :  { %3152 = vmatmul.f32.gmra.mxu0 %v3088_v12  ;;  %3268 = vmatmul.f32.gmra.mxu1 %v6777_v55  ;;  %v3071_v55 = vld [vmem:[%s11805_s9 + $0x30] sm:$0xff] }
 0x8fb   :  { %3155 = vmatmul.f32.gmra.mxu0 %v3089_v17  ;;  %3271 = vmatmul.f32.gmra.mxu1 %v6778_v15 }
 0x903   :  { %3158 = vmatmul.f32.gmra.mxu0 %v3090_v9  ;;  %3274 = vmatmul.f32.gmra.mxu1 %v6779_v18 }
 0x90b   :  { %3161 = vmatmul.f32.gmra.mxu0 %v3091_v42  ;;  %3277 = vmatmul.f32.gmra.mxu1 %v6780_v52 }
 0x913   :  { %3164 = vmatmul.f32.gmra.mxu0 %v3092_v53  ;;  %3280 = vmatmul.f32.gmra.mxu1 %v6781_v16 }
 0x91b   :  { %3167 = vmatmul.f32.gmra.mxu0 %v3093_v59  ;;  %3283 = vmatmul.f32.gmra.mxu1 %v6782_v58  ;;  %v3072_v59 = vld [vmem:[%s11805_s9 + $0x38] sm:$0xff] }
 0x923   :  { %3170 = vmatmul.f32.gmra.mxu0 %v3094_v43  ;;  %3286 = vmatmul.f32.gmra.mxu1 %v6783_v31 }
 0x92b   :  { %3173 = vmatmul.f32.gmra.mxu0 %v3095_v49  ;;  %3289 = vmatmul.f32.gmra.mxu1 %v6784_v23 }
 0x933   :  { %3176 = vmatmul.f32.gmra.mxu0 %v3096_v11  ;;  %3292 = vmatmul.f32.gmra.mxu1 %v6785_v56 }
 0x938   :  { %v3132_v10 = vpop.f32.mrf.mxu0  ;;  %v3248_v3 = vpop.f32.mrf.mxu1 }
 0x939   :  { %v3180_v36 = vadd.f32 %v3132_v10, %v3065_v48  ;;  %v3073_v48 = vld [vmem:[%s11805_s9 + $0x40] sm:$0xff] }
 0x93b   :  { %v3296_v19 = vadd.f32 %v3248_v3, %v3180_v36 }
 0x93d   :  { %v10235_v29 = vadd.f32 %v3296_v19, %v9726_v40 }
 0x93f   :  { %11806 = vst [vmem:[#allocation42_spill] sm:$0xff] %v10235_v29  ;;  %v3330_v37 = vsel %vm347_vm1, %v10235_v29, 0.0 }
 0x940   :  { %3331 = vadd.xlane.f32.xlu2 %v3330_v37  ;;  %v3135_v1 = vpop.f32.mrf.mxu0  ;;  %v3251_v28 = vpop.f32.mrf.mxu1 }
 0x941   :  { %v3181_v2 = vadd.f32 %v3135_v1, %v3066_v26 }
 0x943   :  { %v3297_v8 = vadd.f32 %v3251_v28, %v3181_v2 }
 0x945   :  { %v10241_v62 = vadd.f32 %v3297_v8, %v9668_v0 }
 0x947   :  { %11807 = vst [vmem:[#allocation37_spill] sm:$0xff] %v10241_v62  ;;  %v3333_v24 = vsel %vm347_vm1, %v10241_v62, 0.0 }
 0x948   :  { %3334 = vadd.xlane.f32.xlu0 %v3333_v24  ;;  %v3138_v40 = vpop.f32.mrf.mxu0  ;;  %v3254_v39 = vpop.f32.mrf.mxu1  ;;  %v3074_v24 = vld [vmem:[%s11805_s9 + $0x48] sm:$0xff] }
 0x949   :  { %v3182_v7 = vadd.f32 %v3138_v40, %v3067_v32 }
 0x94b   :  { %v3298_v50 = vadd.f32 %v3254_v39, %v3182_v7 }
 0x94d   :  { %v10247_v27 = vadd.f32 %v3298_v50, %v9706_v47 }
 0x94f   :  { %v3336_v45 = vsel %vm347_vm1, %v10247_v27, 0.0 }
 0x950   :  { %3337 = vadd.xlane.f32.xlu1 %v3336_v45  ;;  %v3141_v0 = vpop.f32.mrf.mxu0  ;;  %v3257_v5 = vpop.f32.mrf.mxu1 }
 0x951   :  { %v3183_v57 = vadd.f32 %v3141_v0, %v3068_v22 }
 0x953   :  { %v3299_v33 = vadd.f32 %v3257_v5, %v3183_v57 }
 0x955   :  { %v10253_v30 = vadd.f32 %v3299_v33, %v9718_v51 }
 0x957   :  { %v3339_v34 = vsel %vm347_vm1, %v10253_v30, 0.0 }
 0x958   :  { %3340 = vadd.xlane.f32.xlu2 %v3339_v34  ;;  %v3144_v47 = vpop.f32.mrf.mxu0  ;;  %v3260_v46 = vpop.f32.mrf.mxu1 }
 0x959   :  { %v3184_v21 = vadd.f32 %v3144_v47, %v3069_v38  ;;  %v3075_v38 = vld [vmem:[%s11805_s9 + $0x50] sm:$0xff]  ;;  %v11808_v47 = vld [vmem:[#allocation45_spill] sm:$0xff] }
 0x95b   :  { %v3300_v20 = vadd.f32 %v3260_v46, %v3184_v21 }
 0x95d   :  { %v10259_v61 = vadd.f32 %v3300_v20, %v9661_v35 }
 0x95f   :  { %v3342_v60 = vsel %vm347_vm1, %v10259_v61, 0.0 }
 0x960   :  { %3343 = vadd.xlane.f32.xlu0 %v3342_v60  ;;  %v3147_v51 = vpop.f32.mrf.mxu0  ;;  %v3263_v41 = vpop.f32.mrf.mxu1 }
 0x961   :  { %v3185_v4 = vadd.f32 %v3147_v51, %v3070_v44 }
 0x963   :  { %v3301_v54 = vadd.f32 %v3263_v41, %v3185_v4 }
 0x965   :  { %v10265_v12 = vadd.f32 %v3301_v54, %v9693_v25  ;;  %v3076_v54 = vld [vmem:[%s11805_s9 + $0x58] sm:$0xff] }
 0x967   :  { %v3345_v17 = vsel %vm347_vm1, %v10265_v12, 0.0 }
 0x968   :  { %3346 = vadd.xlane.f32.xlu1 %v3345_v17  ;;  %v3150_v35 = vpop.f32.mrf.mxu0  ;;  %v3266_v15 = vpop.f32.mrf.mxu1 }
 0x969   :  { %v3186_v9 = vadd.f32 %v3150_v35, %v3071_v55 }
 0x96b   :  { %v3302_v18 = vadd.f32 %v3266_v15, %v3186_v9  ;;  %v11809_v15 = vld [vmem:[#allocation38_spill] sm:$0xff] }
 0x96d   :  { %v10271_v42 = vadd.f32 %v3302_v18, %v9709_v14 }
 0x96f   :  { %v3348_v52 = vsel %vm347_vm1, %v10271_v42, 0.0 }
 0x970   :  { %3349 = vadd.xlane.f32.xlu0 %v3348_v52  ;;  %v3153_v53 = vpop.f32.mrf.mxu0  ;;  %v3269_v25 = vpop.f32.mrf.mxu1 }
 0x971   :  { %v3187_v49 = vadd.f32 %v3153_v53, %v3072_v59 }
 0x973   :  { %v3303_v11 = vadd.f32 %v3269_v25, %v3187_v49 }
 0x975   :  { %v10286_v19 = vadd.f32 %v3303_v11, %v9655_v6  ;;  %v11810_v11 = vld [vmem:[#allocation39_spill] sm:$0xff] }
 0x977   :  { %v3351_v32 = vsel %vm347_vm1, %v10286_v19, 0.0 }
 0x978   :  { %v3156_v16 = vpop.f32.mrf.mxu0  ;;  %v3272_v31 = vpop.f32.mrf.mxu1 }
 0x979   :  { %v3188_v26 = vadd.f32 %v3156_v16, %v3073_v48 }
 0x97b   :  { %v3304_v2 = vadd.f32 %v3272_v31, %v3188_v26 }
 0x97d   :  { %v10299_v7 = vadd.f32 %v3304_v2, %v9680_v63 }
 0x97f   :  { %v3354_v33 = vsel %vm347_vm1, %v10299_v7, 0.0 }
 0x980   :  { %v3159_v10 = vpop.f32.mrf.mxu0  ;;  %v3275_v1 = vpop.f32.mrf.mxu1 }
 0x981   :  { %v3189_v50 = vadd.f32 %v3159_v10, %v3074_v24  ;;  %v11811_v24 = vld [vmem:[#allocation40_spill] sm:$0xff] }
 0x983   :  { %v3305_v5 = vadd.f32 %v3275_v1, %v3189_v50 }
 0x985   :  { %v10312_v46 = vadd.f32 %v3305_v5, %v11808_v47 }
 0x987   :  { %v3357_v4 = vsel %vm347_vm1, %v10312_v46, 0.0 }
 0x988   :  { %v3162_v39 = vpop.f32.mrf.mxu0  ;;  %v3278_v0 = vpop.f32.mrf.mxu1 }
 0x989   :  { %v3190_v21 = vadd.f32 %v3162_v39, %v3075_v38 }
 0x98b   :  { %v3306_v51 = vadd.f32 %v3278_v0, %v3190_v21 }
 0x98d   :  { %v10325_v9 = vadd.f32 %v3306_v51, %v11809_v15 }
 0x990   :  { %v3165_v44 = vpop.f32.mrf.mxu0  ;;  %v3281_v55 = vpop.f32.mrf.mxu1 }
 0x991   :  { %v3191_v18 = vadd.f32 %v3165_v44, %v3076_v54 }
 0x993   :  { %v3307_v16 = vadd.f32 %v3281_v55, %v3191_v18 }
 0x998   :  { %v3168_v25 = vpop.f32.mrf.mxu0 }
 0x9a0   :  { %v3171_v2 = vpop.f32.mrf.mxu0 }
 0x9a8   :  { %v3174_v44 = vpop.f32.mrf.mxu0 }
 0x9b3   :  { %v3332_v58 = vpop.xlane.xlu2 %3331 }
 0x9b4   :  { %v3378_v43 = vmul.f32 %v3332_v58, %v7862_v13  ;;  %v3360_v58 = vsel %vm347_vm1, %v10325_v9, 0.0 }
 0x9b6   :  { %v10278_v23 = vsub.f32 %v10235_v29, %v3378_v43  ;;  %v3077_v43 = vld [vmem:[%s11805_s9 + $0x60] sm:$0xff] }
 0x9b7   :  { %v3192_v48 = vadd.f32 %v3168_v25, %v3077_v43 }
 0x9b8   :  { %v3410_v14 = vmul.f32 %v10278_v23, %v10278_v23 }
 0x9ba   :  { %v3426_v56 = vsel %vm347_vm1, %v3410_v14, 0.0  ;;  %v3284_v14 = vpop.f32.mrf.mxu1 }
 0x9bb   :  { %v3335_v3 = vpop.xlane.xlu0 %3334  ;;  %3427 = vadd.xlane.f32.xlu2 %v3426_v56  ;;  %v10338_v56 = vadd.f32 %v3307_v16, %v11810_v11 }
 0x9bc   :  { %v3379_v36 = vmul.f32 %v3335_v3, %v7862_v13 }
 0x9bd   :  { %v3363_v1 = vsel %vm347_vm1, %v10338_v56, 0.0 }
 0x9be   :  { %v10289_v37 = vsub.f32 %v10241_v62, %v3379_v36  ;;  %v3308_v36 = vadd.f32 %v3284_v14, %v3192_v48  ;;  %v3080_v14 = vld [vmem:[%s11805_s9 + $0x78] sm:$0xff] }
 0x9c0   :  { %v3411_v28 = vmul.f32 %v10289_v37, %v10289_v37 }
 0x9c2   :  { %v3429_v8 = vsel %vm347_vm1, %v3411_v28, 0.0  ;;  %v3078_v28 = vld [vmem:[%s11805_s9 + $0x68] sm:$0xff]  ;;  %v3287_v50 = vpop.f32.mrf.mxu1 }
 0x9c3   :  { %v3338_v40 = vpop.xlane.xlu1 %3337  ;;  %3430 = vadd.xlane.f32.xlu1 %v3429_v8  ;;  %3352 = vadd.xlane.f32.xlu2 %v3351_v32 }
 0x9c4   :  { %v3380_v6 = vmul.f32 %v3338_v40, %v7862_v13  ;;  %v10351_v40 = vadd.f32 %v3308_v36, %v11811_v24 }
 0x9c6   :  { %v10302_v22 = vsub.f32 %v10247_v27, %v3380_v6  ;;  %v3193_v6 = vadd.f32 %v3171_v2, %v3078_v28  ;;  %v11814_v2 = vld [vmem:[#allocation43_spill] sm:$0xff] }
 0x9c8   :  { %v3412_v45 = vmul.f32 %v10302_v22, %v10302_v22  ;;  %v3309_v0 = vadd.f32 %v3287_v50, %v3193_v6 }
 0x9ca   :  { %v3432_v57 = vsel %vm347_vm1, %v3412_v45, 0.0  ;;  %v3290_v55 = vpop.f32.mrf.mxu1 }
 0x9cb   :  { %v3341_v34 = vpop.xlane.xlu2 %3340  ;;  %3433 = vadd.xlane.f32.xlu0 %v3432_v57  ;;  %3355 = vadd.xlane.f32.xlu1 %v3354_v33  ;;  %v3366_v57 = vsel %vm347_vm1, %v10351_v40, 0.0  ;;  %v11812_v33 = vld [vmem:[#allocation41_spill] sm:$0xff] }
 0x9cc   :  { %v3381_v63 = vmul.f32 %v3341_v34, %v7862_v13  ;;  %v10362_v38 = vadd.f32 %v3309_v0, %v11812_v33 }
 0x9ce   :  { %v10315_v20 = vsub.f32 %v10253_v30, %v3381_v63  ;;  %v3369_v34 = vsel %vm347_vm1, %v10362_v38, 0.0 }
 0x9d0   :  { %v3413_v60 = vmul.f32 %v10315_v20, %v10315_v20 }
 0x9d2   :  { %v3435_v41 = vsel %vm347_vm1, %v3413_v60, 0.0  ;;  %v3079_v60 = vld [vmem:[%s11805_s9 + $0x70] sm:$0xff]  ;;  %v3293_v50 = vpop.f32.mrf.mxu1  ;;  %s7467_s9 = scalar_lea.hbm %s7751_s20, 2 }
 0x9d3   :  { %v3344_v17 = vpop.xlane.xlu0 %3343  ;;  %3436 = vadd.xlane.f32.xlu2 %v3435_v41  ;;  %3358 = vadd.xlane.f32.xlu0 %v3357_v4 }
 0x9d4   :  { %v3382_v35 = vmul.f32 %v3344_v17, %v7862_v13 }
 0x9d6   :  { %v10328_v52 = vsub.f32 %v10259_v61, %v3382_v35  ;;  %v3194_v35 = vadd.f32 %v3174_v44, %v3079_v60 }
 0x9d8   :  { %v3414_v53 = vmul.f32 %v10328_v52, %v10328_v52  ;;  %v3310_v43 = vadd.f32 %v3290_v55, %v3194_v35 }
 0x9da   :  { %v3438_v59 = vsel %vm347_vm1, %v3414_v53, 0.0 }
 0x9db   :  { %v3347_v31 = vpop.xlane.xlu1 %3346  ;;  %3439 = vadd.xlane.f32.xlu1 %v3438_v59  ;;  %3361 = vadd.xlane.f32.xlu2 %v3360_v58  ;;  %v3717_v59 = vld [vmem:[%s11813_s13 + $0x8] sm:$0xff]  ;;  %v3716_v58 = vld [vmem:[%s11813_s13] sm:$0xff] }
 0x9dc   :  { %v3383_v49 = vmul.f32 %v3347_v31, %v7862_v13  ;;  %v3177_v31 = vpop.f32.mrf.mxu0  ;;  %3784 = vmatpush.msrb.mxu2 %v3717_v59 }
 0x9de   :  { %v10341_v10 = vsub.f32 %v10265_v12, %v3383_v49  ;;  %3785 = vmatpush.msrb.mxu2 %v3716_v58 }
 0x9e0   :  { %v3415_v3 = vmul.f32 %v10341_v10, %v10341_v10 }
 0x9e2   :  { %v3441_v26 = vsel %vm347_vm1, %v3415_v3, 0.0 }
 0x9e3   :  { %v3350_v8 = vpop.xlane.xlu0 %3349  ;;  %3442 = vadd.xlane.f32.xlu0 %v3441_v26  ;;  %3364 = vadd.xlane.f32.xlu1 %v3363_v1 }
 0x9e4   :  { %v3384_v32 = vmul.f32 %v3350_v8, %v7862_v13  ;;  %v10382_v8 = vadd.f32 %v3310_v43, %v11814_v2 }
 0x9e6   :  { %v10354_v39 = vsub.f32 %v10271_v42, %v3384_v32  ;;  %v3195_v32 = vadd.f32 %v3177_v31, %v3080_v14  ;;  %v3372_v60 = vsel %vm347_vm1, %v10382_v8, 0.0 }
 0x9e8   :  { %v3416_v45 = vmul.f32 %v10354_v39, %v10354_v39 }
 0x9ea   :  { %v3444_v5 = vsel %vm347_vm1, %v3416_v45, 0.0 }
 0x9eb   :  { %3445 = vadd.xlane.f32.xlu2 %v3444_v5  ;;  %3367 = vadd.xlane.f32.xlu0 %v3366_v57  ;;  %v10390_v57 = vld [vmem:[%s7608_s12 + $0x2] ss:$0 sm:$0xff] }
 0x9f3   :  { %3370 = vadd.xlane.f32.xlu2 %v3369_v34 }
 0xa2e   :  { %v3428_v63 = vpop.xlane.xlu2 %3427 }
 0xa2f   :  { %v3474_v47 = vmul.f32 %v3428_v63, %v7862_v13  ;;  %v3311_v63 = vadd.f32 %v3293_v50, %v3195_v32 }
 0xa31   :  { %v3490_v21 = vadd.f32 1e-05, %v3474_v47 }
 0xa33   :  { %7217 = vrsqrt.f32 %v3490_v21  ;;  %vm3512_vm14 = vweird.f32 %v3490_v21 }
 0xa36   :  { %v3431_v51 = vpop.xlane.xlu1 %3430  ;;  %v3353_v41 = vpop.xlane.xlu2 %3352 }
 0xa37   :  { %v3475_v4 = vmul.f32 %v3431_v51, %v7862_v13  ;;  %v3385_v54 = vmul.f32 %v3353_v41, %v7862_v13  ;;  %v10397_v51 = vld [vmem:[%s7608_s12 + $0x3] ss:$0 sm:$0xff] }
 0xa39   :  { %v7218_v17 = vpop.eup %7217  ;;  %v3491_v15 = vadd.f32 1e-05, %v3475_v4  ;;  %v10371_v18 = vsub.f32 %v10286_v19, %v3385_v54 }
 0xa3a   :  { %v3507_v53 = vmul.f32 %v7218_v17, %v3490_v21  ;;  %vm3513_vm13 = vweird.f32 %v7218_v17 }
 0xa3b   :  { %7219 = vrsqrt.f32 %v3491_v15  ;;  %v3417_v25 = vmul.f32 %v10371_v18, %v10371_v18  ;;  %vm3514_vm15 = vmor %vm3512_vm14, %vm3513_vm13  ;;  %vm3522_vm2 = vweird.f32 %v3491_v15 }
 0xa3c   :  { %v3508_v16 = vmul.f32 %v7218_v17, %v3507_v53  ;;  %v11815_v53 = vld [vmem:[#allocation48_spill] sm:$0xff] }
 0xa3d   :  { %v3447_v49 = vsel %vm347_vm1, %v3417_v25, 0.0  ;;  %v10403_v25 = vadd.f32 %v3311_v63, %v11815_v53 }
 0xa3e   :  { %v3509_v11 = vmul.f32 0.5, %v3508_v16  ;;  %v3434_v48 = vpop.xlane.xlu0 %3433  ;;  %v3356_v3 = vpop.xlane.xlu1 %3355  ;;  %3448 = vadd.xlane.f32.xlu1 %v3447_v49 }
 0xa3f   :  { %v3476_v36 = vmul.f32 %v3434_v48, %v7862_v13  ;;  %v3386_v26 = vmul.f32 %v3356_v3, %v7862_v13  ;;  %v3375_v3 = vsel %vm347_vm1, %v10403_v25, 0.0 }
 0xa40   :  { %v3510_v1 = vsub.f32 1.5, %v3509_v11 }
 0xa41   :  { %v7220_v28 = vpop.eup %7219  ;;  %v3492_v24 = vadd.f32 1e-05, %v3476_v36  ;;  %v10385_v6 = vsub.f32 %v10299_v7, %v3386_v26 }
 0xa42   :  { %v3511_v45 = vmul.f32 %v7218_v17, %v3510_v1  ;;  %v3517_v0 = vmul.f32 %v7220_v28, %v3491_v15  ;;  %vm3523_vm0 = vweird.f32 %v7220_v28 }
 0xa43   :  { %7221 = vrsqrt.f32 %v3492_v24  ;;  %v3418_v5 = vmul.f32 %v10385_v6, %v10385_v6  ;;  %vm3524_vm3 = vmor %vm3522_vm2, %vm3523_vm0  ;;  %vm3532_vm5 = vweird.f32 %v3492_v24 }
 0xa44   :  { %v3515_v33 = vsel %vm3514_vm15, %v7218_v17, %v3511_v45  ;;  %v3518_v34 = vmul.f32 %v7220_v28, %v3517_v0 }
 0xa45   :  { %v3666_v47 = vmul.f32 %v3515_v33, %v10278_v23  ;;  %v3450_v44 = vsel %vm347_vm1, %v3418_v5, 0.0 }
 0xa46   :  { %v3519_v21 = vmul.f32 0.5, %v3518_v34  ;;  %v3437_v41 = vpop.xlane.xlu2 %3436  ;;  %v3359_v4 = vpop.xlane.xlu0 %3358  ;;  %3451 = vadd.xlane.f32.xlu0 %v3450_v44  ;;  %3373 = vadd.xlane.f32.xlu1 %v3372_v60 }
 0xa47   :  { %v3477_v54 = vmul.f32 %v3437_v41, %v7862_v13  ;;  %v3387_v55 = vmul.f32 %v3359_v4, %v7862_v13  ;;  %v3683_v17 = vmul.f32 %v10390_v57, %v3666_v47 }
 0xa48   :  { %v3520_v35 = vsub.f32 1.5, %v3519_v21 }
 0xa49   :  { %v7222_v23 = vpop.eup %7221  ;;  %v3493_v16 = vadd.f32 1e-05, %v3477_v54  ;;  %v10406_v59 = vsub.f32 %v10312_v46, %v3387_v55  ;;  %v3700_v58 = vadd.f32 %v10397_v51, %v3683_v17 }
 0xa4a   :  { %v3521_v43 = vmul.f32 %v7220_v28, %v3520_v35  ;;  %v3527_v31 = vmul.f32 %v7222_v23, %v3492_v24  ;;  %vm3533_vm4 = vweird.f32 %v7222_v23 }
 0xa4b   :  { %7223 = vrsqrt.f32 %v3493_v16  ;;  %6786 = vmatmul.msk.f32.vlgmr.msrb.gmra.mxu2 %vm347_vm1, %v3700_v58  ;;  %v3419_v49 = vmul.f32 %v10406_v59, %v10406_v59  ;;  %vm3534_vm6 = vmor %vm3532_vm5, %vm3533_vm4  ;;  %vm3542_vm8 = vweird.f32 %v3493_v16 }
 0xa4c   :  { %v3525_v14 = vsel %vm3524_vm3, %v7220_v28, %v3521_v43  ;;  %v3528_v11 = vmul.f32 %v7222_v23, %v3527_v31 }
 0xa4d   :  { %v3453_v48 = vsel %vm347_vm1, %v3419_v49, 0.0  ;;  %v3667_v36 = vmul.f32 %v3525_v14, %v10289_v37 }
 0xa4e   :  { %v3529_v26 = vmul.f32 0.5, %v3528_v11  ;;  %v3440_v1 = vpop.xlane.xlu1 %3439  ;;  %v3362_v15 = vpop.xlane.xlu2 %3361  ;;  %3454 = vadd.xlane.f32.xlu2 %v3453_v48  ;;  %3376 = vadd.xlane.f32.xlu0 %v3375_v3 }
 0xa4f   :  { %v3478_v2 = vmul.f32 %v3440_v1, %v7862_v13  ;;  %v3388_v32 = vmul.f32 %v3362_v15, %v7862_v13  ;;  %v3684_v50 = vmul.f32 %v10390_v57, %v3667_v36 }
 0xa50   :  { %v3530_v28 = vsub.f32 1.5, %v3529_v26 }
 0xa51   :  { %v7224_v45 = vpop.eup %7223  ;;  %v3494_v0 = vadd.f32 1e-05, %v3478_v2  ;;  %v10420_v5 = vsub.f32 %v10325_v9, %v3388_v32  ;;  %v3701_v37 = vadd.f32 %v10397_v51, %v3684_v50 }
 0xa52   :  { %v3531_v33 = vmul.f32 %v7222_v23, %v3530_v28  ;;  %v3537_v34 = vmul.f32 %v7224_v45, %v3493_v16  ;;  %vm3543_vm7 = vweird.f32 %v7224_v45 }
 0xa53   :  { %7225 = vrsqrt.f32 %v3494_v0  ;;  %6787 = vmatmul.msk.f32.gmra.mxu2 %vm347_vm1, %v3701_v37  ;;  %v3420_v63 = vmul.f32 %v10420_v5, %v10420_v5  ;;  %vm3544_vm9 = vmor %vm3542_vm8, %vm3543_vm7  ;;  %vm3552_vm12 = vweird.f32 %v3494_v0 }
 0xa54   :  { %v3535_v47 = vsel %vm3534_vm6, %v7222_v23, %v3531_v33  ;;  %v3538_v44 = vmul.f32 %v7224_v45, %v3537_v34 }
 0xa55   :  { %v3456_v60 = vsel %vm347_vm1, %v3420_v63, 0.0  ;;  %v3668_v21 = vmul.f32 %v3535_v47, %v10302_v22 }
 0xa56   :  { %v3539_v41 = vmul.f32 0.5, %v3538_v44  ;;  %v3443_v4 = vpop.xlane.xlu0 %3442  ;;  %v3365_v54 = vpop.xlane.xlu1 %3364  ;;  %3457 = vadd.xlane.f32.xlu1 %v3456_v60 }
 0xa57   :  { %v3479_v24 = vmul.f32 %v3443_v4, %v7862_v13  ;;  %v3389_v55 = vmul.f32 %v3365_v54, %v7862_v13  ;;  %v3685_v17 = vmul.f32 %v10390_v57, %v3668_v21 }
 0xa58   :  { %v3540_v35 = vsub.f32 1.5, %v3539_v41 }
 0xa59   :  { %v7226_v53 = vpop.eup %7225  ;;  %v3495_v58 = vadd.f32 1e-05, %v3479_v24  ;;  %v10432_v23 = vsub.f32 %v10338_v56, %v3389_v55  ;;  %v3702_v43 = vadd.f32 %v10397_v51, %v3685_v17 }
 0xa5a   :  { %v3541_v22 = vmul.f32 %v7224_v45, %v3540_v35  ;;  %v3547_v31 = vmul.f32 %v7226_v53, %v3494_v0  ;;  %vm3553_vm10 = vweird.f32 %v7226_v53 }
 0xa5b   :  { %7227 = vrsqrt.f32 %v3495_v58  ;;  %6788 = vmatmul.msk.f32.gmra.mxu2 %vm347_vm1, %v3702_v43  ;;  %v3421_v49 = vmul.f32 %v10432_v23, %v10432_v23  ;;  %vm3554_vm13 = vmor %vm3552_vm12, %vm3553_vm10  ;;  %vm3562_vm15 = vweird.f32 %v3495_v58 }
 0xa5c   :  { %v3545_v14 = vsel %vm3544_vm9, %v7224_v45, %v3541_v22  ;;  %v3548_v11 = vmul.f32 %v7226_v53, %v3547_v31 }
 0xa5d   :  { %v3459_v48 = vsel %vm347_vm1, %v3421_v49, 0.0  ;;  %v3669_v3 = vmul.f32 %v3545_v14, %v10315_v20 }
 0xa5e   :  { %v3549_v36 = vmul.f32 0.5, %v3548_v11  ;;  %v3446_v26 = vpop.xlane.xlu2 %3445  ;;  %v3368_v1 = vpop.xlane.xlu0 %3367  ;;  %3460 = vadd.xlane.f32.xlu2 %v3459_v48 }
 0xa5f   :  { %v3480_v16 = vmul.f32 %v3446_v26, %v7862_v13  ;;  %v3390_v15 = vmul.f32 %v3368_v1, %v7862_v13  ;;  %v3686_v2 = vmul.f32 %v10390_v57, %v3669_v3 }
 0xa60   :  { %v3550_v32 = vsub.f32 1.5, %v3549_v36 }
 0xa61   :  { %v7228_v50 = vpop.eup %7227  ;;  %v3496_v28 = vadd.f32 1e-05, %v3480_v16  ;;  %v10444_v45 = vsub.f32 %v10351_v40, %v3390_v15  ;;  %v3703_v37 = vadd.f32 %v10397_v51, %v3686_v2 }
 0xa62   :  { %v3551_v20 = vmul.f32 %v7226_v53, %v3550_v32  ;;  %v3557_v33 = vmul.f32 %v7228_v50, %v3495_v58  ;;  %vm3563_vm14 = vweird.f32 %v7228_v50 }
 0xa63   :  { %7229 = vrsqrt.f32 %v3496_v28  ;;  %6789 = vmatmul.msk.f32.gmra.mxu2 %vm347_vm1, %v3703_v37  ;;  %v3422_v34 = vmul.f32 %v10444_v45, %v10444_v45  ;;  %vm3564_vm0 = vmor %vm3562_vm15, %vm3563_vm14  ;;  %vm3572_vm3 = vweird.f32 %v3496_v28 }
 0xa64   :  { %v3555_v63 = vsel %vm3554_vm13, %v7226_v53, %v3551_v20  ;;  %v3558_v47 = vmul.f32 %v7228_v50, %v3557_v33 }
 0xa65   :  { %v3462_v44 = vsel %vm347_vm1, %v3422_v34, 0.0  ;;  %v3670_v60 = vmul.f32 %v3555_v63, %v10328_v52 }
 0xa66   :  { %v3559_v21 = vmul.f32 0.5, %v3558_v47  ;;  %v3371_v41 = vpop.xlane.xlu2 %3370  ;;  %3463 = vadd.xlane.f32.xlu0 %v3462_v44 }
 0xa67   :  { %v3391_v4 = vmul.f32 %v3371_v41, %v7862_v13  ;;  %v3687_v0 = vmul.f32 %v10390_v57, %v3670_v60 }
 0xa68   :  { %v3560_v54 = vsub.f32 1.5, %v3559_v21 }
 0xa69   :  { %v7230_v24 = vpop.eup %7229  ;;  %v10455_v55 = vsub.f32 %v10362_v38, %v3391_v4  ;;  %v3704_v17 = vadd.f32 %v10397_v51, %v3687_v0 }
 0xa6a   :  { %v3561_v35 = vmul.f32 %v7228_v50, %v3560_v54  ;;  %v3567_v53 = vmul.f32 %v7230_v24, %v3496_v28  ;;  %vm3573_vm2 = vweird.f32 %v7230_v24 }
 0xa6b   :  { %6790 = vmatmul.msk.f32.gmra.mxu2 %vm347_vm1, %v3704_v17  ;;  %v3423_v52 = vmul.f32 %v10455_v55, %v10455_v55  ;;  %vm3574_vm4 = vmor %vm3572_vm3, %vm3573_vm2 }
 0xa6c   :  { %v3565_v43 = vsel %vm3564_vm0, %v7228_v50, %v3561_v35  ;;  %v3568_v22 = vmul.f32 %v7230_v24, %v3567_v53 }
 0xa6d   :  { %v3465_v31 = vsel %vm347_vm1, %v3423_v52, 0.0  ;;  %v3671_v49 = vmul.f32 %v3565_v43, %v10341_v10 }
 0xa6e   :  { %v3569_v14 = vmul.f32 0.5, %v3568_v22  ;;  %3466 = vadd.xlane.f32.xlu1 %v3465_v31 }
 0xa6f   :  { %v3688_v11 = vmul.f32 %v10390_v57, %v3671_v49 }
 0xa70   :  { %v3570_v48 = vsub.f32 1.5, %v3569_v14 }
 0xa71   :  { %v3705_v58 = vadd.f32 %v10397_v51, %v3688_v11 }
 0xa72   :  { %v3571_v3 = vmul.f32 %v7230_v24, %v3570_v48 }
 0xa73   :  { %6791 = vmatmul.msk.f32.gmra.mxu2 %vm347_vm1, %v3705_v58 }
 0xa74   :  { %v3575_v36 = vsel %vm3574_vm4, %v7230_v24, %v3571_v3 }
 0xa75   :  { %v3672_v26 = vmul.f32 %v3575_v36, %v10354_v39 }
 0xa77   :  { %v3689_v1 = vmul.f32 %v10390_v57, %v3672_v26  ;;  %v10491_v26 = vld [vmem:[%s11816_s17] ss:$0 sm:$0xff] }
 0xa79   :  { %v3706_v10 = vadd.f32 %v10397_v51, %v3689_v1 }
 0xa7b   :  { %6792 = vmatmul.msk.f32.gmra.mxu2 %vm347_vm1, %v3706_v10 }
 0xab1   :  { %v3449_v16 = vpop.xlane.xlu1 %3448 }
 0xab2   :  { %v3481_v15 = vmul.f32 %v3449_v16, %v7862_v13 }
 0xab4   :  { %v3497_v2 = vadd.f32 1e-05, %v3481_v15 }
 0xab6   :  { %7231 = vrsqrt.f32 %v3497_v2  ;;  %vm3582_vm6 = vweird.f32 %v3497_v2 }
 0xab9   :  { %v3452_v32 = vpop.xlane.xlu0 %3451  ;;  %v3374_v50 = vpop.xlane.xlu1 %3373 }
 0xaba   :  { %v3482_v28 = vmul.f32 %v3452_v32, %v7862_v13  ;;  %v3392_v37 = vmul.f32 %v3374_v50, %v7862_v13 }
 0xabc   :  { %v7232_v20 = vpop.eup %7231  ;;  %v3498_v33 = vadd.f32 1e-05, %v3482_v28  ;;  %v10474_v39 = vsub.f32 %v10382_v8, %v3392_v37 }
 0xabd   :  { %v3577_v34 = vmul.f32 %v7232_v20, %v3497_v2  ;;  %vm3583_vm5 = vweird.f32 %v7232_v20 }
 0xabe   :  { %7233 = vrsqrt.f32 %v3498_v33  ;;  %v3424_v63 = vmul.f32 %v10474_v39, %v10474_v39  ;;  %vm3584_vm7 = vmor %vm3582_vm6, %vm3583_vm5  ;;  %vm3592_vm9 = vweird.f32 %v3498_v33 }
 0xabf   :  { %v3578_v47 = vmul.f32 %v7232_v20, %v3577_v34 }
 0xac0   :  { %v3468_v44 = vsel %vm347_vm1, %v3424_v63, 0.0 }
 0xac1   :  { %v3579_v60 = vmul.f32 0.5, %v3578_v47  ;;  %v3455_v21 = vpop.xlane.xlu2 %3454  ;;  %3469 = vadd.xlane.f32.xlu2 %v3468_v44  ;;  %v3377_v41 = vpop.xlane.xlu0 %3376 }
 0xac2   :  { %v3483_v4 = vmul.f32 %v3455_v21, %v7862_v13  ;;  %v3393_v0 = vmul.f32 %v3377_v41, %v7862_v13 }
 0xac3   :  { %v3580_v54 = vsub.f32 1.5, %v3579_v60 }
 0xac4   :  { %v7234_v24 = vpop.eup %7233  ;;  %v3499_v17 = vadd.f32 1e-05, %v3483_v4  ;;  %v10482_v35 = vsub.f32 %v10403_v25, %v3393_v0 }
 0xac5   :  { %v3581_v53 = vmul.f32 %v7232_v20, %v3580_v54  ;;  %v3587_v52 = vmul.f32 %v7234_v24, %v3498_v33  ;;  %vm3593_vm8 = vweird.f32 %v7234_v24 }
 0xac6   :  { %7235 = vrsqrt.f32 %v3499_v17  ;;  %v3425_v43 = vmul.f32 %v10482_v35, %v10482_v35  ;;  %vm3594_vm10 = vmor %vm3592_vm9, %vm3593_vm8  ;;  %vm3602_vm13 = vweird.f32 %v3499_v17 }
 0xac7   :  { %v3585_v22 = vsel %vm3584_vm7, %v7232_v20, %v3581_v53  ;;  %v3588_v31 = vmul.f32 %v7234_v24, %v3587_v52 }
 0xac8   :  { %v3471_v49 = vsel %vm347_vm1, %v3425_v43, 0.0  ;;  %v3673_v14 = vmul.f32 %v3585_v22, %v10371_v18 }
 0xac9   :  { %v3589_v11 = vmul.f32 0.5, %v3588_v31  ;;  %v3458_v48 = vpop.xlane.xlu1 %3457  ;;  %3472 = vadd.xlane.f32.xlu0 %v3471_v49 }
 0xaca   :  { %v3484_v58 = vmul.f32 %v3458_v48, %v7862_v13  ;;  %v3690_v3 = vmul.f32 %v10390_v57, %v3673_v14 }
 0xacb   :  { %v3590_v36 = vsub.f32 1.5, %v3589_v11 }
 0xacc   :  { %v7236_v1 = vpop.eup %7235  ;;  %v3500_v10 = vadd.f32 1e-05, %v3484_v58  ;;  %v3707_v16 = vadd.f32 %v10397_v51, %v3690_v3 }
 0xacd   :  { %v3591_v15 = vmul.f32 %v7234_v24, %v3590_v36  ;;  %v3597_v2 = vmul.f32 %v7236_v1, %v3499_v17  ;;  %vm3603_vm12 = vweird.f32 %v7236_v1 }
 0xace   :  { %7237 = vrsqrt.f32 %v3500_v10  ;;  %v3787_v18 = vpop.f32.mrf.mxu2  ;;  %6793 = vmatmul.msk.f32.gmra.mxu2 %vm347_vm1, %v3707_v16  ;;  %vm3604_vm14 = vmor %vm3602_vm13, %vm3603_vm12  ;;  %vm3612_vm0 = vweird.f32 %v3500_v10 }
 0xacf   :  { %v3595_v32 = vsel %vm3594_vm10, %v7234_v24, %v3591_v15  ;;  %v3598_v50 = vmul.f32 %v7236_v1, %v3597_v2  ;;  %v10496_v28 = vadd.f32 %v10491_v26, %v3787_v18 }
 0xad0   :  { %v3674_v37 = vmul.f32 %v3595_v32, %v10385_v6 }
 0xad1   :  { %v3599_v20 = vmul.f32 0.5, %v3598_v50  ;;  %v10500_v34 = vmul.f32 0.70710677, %v10496_v28  ;;  %v3461_v63 = vpop.xlane.xlu2 %3460 }
 0xad2   :  { %v3485_v33 = vmul.f32 %v3461_v63, %v7862_v13  ;;  %v3691_v47 = vmul.f32 %v10390_v57, %v3674_v37 }
 0xad3   :  { %v3600_v44 = vsub.f32 1.5, %v3599_v20  ;;  %v3867_v60 = vand.u32 2147483647, %v10500_v34 }
 0xad4   :  { %v7238_v21 = vpop.eup %7237  ;;  %v10505_v41 = vadd.f32 1e-05, %v3485_v33  ;;  %v3708_v4 = vadd.f32 %v10397_v51, %v3691_v47 }
 0xad5   :  { %v3601_v0 = vmul.f32 %v7236_v1, %v3600_v44  ;;  %v3607_v6 = vmul.f32 %v7238_v21, %v3500_v10  ;;  %v3883_v54 = vmul.f32 0.3275911, %v3867_v60  ;;  %vm3613_vm15 = vweird.f32 %v7238_v21 }
 0xad6   :  { %7239 = vrsqrt.f32 %v10505_v41  ;;  %v3790_v24 = vpop.f32.mrf.mxu2  ;;  %6794 = vmatmul.msk.f32.gmra.mxu2 %vm347_vm1, %v3708_v4  ;;  %v4299_v50 = vsub.f32 0.0, %v3867_v60  ;;  %vm3614_vm2 = vmor %vm3612_vm0, %vm3613_vm15  ;;  %vm3622_vm8 = vweird.f32 %v10505_v41 }
 0xad7   :  { %v3605_v53 = vsel %vm3604_vm14, %v7236_v1, %v3601_v0  ;;  %v3608_v52 = vmul.f32 %v7238_v21, %v3607_v6  ;;  %v3899_v43 = vadd.f32 1.0, %v3883_v54  ;;  %v10511_v22 = vadd.f32 %v10491_v26, %v3790_v24 }
 0xad8   :  { %v3675_v31 = vmul.f32 %v3605_v53, %v10406_v59  ;;  %v4315_v54 = vmul.f32 %v4299_v50, %v3867_v60 }
 0xad9   :  { %v3609_v49 = vmul.f32 0.5, %v3608_v52  ;;  %7241 = vrcp.f32 %v3899_v43  ;;  %v3464_v14 = vpop.xlane.xlu0 %3463  ;;  %v10515_v17 = vmul.f32 0.70710677, %v10511_v22  ;;  %v3924_v0 = vand.u32 2147483647, %v3899_v43 }
 0xada   :  { %v3486_v48 = vmul.f32 %v3464_v14, %v7862_v13  ;;  %v3692_v58 = vmul.f32 %v10390_v57, %v3675_v31  ;;  %v3926_v6 = vand.u32 2147483648, %v3899_v43  ;;  %vm3920_vm4 = vweird.f32 %v3899_v43 }
 0xadb   :  { %v3610_v11 = vsub.f32 1.5, %v3609_v49  ;;  %v10522_v36 = vand.u32 2147483647, %v10515_v17  ;;  %vm3925_vm6 = vcmp.eq.f32.partialorder %v3924_v0, 8.507059e+37 }
 0xadc   :  { %v10519_v3 = vpop.eup %7239  ;;  %v10526_v59 = vadd.f32 1e-05, %v3486_v48  ;;  %v3709_v18 = vadd.f32 %v10397_v51, %v3692_v58  ;;  %v3927_v58 = vor.u32 1.1754944e-38, %v3926_v6 }
 0xadd   :  { %v3617_v1 = vmul.f32 %v10519_v3, %v10505_v41  ;;  %v3611_v16 = vmul.f32 %v7238_v21, %v3610_v11  ;;  %v3884_v15 = vmul.f32 0.3275911, %v10522_v36  ;;  %vm3623_vm7 = vweird.f32 %v10519_v3 }
 0xade   :  { %v3793_v2 = vpop.f32.mrf.mxu2  ;;  %7243 = vrsqrt.f32 %v10526_v59  ;;  %6795 = vmatmul.msk.f32.gmra.mxu2 %vm347_vm1, %v3709_v18  ;;  %vm10578_vm10 = vmor %vm3622_vm8, %vm3623_vm7  ;;  %vm3632_vm15 = vweird.f32 %v10526_v59 }
 0xadf   :  { %v7242_v32 = vpop.eup %7241  ;;  %v3618_v37 = vmul.f32 %v10519_v3, %v3617_v1  ;;  %v10532_v63 = vadd.f32 1.0, %v3884_v15  ;;  %v10536_v33 = vadd.f32 %v10491_v26, %v3793_v2  ;;  %v3615_v44 = vsel %vm3614_vm2, %v7238_v21, %v3611_v16 }
 0xae0   :  { %v3916_v20 = vmul.f32 %v7242_v32, %v3899_v43  ;;  %vm3921_vm3 = vweird.f32 %v7242_v32  ;;  %v3676_v49 = vmul.f32 %v3615_v44, %v10420_v5  ;;  %v10547_v21 = vmul.f32 0.5, %v10496_v28 }
 0xae1   :  { %v3467_v47 = vpop.xlane.xlu1 %3466  ;;  %7245 = vrcp.f32 %v10532_v63  ;;  %v3619_v24 = vmul.f32 0.5, %v3618_v37  ;;  %v10540_v10 = vmul.f32 0.70710677, %v10536_v33  ;;  %vm3922_vm5 = vmor %vm3920_vm4, %vm3921_vm3  ;;  %v4331_v1 = vmul.f32 1.442695, %v4315_v54 }
 0xae2   :  { %v3917_v4 = vsub.f32 1.0, %v3916_v20  ;;  %v3487_v52 = vmul.f32 %v3467_v47, %v7862_v13  ;;  %v4300_v37 = vsub.f32 0.0, %v10522_v36  ;;  %v3693_v20 = vmul.f32 %v10390_v57, %v3676_v49 }
 0xae3   :  { %v10552_v11 = vand.u32 2147483647, %v10540_v10  ;;  %v3620_v16 = vsub.f32 1.5, %v3619_v24  ;;  %v3941_v6 = vand.u32 2147483648, %v10532_v63  ;;  %vm3935_vm12 = vweird.f32 %v10532_v63 }
 0xae4   :  { %v3918_v53 = vmul.f32 %v7242_v32, %v3917_v4  ;;  %v10543_v31 = vpop.eup %7243  ;;  %v10554_v15 = vadd.f32 1e-05, %v3487_v52  ;;  %v3939_v52 = vand.u32 2147483647, %v10532_v63  ;;  %v4316_v49 = vmul.f32 %v4300_v37, %v10522_v36 }
 0xae5   :  { %v3627_v60 = vmul.f32 %v10543_v31, %v10526_v59  ;;  %v3885_v43 = vmul.f32 0.3275911, %v10552_v11  ;;  %v3621_v4 = vmul.f32 %v10519_v3, %v3620_v16  ;;  %v3710_v41 = vadd.f32 %v10397_v51, %v3693_v20 }
 0xae6   :  { %v3919_v14 = vadd.f32 %v7242_v32, %v3918_v53  ;;  %v3796_v48 = vpop.f32.mrf.mxu2  ;;  %7247 = vrsqrt.f32 %v10554_v15  ;;  %v3942_v36 = vor.u32 1.1754944e-38, %v3941_v6  ;;  %vm3940_vm14 = vcmp.eq.f32.partialorder %v3939_v52, 8.507059e+37 }
 0xae7   :  { %v7246_v2 = vpop.eup %7245  ;;  %v3628_v28 = vmul.f32 %v10543_v31, %v3627_v60  ;;  %v10564_v44 = vadd.f32 1.0, %v3885_v43  ;;  %6796 = vmatmul.msk.f32.gmra.mxu2 %vm347_vm1, %v3710_v41  ;;  %vm3633_vm0 = vweird.f32 %v10543_v31 }
 0xae8   :  { %v3923_v5 = vsel %vm3922_vm5, %v7242_v32, %v3919_v14  ;;  %v3931_v50 = vmul.f32 %v7246_v2, %v10532_v63  ;;  %v10568_v32 = vadd.f32 %v10491_v26, %v3796_v48  ;;  %vm3936_vm9 = vweird.f32 %v7246_v2  ;;  %vm10626_vm2 = vmor %vm3632_vm15, %vm3633_vm0 }
 0xae9   :  { %v10558_v18 = vsel %vm3925_vm6, %v3927_v58, %v3923_v5  ;;  %v3629_v24 = vmul.f32 0.5, %v3628_v28  ;;  %7249 = vrcp.f32 %v10564_v44  ;;  %v3625_v58 = vsel %vm10578_vm10, %v10519_v3, %v3621_v4  ;;  %vm3937_vm13 = vmor %vm3935_vm12, %vm3936_vm9 }
 0xaea   :  { %v4155_v47 = vmul.f32 1.0614054, %v10558_v18  ;;  %v3932_v0 = vsub.f32 1.0, %v3931_v50  ;;  %7251 = vpow2.f32 %v4331_v1  ;;  %v10583_v48 = vmul.f32 0.70710677, %v10568_v32 }
 0xaeb   :  { %v3630_v43 = vsub.f32 1.5, %v3629_v24  ;;  %v4301_v50 = vsub.f32 0.0, %v10552_v11  ;;  %v4333_v3 = vmul.f32 1.442695, %v4316_v49  ;;  %v3677_v4 = vmul.f32 %v3625_v58, %v10432_v23 }
 0xaec   :  { %v4171_v54 = vadd.f32 -1.4531521, %v4155_v47  ;;  %v3933_v53 = vmul.f32 %v7246_v2, %v3932_v0  ;;  %v10590_v28 = vpop.eup %7247  ;;  %v10595_v37 = vand.u32 2147483647, %v10583_v48  ;;  %v3954_v58 = vand.u32 2147483647, %v10564_v44 }
 0xaed   :  { %v3631_v49 = vmul.f32 %v10543_v31, %v3630_v43  ;;  %vm3950_vm4 = vweird.f32 %v10564_v44  ;;  %vm4395_vm5 = vcmp.lt.f32.partialorder %v10500_v34, 0.0  ;;  %vm3643_vm8 = vweird.f32 %v10590_v28 }
 0xaee   :  { %v4187_v14 = vmul.f32 %v4171_v54, %v10558_v18  ;;  %v3934_v16 = vadd.f32 %v7246_v2, %v3933_v53  ;;  %v3799_v5 = vpop.f32.mrf.mxu2  ;;  %v3886_v6 = vmul.f32 0.3275911, %v10595_v37  ;;  %vm3955_vm6 = vcmp.eq.f32.partialorder %v3954_v58, 8.507059e+37 }
 0xaef   :  { %v7250_v63 = vpop.eup %7249  ;;  %vm4396_vm0 = vcmp.lt.f32.partialorder %v10515_v17, 0.0 }
 0xaf0   :  { %v4203_v1 = vadd.f32 1.4214138, %v4187_v14  ;;  %v3938_v20 = vsel %vm3937_vm13, %v7246_v2, %v3934_v16  ;;  %v3946_v24 = vmul.f32 %v7250_v63, %v10564_v44  ;;  %v3637_v2 = vmul.f32 %v10590_v28, %v10554_v15  ;;  %v7252_v53 = vpop.eup %7251 }
 0xaf1   :  { %v10601_v0 = vsel %vm3940_vm14, %v3942_v36, %v3938_v20  ;;  %v4317_v14 = vmul.f32 %v4301_v50, %v10552_v11  ;;  %v10611_v23 = vadd.f32 1.0, %v3886_v6  ;;  %v3956_v16 = vand.u32 2147483648, %v10564_v44 }
 0xaf2   :  { %v4219_v47 = vmul.f32 %v4203_v1, %v10558_v18  ;;  %v4156_v54 = vmul.f32 1.0614054, %v10601_v0  ;;  %v3947_v41 = vsub.f32 1.0, %v3946_v24  ;;  %v10618_v1 = vadd.f32 %v10491_v26, %v3799_v5 }
 0xaf3   :  { %7253 = vrcp.f32 %v10611_v23  ;;  %v3694_v20 = vmul.f32 %v10390_v57, %v3677_v4  ;;  %vm3951_vm3 = vweird.f32 %v7250_v63  ;;  %v3635_v5 = vsel %vm10626_vm2, %v10543_v31, %v3631_v49 }
 0xaf4   :  { %v4235_v52 = vadd.f32 -0.28449672, %v4219_v47  ;;  %v4172_v60 = vadd.f32 -1.4531521, %v4156_v54  ;;  %v3948_v50 = vmul.f32 %v7250_v63, %v3947_v41  ;;  %v3638_v47 = vmul.f32 %v10590_v28, %v3637_v2  ;;  %vm3952_vm7 = vmor %vm3950_vm4, %vm3951_vm3 }
 0xaf5   :  { %7255 = vpow2.f32 %v4333_v3  ;;  %v10636_v54 = vmul.f32 1.442695, %v4317_v14  ;;  %v3957_v2 = vor.u32 1.1754944e-38, %v3956_v16  ;;  %v10640_v3 = vmul.f32 0.70710677, %v10618_v1 }
 0xaf6   :  { %v4251_v36 = vmul.f32 %v4235_v52, %v10558_v18  ;;  %v4188_v43 = vmul.f32 %v4172_v60, %v10601_v0  ;;  %v3949_v59 = vadd.f32 %v7250_v63, %v3948_v50  ;;  %v3802_v24 = vpop.f32.mrf.mxu2  ;;  %v3711_v31 = vadd.f32 %v10397_v51, %v3694_v20  ;;  %v4478_v20 = vld [vmem:[%s11821_s21 + $0x18] sm:$0xff] }
 0xaf7   :  { %v3678_v49 = vmul.f32 %v3635_v5, %v10444_v45  ;;  %v3639_v41 = vmul.f32 0.5, %v3638_v47  ;;  %v10652_v16 = vadd.f32 %v10491_v26, %v3802_v24  ;;  %4543 = vmatpush.msra.mxu3 %v4478_v20  ;;  %v3969_v47 = vand.u32 2147483647, %v10611_v23  ;;  %v4477_v5 = vld [vmem:[%s11821_s21 + $0x10] sm:$0xff] }
 0xaf8   :  { %v4267_v6 = vadd.f32 0.2548296, %v4251_v36  ;;  %v4204_v4 = vadd.f32 1.4214138, %v4188_v43  ;;  %v3953_v60 = vsel %vm3952_vm7, %v7250_v63, %v3949_v59  ;;  %6797 = vmatmul.msk.f32.gmra.mxu2 %vm347_vm1, %v3711_v31  ;;  %v4302_v63 = vsub.f32 0.0, %v10595_v37 }
 0xaf9   :  { %v7254_v58 = vpop.eup %7253  ;;  %v10645_v36 = vsel %vm3955_vm6, %v3957_v2, %v3953_v60  ;;  %v3640_v24 = vsub.f32 1.5, %v3639_v41  ;;  %4544 = vmatpush.msra.mxu3 %v4477_v5  ;;  %v3971_v31 = vand.u32 2147483648, %v10611_v23  ;;  %v10667_v60 = vmul.f32 0.70710677, %v10652_v16 }
 0xafa   :  { %v4283_v52 = vmul.f32 %v4267_v6, %v10558_v18  ;;  %v4220_v44 = vmul.f32 %v4204_v4, %v10601_v0  ;;  %v10648_v18 = vand.u32 2147483647, %v10640_v3  ;;  %v4157_v11 = vmul.f32 1.0614054, %v10645_v36 }
 0xafb   :  { %v3961_v45 = vmul.f32 %v7254_v58, %v10611_v23  ;;  %vm3966_vm9 = vweird.f32 %v7254_v58  ;;  %vm3965_vm10 = vweird.f32 %v10611_v23  ;;  %vm10674_vm12 = vcmp.eq.f32.partialorder %v3969_v47, 8.507059e+37 }
 0xafc   :  { %v4363_v14 = vmul.f32 %v7252_v53, %v4283_v52  ;;  %v4236_v43 = vadd.f32 -0.28449672, %v4220_v44  ;;  %v7256_v53 = vpop.eup %7255  ;;  %v3887_v6 = vmul.f32 0.3275911, %v10648_v18  ;;  %v4173_v59 = vadd.f32 -1.4531521, %v4157_v11  ;;  %vm3967_vm13 = vmor %vm3965_vm10, %vm3966_vm9 }
 0xafd   :  { %v3962_v52 = vsub.f32 1.0, %v3961_v45  ;;  %v4475_v11 = vld [vmem:[%s11821_s21] sm:$0xff]  ;;  %v3972_v34 = vor.u32 1.1754944e-38, %v3971_v31  ;;  %v3695_v23 = vmul.f32 %v10390_v57, %v3678_v49  ;;  %vm3642_vm14 = vweird.f32 %v10554_v15 }
 0xafe   :  { %v4379_v50 = vsub.f32 1.0, %v4363_v14  ;;  %v4252_v4 = vmul.f32 %v4236_v43, %v10601_v0  ;;  %v10664_v44 = vadd.f32 1.0, %v3887_v6  ;;  %v4476_v14 = vld [vmem:[%s11821_s21 + $0x8] sm:$0xff]  ;;  %v4189_v29 = vmul.f32 %v4173_v59, %v10645_v36  ;;  %vm10698_vm15 = vmor %vm3642_vm14, %vm3643_vm8 }
 0xaff   :  { %v3963_v62 = vmul.f32 %v7254_v58, %v3962_v52  ;;  %4545 = vmatpush.msra.mxu3 %v4476_v14  ;;  %v3641_v59 = vmul.f32 %v10590_v28, %v3640_v24  ;;  %v3836_v24 = vmul.f32 0.5, %v10511_v22  ;;  %vm4397_vm3 = vcmp.lt.f32.partialorder %v10540_v10, 0.0 }
 0xb00   :  { %v4411_v2 = vsub.f32 0.0, %v4379_v50  ;;  %v4268_v20 = vadd.f32 0.2548296, %v4252_v4  ;;  %7257 = vrcp.f32 %v10664_v44  ;;  %v4205_v5 = vadd.f32 1.4214138, %v4189_v29 }
 0xb01   :  { %v3964_v4 = vadd.f32 %v7254_v58, %v3963_v62  ;;  %4546 = vmatpush.msra.mxu3 %v4475_v11  ;;  %v4318_v62 = vmul.f32 %v4302_v63, %v10595_v37  ;;  %7259 = vpow2.f32 %v10636_v54  ;;  %v3645_v22 = vsel %vm10698_vm15, %v10590_v28, %v3641_v59 }
 0xb02   :  { %v4427_v41 = vsel %vm4395_vm5, %v4411_v2, %v4379_v50  ;;  %v4284_v6 = vmul.f32 %v4268_v20, %v10601_v0  ;;  %v10683_v50 = vand.u32 2147483647, %v10667_v60  ;;  %v4221_v2 = vmul.f32 %v4205_v5, %v10645_v36 }
 0xb03   :  { %v4443_v45 = vadd.f32 1.0, %v4427_v41  ;;  %v3968_v14 = vsel %vm3967_vm13, %v7254_v58, %v3964_v4  ;;  %v3805_v58 = vpop.f32.mrf.mxu2  ;;  %v3712_v63 = vadd.f32 %v10397_v51, %v3695_v23  ;;  %v3984_v23 = vand.u32 2147483647, %v10664_v44 }
 0xb04   :  { %v4364_v52 = vmul.f32 %v7256_v53, %v4284_v6  ;;  %v10691_v29 = vsel %vm10674_vm12, %v3972_v34, %v3968_v14  ;;  %v3888_v0 = vmul.f32 0.3275911, %v10683_v50  ;;  %v4237_v49 = vadd.f32 -0.28449672, %v4221_v2 }
 0xb05   :  { %v4459_v47 = vmul.f32 %v4443_v45, %v10547_v21  ;;  %v4158_v15 = vmul.f32 1.0614054, %v10691_v29  ;;  %v4337_v45 = vmul.f32 1.442695, %v4318_v62  ;;  %6798 = vmatmul.msk.f32.gmra.mxu2 %vm347_vm1, %v3712_v63  ;;  %v10717_v54 = vadd.f32 %v10491_v26, %v3805_v58 }
 0xb06   :  { %v4380_v31 = vsub.f32 1.0, %v4364_v52  ;;  %v7258_v53 = vpop.eup %7257  ;;  %v10708_v37 = vadd.f32 1.0, %v3888_v0  ;;  %v4253_v41 = vmul.f32 %v4237_v49, %v10645_v36  ;;  %v3679_v34 = vmul.f32 %v3645_v22, %v10455_v55 }
 0xb07   :  { %6802 = vmatmul.msk.f32.vlgmr.msra.gmra.mxu3 %vm2547_vm11, %v4459_v47  ;;  %v4174_v43 = vadd.f32 -1.4531521, %v4158_v15  ;;  %v3976_v11 = vmul.f32 %v7258_v53, %v10664_v44  ;;  %v3986_v17 = vand.u32 2147483648, %v10664_v44  ;;  %vm3981_vm2 = vweird.f32 %v7258_v53  ;;  %v7260_v14 = vpop.eup %7259 }
 0xb08   :  { %v4412_v20 = vsub.f32 0.0, %v4380_v31  ;;  %7261 = vrcp.f32 %v10708_v37  ;;  %v4269_v6 = vadd.f32 0.2548296, %v4253_v41  ;;  %v10726_v0 = vmul.f32 0.70710677, %v10717_v54 }
 0xb09   :  { %v4190_v5 = vmul.f32 %v4174_v43, %v10691_v29  ;;  %v3977_v4 = vsub.f32 1.0, %v3976_v11  ;;  %7263 = vpow2.f32 %v4337_v45  ;;  %vm3980_vm4 = vweird.f32 %v10664_v44 }
 0xb0a   :  { %v4428_v28 = vsel %vm4396_vm0, %v4412_v20, %v4380_v31  ;;  %v4285_v47 = vmul.f32 %v4269_v6, %v10645_v36  ;;  %vm3982_vm5 = vmor %vm3980_vm4, %vm3981_vm2  ;;  %vm3985_vm6 = vcmp.eq.f32.partialorder %v3984_v23, 8.507059e+37  ;;  %v3987_v36 = vor.u32 1.1754944e-38, %v3986_v17 }
 0xb0b   :  { %v4444_v59 = vadd.f32 1.0, %v4428_v28  ;;  %v4206_v52 = vadd.f32 1.4214138, %v4190_v5  ;;  %v3978_v2 = vmul.f32 %v7258_v53, %v3977_v4  ;;  %v10731_v15 = vand.u32 2147483647, %v10726_v0 }
 0xb0c   :  { %v4365_v31 = vmul.f32 %v7260_v14, %v4285_v47  ;;  %v4303_v43 = vsub.f32 0.0, %v10648_v18  ;;  %v3999_v44 = vand.u32 2147483647, %v10708_v37  ;;  %v4001_v4 = vand.u32 2147483648, %v10708_v37 }
 0xb0d   :  { %v4460_v62 = vmul.f32 %v4444_v59, %v3836_v24  ;;  %v4222_v55 = vmul.f32 %v4206_v52, %v10691_v29  ;;  %v3979_v49 = vadd.f32 %v7258_v53, %v3978_v2  ;;  %v3696_v24 = vmul.f32 %v10390_v57, %v3679_v34 }
 0xb0e   :  { %v7262_v21 = vpop.eup %7261  ;;  %v4381_v58 = vsub.f32 1.0, %v4365_v31  ;;  %v3889_v11 = vmul.f32 0.3275911, %v10731_v15  ;;  %v3837_v52 = vmul.f32 0.5, %v10536_v33  ;;  %v4319_v14 = vmul.f32 %v4303_v43, %v10648_v18 }
 0xb0f   :  { %6803 = vmatmul.msk.f32.gmra.mxu3 %vm2547_vm11, %v4460_v62  ;;  %v4238_v22 = vadd.f32 -0.28449672, %v4222_v55  ;;  %v3983_v63 = vsel %vm3982_vm5, %v7258_v53, %v3979_v49  ;;  %v3991_v20 = vmul.f32 %v7262_v21, %v10708_v37  ;;  %v7264_v57 = vpop.eup %7263  ;;  %vm3996_vm7 = vweird.f32 %v7262_v21 }
 0xb10   :  { %v3988_v41 = vsel %vm3985_vm6, %v3987_v36, %v3983_v63  ;;  %v4413_v45 = vsub.f32 0.0, %v4381_v58  ;;  %v10741_v59 = vadd.f32 1.0, %v3889_v11  ;;  %v3713_v53 = vadd.f32 %v10397_v51, %v3696_v24 }
 0xb11   :  { %v4254_v28 = vmul.f32 %v4238_v22, %v10691_v29  ;;  %v4159_v6 = vmul.f32 1.0614054, %v3988_v41  ;;  %v3992_v5 = vsub.f32 1.0, %v3991_v20  ;;  %vm3995_vm8 = vweird.f32 %v10708_v37 }
 0xb12   :  { %v4429_v34 = vsel %vm4397_vm3, %v4413_v45, %v4381_v58  ;;  %7265 = vrcp.f32 %v10741_v59  ;;  %6799 = vmatmul.msk.f32.gmra.mxu2 %vm347_vm1, %v3713_v53  ;;  %vm3997_vm9 = vmor %vm3995_vm8, %vm3996_vm7  ;;  %v4002_v10 = vor.u32 1.1754944e-38, %v4001_v4  ;;  %vm4000_vm10 = vcmp.eq.f32.partialorder %v3999_v44, 8.507059e+37 }
 0xb13   :  { %v4270_v23 = vadd.f32 0.2548296, %v4254_v28  ;;  %v4175_v17 = vadd.f32 -1.4531521, %v4159_v6  ;;  %v3993_v47 = vmul.f32 %v7262_v21, %v3992_v5  ;;  %v4445_v2 = vadd.f32 1.0, %v4429_v34 }
 0xb14   :  { %v4339_v24 = vmul.f32 1.442695, %v4319_v14  ;;  %v4304_v58 = vsub.f32 0.0, %v10683_v50  ;;  %vm4398_vm12 = vcmp.lt.f32.partialorder %v10583_v48, 0.0  ;;  %v4014_v53 = vand.u32 2147483647, %v10741_v59 }
 0xb15   :  { %v4286_v62 = vmul.f32 %v4270_v23, %v10691_v29  ;;  %v4191_v31 = vmul.f32 %v4175_v17, %v3988_v41  ;;  %v3994_v55 = vadd.f32 %v7262_v21, %v3993_v47  ;;  %v4461_v51 = vmul.f32 %v4445_v2, %v3837_v52 }
 0xb16   :  { %7267 = vpow2.f32 %v4339_v24  ;;  %v4016_v34 = vand.u32 2147483648, %v10741_v59  ;;  %vm4010_vm14 = vweird.f32 %v10741_v59  ;;  %vm4015_vm0 = vcmp.eq.f32.partialorder %v4014_v53, 8.507059e+37 }
 0xb17   :  { %v4366_v49 = vmul.f32 %v7264_v57, %v4286_v62  ;;  %v4207_v36 = vadd.f32 1.4214138, %v4191_v31  ;;  %v3998_v33 = vsel %vm3997_vm9, %v7262_v21, %v3994_v55  ;;  %6804 = vmatmul.msk.f32.gmra.mxu3 %vm2547_vm11, %v4461_v51  ;;  %v4320_v21 = vmul.f32 %v4304_v58, %v10683_v50 }
 0xb18   :  { %v4003_v18 = vsel %vm4000_vm10, %v4002_v10, %v3998_v33  ;;  %v7266_v20 = vpop.eup %7265  ;;  %v3838_v57 = vmul.f32 0.5, %v10568_v32  ;;  %v4017_v31 = vor.u32 1.1754944e-38, %v4016_v34  ;;  %vm4399_vm2 = vcmp.lt.f32.partialorder %v10640_v3, 0.0 }
 0xb19   :  { %v4382_v22 = vsub.f32 1.0, %v4366_v49  ;;  %v4223_v29 = vmul.f32 %v4207_v36, %v3988_v41  ;;  %v4160_v63 = vmul.f32 1.0614054, %v4003_v18  ;;  %v4006_v45 = vmul.f32 %v7266_v20, %v10741_v59 }
 0xb1a   :  { %vm4011_vm13 = vweird.f32 %v7266_v20  ;;  %v4341_v48 = vmul.f32 1.442695, %v4320_v21  ;;  %v4305_v49 = vsub.f32 0.0, %v10731_v15  ;;  %vm4400_vm3 = vcmp.lt.f32.partialorder %v10667_v60, 0.0 }
 0xb1b   :  { %v4414_v43 = vsub.f32 0.0, %v4382_v22  ;;  %v4239_v37 = vadd.f32 -0.28449672, %v4223_v29  ;;  %v4176_v11 = vadd.f32 -1.4531521, %v4160_v63  ;;  %v4007_v5 = vsub.f32 1.0, %v4006_v45  ;;  %vm4012_vm15 = vmor %vm4010_vm14, %vm4011_vm13 }
 0xb1c   :  { %v7268_v62 = vpop.eup %7267  ;;  %7269 = vpow2.f32 %v4341_v48  ;;  %v4321_v59 = vmul.f32 %v4305_v49, %v10731_v15  ;;  %vm4401_vm4 = vcmp.lt.f32.partialorder %v10726_v0, 0.0 }
 0xb1d   :  { %v4430_v44 = vsel %vm4398_vm12, %v4414_v43, %v4382_v22  ;;  %v4255_v28 = vmul.f32 %v4239_v37, %v3988_v41  ;;  %v4192_v6 = vmul.f32 %v4176_v11, %v4003_v18  ;;  %v4008_v47 = vmul.f32 %v7266_v20, %v4007_v5 }
 0xb1e   :  { %v4446_v4 = vadd.f32 1.0, %v4430_v44 }
 0xb1f   :  { %v4271_v23 = vadd.f32 0.2548296, %v4255_v28  ;;  %v4208_v17 = vadd.f32 1.4214138, %v4192_v6  ;;  %v4009_v50 = vadd.f32 %v7266_v20, %v4008_v47  ;;  %v4343_v28 = vmul.f32 1.442695, %v4321_v59 }
 0xb20   :  { %v4462_v52 = vmul.f32 %v4446_v4, %v3838_v57 }
 0xb21   :  { %v4287_v2 = vmul.f32 %v4271_v23, %v3988_v41  ;;  %v4224_v14 = vmul.f32 %v4208_v17, %v4003_v18  ;;  %v4013_v51 = vsel %vm4012_vm15, %v7266_v20, %v4009_v50  ;;  %v3839_v20 = vmul.f32 0.5, %v10618_v1 }
 0xb22   :  { %6805 = vmatmul.msk.f32.gmra.mxu3 %vm2547_vm11, %v4462_v52  ;;  %v4018_v10 = vsel %vm4015_vm0, %v4017_v31, %v4013_v51  ;;  %v7270_v37 = vpop.eup %7269  ;;  %7271 = vpow2.f32 %v4343_v28 }
 0xb23   :  { %v4367_v32 = vmul.f32 %v7268_v62, %v4287_v2  ;;  %v4240_v55 = vadd.f32 -0.28449672, %v4224_v14  ;;  %v4161_v41 = vmul.f32 1.0614054, %v4018_v10 }
 0xb25   :  { %v4383_v36 = vsub.f32 1.0, %v4367_v32  ;;  %v4256_v33 = vmul.f32 %v4240_v55, %v4003_v18  ;;  %v4177_v22 = vadd.f32 -1.4531521, %v4161_v41  ;;  %v3841_v55 = vmul.f32 0.5, %v10717_v54 }
 0xb27   :  { %v4415_v24 = vsub.f32 0.0, %v4383_v36  ;;  %v4272_v58 = vadd.f32 0.2548296, %v4256_v33  ;;  %v4193_v43 = vmul.f32 %v4177_v22, %v4018_v10 }
 0xb28   :  { %v7272_v48 = vpop.eup %7271 }
 0xb29   :  { %v4431_v29 = vsel %vm4399_vm2, %v4415_v24, %v4383_v36  ;;  %v4288_v63 = vmul.f32 %v4272_v58, %v4003_v18  ;;  %v4209_v21 = vadd.f32 1.4214138, %v4193_v43  ;;  %v3840_v18 = vmul.f32 0.5, %v10652_v16 }
 0xb2a   :  { %v4447_v11 = vadd.f32 1.0, %v4431_v29  ;;  %v7400_v29 = vld [vmem:[%s7608_s12 + $0x2] ss:$0 sm:$0xff] }
 0xb2b   :  { %v4368_v45 = vmul.f32 %v7270_v37, %v4288_v63  ;;  %v4225_v5 = vmul.f32 %v4209_v21, %v4018_v10  ;;  %v7401_v37 = vld [vmem:[%s7608_s12 + $0x3] ss:$0 sm:$0xff]  ;;  %s11837_s12 = sld [smem:[#allocation25_spill]] }
 0xb2c   :  { %v4463_v44 = vmul.f32 %v4447_v11, %v3839_v20 }
 0xb2d   :  { %v4384_v6 = vsub.f32 1.0, %v4368_v45  ;;  %v4241_v4 = vadd.f32 -0.28449672, %v4225_v5 }
 0xb2e   :  { %6806 = vmatmul.msk.f32.gmra.mxu3 %vm2547_vm11, %v4463_v44 }
 0xb2f   :  { %v4416_v57 = vsub.f32 0.0, %v4384_v6  ;;  %v4257_v15 = vmul.f32 %v4241_v4, %v4018_v10 }
 0xb31   :  { %v4432_v3 = vsel %vm4400_vm3, %v4416_v57, %v4384_v6  ;;  %v4273_v34 = vadd.f32 0.2548296, %v4257_v15 }
 0xb32   :  { %v4448_v53 = vadd.f32 1.0, %v4432_v3 }
 0xb33   :  { %v4289_v47 = vmul.f32 %v4273_v34, %v4018_v10 }
 0xb34   :  { %v3470_v1 = vpop.xlane.xlu2 %3469  ;;  %v4464_v17 = vmul.f32 %v4448_v53, %v3840_v18 }
 0xb35   :  { %v3488_v23 = vmul.f32 %v3470_v1, %v7862_v13  ;;  %v4369_v2 = vmul.f32 %v7272_v48, %v4289_v47 }
 0xb36   :  { %6807 = vmatmul.msk.f32.gmra.mxu3 %vm2547_vm11, %v4464_v17 }
 0xb37   :  { %v3504_v52 = vadd.f32 1e-05, %v3488_v23  ;;  %v4385_v14 = vsub.f32 1.0, %v4369_v2 }
 0xb39   :  { %7273 = vrsqrt.f32 %v3504_v52  ;;  %v4417_v50 = vsub.f32 0.0, %v4385_v14  ;;  %vm3652_vm6 = vweird.f32 %v3504_v52 }
 0xb3b   :  { %v4433_v31 = vsel %vm4401_vm4, %v4417_v50, %v4385_v14 }
 0xb3c   :  { %v3473_v60 = vpop.xlane.xlu0 %3472  ;;  %v4449_v51 = vadd.f32 1.0, %v4433_v31 }
 0xb3d   :  { %v3489_v62 = vmul.f32 %v3473_v60, %v7862_v13 }
 0xb3e   :  { %v4465_v49 = vmul.f32 %v4449_v51, %v3841_v55 }
 0xb3f   :  { %v7274_v16 = vpop.eup %7273  ;;  %v3505_v32 = vadd.f32 1e-05, %v3489_v62 }
 0xb40   :  { %v3647_v10 = vmul.f32 %v7274_v16, %v3504_v52  ;;  %6808 = vmatmul.msk.f32.gmra.mxu3 %vm2547_vm11, %v4465_v49  ;;  %vm3653_vm5 = vweird.f32 %v7274_v16 }
 0xb41   :  { %7275 = vrsqrt.f32 %v3505_v32  ;;  %vm3654_vm7 = vmor %vm3652_vm6, %vm3653_vm5  ;;  %vm3662_vm9 = vweird.f32 %v3505_v32 }
 0xb42   :  { %v3648_v36 = vmul.f32 %v7274_v16, %v3647_v10 }
 0xb44   :  { %v3649_v33 = vmul.f32 0.5, %v3648_v36 }
 0xb46   :  { %v3650_v41 = vsub.f32 1.5, %v3649_v33 }
 0xb47   :  { %v7276_v13 = vpop.eup %7275 }
 0xb48   :  { %v3651_v24 = vmul.f32 %v7274_v16, %v3650_v41  ;;  %v3657_v0 = vmul.f32 %v7276_v13, %v3505_v32  ;;  %vm3663_vm8 = vweird.f32 %v7276_v13 }
 0xb49   :  { %vm3664_vm10 = vmor %vm3662_vm9, %vm3663_vm8 }
 0xb4a   :  { %v3655_v58 = vsel %vm3654_vm7, %v7274_v16, %v3651_v24  ;;  %v3658_v22 = vmul.f32 %v7276_v13, %v3657_v0 }
 0xb4b   :  { %v3680_v54 = vmul.f32 %v3655_v58, %v10474_v39 }
 0xb4c   :  { %v3659_v59 = vmul.f32 0.5, %v3658_v22 }
 0xb4d   :  { %v3697_v63 = vmul.f32 %v7400_v29, %v3680_v54 }
 0xb4e   :  { %v3660_v43 = vsub.f32 1.5, %v3659_v59 }
 0xb4f   :  { %v3714_v20 = vadd.f32 %v7401_v37, %v3697_v63 }
 0xb50   :  { %v3661_v11 = vmul.f32 %v7276_v13, %v3660_v43 }
 0xb51   :  { %v3808_v45 = vpop.f32.mrf.mxu2  ;;  %6800 = vmatmul.msk.f32.gmra.mxu2 %vm347_vm1, %v3714_v20 }
 0xb52   :  { %v3665_v21 = vsel %vm3664_vm10, %v7276_v13, %v3661_v11  ;;  %v10781_v44 = vadd.f32 %v10491_v26, %v3808_v45 }
 0xb53   :  { %v3681_v28 = vmul.f32 %v3665_v21, %v10482_v35 }
 0xb54   :  { %v10785_v39 = vmul.f32 0.70710677, %v10781_v44 }
 0xb55   :  { %v3698_v6 = vmul.f32 %v7400_v29, %v3681_v28 }
 0xb56   :  { %v3874_v5 = vand.u32 2147483647, %v10785_v39  ;;  %vm4402_vm9 = vcmp.lt.f32.partialorder %v10785_v39, 0.0 }
 0xb57   :  { %v3715_v57 = vadd.f32 %v7401_v37, %v3698_v6 }
 0xb58   :  { %v3890_v4 = vmul.f32 0.3275911, %v3874_v5  ;;  %v4306_v10 = vsub.f32 0.0, %v3874_v5 }
 0xb59   :  { %v3811_v3 = vpop.f32.mrf.mxu2  ;;  %6801 = vmatmul.msk.f32.gmra.mxu2 %vm347_vm1, %v3715_v57 }
 0xb5a   :  { %v3906_v15 = vadd.f32 1.0, %v3890_v4  ;;  %v10790_v18 = vadd.f32 %v10491_v26, %v3811_v3  ;;  %v4322_v0 = vmul.f32 %v4306_v10, %v3874_v5 }
 0xb5c   :  { %7277 = vrcp.f32 %v3906_v15  ;;  %v10793_v53 = vmul.f32 0.70710677, %v10790_v18  ;;  %v4031_v2 = vand.u32 2147483648, %v3906_v15  ;;  %v4029_v50 = vand.u32 2147483647, %v3906_v15 }
 0xb5d   :  { %vm4025_vm13 = vweird.f32 %v3906_v15  ;;  %v4345_v43 = vmul.f32 1.442695, %v4322_v0 }
 0xb5e   :  { %v3875_v35 = vand.u32 2147483647, %v10793_v53  ;;  %v4032_v31 = vor.u32 1.1754944e-38, %v4031_v2  ;;  %vm4030_vm15 = vcmp.eq.f32.partialorder %v4029_v50, 8.507059e+37 }
 0xb60   :  { %v3891_v1 = vmul.f32 0.3275911, %v3875_v35  ;;  %v4307_v21 = vsub.f32 0.0, %v3875_v35 }
 0xb61   :  { %v3814_v47 = vpop.f32.mrf.mxu2 }
 0xb62   :  { %v7278_v34 = vpop.eup %7277  ;;  %v3907_v17 = vadd.f32 1.0, %v3891_v1  ;;  %v10797_v52 = vadd.f32 %v10491_v26, %v3814_v47 }
 0xb63   :  { %v4021_v23 = vmul.f32 %v7278_v34, %v3906_v15  ;;  %vm4026_vm12 = vweird.f32 %v7278_v34 }
 0xb64   :  { %7279 = vrcp.f32 %v3907_v17  ;;  %v10800_v14 = vmul.f32 0.70710677, %v10797_v52  ;;  %vm4027_vm14 = vmor %vm4025_vm13, %vm4026_vm12  ;;  %v4046_v58 = vand.u32 2147483648, %v3907_v17  ;;  %v4044_v54 = vand.u32 2147483647, %v3907_v17 }
 0xb65   :  { %v4022_v48 = vsub.f32 1.0, %v4021_v23  ;;  %vm4040_vm2 = vweird.f32 %v3907_v17  ;;  %v4323_v23 = vmul.f32 %v4307_v21, %v3875_v35 }
 0xb66   :  { %v10803_v62 = vand.u32 2147483647, %v10800_v14  ;;  %v4047_v37 = vor.u32 1.1754944e-38, %v4046_v58  ;;  %vm4045_vm4 = vcmp.eq.f32.partialorder %v4044_v54, 8.507059e+37 }
 0xb67   :  { %v4023_v60 = vmul.f32 %v7278_v34, %v4022_v48 }
 0xb68   :  { %v3892_v32 = vmul.f32 0.3275911, %v10803_v62 }
 0xb69   :  { %v4024_v16 = vadd.f32 %v7278_v34, %v4023_v60 }
 0xb6a   :  { %v7280_v55 = vpop.eup %7279  ;;  %v3908_v33 = vadd.f32 1.0, %v3892_v32  ;;  %v3817_v20 = vpop.f32.mrf.mxu2  ;;  %v4308_v32 = vsub.f32 0.0, %v10803_v62 }
 0xb6b   :  { %v4028_v51 = vsel %vm4027_vm14, %v7278_v34, %v4024_v16  ;;  %v4036_v36 = vmul.f32 %v7280_v55, %v3907_v17  ;;  %vm4041_vm0 = vweird.f32 %v7280_v55  ;;  %v10807_v28 = vadd.f32 %v10491_v26, %v3817_v20 }
 0xb6c   :  { %v4033_v49 = vsel %vm4030_vm15, %v4032_v31, %v4028_v51  ;;  %7281 = vrcp.f32 %v3908_v33  ;;  %vm4042_vm3 = vmor %vm4040_vm2, %vm4041_vm0  ;;  %v4061_v17 = vand.u32 2147483648, %v3908_v33  ;;  %v4059_v26 = vand.u32 2147483647, %v3908_v33 }
 0xb6d   :  { %v4162_v41 = vmul.f32 1.0614054, %v4033_v49  ;;  %v4037_v13 = vsub.f32 1.0, %v4036_v36  ;;  %v10810_v3 = vmul.f32 0.70710677, %v10807_v28  ;;  %7283 = vpow2.f32 %v4345_v43 }
 0xb6e   :  { %vm4055_vm6 = vweird.f32 %v3908_v33  ;;  %v4062_v35 = vor.u32 1.1754944e-38, %v4061_v17  ;;  %vm4060_vm8 = vcmp.eq.f32.partialorder %v4059_v26, 8.507059e+37  ;;  %v4324_v54 = vmul.f32 %v4308_v32, %v10803_v62 }
 0xb6f   :  { %v4178_v24 = vadd.f32 -1.4531521, %v4162_v41  ;;  %v4038_v22 = vmul.f32 %v7280_v55, %v4037_v13  ;;  %v10813_v47 = vand.u32 2147483647, %v10810_v3  ;;  %v4347_v41 = vmul.f32 1.442695, %v4323_v23 }
 0xb70   :  { %v4349_v21 = vmul.f32 1.442695, %v4324_v54  ;;  %vm4403_vm14 = vcmp.lt.f32.partialorder %v10793_v53, 0.0  ;;  %vm4404_vm2 = vcmp.lt.f32.partialorder %v10800_v14, 0.0 }
 0xb71   :  { %v4194_v59 = vmul.f32 %v4178_v24, %v4033_v49  ;;  %v4039_v29 = vadd.f32 %v7280_v55, %v4038_v22  ;;  %v3893_v50 = vmul.f32 0.3275911, %v10813_v47 }
 0xb72   :  { %v7282_v11 = vpop.eup %7281 }
 0xb73   :  { %v4210_v63 = vadd.f32 1.4214138, %v4194_v59  ;;  %v4043_v45 = vsel %vm4042_vm3, %v7280_v55, %v4039_v29  ;;  %v4051_v57 = vmul.f32 %v7282_v11, %v3908_v33  ;;  %vm4056_vm5 = vweird.f32 %v7282_v11  ;;  %v7284_v10 = vpop.eup %7283  ;;  %v10819_v29 = vld [vmem:[%s11816_s17] ss:$0 sm:$0xff] }
 0xb74   :  { %v4048_v5 = vsel %vm4045_vm4, %v4047_v37, %v4043_v45  ;;  %vm4057_vm7 = vmor %vm4055_vm6, %vm4056_vm5  ;;  %v3909_v51 = vadd.f32 1.0, %v3893_v50 }
 0xb75   :  { %v4226_v6 = vmul.f32 %v4210_v63, %v4033_v49  ;;  %v4163_v4 = vmul.f32 1.0614054, %v4048_v5  ;;  %v4052_v1 = vsub.f32 1.0, %v4051_v57 }
 0xb76   :  { %7285 = vrcp.f32 %v3909_v51  ;;  %v4076_v39 = vand.u32 2147483648, %v3909_v51  ;;  %vm4070_vm12 = vweird.f32 %v3909_v51 }
 0xb77   :  { %v4242_v15 = vadd.f32 -0.28449672, %v4226_v6  ;;  %v4179_v34 = vadd.f32 -1.4531521, %v4163_v4  ;;  %v4053_v2 = vmul.f32 %v7282_v11, %v4052_v1  ;;  %7287 = vpow2.f32 %v4347_v41 }
 0xb78   :  { %7289 = vpow2.f32 %v4349_v21 }
 0xb79   :  { %v4258_v48 = vmul.f32 %v4242_v15, %v4033_v49  ;;  %v4195_v60 = vmul.f32 %v4179_v34, %v4048_v5  ;;  %v4054_v31 = vadd.f32 %v7282_v11, %v4053_v2  ;;  %v3842_v34 = vmul.f32 0.5, %v10781_v44 }
 0xb7b   :  { %v4274_v16 = vadd.f32 0.2548296, %v4258_v48  ;;  %v4211_v55 = vadd.f32 1.4214138, %v4195_v60  ;;  %v4058_v13 = vsel %vm4057_vm7, %v7282_v11, %v4054_v31  ;;  %v3820_v33 = vpop.f32.mrf.mxu2 }
 0xb7c   :  { %v4063_v0 = vsel %vm4060_vm8, %v4062_v35, %v4058_v13  ;;  %v10822_v63 = vadd.f32 %v10819_v29, %v3820_v33  ;;  %v7286_v6 = vpop.eup %7285  ;;  %v4074_v35 = vand.u32 2147483647, %v3909_v51  ;;  %v4077_v13 = vor.u32 1.1754944e-38, %v4076_v39 }
 0xb7d   :  { %v4290_v36 = vmul.f32 %v4274_v16, %v4033_v49  ;;  %v4227_v24 = vmul.f32 %v4211_v55, %v4048_v5  ;;  %v4164_v22 = vmul.f32 1.0614054, %v4063_v0  ;;  %v4066_v1 = vmul.f32 %v7286_v6, %v3909_v51  ;;  %v7288_v2 = vpop.eup %7287 }
 0xb7e   :  { %v10825_v20 = vmul.f32 0.70710677, %v10822_v63  ;;  %vm4071_vm10 = vweird.f32 %v7286_v6  ;;  %vm4075_vm15 = vcmp.eq.f32.partialorder %v4074_v35, 8.507059e+37  ;;  %v3843_v33 = vmul.f32 0.5, %v10790_v18 }
 0xb7f   :  { %v4370_v58 = vmul.f32 %v7284_v10, %v4290_v36  ;;  %v4243_v59 = vadd.f32 -0.28449672, %v4227_v24  ;;  %v4180_v49 = vadd.f32 -1.4531521, %v4164_v22  ;;  %v4067_v60 = vsub.f32 1.0, %v4066_v1  ;;  %vm4072_vm13 = vmor %vm4070_vm12, %vm4071_vm10  ;;  %v7290_v24 = vpop.eup %7289 }
 0xb80   :  { %v10829_v57 = vand.u32 2147483647, %v10825_v20  ;;  %v4309_v36 = vsub.f32 0.0, %v10813_v47  ;;  %vm4405_vm8 = vcmp.lt.f32.partialorder %v10810_v3, 0.0 }
 0xb81   :  { %v4386_v43 = vsub.f32 1.0, %v4370_v58  ;;  %v4259_v37 = vmul.f32 %v4243_v59, %v4048_v5  ;;  %v4196_v45 = vmul.f32 %v4180_v49, %v4063_v0  ;;  %v4068_v55 = vmul.f32 %v7286_v6, %v4067_v60 }
 0xb82   :  { %v3894_v48 = vmul.f32 0.3275911, %v10829_v57  ;;  %v4310_v14 = vsub.f32 0.0, %v10829_v57 }
 0xb83   :  { %v4418_v11 = vsub.f32 0.0, %v4386_v43  ;;  %v4275_v62 = vadd.f32 0.2548296, %v4259_v37  ;;  %v4212_v15 = vadd.f32 1.4214138, %v4196_v45  ;;  %v4325_v45 = vmul.f32 %v4309_v36, %v10813_v47 }
 0xb84   :  { %v10833_v31 = vadd.f32 1.0, %v3894_v48 }
 0xb85   :  { %v4434_v4 = vsel %vm4402_vm9, %v4418_v11, %v4386_v43  ;;  %v4291_v17 = vmul.f32 %v4275_v62, %v4048_v5  ;;  %v4228_v26 = vmul.f32 %v4212_v15, %v4063_v0  ;;  %v4069_v5 = vadd.f32 %v7286_v6, %v4068_v55 }
 0xb86   :  { %v4450_v23 = vadd.f32 1.0, %v4434_v4  ;;  %7291 = vrcp.f32 %v10833_v31  ;;  %v4089_v47 = vand.u32 2147483647, %v10833_v31  ;;  %vm4085_vm3 = vweird.f32 %v10833_v31 }
 0xb87   :  { %v4371_v16 = vmul.f32 %v7288_v2, %v4291_v17  ;;  %v4244_v32 = vadd.f32 -0.28449672, %v4228_v26  ;;  %v4073_v22 = vsel %vm4072_vm13, %v7286_v6, %v4069_v5  ;;  %v3844_v55 = vmul.f32 0.5, %v10797_v52 }
 0xb88   :  { %v4466_v50 = vmul.f32 %v4450_v23, %v3842_v34  ;;  %v3823_v54 = vpop.f32.mrf.mxu2  ;;  %v4078_v43 = vsel %vm4075_vm15, %v4077_v13, %v4073_v22  ;;  %v4351_v23 = vmul.f32 1.442695, %v4325_v45  ;;  %vm4090_vm5 = vcmp.eq.f32.partialorder %v4089_v47, 8.507059e+37 }
 0xb89   :  { %v4387_v10 = vsub.f32 1.0, %v4371_v16  ;;  %v4260_v44 = vmul.f32 %v4244_v32, %v4063_v0  ;;  %v10841_v49 = vadd.f32 %v10819_v29, %v3823_v54  ;;  %v4165_v11 = vmul.f32 1.0614054, %v4078_v43 }
 0xb8a   :  { %6809 = vmatmul.msk.f32.gmra.mxu3 %vm2547_vm11, %v4466_v50 }
 0xb8b   :  { %v4419_v41 = vsub.f32 0.0, %v4387_v10  ;;  %v4276_v58 = vadd.f32 0.2548296, %v4260_v44  ;;  %v10845_v62 = vmul.f32 0.70710677, %v10841_v49 }
 0xb8c   :  { %v7292_v21 = vpop.eup %7291  ;;  %v4181_v4 = vadd.f32 -1.4531521, %v4165_v11 }
 0xb8d   :  { %v4435_v59 = vsel %vm4403_vm14, %v4419_v41, %v4387_v10  ;;  %v4292_v37 = vmul.f32 %v4276_v58, %v4063_v0  ;;  %v4081_v15 = vmul.f32 %v7292_v21, %v10833_v31  ;;  %v10849_v18 = vand.u32 2147483647, %v10845_v62 }
 0xb8e   :  { %v4451_v51 = vadd.f32 1.0, %v4435_v59  ;;  %v4197_v34 = vmul.f32 %v4181_v4, %v4078_v43  ;;  %v4091_v0 = vand.u32 2147483648, %v10833_v31  ;;  %vm4086_vm0 = vweird.f32 %v7292_v21 }
 0xb8f   :  { %v4372_v6 = vmul.f32 %v7290_v24, %v4292_v37  ;;  %v4082_v17 = vsub.f32 1.0, %v4081_v15  ;;  %v3895_v48 = vmul.f32 0.3275911, %v10849_v18  ;;  %vm4087_vm4 = vmor %vm4085_vm3, %vm4086_vm0  ;;  %v4326_v59 = vmul.f32 %v4310_v14, %v10829_v57 }
 0xb90   :  { %v4467_v53 = vmul.f32 %v4451_v51, %v3843_v33  ;;  %v4213_v26 = vadd.f32 1.4214138, %v4197_v34  ;;  %v4092_v10 = vor.u32 1.1754944e-38, %v4091_v0  ;;  %vm4406_vm14 = vcmp.lt.f32.partialorder %v10825_v20, 0.0 }
 0xb91   :  { %v4388_v1 = vsub.f32 1.0, %v4372_v6  ;;  %v4083_v60 = vmul.f32 %v7292_v21, %v4082_v17  ;;  %v3911_v50 = vadd.f32 1.0, %v3895_v48 }
 0xb92   :  { %6810 = vmatmul.msk.f32.gmra.mxu3 %vm2547_vm11, %v4467_v53  ;;  %v4229_v39 = vmul.f32 %v4213_v26, %v4078_v43 }
 0xb93   :  { %v4420_v2 = vsub.f32 0.0, %v4388_v1  ;;  %v4084_v32 = vadd.f32 %v7292_v21, %v4083_v60  ;;  %7293 = vrcp.f32 %v3911_v50  ;;  %v4104_v34 = vand.u32 2147483647, %v3911_v50 }
 0xb94   :  { %v4245_v44 = vadd.f32 -0.28449672, %v4229_v39  ;;  %7295 = vpow2.f32 %v4351_v23  ;;  %v4106_v23 = vand.u32 2147483648, %v3911_v50  ;;  %vm4100_vm7 = vweird.f32 %v3911_v50 }
 0xb95   :  { %v4436_v16 = vsel %vm4404_vm2, %v4420_v2, %v4388_v1  ;;  %v4088_v5 = vsel %vm4087_vm4, %v7292_v21, %v4084_v32  ;;  %v3826_v36 = vpop.f32.mrf.mxu2  ;;  %v4353_v1 = vmul.f32 1.442695, %v4326_v59  ;;  %vm4105_vm10 = vcmp.eq.f32.partialorder %v4104_v34, 8.507059e+37 }
 0xb96   :  { %v4452_v35 = vadd.f32 1.0, %v4436_v16  ;;  %v4093_v13 = vsel %vm4090_vm5, %v4092_v10, %v4088_v5  ;;  %v10860_v24 = vadd.f32 %v10819_v29, %v3826_v36  ;;  %v4261_v58 = vmul.f32 %v4245_v44, %v4078_v43 }
 0xb97   :  { %v4166_v31 = vmul.f32 1.0614054, %v4093_v13  ;;  %v3845_v32 = vmul.f32 0.5, %v10807_v28  ;;  %v4311_v10 = vsub.f32 0.0, %v10849_v18  ;;  %vm4407_vm2 = vcmp.lt.f32.partialorder %v10845_v62, 0.0 }
 0xb98   :  { %v4468_v41 = vmul.f32 %v4452_v35, %v3844_v55  ;;  %v10863_v52 = vmul.f32 0.70710677, %v10860_v24  ;;  %v4277_v22 = vadd.f32 0.2548296, %v4261_v58  ;;  %v3848_v62 = vmul.f32 0.5, %v10860_v24 }
 0xb99   :  { %v4182_v54 = vadd.f32 -1.4531521, %v4166_v31  ;;  %v7294_v33 = vpop.eup %7293  ;;  %v4327_v31 = vmul.f32 %v4311_v10, %v10849_v18 }
 0xb9a   :  { %6811 = vmatmul.msk.f32.gmra.mxu3 %vm2547_vm11, %v4468_v41  ;;  %v10868_v51 = vand.u32 2147483647, %v10863_v52  ;;  %v7296_v37 = vpop.eup %7295  ;;  %v4293_v11 = vmul.f32 %v4277_v22, %v4078_v43  ;;  %v4096_v21 = vmul.f32 %v7294_v33, %v3911_v50  ;;  %vm4101_vm6 = vweird.f32 %v7294_v33 }
 0xb9b   :  { %v4198_v45 = vmul.f32 %v4182_v54, %v4093_v13  ;;  %vm4102_vm9 = vmor %vm4100_vm7, %vm4101_vm6  ;;  %v4107_v43 = vor.u32 1.1754944e-38, %v4106_v23  ;;  %vm4408_vm3 = vcmp.lt.f32.partialorder %v10863_v52, 0.0 }
 0xb9c   :  { %v3896_v53 = vmul.f32 0.3275911, %v10868_v51  ;;  %v4373_v6 = vmul.f32 %v7296_v37, %v4293_v11  ;;  %v4097_v15 = vsub.f32 1.0, %v4096_v21  ;;  %v4355_v21 = vmul.f32 1.442695, %v4327_v31 }
 0xb9d   :  { %v4214_v4 = vadd.f32 1.4214138, %v4198_v45 }
 0xb9e   :  { %v3912_v17 = vadd.f32 1.0, %v3896_v53  ;;  %v4389_v47 = vsub.f32 1.0, %v4373_v6  ;;  %v4098_v48 = vmul.f32 %v7294_v33, %v4097_v15 }
 0xb9f   :  { %v4230_v0 = vmul.f32 %v4214_v4, %v4093_v13  ;;  %v3846_v4 = vmul.f32 0.5, %v10822_v63 }
 0xba0   :  { %7297 = vrcp.f32 %v3912_v17  ;;  %v4421_v57 = vsub.f32 0.0, %v4389_v47  ;;  %v4099_v26 = vadd.f32 %v7294_v33, %v4098_v48  ;;  %v4119_v28 = vand.u32 2147483647, %v3912_v17 }
 0xba1   :  { %v4246_v2 = vadd.f32 -0.28449672, %v4230_v0  ;;  %7299 = vpow2.f32 %v4353_v1  ;;  %v4121_v59 = vand.u32 2147483648, %v3912_v17  ;;  %vm4115_vm13 = vweird.f32 %v3912_v17 }
 0xba2   :  { %v4437_v60 = vsel %vm4405_vm8, %v4421_v57, %v4389_v47  ;;  %v4103_v39 = vsel %vm4102_vm9, %v7294_v33, %v4099_v26  ;;  %vm4120_vm0 = vcmp.eq.f32.partialorder %v4119_v28, 8.507059e+37  ;;  %7301 = vpow2.f32 %v4355_v21 }
 0xba3   :  { %v4262_v16 = vmul.f32 %v4246_v2, %v4093_v13  ;;  %v4453_v55 = vadd.f32 1.0, %v4437_v60  ;;  %v4108_v35 = vsel %vm4105_vm10, %v4107_v43, %v4103_v39  ;;  %v4122_v18 = vor.u32 1.1754944e-38, %v4121_v59 }
 0xba4   :  { %v4167_v5 = vmul.f32 1.0614054, %v4108_v35  ;;  %v4312_v0 = vsub.f32 0.0, %v10868_v51 }
 0xba5   :  { %v4278_v44 = vadd.f32 0.2548296, %v4262_v16  ;;  %v4469_v41 = vmul.f32 %v4453_v55, %v3845_v32 }
 0xba6   :  { %v7298_v36 = vpop.eup %7297  ;;  %v4183_v14 = vadd.f32 -1.4531521, %v4167_v5  ;;  %v4328_v63 = vmul.f32 %v4312_v0, %v10868_v51 }
 0xba7   :  { %v4294_v50 = vmul.f32 %v4278_v44, %v4093_v13  ;;  %v4111_v3 = vmul.f32 %v7298_v36, %v3912_v17  ;;  %v7300_v58 = vpop.eup %7299  ;;  %6812 = vmatmul.msk.f32.gmra.mxu3 %vm2547_vm11, %v4469_v41  ;;  %vm4116_vm12 = vweird.f32 %v7298_v36 }
 0xba8   :  { %v4199_v54 = vmul.f32 %v4183_v14, %v4108_v35  ;;  %vm4117_vm15 = vmor %vm4115_vm13, %vm4116_vm12  ;;  %v7302_v60 = vpop.eup %7301  ;;  %v4357_v32 = vmul.f32 1.442695, %v4328_v63 }
 0xba9   :  { %v4374_v22 = vmul.f32 %v7300_v58, %v4294_v50  ;;  %v4112_v33 = vsub.f32 1.0, %v4111_v3  ;;  %v3847_v50 = vmul.f32 0.5, %v10841_v49 }
 0xbaa   :  { %v4215_v11 = vadd.f32 1.4214138, %v4199_v54  ;;  %7303 = vpow2.f32 %v4357_v32 }
 0xbab   :  { %v4390_v37 = vsub.f32 1.0, %v4374_v22  ;;  %v4113_v45 = vmul.f32 %v7298_v36, %v4112_v33 }
 0xbac   :  { %v4231_v6 = vmul.f32 %v4215_v11, %v4108_v35 }
 0xbad   :  { %v4422_v53 = vsub.f32 0.0, %v4390_v37  ;;  %v4114_v13 = vadd.f32 %v7298_v36, %v4113_v45 }
 0xbae   :  { %v4247_v1 = vadd.f32 -0.28449672, %v4231_v6 }
 0xbaf   :  { %v4438_v15 = vsel %vm4406_vm14, %v4422_v53, %v4390_v37  ;;  %v4118_v34 = vsel %vm4117_vm15, %v7298_v36, %v4114_v13  ;;  %vm4932_vm15 = vcmask 523264  }
 0xbb0   :  { %v4454_v23 = vadd.f32 1.0, %v4438_v15  ;;  %v4123_v47 = vsel %vm4120_vm0, %v4122_v18, %v4118_v34  ;;  %v4263_v48 = vmul.f32 %v4247_v1, %v4108_v35  ;;  %v7304_v58 = vpop.eup %7303 }
 0xbb1   :  { %v4168_v57 = vmul.f32 1.0614054, %v4123_v47 }
 0xbb2   :  { %v4470_v2 = vmul.f32 %v4454_v23, %v3846_v4  ;;  %v4279_v26 = vadd.f32 0.2548296, %v4263_v48 }
 0xbb3   :  { %v4184_v17 = vadd.f32 -1.4531521, %v4168_v57 }
 0xbb4   :  { %6813 = vmatmul.msk.f32.gmra.mxu3 %vm2547_vm11, %v4470_v2  ;;  %v4295_v20 = vmul.f32 %v4279_v26, %v4108_v35 }
 0xbb5   :  { %v4200_v43 = vmul.f32 %v4184_v17, %v4123_v47 }
 0xbb6   :  { %v4375_v16 = vmul.f32 %v7302_v60, %v4295_v20 }
 0xbb7   :  { %v4216_v39 = vadd.f32 1.4214138, %v4200_v43 }
 0xbb8   :  { %v4391_v55 = vsub.f32 1.0, %v4375_v16 }
 0xbb9   :  { %v4232_v10 = vmul.f32 %v4216_v39, %v4123_v47 }
 0xbba   :  { %v4423_v44 = vsub.f32 0.0, %v4391_v55 }
 0xbbb   :  { %v4248_v5 = vadd.f32 -0.28449672, %v4232_v10 }
 0xbbc   :  { %v4439_v36 = vsel %vm4407_vm2, %v4423_v44, %v4391_v55 }
 0xbbd   :  { %v4264_v41 = vmul.f32 %v4248_v5, %v4123_v47  ;;  %v4455_v51 = vadd.f32 1.0, %v4439_v36 }
 0xbbf   :  { %v4280_v14 = vadd.f32 0.2548296, %v4264_v41  ;;  %v4471_v3 = vmul.f32 %v4455_v51, %v3847_v50 }
 0xbc1   :  { %v4296_v35 = vmul.f32 %v4280_v14, %v4123_v47  ;;  %6814 = vmatmul.msk.f32.gmra.mxu3 %vm2547_vm11, %v4471_v3 }
 0xbc3   :  { %v4376_v31 = vmul.f32 %v7304_v58, %v4296_v35 }
 0xbc5   :  { %v4392_v22 = vsub.f32 1.0, %v4376_v31 }
 0xbc7   :  { %v4424_v54 = vsub.f32 0.0, %v4392_v22 }
 0xbc9   :  { %v4440_v33 = vsel %vm4408_vm3, %v4424_v54, %v4392_v22 }
 0xbca   :  { %v4456_v28 = vadd.f32 1.0, %v4440_v33 }
 0xbcc   :  { %v4472_v59 = vmul.f32 %v4456_v28, %v3848_v62 }
 0xbce   :  { %6815 = vmatmul.msk.f32.gmra.mxu3 %vm2547_vm11, %v4472_v59 }
 0xbd4   :  { %v3829_v49 = vpop.f32.mrf.mxu2 }
 0xbd5   :  { %v10888_v37 = vadd.f32 %v10819_v29, %v3829_v49 }
 0xbd7   :  { %v10891_v11 = vmul.f32 0.70710677, %v10888_v37 }
 0xbd9   :  { %v3881_v45 = vand.u32 2147483647, %v10891_v11  ;;  %vm4409_vm13 = vcmp.lt.f32.partialorder %v10891_v11, 0.0 }
 0xbdb   :  { %v3897_v21 = vmul.f32 0.3275911, %v3881_v45  ;;  %v4313_v17 = vsub.f32 0.0, %v3881_v45 }
 0xbdc   :  { %v3832_v53 = vpop.f32.mrf.mxu2 }
 0xbdd   :  { %v3913_v6 = vadd.f32 1.0, %v3897_v21  ;;  %v10895_v52 = vadd.f32 %v10819_v29, %v3832_v53  ;;  %v4329_v39 = vmul.f32 %v4313_v17, %v3881_v45 }
 0xbdf   :  { %7305 = vrcp.f32 %v3913_v6  ;;  %v10898_v24 = vmul.f32 0.70710677, %v10895_v52  ;;  %v4136_v23 = vand.u32 2147483648, %v3913_v6  ;;  %v4134_v0 = vand.u32 2147483647, %v3913_v6 }
 0xbe0   :  { %vm4130_vm5 = vweird.f32 %v3913_v6  ;;  %v4359_v41 = vmul.f32 1.442695, %v4329_v39  ;;  %v3850_v11 = vmul.f32 0.5, %v10895_v52 }
 0xbe1   :  { %v3882_v13 = vand.u32 2147483647, %v10898_v24  ;;  %v4137_v29 = vor.u32 1.1754944e-38, %v4136_v23  ;;  %vm4135_vm7 = vcmp.eq.f32.partialorder %v4134_v0, 8.507059e+37  ;;  %vm4410_vm14 = vcmp.lt.f32.partialorder %v10898_v24, 0.0 }
 0xbe3   :  { %v3898_v4 = vmul.f32 0.3275911, %v3882_v13  ;;  %v4314_v3 = vsub.f32 0.0, %v3882_v13 }
 0xbe5   :  { %v7306_v18 = vpop.eup %7305  ;;  %v3914_v1 = vadd.f32 1.0, %v3898_v4  ;;  %v4330_v54 = vmul.f32 %v4314_v3, %v3882_v13  ;;  %v3849_v13 = vmul.f32 0.5, %v10888_v37 }
 0xbe6   :  { %v4126_v15 = vmul.f32 %v7306_v18, %v3913_v6  ;;  %vm4131_vm4 = vweird.f32 %v7306_v18 }
 0xbe7   :  { %7307 = vrcp.f32 %v3914_v1  ;;  %vm4132_vm6 = vmor %vm4130_vm5, %vm4131_vm4  ;;  %v4151_v16 = vand.u32 2147483648, %v3914_v1  ;;  %v4149_v55 = vand.u32 2147483647, %v3914_v1  ;;  %vm4145_vm9 = vweird.f32 %v3914_v1 }
 0xbe8   :  { %v4127_v34 = vsub.f32 1.0, %v4126_v15  ;;  %7309 = vpow2.f32 %v4359_v41  ;;  %v4361_v49 = vmul.f32 1.442695, %v4330_v54 }
 0xbe9   :  { %v4152_v36 = vor.u32 1.1754944e-38, %v4151_v16  ;;  %vm4150_vm12 = vcmp.eq.f32.partialorder %v4149_v55, 8.507059e+37 }
 0xbea   :  { %v4128_v47 = vmul.f32 %v7306_v18, %v4127_v34  ;;  %7311 = vpow2.f32 %v4361_v49  ;;  %v10902_v34 = vpop.f32.mrf.mxu3 }
 0xbec   :  { %v4129_v48 = vadd.f32 %v7306_v18, %v4128_v47 }
 0xbed   :  { %v7308_v57 = vpop.eup %7307 }
 0xbee   :  { %v4133_v2 = vsel %vm4132_vm6, %v7306_v18, %v4129_v48  ;;  %v4141_v63 = vmul.f32 %v7308_v57, %v3914_v1  ;;  %vm4146_vm8 = vweird.f32 %v7308_v57  ;;  %v7310_v45 = vpop.eup %7309 }
 0xbef   :  { %v4138_v26 = vsel %vm4135_vm7, %v4137_v29, %v4133_v2  ;;  %vm4147_vm10 = vmor %vm4145_vm9, %vm4146_vm8 }
 0xbf0   :  { %v4169_v20 = vmul.f32 1.0614054, %v4138_v26  ;;  %v4142_v43 = vsub.f32 1.0, %v4141_v63  ;;  %v7312_v48 = vpop.eup %7311 }
 0xbf2   :  { %v4185_v60 = vadd.f32 -1.4531521, %v4169_v20  ;;  %v4143_v32 = vmul.f32 %v7308_v57, %v4142_v43  ;;  %v10907_v63 = vpop.f32.mrf.mxu3 }
 0xbf4   :  { %v4201_v10 = vmul.f32 %v4185_v60, %v4138_v26  ;;  %v4144_v44 = vadd.f32 %v7308_v57, %v4143_v32 }
 0xbf6   :  { %v4217_v5 = vadd.f32 1.4214138, %v4201_v10  ;;  %v4148_v50 = vsel %vm4147_vm10, %v7308_v57, %v4144_v44 }
 0xbf7   :  { %v4153_v14 = vsel %vm4150_vm12, %v4152_v36, %v4148_v50 }
 0xbf8   :  { %v4233_v51 = vmul.f32 %v4217_v5, %v4138_v26  ;;  %v4170_v35 = vmul.f32 1.0614054, %v4153_v14 }
 0xbfa   :  { %v4249_v58 = vadd.f32 -0.28449672, %v4233_v51  ;;  %v4186_v31 = vadd.f32 -1.4531521, %v4170_v35  ;;  %v4554_v37 = vpop.f32.mrf.mxu3  ;;  %v6997_v51 = vld [vmem:[%s11826_s25] ss:$0 sm:$0xff] }
 0xbfc   :  { %v4265_v22 = vmul.f32 %v4249_v58, %v4138_v26  ;;  %v4202_v33 = vmul.f32 %v4186_v31, %v4153_v14 }
 0xbfe   :  { %v4281_v62 = vadd.f32 0.2548296, %v4265_v22  ;;  %v4218_v28 = vadd.f32 1.4214138, %v4202_v33 }
 0xc00   :  { %v4297_v59 = vmul.f32 %v4281_v62, %v4138_v26  ;;  %v4234_v21 = vmul.f32 %v4218_v28, %v4153_v14 }
 0xc02   :  { %v4377_v53 = vmul.f32 %v7310_v45, %v4297_v59  ;;  %v4250_v6 = vadd.f32 -0.28449672, %v4234_v21  ;;  %v4557_v60 = vpop.f32.mrf.mxu3 }
 0xc04   :  { %v4393_v4 = vsub.f32 1.0, %v4377_v53  ;;  %v4266_v18 = vmul.f32 %v4250_v6, %v4153_v14 }
 0xc06   :  { %v4425_v15 = vsub.f32 0.0, %v4393_v4  ;;  %v4282_v1 = vadd.f32 0.2548296, %v4266_v18 }
 0xc08   :  { %v4441_v23 = vsel %vm4409_vm13, %v4425_v15, %v4393_v4  ;;  %v4298_v0 = vmul.f32 %v4282_v1, %v4153_v14 }
 0xc09   :  { %v4457_v47 = vadd.f32 1.0, %v4441_v23  ;;  %v11830_v23 = vld [vmem:[#allocation42_spill] sm:$0xff] }
 0xc0a   :  { %v4378_v57 = vmul.f32 %v7312_v48, %v4298_v0  ;;  %v4560_v16 = vpop.f32.mrf.mxu3  ;;  %v4646_v0 = vld [vmem:[%s11828_s3 + $0x8] sm:$0xff] }
 0xc0b   :  { %v4473_v29 = vmul.f32 %v4457_v47, %v3849_v13  ;;  %v6818_v47 = vld [vmem:[%s11827_s29 + $0x20] sm:$0xff]  ;;  %v4613_v48 = vld [vmem:[%s11827_s29 + $0x8] sm:$0xff] }
 0xc0c   :  { %v4394_v2 = vsub.f32 1.0, %v4378_v57  ;;  %v4614_v57 = vld [vmem:[%s11827_s29 + $0x10] sm:$0xff] }
 0xc0d   :  { %6816 = vmatmul.msk.f32.gmra.mxu3 %vm2547_vm11, %v4473_v29  ;;  %v6820_v29 = vld [vmem:[%s11827_s29 + $0x30] sm:$0xff] }
 0xc0e   :  { %v4426_v26 = vsub.f32 0.0, %v4394_v2 }
 0xc10   :  { %v4442_v17 = vsel %vm4410_vm14, %v4426_v26, %v4394_v2  ;;  %v6821_v2 = vld [vmem:[%s11827_s29 + $0x38] sm:$0xff] }
 0xc11   :  { %v4458_v20 = vadd.f32 1.0, %v4442_v17  ;;  %v4615_v26 = vld [vmem:[%s11827_s29 + $0x18] sm:$0xff] }
 0xc12   :  { %v4563_v39 = vpop.f32.mrf.mxu3  ;;  %v6823_v17 = vld [vmem:[%s11828_s3 + $0x18] sm:$0xff] }
 0xc13   :  { %v4474_v43 = vmul.f32 %v4458_v20, %v3850_v11  ;;  %4710 = vmatpush.msra.mxu2 %v6823_v17  ;;  %v6833_v11 = vld [vmem:[%s11827_s29 + $0x48] sm:$0xff]  ;;  %v6834_v20 = vld [vmem:[%s11827_s29 + $0x50] sm:$0xff] }
 0xc15   :  { %6817 = vmatmul.msk.f32.gmra.mxu3 %vm2547_vm11, %v4474_v43  ;;  %v6835_v43 = vld [vmem:[%s11827_s29 + $0x58] sm:$0xff] }
 0xc1a   :  { %v4566_v32 = vpop.f32.mrf.mxu3 }
 0xc22   :  { %v4569_v55 = vpop.f32.mrf.mxu3 }
 0xc2a   :  { %v4572_v10 = vpop.f32.mrf.mxu3 }
 0xc32   :  { %v4575_v44 = vpop.f32.mrf.mxu3 }
 0xc3a   :  { %v4578_v5 = vpop.f32.mrf.mxu3 }
 0xc3b   :  { %v4579_v62 = vadd.f32 %v6997_v51, %v4578_v5 }
 0xc3d   :  { %v10936_v59 = vadd.f32 %v4579_v62, %v10325_v9  ;;  %v4564_v9 = vadd.f32 %v6997_v51, %v4563_v39 }
 0xc3f   :  { %v4601_v6 = vadd.f32 %v4564_v9, %v10265_v12  ;;  %v4549_v12 = vadd.f32 %v6997_v51, %v10902_v34  ;;  %v6819_v34 = vld [vmem:[%s11827_s29 + $0x28] sm:$0xff] }
 0xc41   :  { %v4596_v13 = vadd.f32 %v4549_v12, %v11830_v23 }
 0xc42   :  { %v4581_v24 = vpop.f32.mrf.mxu3 }
 0xc43   :  { %v4582_v54 = vadd.f32 %v6997_v51, %v4581_v24 }
 0xc45   :  { %v10931_v28 = vadd.f32 %v4582_v54, %v10338_v56  ;;  %v4567_v56 = vadd.f32 %v6997_v51, %v4566_v32  ;;  %v6836_v32 = vld [vmem:[%s11828_s3 + $0x20] sm:$0xff]  ;;  %v6846_v54 = vld [vmem:[%s11828_s3 + $0x30] sm:$0xff] }
 0xc47   :  { %v10956_v53 = vadd.f32 %v4567_v56, %v10271_v42  ;;  %v4552_v42 = vadd.f32 %v6997_v51, %v10907_v63  ;;  %v6832_v63 = vld [vmem:[%s11827_s29 + $0x40] sm:$0xff] }
 0xc4a   :  { %v4584_v36 = vpop.f32.mrf.mxu3 }
 0xc4b   :  { %v4585_v31 = vadd.f32 %v6997_v51, %v4584_v36 }
 0xc52   :  { %v4587_v41 = vpop.f32.mrf.mxu3 }
 0xc53   :  { %v4588_v35 = vadd.f32 %v6997_v51, %v4587_v41  ;;  %v6842_v41 = vld [vmem:[%s11827_s29 + $0x60] sm:$0xff] }
 0xc55   :  { %v10921_v33 = vadd.f32 %v4588_v35, %v10362_v38  ;;  %v4573_v38 = vadd.f32 %v6997_v51, %v4572_v10  ;;  %v6845_v35 = vld [vmem:[%s11827_s29 + $0x78] sm:$0xff] }
 0xc57   :  { %v10946_v45 = vadd.f32 %v4573_v38, %v10299_v7  ;;  %v4558_v7 = vadd.f32 %v6997_v51, %v4557_v60  ;;  %v6837_v60 = vld [vmem:[%s11828_s3 + $0x28] sm:$0xff] }
 0xc59   :  { %v4599_v18 = vadd.f32 %v4558_v7, %v10253_v30  ;;  %v4612_v30 = vld [vmem:[%s11827_s29] sm:$0xff] }
 0xc90   :  { %v4590_v50 = vpop.f32.mrf.mxu3 }
 0xc91   :  { %v4591_v14 = vadd.f32 %v6997_v51, %v4590_v50 }
 0xc93   :  { %v10916_v22 = vadd.f32 %v4591_v14, %v10382_v8  ;;  %v4576_v8 = vadd.f32 %v6997_v51, %v4575_v44  ;;  %v6844_v14 = vld [vmem:[%s11827_s29 + $0x70] sm:$0xff] }
 0xc95   :  { %v10941_v49 = vadd.f32 %v4576_v8, %v10312_v46  ;;  %v4561_v46 = vadd.f32 %v6997_v51, %v4560_v16 }
 0xc97   :  { %v10964_v4 = vadd.f32 %v4561_v46, %v10259_v61  ;;  %v11829_v61 = vld [vmem:[#allocation37_spill] sm:$0xff] }
 0xc98   :  { %v4593_v52 = vpop.f32.mrf.mxu3  ;;  %v4597_v1 = vadd.f32 %v4552_v42, %v11829_v61 }
 0xc99   :  { %v4594_v3 = vadd.f32 %v6997_v51, %v4593_v52 }
 0xc9b   :  { %v10913_v58 = vadd.f32 %v4594_v3, %v10403_v25  ;;  %v10926_v25 = vadd.f32 %v4585_v31, %v10351_v40  ;;  %v4570_v40 = vadd.f32 %v6997_v51, %v4569_v55  ;;  %v6847_v31 = vld [vmem:[%s11828_s3 + $0x38] sm:$0xff] }
 0xc9d   :  { %4616 = vmatpush.msra.mxu0 %v10913_v58  ;;  %4652 = vmatpush.msra.mxu1 %v10913_v58  ;;  %v10951_v21 = vadd.f32 %v4570_v40, %v10286_v19  ;;  %v4555_v19 = vadd.f32 %v6997_v51, %v4554_v37  ;;  %v6822_v37 = vld [vmem:[%s11828_s3 + $0x10] sm:$0xff]  ;;  %v6843_v51 = vld [vmem:[%s11827_s29 + $0x68] sm:$0xff] }
 0xc9e   :  { %4711 = vmatpush.msra.mxu2 %v6822_v37 }
 0xc9f   :  { %4617 = vmatpush.msra.mxu0 %v10916_v22  ;;  %4653 = vmatpush.msra.mxu1 %v10916_v22  ;;  %v4598_v15 = vadd.f32 %v4555_v19, %v10247_v27  ;;  %v4645_v27 = vld [vmem:[%s11828_s3] sm:$0xff] }
 0xca0   :  { %4829 = vmatpush.msrb.mxu2 %v6837_v60 }
 0xca1   :  { %4618 = vmatpush.msra.mxu0 %v10921_v33  ;;  %4654 = vmatpush.msra.mxu1 %v10921_v33 }
 0xca2   :  { %4830 = vmatpush.msrb.mxu2 %v6836_v32 }
 0xca3   :  { %4619 = vmatpush.msra.mxu0 %v10926_v25  ;;  %4655 = vmatpush.msra.mxu1 %v10926_v25 }
 0xca5   :  { %4620 = vmatpush.msra.mxu0 %v10931_v28  ;;  %4656 = vmatpush.msra.mxu1 %v10931_v28 }
 0xca7   :  { %4621 = vmatpush.msra.mxu0 %v10936_v59  ;;  %4657 = vmatpush.msra.mxu1 %v10936_v59 }
 0xca9   :  { %4622 = vmatpush.msra.mxu0 %v10941_v49  ;;  %4658 = vmatpush.msra.mxu1 %v10941_v49 }
 0xcab   :  { %4623 = vmatpush.msra.mxu0 %v10946_v45  ;;  %4659 = vmatpush.msra.mxu1 %v10946_v45 }
 0xcad   :  { %4624 = vmatpush.msra.mxu0 %v10951_v21  ;;  %4660 = vmatpush.msra.mxu1 %v10951_v21 }
 0xcaf   :  { %4625 = vmatpush.msra.mxu0 %v10956_v53  ;;  %4661 = vmatpush.msra.mxu1 %v10956_v53 }
 0xcb1   :  { %4626 = vmatpush.msra.mxu0 %v4601_v6  ;;  %4662 = vmatpush.msra.mxu1 %v4601_v6 }
 0xcb3   :  { %4627 = vmatpush.msra.mxu0 %v10964_v4  ;;  %4663 = vmatpush.msra.mxu1 %v10964_v4 }
 0xcb5   :  { %4628 = vmatpush.msra.mxu0 %v4599_v18  ;;  %4664 = vmatpush.msra.mxu1 %v4599_v18 }
 0xcb7   :  { %4629 = vmatpush.msra.mxu0 %v4598_v15  ;;  %4665 = vmatpush.msra.mxu1 %v4598_v15 }
 0xcb9   :  { %4630 = vmatpush.msra.mxu0 %v4597_v1  ;;  %4666 = vmatpush.msra.mxu1 %v4597_v1 }
 0xcbb   :  { %4631 = vmatpush.msra.mxu0 %v4596_v13  ;;  %4667 = vmatpush.msra.mxu1 %v4596_v13 }
 0xcbc   :  { %4632 = vmatmul.f32.vlgmr.msra.gmra.mxu0 %v4612_v30  ;;  %4668 = vmatmul.f32.vlgmr.msra.gmra.mxu1 %v6818_v47 }
 0xcbd   :  { %4751 = vmatpush.msrb.mxu0 %v4646_v0  ;;  %4771 = vmatpush.msrb.mxu1 %v10913_v58 }
 0xcbf   :  { %4752 = vmatpush.msrb.mxu0 %v4645_v27  ;;  %4772 = vmatpush.msrb.mxu1 %v10916_v22 }
 0xcc1   :  { %4853 = vmatpush.msra.mxu0 %v10913_v58  ;;  %4773 = vmatpush.msrb.mxu1 %v10921_v33 }
 0xcc3   :  { %4854 = vmatpush.msra.mxu0 %v10916_v22  ;;  %4774 = vmatpush.msrb.mxu1 %v10926_v25 }
 0xcc4   :  { %4671 = vmatmul.f32.gmra.mxu1 %v6819_v34  ;;  %4635 = vmatmul.f32.gmra.mxu0 %v4613_v48 }
 0xcc5   :  { %4855 = vmatpush.msra.mxu0 %v10921_v33  ;;  %4775 = vmatpush.msrb.mxu1 %v10931_v28 }
 0xcc7   :  { %4856 = vmatpush.msra.mxu0 %v10926_v25  ;;  %4776 = vmatpush.msrb.mxu1 %v10936_v59 }
 0xcc9   :  { %4857 = vmatpush.msra.mxu0 %v10931_v28  ;;  %4777 = vmatpush.msrb.mxu1 %v10941_v49 }
 0xccb   :  { %4858 = vmatpush.msra.mxu0 %v10936_v59  ;;  %4778 = vmatpush.msrb.mxu1 %v10946_v45 }
 0xccc   :  { %4674 = vmatmul.f32.gmra.mxu1 %v6820_v29  ;;  %4638 = vmatmul.f32.gmra.mxu0 %v4614_v57 }
 0xccd   :  { %4859 = vmatpush.msra.mxu0 %v10941_v49  ;;  %4779 = vmatpush.msrb.mxu1 %v10951_v21 }
 0xccf   :  { %4860 = vmatpush.msra.mxu0 %v10946_v45  ;;  %4780 = vmatpush.msrb.mxu1 %v10956_v53 }
 0xcd1   :  { %4861 = vmatpush.msra.mxu0 %v10951_v21  ;;  %4781 = vmatpush.msrb.mxu1 %v4601_v6 }
 0xcd3   :  { %4862 = vmatpush.msra.mxu0 %v10956_v53  ;;  %4782 = vmatpush.msrb.mxu1 %v10964_v4 }
 0xcd4   :  { %4677 = vmatmul.f32.gmra.mxu1 %v6821_v2  ;;  %4641 = vmatmul.f32.gmra.mxu0 %v4615_v26  ;;  %v7527_v2 = vmov 64.0  }
 0xcd5   :  { %4863 = vmatpush.msra.mxu0 %v4601_v6  ;;  %4783 = vmatpush.msrb.mxu1 %v4599_v18  ;;  %7313 = vrcp.f32 %v7527_v2 }
 0xcd7   :  { %4864 = vmatpush.msra.mxu0 %v10964_v4  ;;  %4784 = vmatpush.msrb.mxu1 %v4598_v15 }
 0xcd9   :  { %4865 = vmatpush.msra.mxu0 %v4599_v18  ;;  %4785 = vmatpush.msrb.mxu1 %v4597_v1 }
 0xcdb   :  { %4866 = vmatpush.msra.mxu0 %v4598_v15  ;;  %4786 = vmatpush.msrb.mxu1 %v4596_v13  ;;  %v7314_v26 = vpop.eup %7313 }
 0xcdc   :  { %4787 = vmatmul.f32.vlgmr.msrb.gmra.mxu1 %v6832_v63  ;;  %v4946_v17 = vmul.f32 64.0, %v7314_v26 }
 0xcdd   :  { %4867 = vmatpush.msra.mxu0 %v4597_v1  ;;  %4911 = vmatpush.msra.mxu1 %v6847_v31 }
 0xcde   :  { %v4947_v63 = vsub.f32 1.0, %v4946_v17 }
 0xcdf   :  { %4868 = vmatpush.msra.mxu0 %v4596_v13  ;;  %4912 = vmatpush.msra.mxu1 %v6846_v54  ;;  %v5044_v54 = vld [vmem:[%s11831_s8 + $0x30] sm:$0xff] }
 0xce4   :  { %4790 = vmatmul.f32.gmra.mxu1 %v6833_v11  ;;  %v4948_v11 = vmul.f32 %v7314_v26, %v4947_v63 }
 0xcec   :  { %4793 = vmatmul.f32.gmra.mxu1 %v6834_v20  ;;  %v4949_v20 = vadd.f32 %v7314_v26, %v4948_v11 }
 0xcf4   :  { %4796 = vmatmul.f32.gmra.mxu1 %v6835_v43 }
 0xd39   :  { %v4633_v16 = vpop.f32.mrf.mxu0  ;;  %v4669_v39 = vpop.f32.mrf.mxu1 }
 0xd3a   :  { %6824 = vmatmul.msk.f32.vlgmr.msra.gmra.mxu2 %vm347_vm1, %v4669_v39  ;;  %6828 = vmatmul.msk.f32.vlgmr.msrb.gmra.mxu0 %vm347_vm1, %v4633_v16 }
 0xd41   :  { %v4672_v55 = vpop.f32.mrf.mxu1  ;;  %v4636_v10 = vpop.f32.mrf.mxu0 }
 0xd42   :  { %6825 = vmatmul.msk.f32.gmra.mxu2 %vm347_vm1, %v4672_v55  ;;  %6829 = vmatmul.msk.f32.gmra.mxu0 %vm347_vm1, %v4636_v10 }
 0xd49   :  { %v4675_v44 = vpop.f32.mrf.mxu1  ;;  %v4639_v5 = vpop.f32.mrf.mxu0 }
 0xd4a   :  { %6826 = vmatmul.msk.f32.gmra.mxu2 %vm347_vm1, %v4675_v44  ;;  %6830 = vmatmul.msk.f32.gmra.mxu0 %vm347_vm1, %v4639_v5 }
 0xd51   :  { %v4678_v24 = vpop.f32.mrf.mxu1  ;;  %v4642_v36 = vpop.f32.mrf.mxu0 }
 0xd52   :  { %6827 = vmatmul.msk.f32.gmra.mxu2 %vm347_vm1, %v4678_v24  ;;  %6831 = vmatmul.msk.f32.gmra.mxu0 %vm347_vm1, %v4642_v36 }
 0xd59   :  { %v4788_v50 = vpop.f32.mrf.mxu1 }
 0xd5a   :  { %6838 = vmatmul.msk.f32.vlgmr.msrb.gmra.mxu2 %vm347_vm1, %v4788_v50  ;;  %4869 = vmatmul.f32.vlgmr.msra.gmra.mxu0 %v6842_v41 }
 0xd61   :  { %v4791_v52 = vpop.f32.mrf.mxu1 }
 0xd62   :  { %6839 = vmatmul.msk.f32.gmra.mxu2 %vm347_vm1, %v4791_v52  ;;  %4872 = vmatmul.f32.gmra.mxu0 %v6843_v51 }
 0xd69   :  { %v4794_v3 = vpop.f32.mrf.mxu1 }
 0xd6a   :  { %6840 = vmatmul.msk.f32.gmra.mxu2 %vm347_vm1, %v4794_v3  ;;  %4875 = vmatmul.f32.gmra.mxu0 %v6844_v14 }
 0xd71   :  { %v4797_v58 = vpop.f32.mrf.mxu1 }
 0xd72   :  { %6841 = vmatmul.msk.f32.gmra.mxu2 %vm347_vm1, %v4797_v58  ;;  %4878 = vmatmul.f32.gmra.mxu0 %v6845_v35 }
 0xdb7   :  { %v4754_v22 = vpop.f32.mrf.mxu0 }
 0xdbd   :  { %v4713_v40 = vpop.f32.mrf.mxu2 }
 0xdbe   :  { %v4755_v21 = vadd.f32 %v4754_v22, %v4713_v40  ;;  %v5045_v22 = vld [vmem:[%s11831_s8 + $0x38] sm:$0xff] }
 0xdbf   :  { %v4757_v33 = vpop.f32.mrf.mxu0  ;;  %5066 = vmatpush.msra.mxu2 %v5045_v22  ;;  %v5041_v40 = vld [vmem:[%s11831_s8 + $0x18] sm:$0xff] }
 0xdc1   :  { %5067 = vmatpush.msra.mxu2 %v5044_v54 }
 0xdc5   :  { %v4716_v49 = vpop.f32.mrf.mxu2 }
 0xdc6   :  { %v4758_v4 = vadd.f32 %v4757_v33, %v4716_v49 }
 0xdc7   :  { %v4760_v62 = vpop.f32.mrf.mxu0 }
 0xdcd   :  { %v4719_v56 = vpop.f32.mrf.mxu2 }
 0xdce   :  { %v4761_v1 = vadd.f32 %v4760_v62, %v4719_v56 }
 0xdcf   :  { %v4763_v25 = vpop.f32.mrf.mxu0 }
 0xdd5   :  { %v4722_v45 = vpop.f32.mrf.mxu2 }
 0xdd6   :  { %v4764_v27 = vadd.f32 %v4763_v25, %v4722_v45  ;;  %v5040_v45 = vld [vmem:[%s11831_s8 + $0x10] sm:$0xff] }
 0xdd7   :  { %v4870_v8 = vpop.f32.mrf.mxu0 }
 0xdd8   :  { %6848 = vmatmul.msk.f32.vlgmr.msra.gmra.mxu1 %vm347_vm1, %v4870_v8  ;;  %v5043_v8 = vld [vmem:[%s11831_s8 + $0x28] sm:$0xff] }
 0xdd9   :  { %5068 = vmatpush.msra.mxu2 %v5043_v8 }
 0xddd   :  { %v4832_v9 = vpop.f32.mrf.mxu2 }
 0xdde   :  { %v4844_v46 = vadd.f32 %v4832_v9, %v4755_v21 }
 0xddf   :  { %v4873_v28 = vpop.f32.mrf.mxu0 }
 0xde0   :  { %6849 = vmatmul.msk.f32.gmra.mxu1 %vm347_vm1, %v4873_v28  ;;  %v5042_v28 = vld [vmem:[%s11831_s8 + $0x20] sm:$0xff] }
 0xde1   :  { %5069 = vmatpush.msra.mxu2 %v5042_v28  ;;  %v7528_v28 = vmov 32.0  }
 0xde3   :  { %5070 = vmatpush.msra.mxu2 %v5041_v40 }
 0xde5   :  { %v4835_v53 = vpop.f32.mrf.mxu2  ;;  %5071 = vmatpush.msra.mxu2 %v5040_v45 }
 0xde6   :  { %v4845_v42 = vadd.f32 %v4835_v53, %v4758_v4  ;;  %v5038_v53 = vld [vmem:[%s11831_s8] sm:$0xff] }
 0xde7   :  { %v4876_v38 = vpop.f32.mrf.mxu0 }
 0xde8   :  { %6850 = vmatmul.msk.f32.gmra.mxu1 %vm347_vm1, %v4876_v38 }
 0xded   :  { %v4838_v15 = vpop.f32.mrf.mxu2 }
 0xdee   :  { %v4846_v23 = vadd.f32 %v4838_v15, %v4761_v1 }
 0xdef   :  { %v4879_v59 = vpop.f32.mrf.mxu0 }
 0xdf0   :  { %6851 = vmatmul.msk.f32.gmra.mxu1 %vm347_vm1, %v4879_v59  ;;  %vm4950_vm1 = vweird.f32 %v7314_v26 }
 0xdf1   :  { %v11040_v43 = vsel %vm4950_vm1, %v7314_v26, %v4949_v20 }
 0xdf5   :  { %v4841_v0 = vpop.f32.mrf.mxu2 }
 0xdf6   :  { %v4847_v34 = vadd.f32 %v4841_v0, %v4764_v27 }
 0xe55   :  { %v4914_v7 = vpop.f32.mrf.mxu1 }
 0xe56   :  { %v4926_v6 = vadd.f32 %v4914_v7, %v4844_v46  ;;  %v5039_v46 = vld [vmem:[%s11831_s8 + $0x8] sm:$0xff] }
 0xe57   :  { %5072 = vmatpush.msra.mxu2 %v5039_v46 }
 0xe58   :  { %v4933_v19 = vsel %vm4932_vm15, %v4926_v6, 0.0 }
 0xe59   :  { %4934 = vadd.xlane.f32.xlu1 %v4933_v19  ;;  %5073 = vmatpush.msra.mxu2 %v5038_v53 }
 0xe5d   :  { %v4917_v18 = vpop.f32.mrf.mxu1 }
 0xe5e   :  { %v4927_v12 = vadd.f32 %v4917_v18, %v4845_v42 }
 0xe60   :  { %v4936_v61 = vsel %vm4932_vm15, %v4927_v12, 0.0 }
 0xe61   :  { %4937 = vadd.xlane.f32.xlu2 %v4936_v61  ;;  %v6998_v61 = vld [vmem:[%s11832_s14] ss:$0 sm:$0xff] }
 0xe65   :  { %v4920_v13 = vpop.f32.mrf.mxu1 }
 0xe66   :  { %v4928_v30 = vadd.f32 %v4920_v13, %v4846_v23  ;;  %v6999_v13 = vld [vmem:[%s11832_s14 + $0x1] ss:$0 sm:$0xff] }
 0xe68   :  { %v4939_v47 = vsel %vm4932_vm15, %v4928_v30, 0.0 }
 0xe69   :  { %4940 = vadd.xlane.f32.xlu0 %v4939_v47 }
 0xe6d   :  { %v4923_v48 = vpop.f32.mrf.mxu1 }
 0xe6e   :  { %v4929_v29 = vadd.f32 %v4923_v48, %v4847_v34 }
 0xe70   :  { %v4942_v57 = vsel %vm4932_vm15, %v4929_v29, 0.0 }
 0xe71   :  { %4943 = vadd.xlane.f32.xlu1 %v4942_v57 }
 0xecc   :  { %v4935_v37 = vpop.xlane.xlu1 %4934 }
 0xecd   :  { %v4952_v60 = vmul.f32 %v11040_v43, %v4935_v37 }
 0xecf   :  { %v11043_v16 = vsub.f32 %v4926_v6, %v4952_v60 }
 0xed1   :  { %v4960_v39 = vmul.f32 %v11043_v16, %v11043_v16 }
 0xed3   :  { %v4964_v32 = vsel %vm4932_vm15, %v4960_v39, 0.0 }
 0xed4   :  { %v4938_v55 = vpop.xlane.xlu2 %4937  ;;  %4965 = vadd.xlane.f32.xlu2 %v4964_v32 }
 0xed5   :  { %v4953_v10 = vmul.f32 %v11040_v43, %v4938_v55 }
 0xed7   :  { %v11049_v44 = vsub.f32 %v4927_v12, %v4953_v10 }
 0xed9   :  { %v4961_v5 = vmul.f32 %v11049_v44, %v11049_v44 }
 0xedb   :  { %v4967_v24 = vsel %vm4932_vm15, %v4961_v5, 0.0 }
 0xedc   :  { %v4941_v36 = vpop.xlane.xlu0 %4940  ;;  %4968 = vadd.xlane.f32.xlu0 %v4967_v24 }
 0xedd   :  { %v4954_v41 = vmul.f32 %v11040_v43, %v4941_v36 }
 0xedf   :  { %v11055_v50 = vsub.f32 %v4928_v30, %v4954_v41 }
 0xee1   :  { %v4962_v51 = vmul.f32 %v11055_v50, %v11055_v50 }
 0xee3   :  { %v4970_v52 = vsel %vm4932_vm15, %v4962_v51, 0.0 }
 0xee4   :  { %4971 = vadd.xlane.f32.xlu1 %v4970_v52  ;;  %v4944_v14 = vpop.xlane.xlu1 %4943 }
 0xee5   :  { %v4955_v3 = vmul.f32 %v11040_v43, %v4944_v14 }
 0xee7   :  { %v11061_v35 = vsub.f32 %v4929_v29, %v4955_v3 }
 0xee9   :  { %v4963_v58 = vmul.f32 %v11061_v35, %v11061_v35 }
 0xeeb   :  { %v4973_v31 = vsel %vm4932_vm15, %v4963_v58, 0.0 }
 0xeec   :  { %4974 = vadd.xlane.f32.xlu2 %v4973_v31 }
 0xf47   :  { %v4966_v33 = vpop.xlane.xlu2 %4965 }
 0xf48   :  { %v4976_v62 = vmul.f32 %v4966_v33, %v11040_v43 }
 0xf4a   :  { %v4980_v25 = vadd.f32 1e-05, %v4976_v62 }
 0xf4c   :  { %7315 = vrsqrt.f32 %v4980_v25  ;;  %vm4990_vm2 = vweird.f32 %v4980_v25 }
 0xf4f   :  { %v4969_v38 = vpop.xlane.xlu0 %4968 }
 0xf50   :  { %v4977_v59 = vmul.f32 %v4969_v38, %v11040_v43 }
 0xf52   :  { %v7316_v49 = vpop.eup %7315  ;;  %v4981_v56 = vadd.f32 1e-05, %v4977_v59 }
 0xf53   :  { %v4985_v9 = vmul.f32 %v7316_v49, %v4980_v25  ;;  %vm4991_vm0 = vweird.f32 %v7316_v49 }
 0xf54   :  { %7317 = vrsqrt.f32 %v4981_v56  ;;  %vm4992_vm3 = vmor %vm4990_vm2, %vm4991_vm0  ;;  %vm5000_vm5 = vweird.f32 %v4981_v56 }
 0xf55   :  { %v4986_v21 = vmul.f32 %v7316_v49, %v4985_v9 }
 0xf57   :  { %v4987_v7 = vmul.f32 0.5, %v4986_v21  ;;  %v4972_v6 = vpop.xlane.xlu1 %4971 }
 0xf58   :  { %v4978_v19 = vmul.f32 %v4972_v6, %v11040_v43 }
 0xf59   :  { %v4988_v4 = vsub.f32 1.5, %v4987_v7 }
 0xf5a   :  { %v7318_v42 = vpop.eup %7317  ;;  %v4982_v18 = vadd.f32 1e-05, %v4978_v19 }
 0xf5b   :  { %v4989_v12 = vmul.f32 %v7316_v49, %v4988_v4  ;;  %v4995_v15 = vmul.f32 %v7318_v42, %v4981_v56  ;;  %vm5001_vm4 = vweird.f32 %v7318_v42 }
 0xf5c   :  { %7319 = vrsqrt.f32 %v4982_v18  ;;  %vm5002_vm6 = vmor %vm5000_vm5, %vm5001_vm4  ;;  %vm5010_vm8 = vweird.f32 %v4982_v18 }
 0xf5d   :  { %v4993_v1 = vsel %vm4992_vm3, %v7316_v49, %v4989_v12  ;;  %v4996_v23 = vmul.f32 %v7318_v42, %v4995_v15 }
 0xf5e   :  { %v5024_v30 = vmul.f32 %v4993_v1, %v11043_v16 }
 0xf5f   :  { %v4997_v47 = vmul.f32 0.5, %v4996_v23  ;;  %v4975_v0 = vpop.xlane.xlu2 %4974 }
 0xf60   :  { %v5029_v27 = vmul.f32 %v6998_v61, %v5024_v30  ;;  %v4979_v34 = vmul.f32 %v4975_v0, %v11040_v43 }
 0xf61   :  { %v4998_v48 = vsub.f32 1.5, %v4997_v47 }
 0xf62   :  { %v7320_v29 = vpop.eup %7319  ;;  %v5034_v57 = vadd.f32 %v6999_v13, %v5029_v27  ;;  %v4983_v2 = vadd.f32 1e-05, %v4979_v34 }
 0xf63   :  { %v4999_v26 = vmul.f32 %v7318_v42, %v4998_v48  ;;  %v5005_v17 = vmul.f32 %v7320_v29, %v4982_v18  ;;  %vm5011_vm7 = vweird.f32 %v7320_v29 }
 0xf64   :  { %7321 = vrsqrt.f32 %v4983_v2  ;;  %6852 = vmatmul.msk.f32.vlgmr.msra.gmra.mxu2 %vm4932_vm15, %v5034_v57  ;;  %vm5012_vm9 = vmor %vm5010_vm8, %vm5011_vm7  ;;  %vm5020_vm12 = vweird.f32 %v4983_v2 }
 0xf65   :  { %v5003_v63 = vsel %vm5002_vm6, %v7318_v42, %v4999_v26  ;;  %v5006_v11 = vmul.f32 %v7320_v29, %v5005_v17  ;;  %7323 = vrcp.f32 %v7528_v28  ;;  %v7000_v28 = vld [vmem:[%s11833_s19] ss:$0 sm:$0xff] }
 0xf66   :  { %v5025_v20 = vmul.f32 %v5003_v63, %v11049_v44 }
 0xf67   :  { %v5007_v37 = vmul.f32 0.5, %v5006_v11 }
 0xf68   :  { %v5030_v60 = vmul.f32 %v6998_v61, %v5025_v20 }
 0xf69   :  { %v5008_v16 = vsub.f32 1.5, %v5007_v37 }
 0xf6a   :  { %v7322_v43 = vpop.eup %7321  ;;  %v5035_v39 = vadd.f32 %v6999_v13, %v5030_v60 }
 0xf6b   :  { %v5009_v32 = vmul.f32 %v7320_v29, %v5008_v16  ;;  %v5015_v55 = vmul.f32 %v7322_v43, %v4983_v2  ;;  %vm5021_vm10 = vweird.f32 %v7322_v43  ;;  %v7324_v38 = vpop.eup %7323 }
 0xf6c   :  { %6853 = vmatmul.msk.f32.gmra.mxu2 %vm4932_vm15, %v5035_v39  ;;  %vm5022_vm13 = vmor %vm5020_vm12, %vm5021_vm10  ;;  %v5102_v59 = vmul.f32 32.0, %v7324_v38  ;;  %vm5106_vm14 = vweird.f32 %v7324_v38 }
 0xf6d   :  { %v5013_v10 = vsel %vm5012_vm9, %v7320_v29, %v5009_v32  ;;  %v5016_v5 = vmul.f32 %v7322_v43, %v5015_v55 }
 0xf6e   :  { %v5026_v24 = vmul.f32 %v5013_v10, %v11055_v50  ;;  %v5103_v40 = vsub.f32 1.0, %v5102_v59 }
 0xf6f   :  { %v5017_v36 = vmul.f32 0.5, %v5016_v5 }
 0xf70   :  { %v5031_v41 = vmul.f32 %v6998_v61, %v5026_v24  ;;  %v5104_v49 = vmul.f32 %v7324_v38, %v5103_v40 }
 0xf71   :  { %v5018_v51 = vsub.f32 1.5, %v5017_v36 }
 0xf72   :  { %v5036_v44 = vadd.f32 %v6999_v13, %v5031_v41  ;;  %v5105_v56 = vadd.f32 %v7324_v38, %v5104_v49 }
 0xf73   :  { %v5019_v52 = vmul.f32 %v7322_v43, %v5018_v51 }
 0xf74   :  { %6854 = vmatmul.msk.f32.gmra.mxu2 %vm4932_vm15, %v5036_v44  ;;  %v11104_v45 = vsel %vm5106_vm14, %v7324_v38, %v5105_v56 }
 0xf75   :  { %v5023_v14 = vsel %vm5022_vm13, %v7322_v43, %v5019_v52 }
 0xf76   :  { %v5027_v3 = vmul.f32 %v5023_v14, %v11061_v35 }
 0xf78   :  { %v5032_v58 = vmul.f32 %v6998_v61, %v5027_v3 }
 0xf7a   :  { %v5037_v31 = vadd.f32 %v6999_v13, %v5032_v58 }
 0xf7c   :  { %6855 = vmatmul.msk.f32.gmra.mxu2 %vm4932_vm15, %v5037_v31 }
 0xfe7   :  { %v11088_v22 = vpop.f32.mrf.mxu2 }
 0xfe8   :  { %v5089_v8 = vsel %vm2547_vm11, %v11088_v22, 0.0 }
 0xfef   :  { %v11090_v50 = vpop.f32.mrf.mxu2 }
 0xff0   :  { %v5092_v54 = vsel %vm2547_vm11, %v11090_v50, 0.0 }
 0xff1   :  { %5093 = vadd.xlane.f32.xlu2 %v5092_v54 }
 0xff7   :  { %v11094_v33 = vpop.f32.mrf.mxu2 }
 0xff8   :  { %v5095_v62 = vsel %vm2547_vm11, %v11094_v33, 0.0 }
 0xff9   :  { %5096 = vadd.xlane.f32.xlu1 %v5095_v62 }
 0xfff   :  { %v11098_v25 = vpop.f32.mrf.mxu2 }
0x1000   :  { %v5098_v35 = vsel %vm2547_vm11, %v11098_v25, 0.0 }
0x1001   :  { %5099 = vadd.xlane.f32.xlu0 %v5098_v35 }
0x1009   :  { %5090 = vadd.xlane.f32.xlu0 %v5089_v8 }
0x1064   :  { %v5094_v9 = vpop.xlane.xlu2 %5093 }
0x1065   :  { %v5109_v21 = vmul.f32 %v11104_v45, %v5094_v9 }
0x1067   :  { %v11108_v46 = vsub.f32 %v11090_v50, %v5109_v21 }
0x1069   :  { %v5117_v53 = vmul.f32 %v11108_v46, %v11108_v46 }
0x106b   :  { %v5123_v7 = vsel %vm2547_vm11, %v5117_v53, 0.0 }
0x106c   :  { %v5097_v6 = vpop.xlane.xlu1 %5096  ;;  %5124 = vadd.xlane.f32.xlu0 %v5123_v7  ;;  %v7001_v7 = vld [vmem:[%s11833_s19 + $0x1] ss:$0 sm:$0xff] }
0x106d   :  { %v5110_v19 = vmul.f32 %v11104_v45, %v5097_v6 }
0x106f   :  { %v5114_v4 = vsub.f32 %v11094_v33, %v5110_v19 }
0x1071   :  { %v5118_v42 = vmul.f32 %v5114_v4, %v5114_v4 }
0x1073   :  { %v5126_v18 = vsel %vm2547_vm11, %v5118_v42, 0.0  ;;  %v7002_v42 = vld [vmem:[%s11834_s24] ss:$0 sm:$0xff] }
0x1074   :  { %5127 = vadd.xlane.f32.xlu2 %v5126_v18  ;;  %v5100_v12 = vpop.xlane.xlu0 %5099  ;;  %v7003_v18 = vld [vmem:[%s11834_s24 + $0x1] ss:$0 sm:$0xff] }
0x1075   :  { %v5111_v15 = vmul.f32 %v11104_v45, %v5100_v12  ;;  %v7004_v12 = vld [vmem:[%s11834_s24 + $0x2] ss:$0 sm:$0xff] }
0x1077   :  { %v11118_v61 = vsub.f32 %v11098_v25, %v5111_v15  ;;  %v7005_v15 = vld [vmem:[%s11834_s24 + $0x3] ss:$0 sm:$0xff] }
0x1079   :  { %v5119_v1 = vmul.f32 %v11118_v61, %v11118_v61 }
0x107b   :  { %v5129_v23 = vsel %vm2547_vm11, %v5119_v1, 0.0 }
0x107c   :  { %5130 = vadd.xlane.f32.xlu1 %v5129_v23  ;;  %v5091_v13 = vpop.xlane.xlu0 %5090 }
0x107d   :  { %v5108_v30 = vmul.f32 %v11104_v45, %v5091_v13 }
0x107f   :  { %v11125_v47 = vsub.f32 %v11088_v22, %v5108_v30 }
0x1081   :  { %v5116_v0 = vmul.f32 %v11125_v47, %v11125_v47 }
0x1083   :  { %v5120_v27 = vsel %vm2547_vm11, %v5116_v0, 0.0 }
0x1084   :  { %5121 = vadd.xlane.f32.xlu1 %v5120_v27 }
0x10df   :  { %v5125_v34 = vpop.xlane.xlu0 %5124 }
0x10e0   :  { %v5133_v48 = vmul.f32 %v5125_v34, %v11104_v45 }
0x10e2   :  { %v5137_v29 = vadd.f32 1e-05, %v5133_v48 }
0x10e4   :  { %7325 = vrsqrt.f32 %v5137_v29  ;;  %vm5156_vm3 = vweird.f32 %v5137_v29 }
0x10e7   :  { %v5128_v57 = vpop.xlane.xlu2 %5127 }
0x10e8   :  { %v5134_v2 = vmul.f32 %v5128_v57, %v11104_v45 }
0x10ea   :  { %v7326_v26 = vpop.eup %7325  ;;  %v5138_v17 = vadd.f32 1e-05, %v5134_v2 }
0x10eb   :  { %v5151_v63 = vmul.f32 %v7326_v26, %v5137_v29  ;;  %vm5157_vm0 = vweird.f32 %v7326_v26 }
0x10ec   :  { %7327 = vrsqrt.f32 %v5138_v17  ;;  %vm5166_vm2 = vweird.f32 %v5138_v17  ;;  %vm5158_vm5 = vmor %vm5156_vm3, %vm5157_vm0 }
0x10ed   :  { %v5152_v20 = vmul.f32 %v7326_v26, %v5151_v63 }
0x10ef   :  { %v5131_v11 = vpop.xlane.xlu1 %5130  ;;  %v5153_v39 = vmul.f32 0.5, %v5152_v20 }
0x10f0   :  { %v5135_v37 = vmul.f32 %v5131_v11, %v11104_v45 }
0x10f1   :  { %v5154_v5 = vsub.f32 1.5, %v5153_v39 }
0x10f2   :  { %v7328_v60 = vpop.eup %7327  ;;  %v5139_v16 = vadd.f32 1e-05, %v5135_v37 }
0x10f3   :  { %v5161_v43 = vmul.f32 %v7328_v60, %v5138_v17  ;;  %vm5167_vm1 = vweird.f32 %v7328_v60  ;;  %v5155_v14 = vmul.f32 %v7326_v26, %v5154_v5  ;;  %v6860_v5 = vld [vmem:[%s11835_s30 + $0x20] sm:$0xff] }
0x10f4   :  { %7329 = vrsqrt.f32 %v5139_v16  ;;  %vm5168_vm4 = vmor %vm5166_vm2, %vm5167_vm1  ;;  %vm5176_vm7 = vweird.f32 %v5139_v16 }
0x10f5   :  { %v5162_v32 = vmul.f32 %v7328_v60, %v5161_v43  ;;  %v5159_v54 = vsel %vm5158_vm5, %v7326_v26, %v5155_v14  ;;  %v6878_v14 = vld [vmem:[%s11835_s30 + $0x70] sm:$0xff] }
0x10f6   :  { %v5181_v38 = vmul.f32 %v5159_v54, %v11108_v46  ;;  %v6879_v54 = vld [vmem:[%s11835_s30 + $0x78] sm:$0xff] }
0x10f7   :  { %v5163_v55 = vmul.f32 0.5, %v5162_v32  ;;  %v5122_v10 = vpop.xlane.xlu1 %5121  ;;  %v6868_v32 = vld [vmem:[%s11835_s30 + $0x40] sm:$0xff] }
0x10f8   :  { %v5132_v24 = vmul.f32 %v5122_v10, %v11104_v45  ;;  %v5186_v53 = vmul.f32 %v7000_v28, %v5181_v38  ;;  %v6876_v10 = vld [vmem:[%s11835_s30 + $0x60] sm:$0xff] }
0x10f9   :  { %v5164_v36 = vsub.f32 1.5, %v5163_v55  ;;  %v5198_v55 = vld [vmem:[%s11835_s30] sm:$0xff] }
0x10fa   :  { %v7330_v41 = vpop.eup %7329  ;;  %v5136_v51 = vadd.f32 1e-05, %v5132_v24  ;;  %v5191_v13 = vadd.f32 %v7001_v7, %v5186_v53  ;;  %v6869_v24 = vld [vmem:[%s11835_s30 + $0x48] sm:$0xff] }
0x10fb   :  { %v5165_v44 = vmul.f32 %v7328_v60, %v5164_v36  ;;  %v5171_v52 = vmul.f32 %v7330_v41, %v5139_v16  ;;  %vm5177_vm6 = vweird.f32 %v7330_v41  ;;  %v5199_v36 = vld [vmem:[%s11835_s30 + $0x8] sm:$0xff] }
0x10fc   :  { %7331 = vrsqrt.f32 %v5136_v51  ;;  %vm5178_vm8 = vmor %vm5176_vm7, %vm5177_vm6  ;;  %vm5146_vm10 = vweird.f32 %v5136_v51  ;;  %v5205_v63 = vmul.f32 %v7002_v42, %v5191_v13  ;;  %v5261_v11 = vmul.f32 %v7003_v18, %v5191_v13 }
0x10fd   :  { %v5172_v3 = vmul.f32 %v7330_v41, %v5171_v52  ;;  %v5169_v58 = vsel %vm5168_vm4, %v7328_v60, %v5165_v44  ;;  %v5317_v20 = vmul.f32 %v7004_v12, %v5191_v13  ;;  %v6870_v44 = vld [vmem:[%s11835_s30 + $0x50] sm:$0xff] }
0x10fe   :  { %v5182_v8 = vmul.f32 %v5169_v58, %v5114_v4  ;;  %v5200_v52 = vld [vmem:[%s11835_s30 + $0x10] sm:$0xff]  ;;  %v6871_v58 = vld [vmem:[%s11835_s30 + $0x58] sm:$0xff] }
0x10ff   :  { %v5173_v31 = vmul.f32 0.5, %v5172_v3  ;;  %v6862_v3 = vld [vmem:[%s11835_s30 + $0x30] sm:$0xff] }
0x1100   :  { %v5187_v9 = vmul.f32 %v7000_v28, %v5182_v8 }
0x1101   :  { %v5174_v62 = vsub.f32 1.5, %v5173_v31  ;;  %v5201_v31 = vld [vmem:[%s11835_s30 + $0x18] sm:$0xff] }
0x1102   :  { %v7332_v35 = vpop.eup %7331  ;;  %v5192_v1 = vadd.f32 %v7001_v7, %v5187_v9 }
0x1103   :  { %v5175_v59 = vmul.f32 %v7330_v41, %v5174_v62  ;;  %v5141_v40 = vmul.f32 %v7332_v35, %v5136_v51  ;;  %vm5147_vm9 = vweird.f32 %v7332_v35  ;;  %v6861_v51 = vld [vmem:[%s11835_s30 + $0x28] sm:$0xff]  ;;  %v6863_v62 = vld [vmem:[%s11835_s30 + $0x38] sm:$0xff] }
0x1104   :  { %vm5148_vm12 = vmor %vm5146_vm10, %vm5147_vm9  ;;  %v5206_v29 = vmul.f32 %v7002_v42, %v5192_v1  ;;  %v5262_v57 = vmul.f32 %v7003_v18, %v5192_v1  ;;  %v5318_v2 = vmul.f32 %v7004_v12, %v5192_v1  ;;  %v5374_v26 = vmul.f32 %v7005_v15, %v5192_v1 }
0x1105   :  { %v5179_v49 = vsel %vm5178_vm8, %v7330_v41, %v5175_v59  ;;  %v5142_v56 = vmul.f32 %v7332_v35, %v5141_v40  ;;  %v6877_v41 = vld [vmem:[%s11835_s30 + $0x68] sm:$0xff] }
0x1106   :  { %v5183_v21 = vmul.f32 %v5179_v49, %v11118_v61  ;;  %v5195_v49 = vld [vmem:[%s11836_s6 + $0x8] sm:$0xff] }
0x1107   :  { %v5143_v6 = vmul.f32 0.5, %v5142_v56 }
0x1108   :  { %v5188_v19 = vmul.f32 %v7000_v28, %v5183_v21 }
0x1109   :  { %v5144_v4 = vsub.f32 1.5, %v5143_v6 }
0x110a   :  { %v5193_v46 = vadd.f32 %v7001_v7, %v5188_v19 }
0x110b   :  { %v5145_v23 = vmul.f32 %v7332_v35, %v5144_v4 }
0x110c   :  { %v5207_v30 = vmul.f32 %v7002_v42, %v5193_v46  ;;  %v5263_v0 = vmul.f32 %v7003_v18, %v5193_v46  ;;  %v5319_v27 = vmul.f32 %v7004_v12, %v5193_v46  ;;  %v5375_v61 = vmul.f32 %v7005_v15, %v5193_v46 }
0x110d   :  { %v5149_v34 = vsel %vm5148_vm12, %v7332_v35, %v5145_v23  ;;  %v5194_v35 = vld [vmem:[%s11836_s6] sm:$0xff] }
0x110e   :  { %v5180_v48 = vmul.f32 %v5149_v34, %v11125_v47  ;;  %5232 = vmatpush.msrb.mxu0 %v5207_v30  ;;  %5288 = vmatpush.msrb.mxu1 %v5263_v0  ;;  %v5373_v47 = vmul.f32 %v7005_v15, %v5191_v13  ;;  %v5197_v34 = vld [vmem:[%s11836_s6 + $0x18] sm:$0xff] }
0x110f   :  { %5344 = vmatpush.msrb.mxu2 %v5319_v27  ;;  %5400 = vmatpush.msrb.mxu3 %v5375_v61 }
0x1110   :  { %v5185_v17 = vmul.f32 %v7000_v28, %v5180_v48  ;;  %5233 = vmatpush.msrb.mxu0 %v5206_v29  ;;  %5289 = vmatpush.msrb.mxu1 %v5262_v57 }
0x1111   :  { %5345 = vmatpush.msrb.mxu2 %v5318_v2  ;;  %5401 = vmatpush.msrb.mxu3 %v5374_v26 }
0x1112   :  { %5234 = vmatpush.msrb.mxu0 %v5205_v63  ;;  %5290 = vmatpush.msrb.mxu1 %v5261_v11  ;;  %v5190_v37 = vadd.f32 %v7001_v7, %v5185_v17 }
0x1113   :  { %5346 = vmatpush.msrb.mxu2 %v5317_v20  ;;  %5402 = vmatpush.msrb.mxu3 %v5373_v47 }
0x1114   :  { %v5204_v60 = vmul.f32 %v7002_v42, %v5190_v37  ;;  %v5260_v16 = vmul.f32 %v7003_v18, %v5190_v37  ;;  %v5316_v43 = vmul.f32 %v7004_v12, %v5190_v37  ;;  %v5372_v39 = vmul.f32 %v7005_v15, %v5190_v37  ;;  %v5196_v18 = vld [vmem:[%s11836_s6 + $0x10] sm:$0xff] }
0x1116   :  { %5235 = vmatpush.msrb.mxu0 %v5204_v60  ;;  %5291 = vmatpush.msrb.mxu1 %v5260_v16 }
0x1117   :  { %5347 = vmatpush.msrb.mxu2 %v5316_v43  ;;  %5403 = vmatpush.msrb.mxu3 %v5372_v39 }
0x1118   :  { %6872 = vmatmul.msk.f32.vlgmr.msrb.gmra.mxu2 %vm2547_vm11, %v6868_v32  ;;  %6856 = vmatmul.msk.f32.vlgmr.msrb.gmra.mxu0 %vm2547_vm11, %v5198_v55 }
0x1119   :  { %6880 = vmatmul.msk.f32.vlgmr.msrb.gmra.mxu3 %vm2547_vm11, %v6876_v10  ;;  %6864 = vmatmul.msk.f32.vlgmr.msrb.gmra.mxu1 %vm2547_vm11, %v6860_v5 }
0x1120   :  { %6873 = vmatmul.msk.f32.gmra.mxu2 %vm2547_vm11, %v6869_v24  ;;  %6857 = vmatmul.msk.f32.gmra.mxu0 %vm2547_vm11, %v5199_v36 }
0x1121   :  { %6881 = vmatmul.msk.f32.gmra.mxu3 %vm2547_vm11, %v6877_v41  ;;  %6865 = vmatmul.msk.f32.gmra.mxu1 %vm2547_vm11, %v6861_v51 }
0x1128   :  { %6874 = vmatmul.msk.f32.gmra.mxu2 %vm2547_vm11, %v6870_v44  ;;  %6858 = vmatmul.msk.f32.gmra.mxu0 %vm2547_vm11, %v5200_v52 }
0x1129   :  { %6882 = vmatmul.msk.f32.gmra.mxu3 %vm2547_vm11, %v6878_v14  ;;  %6866 = vmatmul.msk.f32.gmra.mxu1 %vm2547_vm11, %v6862_v3 }
0x1130   :  { %6875 = vmatmul.msk.f32.gmra.mxu2 %vm2547_vm11, %v6871_v58  ;;  %6859 = vmatmul.msk.f32.gmra.mxu0 %vm2547_vm11, %v5201_v31 }
0x1131   :  { %6883 = vmatmul.msk.f32.gmra.mxu3 %vm2547_vm11, %v6879_v54  ;;  %6867 = vmatmul.msk.f32.gmra.mxu1 %vm2547_vm11, %v6863_v62 }
0x1195   :  { %v5237_v8 = vpop.f32.mrf.mxu0 }
0x1196   :  { %v5249_v28 = vadd.f32 %v5237_v8, %v5194_v35  ;;  %v5293_v38 = vpop.f32.mrf.mxu1 }
0x1198   :  { %v5305_v59 = vadd.f32 %v5293_v38, %v5249_v28 }
0x119b   :  { %v5349_v40 = vpop.f32.mrf.mxu2 }
0x119c   :  { %v5361_v56 = vadd.f32 %v5349_v40, %v5305_v59  ;;  %v5405_v9 = vpop.f32.mrf.mxu3  ;;  %v5528_v59 = vld [vmem:[%s11837_s12 + $0x18] sm:$0xff]  ;;  %v5527_v40 = vld [vmem:[%s11837_s12 + $0x10] sm:$0xff] }
0x119d   :  { %v5240_v21 = vpop.f32.mrf.mxu0  ;;  %5557 = vmatpush.msra.mxu0 %v5528_v59 }
0x119e   :  { %v5417_v53 = vadd.f32 %v5405_v9, %v5361_v56  ;;  %v5250_v7 = vadd.f32 %v5240_v21, %v5195_v49  ;;  %v5296_v6 = vpop.f32.mrf.mxu1 }
0x119f   :  { %5558 = vmatpush.msra.mxu0 %v5527_v40 }
0x11a0   :  { %v11178_v19 = vadd.f32 %v5417_v53, %v11088_v22  ;;  %v5306_v4 = vadd.f32 %v5296_v6, %v5250_v7  ;;  %v5526_v6 = vld [vmem:[%s11837_s12 + $0x8] sm:$0xff] }
0x11a1   :  { %5559 = vmatpush.msra.mxu0 %v5526_v6 }
0x11a2   :  { %v5427_v42 = vsel %vm2547_vm11, %v11178_v19, 0.0 }
0x11a3   :  { %v5352_v46 = vpop.f32.mrf.mxu2  ;;  %5428 = vadd.xlane.f32.xlu2 %v5427_v42 }
0x11a4   :  { %v5362_v12 = vadd.f32 %v5352_v46, %v5306_v4  ;;  %v5408_v15 = vpop.f32.mrf.mxu3  ;;  %v5525_v4 = vld [vmem:[%s11837_s12] sm:$0xff] }
0x11a5   :  { %v5243_v1 = vpop.f32.mrf.mxu0  ;;  %5560 = vmatpush.msra.mxu0 %v5525_v4 }
0x11a6   :  { %v5418_v23 = vadd.f32 %v5408_v15, %v5362_v12  ;;  %v5251_v13 = vadd.f32 %v5243_v1, %v5196_v18  ;;  %v5299_v30 = vpop.f32.mrf.mxu1 }
0x11a8   :  { %v11184_v0 = vadd.f32 %v5418_v23, %v11090_v50  ;;  %v5307_v27 = vadd.f32 %v5299_v30, %v5251_v13  ;;  %v7006_v30 = vld [vmem:[%s11833_s19 + $0x2] ss:$0 sm:$0xff] }
0x11aa   :  { %v5430_v22 = vsel %vm2547_vm11, %v11184_v0, 0.0 }
0x11ab   :  { %v5355_v61 = vpop.f32.mrf.mxu2  ;;  %5431 = vadd.xlane.f32.xlu0 %v5430_v22 }
0x11ac   :  { %v5363_v48 = vadd.f32 %v5355_v61, %v5307_v27  ;;  %v5411_v29 = vpop.f32.mrf.mxu3  ;;  %v7007_v61 = vld [vmem:[%s11833_s19 + $0x3] ss:$0 sm:$0xff] }
0x11ad   :  { %v5246_v57 = vpop.f32.mrf.mxu0 }
0x11ae   :  { %v5419_v2 = vadd.f32 %v5411_v29, %v5363_v48  ;;  %v5252_v26 = vadd.f32 %v5246_v57, %v5197_v34  ;;  %v5302_v17 = vpop.f32.mrf.mxu1 }
0x11b0   :  { %v11190_v63 = vadd.f32 %v5419_v2, %v11094_v33  ;;  %v5308_v11 = vadd.f32 %v5302_v17, %v5252_v26 }
0x11b2   :  { %v5433_v50 = vsel %vm2547_vm11, %v11190_v63, 0.0 }
0x11b3   :  { %v5358_v20 = vpop.f32.mrf.mxu2  ;;  %5434 = vadd.xlane.f32.xlu1 %v5433_v50 }
0x11b4   :  { %v5364_v47 = vadd.f32 %v5358_v20, %v5308_v11  ;;  %v5414_v37 = vpop.f32.mrf.mxu3 }
0x11b6   :  { %v5420_v60 = vadd.f32 %v5414_v37, %v5364_v47 }
0x11b8   :  { %v11195_v16 = vadd.f32 %v5420_v60, %v11098_v25 }
0x11ba   :  { %v5436_v43 = vsel %vm2547_vm11, %v11195_v16, 0.0 }
0x11bb   :  { %5437 = vadd.xlane.f32.xlu2 %v5436_v43 }
0x1216   :  { %v5429_v39 = vpop.xlane.xlu2 %5428 }
0x1217   :  { %v5439_v33 = vmul.f32 %v5429_v39, %v11104_v45 }
0x1219   :  { %v5443_v32 = vsub.f32 %v11178_v19, %v5439_v33 }
0x121b   :  { %v5447_v55 = vmul.f32 %v5443_v32, %v5443_v32 }
0x121d   :  { %v5451_v10 = vsel %vm2547_vm11, %v5447_v55, 0.0 }
0x121e   :  { %5452 = vadd.xlane.f32.xlu0 %v5451_v10  ;;  %v5432_v5 = vpop.xlane.xlu0 %5431 }
0x121f   :  { %v5440_v24 = vmul.f32 %v5432_v5, %v11104_v45 }
0x1221   :  { %v11204_v36 = vsub.f32 %v11184_v0, %v5440_v24 }
0x1223   :  { %v5448_v25 = vmul.f32 %v11204_v36, %v11204_v36 }
0x1225   :  { %v5454_v41 = vsel %vm2547_vm11, %v5448_v25, 0.0 }
0x1226   :  { %5455 = vadd.xlane.f32.xlu1 %v5454_v41  ;;  %v5435_v51 = vpop.xlane.xlu1 %5434 }
0x1227   :  { %v5441_v44 = vmul.f32 %v5435_v51, %v11104_v45 }
0x1229   :  { %v11211_v52 = vsub.f32 %v11190_v63, %v5441_v44 }
0x122b   :  { %v5449_v14 = vmul.f32 %v11211_v52, %v11211_v52 }
0x122d   :  { %v5457_v3 = vsel %vm2547_vm11, %v5449_v14, 0.0 }
0x122e   :  { %5458 = vadd.xlane.f32.xlu2 %v5457_v3  ;;  %v5438_v58 = vpop.xlane.xlu2 %5437 }
0x122f   :  { %v5442_v31 = vmul.f32 %v5438_v58, %v11104_v45 }
0x1231   :  { %v11218_v54 = vsub.f32 %v11195_v16, %v5442_v31 }
0x1233   :  { %v5450_v62 = vmul.f32 %v11218_v54, %v11218_v54 }
0x1235   :  { %v5460_v35 = vsel %vm2547_vm11, %v5450_v62, 0.0 }
0x1236   :  { %5461 = vadd.xlane.f32.xlu0 %v5460_v35 }
0x1291   :  { %v5453_v8 = vpop.xlane.xlu0 %5452 }
0x1292   :  { %v5463_v28 = vmul.f32 %v5453_v8, %v11104_v45 }
0x1294   :  { %v5467_v38 = vadd.f32 1e-05, %v5463_v28  ;;  %v7008_v28 = vld [vmem:[%s11838_s18] ss:$0 sm:$0xff] }
0x1296   :  { %7333 = vrsqrt.f32 %v5467_v38  ;;  %vm5477_vm14 = vweird.f32 %v5467_v38 }
0x1299   :  { %v5456_v49 = vpop.xlane.xlu1 %5455 }
0x129a   :  { %v5464_v56 = vmul.f32 %v5456_v49, %v11104_v45 }
0x129c   :  { %v7334_v9 = vpop.eup %7333  ;;  %v5468_v21 = vadd.f32 1e-05, %v5464_v56 }
0x129d   :  { %v5472_v53 = vmul.f32 %v7334_v9, %v5467_v38  ;;  %vm5478_vm13 = vweird.f32 %v7334_v9 }
0x129e   :  { %7335 = vrsqrt.f32 %v5468_v21  ;;  %vm5479_vm1 = vmor %vm5477_vm14, %vm5478_vm13  ;;  %vm5487_vm2 = vweird.f32 %v5468_v21 }
0x129f   :  { %v5473_v7 = vmul.f32 %v7334_v9, %v5472_v53 }
0x12a1   :  { %v5474_v42 = vmul.f32 0.5, %v5473_v7  ;;  %v5459_v46 = vpop.xlane.xlu2 %5458 }
0x12a2   :  { %v5465_v18 = vmul.f32 %v5459_v46, %v11104_v45 }
0x12a3   :  { %v5475_v12 = vsub.f32 1.5, %v5474_v42 }
0x12a4   :  { %v7336_v15 = vpop.eup %7335  ;;  %v5469_v1 = vadd.f32 1e-05, %v5465_v18 }
0x12a5   :  { %v5476_v23 = vmul.f32 %v7334_v9, %v5475_v12  ;;  %v5482_v13 = vmul.f32 %v7336_v15, %v5468_v21  ;;  %vm5488_vm0 = vweird.f32 %v7336_v15 }
0x12a6   :  { %7337 = vrsqrt.f32 %v5469_v1  ;;  %vm5489_vm3 = vmor %vm5487_vm2, %vm5488_vm0  ;;  %vm5497_vm5 = vweird.f32 %v5469_v1 }
0x12a7   :  { %v5480_v27 = vsel %vm5479_vm1, %v7334_v9, %v5476_v23  ;;  %v5483_v22 = vmul.f32 %v7336_v15, %v5482_v13 }
0x12a8   :  { %v5511_v34 = vmul.f32 %v5480_v27, %v5443_v32 }
0x12a9   :  { %v5484_v48 = vmul.f32 0.5, %v5483_v22  ;;  %v5462_v29 = vpop.xlane.xlu0 %5461 }
0x12aa   :  { %v5516_v57 = vmul.f32 %v7006_v30, %v5511_v34  ;;  %v5466_v2 = vmul.f32 %v5462_v29, %v11104_v45 }
0x12ab   :  { %v5485_v26 = vsub.f32 1.5, %v5484_v48 }
0x12ac   :  { %v7338_v17 = vpop.eup %7337  ;;  %v5521_v11 = vadd.f32 %v7007_v61, %v5516_v57  ;;  %v5470_v50 = vadd.f32 1e-05, %v5466_v2 }
0x12ad   :  { %v5486_v20 = vmul.f32 %v7336_v15, %v5485_v26  ;;  %v5492_v47 = vmul.f32 %v7338_v17, %v5469_v1  ;;  %vm5498_vm4 = vweird.f32 %v7338_v17 }
0x12ae   :  { %7339 = vrsqrt.f32 %v5470_v50  ;;  %6884 = vmatmul.msk.f32.vlgmr.msra.gmra.mxu0 %vm2547_vm11, %v5521_v11  ;;  %vm5499_vm6 = vmor %vm5497_vm5, %vm5498_vm4  ;;  %vm5507_vm8 = vweird.f32 %v5470_v50 }
0x12af   :  { %v5490_v37 = vsel %vm5489_vm3, %v7336_v15, %v5486_v20  ;;  %v5493_v60 = vmul.f32 %v7338_v17, %v5492_v47 }
0x12b0   :  { %v5512_v43 = vmul.f32 %v5490_v37, %v11204_v36 }
0x12b1   :  { %v5494_v39 = vmul.f32 0.5, %v5493_v60 }
0x12b2   :  { %v5517_v33 = vmul.f32 %v7006_v30, %v5512_v43 }
0x12b3   :  { %v5495_v32 = vsub.f32 1.5, %v5494_v39 }
0x12b4   :  { %v7340_v55 = vpop.eup %7339  ;;  %v5522_v10 = vadd.f32 %v7007_v61, %v5517_v33 }
0x12b5   :  { %v5496_v5 = vmul.f32 %v7338_v17, %v5495_v32  ;;  %v5502_v24 = vmul.f32 %v7340_v55, %v5470_v50  ;;  %vm5508_vm7 = vweird.f32 %v7340_v55 }
0x12b6   :  { %6885 = vmatmul.msk.f32.gmra.mxu0 %vm2547_vm11, %v5522_v10  ;;  %vm5509_vm9 = vmor %vm5507_vm8, %vm5508_vm7 }
0x12b7   :  { %v5500_v25 = vsel %vm5499_vm6, %v7338_v17, %v5496_v5  ;;  %v5503_v41 = vmul.f32 %v7340_v55, %v5502_v24 }
0x12b8   :  { %v5513_v51 = vmul.f32 %v5500_v25, %v11211_v52 }
0x12b9   :  { %v5504_v44 = vmul.f32 0.5, %v5503_v41 }
0x12ba   :  { %v5518_v14 = vmul.f32 %v7006_v30, %v5513_v51 }
0x12bb   :  { %v5505_v36 = vsub.f32 1.5, %v5504_v44 }
0x12bc   :  { %v5523_v3 = vadd.f32 %v7007_v61, %v5518_v14 }
0x12bd   :  { %v5506_v58 = vmul.f32 %v7340_v55, %v5505_v36 }
0x12be   :  { %6886 = vmatmul.msk.f32.gmra.mxu0 %vm2547_vm11, %v5523_v3 }
0x12bf   :  { %v5510_v31 = vsel %vm5509_vm9, %v7340_v55, %v5506_v58  ;;  %v5741_v58 = vld [vmem:[%s11839_s23 + $0x38] sm:$0xff] }
0x12c0   :  { %v5514_v62 = vmul.f32 %v5510_v31, %v11218_v54  ;;  %5766 = vmatpush.msra.mxu1 %v5741_v58 }
0x12c2   :  { %v5519_v35 = vmul.f32 %v7006_v30, %v5514_v62 }
0x12c4   :  { %v5524_v8 = vadd.f32 %v7007_v61, %v5519_v35 }
0x12c6   :  { %6887 = vmatmul.msk.f32.gmra.mxu0 %vm2547_vm11, %v5524_v8 }
0x132b   :  { %v5562_v38 = vpop.f32.mrf.mxu0 }
0x132c   :  { %v11241_v52 = vadd.f32 %v7008_v28, %v5562_v38 }
0x132e   :  { %v11244_v59 = vmul.f32 0.70710677, %v11241_v52 }
0x1330   :  { %v5582_v40 = vand.u32 2147483647, %v11244_v59 }
0x1332   :  { %v5586_v49 = vmul.f32 0.3275911, %v5582_v40  ;;  %v5690_v26 = vsub.f32 0.0, %v5582_v40 }
0x1333   :  { %v5565_v56 = vpop.f32.mrf.mxu0 }
0x1334   :  { %v5590_v9 = vadd.f32 1.0, %v5586_v49  ;;  %v11247_v21 = vadd.f32 %v7008_v28, %v5565_v56  ;;  %v5694_v60 = vmul.f32 %v5690_v26, %v5582_v40  ;;  %v5740_v40 = vld [vmem:[%s11839_s23 + $0x30] sm:$0xff] }
0x1335   :  { %5767 = vmatpush.msra.mxu1 %v5740_v40 }
0x1336   :  { %7341 = vrcp.f32 %v5590_v9  ;;  %v11250_v54 = vmul.f32 0.70710677, %v11247_v21  ;;  %v5605_v1 = vand.u32 2147483648, %v5590_v9  ;;  %v5603_v30 = vand.u32 2147483647, %v5590_v9 }
0x1337   :  { %vm5599_vm12 = vweird.f32 %v5590_v9  ;;  %v5698_v14 = vmul.f32 1.442695, %v5694_v60 }
0x1338   :  { %v5583_v53 = vand.u32 2147483647, %v11250_v54  ;;  %v5606_v34 = vor.u32 1.1754944e-38, %v5605_v1  ;;  %vm5604_vm14 = vcmp.eq.f32.partialorder %v5603_v30, 8.507059e+37 }
0x133a   :  { %v5587_v7 = vmul.f32 0.3275911, %v5583_v53  ;;  %v5691_v24 = vsub.f32 0.0, %v5583_v53 }
0x133b   :  { %v5568_v6 = vpop.f32.mrf.mxu0 }
0x133c   :  { %v7342_v4 = vpop.eup %7341  ;;  %v11253_v42 = vadd.f32 %v7008_v28, %v5568_v6  ;;  %v5591_v18 = vadd.f32 1.0, %v5587_v7  ;;  %v5739_v6 = vld [vmem:[%s11839_s23 + $0x28] sm:$0xff] }
0x133d   :  { %v5595_v46 = vmul.f32 %v7342_v4, %v5590_v9  ;;  %vm5600_vm10 = vweird.f32 %v7342_v4  ;;  %5768 = vmatpush.msra.mxu1 %v5739_v6 }
0x133e   :  { %v11256_v12 = vmul.f32 0.70710677, %v11253_v42  ;;  %7343 = vrcp.f32 %v5591_v18  ;;  %vm5601_vm13 = vmor %vm5599_vm12, %vm5600_vm10  ;;  %v5620_v43 = vand.u32 2147483648, %v5591_v18  ;;  %v5618_v33 = vand.u32 2147483647, %v5591_v18 }
0x133f   :  { %v5596_v15 = vsub.f32 1.0, %v5595_v46  ;;  %vm5614_vm0 = vweird.f32 %v5591_v18  ;;  %vm5714_vm10 = vcmp.lt.f32.partialorder %v11244_v59, 0.0 }
0x1340   :  { %v11259_v23 = vand.u32 2147483647, %v11256_v12  ;;  %v5621_v51 = vor.u32 1.1754944e-38, %v5620_v43  ;;  %vm5619_vm3 = vcmp.eq.f32.partialorder %v5618_v33, 8.507059e+37 }
0x1341   :  { %v5597_v13 = vmul.f32 %v7342_v4, %v5596_v15  ;;  %v5738_v15 = vld [vmem:[%s11839_s23 + $0x20] sm:$0xff] }
0x1342   :  { %v5588_v27 = vmul.f32 0.3275911, %v11259_v23  ;;  %5769 = vmatpush.msra.mxu1 %v5738_v15 }
0x1343   :  { %v5598_v22 = vadd.f32 %v7342_v4, %v5597_v13  ;;  %v5571_v61 = vpop.f32.mrf.mxu0 }
0x1344   :  { %v11262_v48 = vadd.f32 1.0, %v5588_v27  ;;  %v11264_v29 = vadd.f32 %v7008_v28, %v5571_v61  ;;  %v7344_v57 = vpop.eup %7343  ;;  %v5695_v28 = vmul.f32 %v5691_v24, %v5583_v53 }
0x1345   :  { %v5602_v2 = vsel %vm5601_vm13, %v7342_v4, %v5598_v22  ;;  %v5610_v11 = vmul.f32 %v7344_v57, %v5591_v18  ;;  %vm5615_vm1 = vweird.f32 %v7344_v57 }
0x1346   :  { %v11266_v17 = vsel %vm5604_vm14, %v5606_v34, %v5602_v2  ;;  %7345 = vrcp.f32 %v11262_v48  ;;  %v11271_v47 = vmul.f32 0.70710677, %v11264_v29  ;;  %vm5616_vm2 = vmor %vm5614_vm0, %vm5615_vm1  ;;  %v5635_v38 = vand.u32 2147483648, %v11262_v48 }
0x1347   :  { %v5654_v50 = vmul.f32 1.0614054, %v11266_v17  ;;  %v5611_v20 = vsub.f32 1.0, %v5610_v11  ;;  %v5633_v9 = vand.u32 2147483647, %v11262_v48  ;;  %vm5629_vm5 = vweird.f32 %v11262_v48 }
0x1348   :  { %v11274_v32 = vand.u32 2147483647, %v11271_v47  ;;  %v5636_v18 = vor.u32 1.1754944e-38, %v5635_v38  ;;  %v5700_v13 = vmul.f32 1.442695, %v5695_v28  ;;  %v5692_v34 = vsub.f32 0.0, %v11259_v23 }
0x1349   :  { %v5658_v37 = vadd.f32 -1.4531521, %v5654_v50  ;;  %v5612_v39 = vmul.f32 %v7344_v57, %v5611_v20  ;;  %vm5634_vm7 = vcmp.eq.f32.partialorder %v5633_v9, 8.507059e+37  ;;  %v5736_v20 = vld [vmem:[%s11839_s23 + $0x10] sm:$0xff]  ;;  %vm5715_vm14 = vcmp.lt.f32.partialorder %v11250_v54, 0.0 }
0x134a   :  { %v5589_v25 = vmul.f32 0.3275911, %v11274_v32  ;;  %v5696_v33 = vmul.f32 %v5692_v34, %v11259_v23  ;;  %v5693_v9 = vsub.f32 0.0, %v11274_v32  ;;  %vm5716_vm1 = vcmp.lt.f32.partialorder %v11256_v12, 0.0 }
0x134b   :  { %v5662_v55 = vmul.f32 %v5658_v37, %v11266_v17  ;;  %v5613_v5 = vadd.f32 %v7344_v57, %v5612_v39  ;;  %vm5717_vm0 = vcmp.lt.f32.partialorder %v11271_v47, 0.0 }
0x134c   :  { %v7346_v10 = vpop.eup %7345  ;;  %v11279_v3 = vadd.f32 1.0, %v5589_v25 }
0x134d   :  { %v5666_v41 = vadd.f32 1.4214138, %v5662_v55  ;;  %v5625_v44 = vmul.f32 %v7346_v10, %v11262_v48  ;;  %v5617_v36 = vsel %vm5616_vm2, %v7344_v57, %v5613_v5  ;;  %vm5630_vm4 = vweird.f32 %v7346_v10  ;;  %v5737_v57 = vld [vmem:[%s11839_s23 + $0x18] sm:$0xff] }
0x134e   :  { %v11283_v62 = vsel %vm5619_vm3, %v5621_v51, %v5617_v36  ;;  %7347 = vrcp.f32 %v11279_v3  ;;  %vm5631_vm6 = vmor %vm5629_vm5, %vm5630_vm4  ;;  %5770 = vmatpush.msra.mxu1 %v5737_v57  ;;  %v5650_v55 = vand.u32 2147483648, %v11279_v3  ;;  %vm5644_vm9 = vweird.f32 %v11279_v3 }
0x134f   :  { %v5670_v31 = vmul.f32 %v5666_v41, %v11266_v17  ;;  %v5626_v35 = vsub.f32 1.0, %v5625_v44  ;;  %v5655_v8 = vmul.f32 1.0614054, %v11283_v62  ;;  %7349 = vpow2.f32 %v5698_v14  ;;  %v5734_v44 = vld [vmem:[%s11839_s23] sm:$0xff] }
0x1350   :  { %7351 = vpow2.f32 %v5700_v13  ;;  %5771 = vmatpush.msra.mxu1 %v5736_v20  ;;  %v5574_v41 = vmul.f32 0.5, %v11241_v52  ;;  %v5575_v57 = vmul.f32 0.5, %v11247_v21 }
0x1351   :  { %v5674_v49 = vadd.f32 -0.28449672, %v5670_v31  ;;  %v5627_v56 = vmul.f32 %v7346_v10, %v5626_v35  ;;  %v5659_v7 = vadd.f32 -1.4531521, %v5655_v8  ;;  %v5702_v31 = vmul.f32 1.442695, %v5696_v33 }
0x1352   :  { %v5651_v35 = vor.u32 1.1754944e-38, %v5650_v55 }
0x1353   :  { %v5678_v4 = vmul.f32 %v5674_v49, %v11266_v17  ;;  %v5628_v46 = vadd.f32 %v7346_v10, %v5627_v56  ;;  %v5663_v53 = vmul.f32 %v5659_v7, %v11283_v62  ;;  %7353 = vpow2.f32 %v5702_v31 }
0x1354   :  { %v7348_v27 = vpop.eup %7347 }
0x1355   :  { %v5682_v1 = vadd.f32 0.2548296, %v5678_v4  ;;  %v5632_v30 = vsel %vm5631_vm6, %v7346_v10, %v5628_v46  ;;  %v5667_v22 = vadd.f32 1.4214138, %v5663_v53  ;;  %v5640_v26 = vmul.f32 %v7348_v27, %v11279_v3  ;;  %v7350_v11 = vpop.eup %7349  ;;  %v5735_v10 = vld [vmem:[%s11839_s23 + $0x8] sm:$0xff] }
0x1356   :  { %v5637_v61 = vsel %vm5634_vm7, %v5636_v18, %v5632_v30  ;;  %vm5645_vm8 = vweird.f32 %v7348_v27  ;;  %5772 = vmatpush.msra.mxu1 %v5735_v10  ;;  %v7352_v8 = vpop.eup %7351  ;;  %v5697_v18 = vmul.f32 %v5693_v9, %v11274_v32 }
0x1357   :  { %v5686_v48 = vmul.f32 %v5682_v1, %v11266_v17  ;;  %v5656_v2 = vmul.f32 1.0614054, %v5637_v61  ;;  %v5671_v50 = vmul.f32 %v5667_v22, %v11283_v62  ;;  %v5641_v43 = vsub.f32 1.0, %v5640_v26  ;;  %vm5646_vm12 = vmor %vm5644_vm9, %vm5645_vm8 }
0x1358   :  { %v5648_v17 = vand.u32 2147483647, %v11279_v3  ;;  %5773 = vmatpush.msra.mxu1 %v5734_v44  ;;  %v5704_v34 = vmul.f32 1.442695, %v5697_v18 }
0x1359   :  { %v5706_v37 = vmul.f32 %v7350_v11, %v5686_v48  ;;  %v5660_v60 = vadd.f32 -1.4531521, %v5656_v2  ;;  %v5675_v39 = vadd.f32 -0.28449672, %v5671_v50  ;;  %v5642_v25 = vmul.f32 %v7348_v27, %v5641_v43 }
0x135a   :  { %vm5649_vm13 = vcmp.eq.f32.partialorder %v5648_v17, 8.507059e+37  ;;  %7355 = vpow2.f32 %v5704_v34 }
0x135b   :  { %v5710_v5 = vsub.f32 1.0, %v5706_v37  ;;  %v5664_v24 = vmul.f32 %v5660_v60, %v5637_v61  ;;  %v5679_v51 = vmul.f32 %v5675_v39, %v11283_v62  ;;  %v5643_v58 = vadd.f32 %v7348_v27, %v5642_v25 }
0x135c   :  { %v5576_v60 = vmul.f32 0.5, %v11253_v42 }
0x135d   :  { %v5718_v14 = vsub.f32 0.0, %v5710_v5  ;;  %v5668_v36 = vadd.f32 1.4214138, %v5664_v24  ;;  %v5683_v23 = vadd.f32 0.2548296, %v5679_v51  ;;  %v5647_v40 = vsel %vm5646_vm12, %v7348_v27, %v5643_v58  ;;  %v7354_v27 = vpop.eup %7353 }
0x135e   :  { %v5652_v56 = vsel %vm5649_vm13, %v5651_v35, %v5647_v40  ;;  %v5577_v24 = vmul.f32 0.5, %v11264_v29 }
0x135f   :  { %v5722_v28 = vsel %vm5714_vm10, %v5718_v14, %v5710_v5  ;;  %v5672_v38 = vmul.f32 %v5668_v36, %v5637_v61  ;;  %v5687_v49 = vmul.f32 %v5683_v23, %v11283_v62  ;;  %v5657_v3 = vmul.f32 1.0614054, %v5652_v56 }
0x1360   :  { %v5726_v52 = vadd.f32 1.0, %v5722_v28  ;;  %v7356_v39 = vpop.eup %7355 }
0x1361   :  { %v5676_v7 = vadd.f32 -0.28449672, %v5672_v38  ;;  %v5707_v4 = vmul.f32 %v7352_v8, %v5687_v49  ;;  %v5661_v46 = vadd.f32 -1.4531521, %v5657_v3 }
0x1362   :  { %v5730_v6 = vmul.f32 %v5726_v52, %v5574_v41  ;;  %v7009_v41 = vld [vmem:[%s11840_s22] ss:$0 sm:$0xff] }
0x1363   :  { %v5680_v59 = vmul.f32 %v5676_v7, %v5637_v61  ;;  %v5711_v53 = vsub.f32 1.0, %v5707_v4  ;;  %v5665_v1 = vmul.f32 %v5661_v46, %v5652_v56 }
0x1364   :  { %6888 = vmatmul.msk.f32.vlgmr.msra.gmra.mxu1 %vm4932_vm15, %v5730_v6 }
0x1365   :  { %v5684_v15 = vadd.f32 0.2548296, %v5680_v59  ;;  %v5719_v13 = vsub.f32 0.0, %v5711_v53  ;;  %v5669_v30 = vadd.f32 1.4214138, %v5665_v1 }
0x1367   :  { %v5688_v62 = vmul.f32 %v5684_v15, %v5637_v61  ;;  %v5723_v22 = vsel %vm5715_vm14, %v5719_v13, %v5711_v53  ;;  %v5673_v26 = vmul.f32 %v5669_v30, %v5652_v56 }
0x1368   :  { %v5727_v48 = vadd.f32 1.0, %v5723_v22 }
0x1369   :  { %v5708_v2 = vmul.f32 %v7354_v27, %v5688_v62  ;;  %v5677_v32 = vadd.f32 -0.28449672, %v5673_v26 }
0x136a   :  { %v5731_v11 = vmul.f32 %v5727_v48, %v5575_v57 }
0x136b   :  { %v5712_v50 = vsub.f32 1.0, %v5708_v2  ;;  %v5681_v37 = vmul.f32 %v5677_v32, %v5652_v56 }
0x136c   :  { %6889 = vmatmul.msk.f32.gmra.mxu1 %vm4932_vm15, %v5731_v11 }
0x136d   :  { %v5720_v20 = vsub.f32 0.0, %v5712_v50  ;;  %v5685_v61 = vadd.f32 0.2548296, %v5681_v37 }
0x136f   :  { %v5724_v54 = vsel %vm5716_vm1, %v5720_v20, %v5712_v50  ;;  %v5689_v21 = vmul.f32 %v5685_v61, %v5652_v56 }
0x1370   :  { %v5728_v43 = vadd.f32 1.0, %v5724_v54 }
0x1371   :  { %v5709_v17 = vmul.f32 %v7356_v39, %v5689_v21 }
0x1372   :  { %v5732_v33 = vmul.f32 %v5728_v43, %v5576_v60 }
0x1373   :  { %v5713_v55 = vsub.f32 1.0, %v5709_v17 }
0x1374   :  { %6890 = vmatmul.msk.f32.gmra.mxu1 %vm4932_vm15, %v5732_v33 }
0x1375   :  { %v5721_v10 = vsub.f32 0.0, %v5713_v55 }
0x1377   :  { %v5725_v5 = vsel %vm5717_vm0, %v5721_v10, %v5713_v55 }
0x1378   :  { %v5729_v12 = vadd.f32 1.0, %v5725_v5 }
0x137a   :  { %v5733_v25 = vmul.f32 %v5729_v12, %v5577_v24 }
0x137c   :  { %6891 = vmatmul.msk.f32.gmra.mxu1 %vm4932_vm15, %v5733_v25 }
0x13e1   :  { %v5775_v42 = vpop.f32.mrf.mxu1 }
0x13e9   :  { %v5778_v51 = vpop.f32.mrf.mxu1 }
0x13ea   :  { %v5779_v44 = vadd.f32 %v7009_v41, %v5778_v51 }
0x13ec   :  { %v11325_v14 = vadd.f32 %v5779_v44, %v11184_v0  ;;  %v5776_v0 = vadd.f32 %v7009_v41, %v5775_v42 }
0x13ee   :  { %v5796_v36 = vsel %vm2547_vm11, %v11325_v14, 0.0  ;;  %v11340_v38 = vadd.f32 %v5776_v0, %v11178_v19 }
0x13ef   :  { %5797 = vadd.xlane.f32.xlu0 %v5796_v36 }
0x13f1   :  { %v5781_v58 = vpop.f32.mrf.mxu1 }
0x13f2   :  { %v5782_v47 = vadd.f32 %v7009_v41, %v5781_v58 }
0x13f4   :  { %v11330_v23 = vadd.f32 %v5782_v47, %v11190_v63  ;;  %v5793_v63 = vsel %vm2547_vm11, %v11340_v38, 0.0 }
0x13f6   :  { %v5799_v29 = vsel %vm2547_vm11, %v11330_v23, 0.0 }
0x13f7   :  { %5800 = vadd.xlane.f32.xlu2 %v5799_v29  ;;  %v7010_v29 = vld [vmem:[%s11841_s26] ss:$0 sm:$0xff] }
0x13f9   :  { %v5784_v31 = vpop.f32.mrf.mxu1 }
0x13fa   :  { %v5785_v35 = vadd.f32 %v7009_v41, %v5784_v31 }
0x13fc   :  { %v11335_v8 = vadd.f32 %v5785_v35, %v11195_v16 }
0x13fe   :  { %v5802_v28 = vsel %vm2547_vm11, %v11335_v8, 0.0 }
0x13ff   :  { %5803 = vadd.xlane.f32.xlu1 %v5802_v28 }
0x1407   :  { %5794 = vadd.xlane.f32.xlu1 %v5793_v63 }
0x1462   :  { %v5798_v40 = vpop.xlane.xlu0 %5797 }
0x1463   :  { %v5806_v52 = vmul.f32 %v5798_v40, %v11104_v45 }
0x1465   :  { %v11346_v49 = vsub.f32 %v11325_v14, %v5806_v52 }
0x1467   :  { %v5814_v16 = vmul.f32 %v11346_v49, %v11346_v49 }
0x1469   :  { %v5820_v56 = vsel %vm2547_vm11, %v5814_v16, 0.0 }
0x146a   :  { %5821 = vadd.xlane.f32.xlu1 %v5820_v56  ;;  %v5801_v9 = vpop.xlane.xlu2 %5800  ;;  %v7011_v56 = vld [vmem:[%s11841_s26 + $0x1] ss:$0 sm:$0xff] }
0x146b   :  { %v5807_v19 = vmul.f32 %v5801_v9, %v11104_v45 }
0x146d   :  { %v5811_v7 = vsub.f32 %v11330_v23, %v5807_v19 }
0x146f   :  { %v5815_v3 = vmul.f32 %v5811_v7, %v5811_v7 }
0x1471   :  { %v5823_v6 = vsel %vm2547_vm11, %v5815_v3, 0.0  ;;  %v7012_v3 = vld [vmem:[%s11842_s1] ss:$0 sm:$0xff] }
0x1472   :  { %5824 = vadd.xlane.f32.xlu0 %v5823_v6  ;;  %v5804_v4 = vpop.xlane.xlu1 %5803  ;;  %v7013_v6 = vld [vmem:[%s11842_s1 + $0x1] ss:$0 sm:$0xff] }
0x1473   :  { %v5808_v59 = vmul.f32 %v5804_v4, %v11104_v45  ;;  %v7014_v4 = vld [vmem:[%s11842_s1 + $0x2] ss:$0 sm:$0xff] }
0x1475   :  { %v11356_v46 = vsub.f32 %v11335_v8, %v5808_v59  ;;  %v7015_v59 = vld [vmem:[%s11842_s1 + $0x3] ss:$0 sm:$0xff] }
0x1477   :  { %v5816_v53 = vmul.f32 %v11356_v46, %v11356_v46 }
0x1479   :  { %v5826_v18 = vsel %vm2547_vm11, %v5816_v53, 0.0 }
0x147a   :  { %v5795_v15 = vpop.xlane.xlu1 %5794  ;;  %5827 = vadd.xlane.f32.xlu2 %v5826_v18 }
0x147b   :  { %v5805_v1 = vmul.f32 %v5795_v15, %v11104_v45 }
0x147d   :  { %v11363_v13 = vsub.f32 %v11340_v38, %v5805_v1 }
0x147f   :  { %v5813_v62 = vmul.f32 %v11363_v13, %v11363_v13 }
0x1481   :  { %v5817_v30 = vsel %vm2547_vm11, %v5813_v62, 0.0 }
0x1482   :  { %5818 = vadd.xlane.f32.xlu2 %v5817_v30 }
0x14dd   :  { %v5822_v27 = vpop.xlane.xlu1 %5821 }
0x14de   :  { %v5830_v22 = vmul.f32 %v5822_v27, %v11104_v45 }
0x14e0   :  { %v5834_v34 = vadd.f32 1e-05, %v5830_v22 }
0x14e2   :  { %7357 = vrsqrt.f32 %v5834_v34  ;;  %vm5853_vm5 = vweird.f32 %v5834_v34 }
0x14e5   :  { %v5825_v57 = vpop.xlane.xlu0 %5824 }
0x14e6   :  { %v5831_v48 = vmul.f32 %v5825_v57, %v11104_v45 }
0x14e8   :  { %v7358_v2 = vpop.eup %7357  ;;  %v5835_v26 = vadd.f32 1e-05, %v5831_v48 }
0x14e9   :  { %v5848_v11 = vmul.f32 %v7358_v2, %v5834_v34  ;;  %vm5854_vm3 = vweird.f32 %v7358_v2 }
0x14ea   :  { %7359 = vrsqrt.f32 %v5835_v26  ;;  %vm5863_vm4 = vweird.f32 %v5835_v26  ;;  %vm5855_vm7 = vmor %vm5853_vm5, %vm5854_vm3 }
0x14eb   :  { %v5849_v32 = vmul.f32 %v7358_v2, %v5848_v11 }
0x14ed   :  { %v5828_v50 = vpop.xlane.xlu2 %5827  ;;  %v5850_v60 = vmul.f32 0.5, %v5849_v32 }
0x14ee   :  { %v5832_v20 = vmul.f32 %v5828_v50, %v11104_v45 }
0x14ef   :  { %v5851_v33 = vsub.f32 1.5, %v5850_v60 }
0x14f0   :  { %v7360_v37 = vpop.eup %7359  ;;  %v5836_v61 = vadd.f32 1e-05, %v5832_v20 }
0x14f1   :  { %v5858_v54 = vmul.f32 %v7360_v37, %v5835_v26  ;;  %vm5864_vm2 = vweird.f32 %v7360_v37  ;;  %v5852_v25 = vmul.f32 %v7358_v2, %v5851_v33  ;;  %v6912_v33 = vld [vmem:[%s11843_s28 + $0x60] sm:$0xff] }
0x14f2   :  { %7361 = vrsqrt.f32 %v5836_v61  ;;  %vm5865_vm6 = vmor %vm5863_vm4, %vm5864_vm2  ;;  %vm5873_vm9 = vweird.f32 %v5836_v61 }
0x14f3   :  { %v5859_v43 = vmul.f32 %v7360_v37, %v5858_v54  ;;  %v5856_v44 = vsel %vm5855_vm7, %v7358_v2, %v5852_v25  ;;  %v6906_v25 = vld [vmem:[%s11843_s28 + $0x50] sm:$0xff] }
0x14f4   :  { %v5878_v31 = vmul.f32 %v5856_v44, %v11346_v49  ;;  %v6907_v44 = vld [vmem:[%s11843_s28 + $0x58] sm:$0xff] }
0x14f5   :  { %v5860_v21 = vmul.f32 0.5, %v5859_v43  ;;  %v5819_v39 = vpop.xlane.xlu2 %5818  ;;  %v5895_v43 = vld [vmem:[%s11843_s28] sm:$0xff] }
0x14f6   :  { %v5829_v55 = vmul.f32 %v5819_v39, %v11104_v45  ;;  %v5883_v16 = vmul.f32 %v7010_v29, %v5878_v31  ;;  %v6904_v39 = vld [vmem:[%s11843_s28 + $0x40] sm:$0xff] }
0x14f7   :  { %v5861_v17 = vsub.f32 1.5, %v5860_v21  ;;  %v6896_v21 = vld [vmem:[%s11843_s28 + $0x20] sm:$0xff] }
0x14f8   :  { %v7362_v10 = vpop.eup %7361  ;;  %v5833_v5 = vadd.f32 1e-05, %v5829_v55  ;;  %v5888_v15 = vadd.f32 %v7011_v56, %v5883_v16  ;;  %v6897_v55 = vld [vmem:[%s11843_s28 + $0x28] sm:$0xff] }
0x14f9   :  { %v5862_v24 = vmul.f32 %v7360_v37, %v5861_v17  ;;  %v5868_v12 = vmul.f32 %v7362_v10, %v5836_v61  ;;  %vm5874_vm8 = vweird.f32 %v7362_v10  ;;  %v5896_v17 = vld [vmem:[%s11843_s28 + $0x8] sm:$0xff] }
0x14fa   :  { %7363 = vrsqrt.f32 %v5833_v5  ;;  %vm5875_vm10 = vmor %vm5873_vm9, %vm5874_vm8  ;;  %vm5843_vm13 = vweird.f32 %v5833_v5  ;;  %v5902_v11 = vmul.f32 %v7012_v3, %v5888_v15  ;;  %v5958_v50 = vmul.f32 %v7013_v6, %v5888_v15 }
0x14fb   :  { %v5869_v42 = vmul.f32 %v7362_v10, %v5868_v12  ;;  %v5866_v41 = vsel %vm5865_vm6, %v7360_v37, %v5862_v24  ;;  %v6014_v32 = vmul.f32 %v7014_v4, %v5888_v15  ;;  %v5897_v24 = vld [vmem:[%s11843_s28 + $0x10] sm:$0xff] }
0x14fc   :  { %v5879_v47 = vmul.f32 %v5866_v41, %v5811_v7  ;;  %v6898_v12 = vld [vmem:[%s11843_s28 + $0x30] sm:$0xff]  ;;  %v5898_v41 = vld [vmem:[%s11843_s28 + $0x18] sm:$0xff] }
0x14fd   :  { %v5870_v51 = vmul.f32 0.5, %v5869_v42  ;;  %v6914_v42 = vld [vmem:[%s11843_s28 + $0x70] sm:$0xff] }
0x14fe   :  { %v5884_v40 = vmul.f32 %v7010_v29, %v5879_v47 }
0x14ff   :  { %v5871_v36 = vsub.f32 1.5, %v5870_v51  ;;  %v6899_v51 = vld [vmem:[%s11843_s28 + $0x38] sm:$0xff] }
0x1500   :  { %v7364_v58 = vpop.eup %7363  ;;  %v5889_v53 = vadd.f32 %v7011_v56, %v5884_v40 }
0x1501   :  { %v5872_v35 = vmul.f32 %v7362_v10, %v5871_v36  ;;  %v5838_v0 = vmul.f32 %v7364_v58, %v5833_v5  ;;  %vm5844_vm12 = vweird.f32 %v7364_v58  ;;  %v6913_v5 = vld [vmem:[%s11843_s28 + $0x68] sm:$0xff]  ;;  %v6915_v36 = vld [vmem:[%s11843_s28 + $0x78] sm:$0xff] }
0x1502   :  { %vm5845_vm14 = vmor %vm5843_vm13, %vm5844_vm12  ;;  %v5903_v34 = vmul.f32 %v7012_v3, %v5889_v53  ;;  %v5959_v57 = vmul.f32 %v7013_v6, %v5889_v53  ;;  %v6015_v48 = vmul.f32 %v7014_v4, %v5889_v53  ;;  %v6071_v2 = vmul.f32 %v7015_v59, %v5889_v53 }
0x1503   :  { %v5876_v28 = vsel %vm5875_vm10, %v7362_v10, %v5872_v35  ;;  %v5839_v63 = vmul.f32 %v7364_v58, %v5838_v0  ;;  %v6905_v10 = vld [vmem:[%s11843_s28 + $0x48] sm:$0xff] }
0x1504   :  { %v5880_v52 = vmul.f32 %v5876_v28, %v11356_v46 }
0x1505   :  { %v5840_v9 = vmul.f32 0.5, %v5839_v63 }
0x1506   :  { %v5885_v19 = vmul.f32 %v7010_v29, %v5880_v52  ;;  %v5892_v52 = vld [vmem:[%s11844_s2 + $0x8] sm:$0xff] }
0x1507   :  { %v5841_v7 = vsub.f32 1.5, %v5840_v9 }
0x1508   :  { %v5890_v49 = vadd.f32 %v7011_v56, %v5885_v19 }
0x1509   :  { %v5842_v18 = vmul.f32 %v7364_v58, %v5841_v7 }
0x150a   :  { %v5904_v1 = vmul.f32 %v7012_v3, %v5890_v49  ;;  %v5960_v62 = vmul.f32 %v7013_v6, %v5890_v49  ;;  %v6016_v30 = vmul.f32 %v7014_v4, %v5890_v49  ;;  %v6072_v46 = vmul.f32 %v7015_v59, %v5890_v49 }
0x150b   :  { %v5846_v27 = vsel %vm5845_vm14, %v7364_v58, %v5842_v18 }
0x150c   :  { %v5877_v22 = vmul.f32 %v5846_v27, %v11363_v13  ;;  %5929 = vmatpush.msra.mxu2 %v5904_v1  ;;  %5985 = vmatpush.msra.mxu3 %v5960_v62  ;;  %v6070_v13 = vmul.f32 %v7015_v59, %v5888_v15 }
0x150d   :  { %6041 = vmatpush.msrb.mxu0 %v6016_v30  ;;  %6097 = vmatpush.msrb.mxu1 %v6072_v46 }
0x150e   :  { %v5882_v26 = vmul.f32 %v7010_v29, %v5877_v22  ;;  %5930 = vmatpush.msra.mxu2 %v5903_v34  ;;  %5986 = vmatpush.msra.mxu3 %v5959_v57  ;;  %v5891_v29 = vld [vmem:[%s11844_s2] sm:$0xff]  ;;  %v5894_v34 = vld [vmem:[%s11844_s2 + $0x18] sm:$0xff] }
0x150f   :  { %6042 = vmatpush.msrb.mxu0 %v6015_v48  ;;  %6098 = vmatpush.msrb.mxu1 %v6071_v2 }
0x1510   :  { %5931 = vmatpush.msra.mxu2 %v5902_v11  ;;  %5987 = vmatpush.msra.mxu3 %v5958_v50  ;;  %v5887_v20 = vadd.f32 %v7011_v56, %v5882_v26 }
0x1511   :  { %6043 = vmatpush.msrb.mxu0 %v6014_v32  ;;  %6099 = vmatpush.msrb.mxu1 %v6070_v13 }
0x1512   :  { %v5901_v37 = vmul.f32 %v7012_v3, %v5887_v20  ;;  %v5957_v54 = vmul.f32 %v7013_v6, %v5887_v20  ;;  %v6013_v61 = vmul.f32 %v7014_v4, %v5887_v20  ;;  %v6069_v60 = vmul.f32 %v7015_v59, %v5887_v20  ;;  %v5893_v59 = vld [vmem:[%s11844_s2 + $0x10] sm:$0xff] }
0x1514   :  { %5932 = vmatpush.msra.mxu2 %v5901_v37  ;;  %5988 = vmatpush.msra.mxu3 %v5957_v54 }
0x1515   :  { %6044 = vmatpush.msrb.mxu0 %v6013_v61  ;;  %6100 = vmatpush.msrb.mxu1 %v6069_v60 }
0x1516   :  { %6892 = vmatmul.msk.f32.vlgmr.msra.gmra.mxu2 %vm2547_vm11, %v5895_v43  ;;  %6900 = vmatmul.msk.f32.vlgmr.msra.gmra.mxu3 %vm2547_vm11, %v6896_v21 }
0x1517   :  { %6908 = vmatmul.msk.f32.vlgmr.msrb.gmra.mxu0 %vm2547_vm11, %v6904_v39  ;;  %6916 = vmatmul.msk.f32.vlgmr.msrb.gmra.mxu1 %vm2547_vm11, %v6912_v33 }
0x151e   :  { %6893 = vmatmul.msk.f32.gmra.mxu2 %vm2547_vm11, %v5896_v17  ;;  %6901 = vmatmul.msk.f32.gmra.mxu3 %vm2547_vm11, %v6897_v55 }
0x151f   :  { %6909 = vmatmul.msk.f32.gmra.mxu0 %vm2547_vm11, %v6905_v10  ;;  %6917 = vmatmul.msk.f32.gmra.mxu1 %vm2547_vm11, %v6913_v5 }
0x1526   :  { %6894 = vmatmul.msk.f32.gmra.mxu2 %vm2547_vm11, %v5897_v24  ;;  %6902 = vmatmul.msk.f32.gmra.mxu3 %vm2547_vm11, %v6898_v12 }
0x1527   :  { %6910 = vmatmul.msk.f32.gmra.mxu0 %vm2547_vm11, %v6906_v25  ;;  %6918 = vmatmul.msk.f32.gmra.mxu1 %vm2547_vm11, %v6914_v42 }
0x152e   :  { %6895 = vmatmul.msk.f32.gmra.mxu2 %vm2547_vm11, %v5898_v41  ;;  %6903 = vmatmul.msk.f32.gmra.mxu3 %vm2547_vm11, %v6899_v51 }
0x152f   :  { %6911 = vmatmul.msk.f32.gmra.mxu0 %vm2547_vm11, %v6907_v44  ;;  %6919 = vmatmul.msk.f32.gmra.mxu1 %vm2547_vm11, %v6915_v36 }
0x1594   :  { %v6046_v58 = vpop.f32.mrf.mxu0  ;;  %v6102_v47 = vpop.f32.mrf.mxu1 }
0x1599   :  { %v5934_v31 = vpop.f32.mrf.mxu2  ;;  %v5990_v35 = vpop.f32.mrf.mxu3 }
0x159a   :  { %v5946_v0 = vadd.f32 %v5934_v31, %v5891_v29 }
0x159c   :  { %v6002_v28 = vadd.f32 %v5990_v35, %v5946_v0  ;;  %v6049_v40 = vpop.f32.mrf.mxu0  ;;  %v6105_v56 = vpop.f32.mrf.mxu1  ;;  %v6225_v35 = vld [vmem:[%s11845_s10 + $0x18] sm:$0xff]  ;;  %v6224_v0 = vld [vmem:[%s11845_s10 + $0x10] sm:$0xff] }
0x159d   :  { %6254 = vmatpush.msrb.mxu2 %v6225_v35 }
0x159e   :  { %v6058_v63 = vadd.f32 %v6046_v58, %v6002_v28 }
0x159f   :  { %6255 = vmatpush.msrb.mxu2 %v6224_v0 }
0x15a0   :  { %v6114_v16 = vadd.f32 %v6102_v47, %v6058_v63 }
0x15a1   :  { %v5937_v9 = vpop.f32.mrf.mxu2  ;;  %v5993_v19 = vpop.f32.mrf.mxu3 }
0x15a2   :  { %v11416_v7 = vadd.f32 %v6114_v16, %v11340_v38  ;;  %v5947_v3 = vadd.f32 %v5937_v9, %v5892_v52  ;;  %v6223_v9 = vld [vmem:[%s11845_s10 + $0x8] sm:$0xff] }
0x15a3   :  { %6256 = vmatpush.msrb.mxu2 %v6223_v9 }
0x15a4   :  { %v6003_v49 = vadd.f32 %v5993_v19, %v5947_v3  ;;  %v6124_v6 = vsel %vm2547_vm11, %v11416_v7, 0.0  ;;  %v6052_v18 = vpop.f32.mrf.mxu0  ;;  %v6108_v46 = vpop.f32.mrf.mxu1  ;;  %v6222_v19 = vld [vmem:[%s11845_s10] sm:$0xff] }
0x15a5   :  { %6125 = vadd.xlane.f32.xlu0 %v6124_v6  ;;  %6257 = vmatpush.msrb.mxu2 %v6222_v19 }
0x15a6   :  { %v6059_v4 = vadd.f32 %v6049_v40, %v6003_v49 }
0x15a8   :  { %v6115_v53 = vadd.f32 %v6105_v56, %v6059_v4 }
0x15a9   :  { %v5940_v15 = vpop.f32.mrf.mxu2  ;;  %v5996_v1 = vpop.f32.mrf.mxu3 }
0x15aa   :  { %v11422_v62 = vadd.f32 %v6115_v53, %v11325_v14  ;;  %v5948_v30 = vadd.f32 %v5940_v15, %v5893_v59 }
0x15ac   :  { %v6004_v38 = vadd.f32 %v5996_v1, %v5948_v30  ;;  %v6127_v27 = vsel %vm2547_vm11, %v11422_v62, 0.0  ;;  %v6055_v50 = vpop.f32.mrf.mxu0  ;;  %v6111_v13 = vpop.f32.mrf.mxu1  ;;  %v7016_v1 = vld [vmem:[%s11841_s26 + $0x2] ss:$0 sm:$0xff] }
0x15ad   :  { %6128 = vadd.xlane.f32.xlu1 %v6127_v27 }
0x15ae   :  { %v6060_v22 = vadd.f32 %v6052_v18, %v6004_v38  ;;  %v7017_v38 = vld [vmem:[%s11841_s26 + $0x3] ss:$0 sm:$0xff] }
0x15b0   :  { %v6116_v57 = vadd.f32 %v6108_v46, %v6060_v22 }
0x15b1   :  { %v5943_v48 = vpop.f32.mrf.mxu2  ;;  %v5999_v2 = vpop.f32.mrf.mxu3 }
0x15b2   :  { %v11428_v26 = vadd.f32 %v6116_v57, %v11330_v23  ;;  %v5949_v11 = vadd.f32 %v5943_v48, %v5894_v34 }
0x15b4   :  { %v6005_v32 = vadd.f32 %v5999_v2, %v5949_v11  ;;  %v6130_v14 = vsel %vm2547_vm11, %v11428_v26, 0.0 }
0x15b5   :  { %6131 = vadd.xlane.f32.xlu2 %v6130_v14 }
0x15b6   :  { %v6061_v20 = vadd.f32 %v6055_v50, %v6005_v32 }
0x15b8   :  { %v6117_v37 = vadd.f32 %v6111_v13, %v6061_v20 }
0x15ba   :  { %v11433_v54 = vadd.f32 %v6117_v37, %v11335_v8 }
0x15bc   :  { %v6133_v61 = vsel %vm2547_vm11, %v11433_v54, 0.0 }
0x15bd   :  { %6134 = vadd.xlane.f32.xlu0 %v6133_v61 }
0x1618   :  { %v6126_v60 = vpop.xlane.xlu0 %6125 }
0x1619   :  { %v6136_v23 = vmul.f32 %v6126_v60, %v11104_v45 }
0x161b   :  { %v6140_v43 = vsub.f32 %v11416_v7, %v6136_v23 }
0x161d   :  { %v6144_v21 = vmul.f32 %v6140_v43, %v6140_v43 }
0x161f   :  { %v6148_v39 = vsel %vm2547_vm11, %v6144_v21, 0.0 }
0x1620   :  { %6149 = vadd.xlane.f32.xlu1 %v6148_v39  ;;  %v6129_v33 = vpop.xlane.xlu1 %6128 }
0x1621   :  { %v6137_v17 = vmul.f32 %v6129_v33, %v11104_v45 }
0x1623   :  { %v11442_v55 = vsub.f32 %v11422_v62, %v6137_v17 }
0x1625   :  { %v6145_v8 = vmul.f32 %v11442_v55, %v11442_v55 }
0x1627   :  { %v6151_v10 = vsel %vm2547_vm11, %v6145_v8, 0.0 }
0x1628   :  { %6152 = vadd.xlane.f32.xlu2 %v6151_v10  ;;  %v6132_v5 = vpop.xlane.xlu2 %6131 }
0x1629   :  { %v6138_v24 = vmul.f32 %v6132_v5, %v11104_v45 }
0x162b   :  { %v11449_v12 = vsub.f32 %v11428_v26, %v6138_v24 }
0x162d   :  { %v6146_v25 = vmul.f32 %v11449_v12, %v11449_v12 }
0x162f   :  { %v6154_v42 = vsel %vm2547_vm11, %v6146_v25, 0.0 }
0x1630   :  { %6155 = vadd.xlane.f32.xlu0 %v6154_v42  ;;  %v6135_v41 = vpop.xlane.xlu0 %6134 }
0x1631   :  { %v6139_v51 = vmul.f32 %v6135_v41, %v11104_v45 }
0x1633   :  { %v11456_v44 = vsub.f32 %v11433_v54, %v6139_v51 }
0x1635   :  { %v6147_v36 = vmul.f32 %v11456_v44, %v11456_v44 }
0x1637   :  { %v6157_v58 = vsel %vm2547_vm11, %v6147_v36, 0.0 }
0x1638   :  { %6158 = vadd.xlane.f32.xlu1 %v6157_v58 }
0x1693   :  { %v6150_v47 = vpop.xlane.xlu1 %6149 }
0x1694   :  { %v6160_v29 = vmul.f32 %v6150_v47, %v11104_v45 }
0x1696   :  { %v6164_v31 = vadd.f32 1e-05, %v6160_v29  ;;  %v7018_v29 = vld [vmem:[%s11846_s0] ss:$0 sm:$0xff] }
0x1698   :  { %7365 = vrsqrt.f32 %v6164_v31  ;;  %vm6174_vm0 = vweird.f32 %v6164_v31 }
0x169b   :  { %v6153_v28 = vpop.xlane.xlu2 %6152 }
0x169c   :  { %v6161_v63 = vmul.f32 %v6153_v28, %v11104_v45 }
0x169e   :  { %v7366_v40 = vpop.eup %7365  ;;  %v6165_v52 = vadd.f32 1e-05, %v6161_v63 }
0x169f   :  { %v6169_v16 = vmul.f32 %v7366_v40, %v6164_v31  ;;  %vm6175_vm1 = vweird.f32 %v7366_v40 }
0x16a0   :  { %7367 = vrsqrt.f32 %v6165_v52  ;;  %vm6176_vm2 = vmor %vm6174_vm0, %vm6175_vm1  ;;  %vm6184_vm4 = vweird.f32 %v6165_v52 }
0x16a1   :  { %v6170_v56 = vmul.f32 %v7366_v40, %v6169_v16 }
0x16a3   :  { %v6171_v3 = vmul.f32 0.5, %v6170_v56  ;;  %v6156_v49 = vpop.xlane.xlu0 %6155 }
0x16a4   :  { %v6162_v6 = vmul.f32 %v6156_v49, %v11104_v45 }
0x16a5   :  { %v6172_v4 = vsub.f32 1.5, %v6171_v3 }
0x16a6   :  { %v7368_v59 = vpop.eup %7367  ;;  %v6166_v53 = vadd.f32 1e-05, %v6162_v6 }
0x16a7   :  { %v6173_v18 = vmul.f32 %v7366_v40, %v6172_v4  ;;  %v6179_v15 = vmul.f32 %v7368_v59, %v6165_v52  ;;  %vm6185_vm3 = vweird.f32 %v7368_v59 }
0x16a8   :  { %7369 = vrsqrt.f32 %v6166_v53  ;;  %vm6186_vm5 = vmor %vm6184_vm4, %vm6185_vm3  ;;  %vm6194_vm7 = vweird.f32 %v6166_v53 }
0x16a9   :  { %v6177_v30 = vsel %vm6176_vm2, %v7366_v40, %v6173_v18  ;;  %v6180_v46 = vmul.f32 %v7368_v59, %v6179_v15 }
0x16aa   :  { %v6208_v27 = vmul.f32 %v6177_v30, %v6140_v43 }
0x16ab   :  { %v6181_v22 = vmul.f32 0.5, %v6180_v46  ;;  %v6159_v34 = vpop.xlane.xlu1 %6158 }
0x16ac   :  { %v6213_v57 = vmul.f32 %v7016_v1, %v6208_v27  ;;  %v6163_v48 = vmul.f32 %v6159_v34, %v11104_v45 }
0x16ad   :  { %v6182_v2 = vsub.f32 1.5, %v6181_v22 }
0x16ae   :  { %v7370_v11 = vpop.eup %7369  ;;  %v6218_v50 = vadd.f32 %v7017_v38, %v6213_v57  ;;  %v6167_v32 = vadd.f32 1e-05, %v6163_v48 }
0x16af   :  { %v6183_v14 = vmul.f32 %v7368_v59, %v6182_v2  ;;  %v6189_v13 = vmul.f32 %v7370_v11, %v6166_v53  ;;  %vm6195_vm6 = vweird.f32 %v7370_v11 }
0x16b0   :  { %7371 = vrsqrt.f32 %v6167_v32  ;;  %6920 = vmatmul.msk.f32.vlgmr.msrb.gmra.mxu2 %vm2547_vm11, %v6218_v50  ;;  %vm6196_vm8 = vmor %vm6194_vm7, %vm6195_vm6  ;;  %vm6204_vm10 = vweird.f32 %v6167_v32 }
0x16b1   :  { %v6187_v20 = vsel %vm6186_vm5, %v7368_v59, %v6183_v14  ;;  %v6190_v37 = vmul.f32 %v7370_v11, %v6189_v13 }
0x16b2   :  { %v6209_v61 = vmul.f32 %v6187_v20, %v11442_v55 }
0x16b3   :  { %v6191_v60 = vmul.f32 0.5, %v6190_v37 }
0x16b4   :  { %v6214_v23 = vmul.f32 %v7016_v1, %v6209_v61 }
0x16b5   :  { %v6192_v43 = vsub.f32 1.5, %v6191_v60 }
0x16b6   :  { %v7372_v21 = vpop.eup %7371  ;;  %v6219_v39 = vadd.f32 %v7017_v38, %v6214_v23 }
0x16b7   :  { %v6193_v33 = vmul.f32 %v7370_v11, %v6192_v43  ;;  %v6199_v17 = vmul.f32 %v7372_v21, %v6167_v32  ;;  %vm6205_vm9 = vweird.f32 %v7372_v21 }
0x16b8   :  { %6921 = vmatmul.msk.f32.gmra.mxu2 %vm2547_vm11, %v6219_v39  ;;  %vm6206_vm12 = vmor %vm6204_vm10, %vm6205_vm9  ;;  %v6438_v39 = vld [vmem:[%s11847_s7 + $0x38] sm:$0xff] }
0x16b9   :  { %v6197_v8 = vsel %vm6196_vm8, %v7370_v11, %v6193_v33  ;;  %v6200_v10 = vmul.f32 %v7372_v21, %v6199_v17  ;;  %6463 = vmatpush.msrb.mxu3 %v6438_v39 }
0x16ba   :  { %v6210_v5 = vmul.f32 %v6197_v8, %v11449_v12 }
0x16bb   :  { %v6201_v24 = vmul.f32 0.5, %v6200_v10 }
0x16bc   :  { %v6215_v25 = vmul.f32 %v7016_v1, %v6210_v5 }
0x16bd   :  { %v6202_v55 = vsub.f32 1.5, %v6201_v24 }
0x16be   :  { %v6220_v42 = vadd.f32 %v7017_v38, %v6215_v25 }
0x16bf   :  { %v6203_v41 = vmul.f32 %v7372_v21, %v6202_v55  ;;  %v6437_v55 = vld [vmem:[%s11847_s7 + $0x30] sm:$0xff] }
0x16c0   :  { %6922 = vmatmul.msk.f32.gmra.mxu2 %vm2547_vm11, %v6220_v42  ;;  %6464 = vmatpush.msrb.mxu3 %v6437_v55 }
0x16c1   :  { %v6207_v51 = vsel %vm6206_vm12, %v7372_v21, %v6203_v41 }
0x16c2   :  { %v6211_v36 = vmul.f32 %v6207_v51, %v11456_v44 }
0x16c4   :  { %v6216_v58 = vmul.f32 %v7016_v1, %v6211_v36 }
0x16c6   :  { %v6221_v47 = vadd.f32 %v7017_v38, %v6216_v58 }
0x16c8   :  { %6923 = vmatmul.msk.f32.gmra.mxu2 %vm2547_vm11, %v6221_v47 }
0x1733   :  { %v6259_v31 = vpop.f32.mrf.mxu2 }
0x1734   :  { %v11479_v12 = vadd.f32 %v7018_v29, %v6259_v31 }
0x1736   :  { %v11482_v35 = vmul.f32 0.70710677, %v11479_v12 }
0x1738   :  { %v6279_v0 = vand.u32 2147483647, %v11482_v35 }
0x173a   :  { %v6283_v28 = vmul.f32 0.3275911, %v6279_v0  ;;  %v6387_v2 = vsub.f32 0.0, %v6279_v0 }
0x173b   :  { %v6262_v63 = vpop.f32.mrf.mxu2 }
0x173c   :  { %v6287_v40 = vadd.f32 1.0, %v6283_v28  ;;  %v11485_v52 = vadd.f32 %v7018_v29, %v6262_v63  ;;  %v6391_v37 = vmul.f32 %v6387_v2, %v6279_v0 }
0x173e   :  { %7373 = vrcp.f32 %v6287_v40  ;;  %v11488_v44 = vmul.f32 0.70710677, %v11485_v52  ;;  %v6302_v53 = vand.u32 2147483648, %v6287_v40  ;;  %v6300_v1 = vand.u32 2147483647, %v6287_v40 }
0x173f   :  { %vm6296_vm14 = vweird.f32 %v6287_v40  ;;  %v6395_v42 = vmul.f32 1.442695, %v6391_v37 }
0x1740   :  { %v11491_v16 = vand.u32 2147483647, %v11488_v44  ;;  %v6303_v27 = vor.u32 1.1754944e-38, %v6302_v53  ;;  %vm6301_vm0 = vcmp.eq.f32.partialorder %v6300_v1, 8.507059e+37 }
0x1742   :  { %v6284_v56 = vmul.f32 0.3275911, %v11491_v16  ;;  %v6388_v8 = vsub.f32 0.0, %v11491_v16 }
0x1743   :  { %v6265_v9 = vpop.f32.mrf.mxu2 }
0x1744   :  { %v7374_v19 = vpop.eup %7373  ;;  %v11494_v3 = vadd.f32 %v7018_v29, %v6265_v9  ;;  %v6288_v6 = vadd.f32 1.0, %v6284_v56  ;;  %v6392_v0 = vmul.f32 %v6388_v8, %v11491_v16  ;;  %v6435_v9 = vld [vmem:[%s11847_s7 + $0x20] sm:$0xff]  ;;  %v6434_v16 = vld [vmem:[%s11847_s7 + $0x18] sm:$0xff] }
0x1745   :  { %v6292_v49 = vmul.f32 %v7374_v19, %v6287_v40  ;;  %vm6297_vm13 = vweird.f32 %v7374_v19 }
0x1746   :  { %v11497_v4 = vmul.f32 0.70710677, %v11494_v3  ;;  %7375 = vrcp.f32 %v6288_v6  ;;  %vm6298_vm1 = vmor %vm6296_vm14, %vm6297_vm13  ;;  %v6317_v61 = vand.u32 2147483648, %v6288_v6  ;;  %v6315_v23 = vand.u32 2147483647, %v6288_v6 }
0x1747   :  { %v6293_v59 = vsub.f32 1.0, %v6292_v49  ;;  %vm6311_vm3 = vweird.f32 %v6288_v6  ;;  %v6397_v1 = vmul.f32 1.442695, %v6392_v0  ;;  %vm6411_vm13 = vcmp.lt.f32.partialorder %v11482_v35, 0.0 }
0x1748   :  { %v11500_v18 = vand.u32 2147483647, %v11497_v4  ;;  %v6318_v24 = vor.u32 1.1754944e-38, %v6317_v61  ;;  %vm6316_vm5 = vcmp.eq.f32.partialorder %v6315_v23, 8.507059e+37  ;;  %v6431_v23 = vld [vmem:[%s11847_s7] sm:$0xff] }
0x1749   :  { %v6294_v15 = vmul.f32 %v7374_v19, %v6293_v59 }
0x174a   :  { %v6285_v30 = vmul.f32 0.3275911, %v11500_v18 }
0x174b   :  { %v6295_v46 = vadd.f32 %v7374_v19, %v6294_v15  ;;  %v6268_v38 = vpop.f32.mrf.mxu2 }
0x174c   :  { %v11503_v22 = vadd.f32 1.0, %v6285_v30  ;;  %v11505_v34 = vadd.f32 %v7018_v29, %v6268_v38  ;;  %v7376_v57 = vpop.eup %7375  ;;  %v6436_v29 = vld [vmem:[%s11847_s7 + $0x28] sm:$0xff] }
0x174d   :  { %v6299_v48 = vsel %vm6298_vm1, %v7374_v19, %v6295_v46  ;;  %v6307_v50 = vmul.f32 %v7376_v57, %v6288_v6  ;;  %vm6312_vm2 = vweird.f32 %v7376_v57  ;;  %6465 = vmatpush.msrb.mxu3 %v6436_v29  ;;  %v6433_v46 = vld [vmem:[%s11847_s7 + $0x10] sm:$0xff] }
0x174e   :  { %v11507_v11 = vsel %vm6301_vm0, %v6303_v27, %v6299_v48  ;;  %7377 = vrcp.f32 %v11503_v22  ;;  %v11512_v13 = vmul.f32 0.70710677, %v11505_v34  ;;  %vm6313_vm4 = vmor %vm6311_vm3, %vm6312_vm2  ;;  %v6332_v28 = vand.u32 2147483648, %v11503_v22 }
0x174f   :  { %v6351_v32 = vmul.f32 1.0614054, %v11507_v11  ;;  %v6308_v14 = vsub.f32 1.0, %v6307_v50  ;;  %v6330_v56 = vand.u32 2147483647, %v11503_v22  ;;  %6466 = vmatpush.msrb.mxu3 %v6435_v9  ;;  %vm6326_vm7 = vweird.f32 %v11503_v22 }
0x1750   :  { %v11515_v43 = vand.u32 2147483647, %v11512_v13  ;;  %v6333_v53 = vor.u32 1.1754944e-38, %v6332_v28  ;;  %v6389_v48 = vsub.f32 0.0, %v11500_v18  ;;  %vm6412_vm0 = vcmp.lt.f32.partialorder %v11488_v44, 0.0 }
0x1751   :  { %v6355_v20 = vadd.f32 -1.4531521, %v6351_v32  ;;  %v6309_v60 = vmul.f32 %v7376_v57, %v6308_v14  ;;  %6467 = vmatpush.msrb.mxu3 %v6434_v16  ;;  %vm6331_vm9 = vcmp.eq.f32.partialorder %v6330_v56, 8.507059e+37  ;;  %v6432_v32 = vld [vmem:[%s11847_s7 + $0x8] sm:$0xff]  ;;  %vm6413_vm2 = vcmp.lt.f32.partialorder %v11497_v4, 0.0 }
0x1752   :  { %v6286_v10 = vmul.f32 0.3275911, %v11515_v43  ;;  %v6393_v39 = vmul.f32 %v6389_v48, %v11500_v18  ;;  %vm6414_vm3 = vcmp.lt.f32.partialorder %v11512_v13, 0.0 }
0x1753   :  { %v6359_v21 = vmul.f32 %v6355_v20, %v11507_v11  ;;  %v6310_v17 = vadd.f32 %v7376_v57, %v6309_v60  ;;  %6468 = vmatpush.msrb.mxu3 %v6433_v46 }
0x1754   :  { %v7378_v33 = vpop.eup %7377  ;;  %v11523_v51 = vadd.f32 1.0, %v6286_v10 }
0x1755   :  { %v6363_v5 = vadd.f32 1.4214138, %v6359_v21  ;;  %v6322_v25 = vmul.f32 %v7378_v33, %v11503_v22  ;;  %v6314_v41 = vsel %vm6313_vm4, %v7376_v57, %v6310_v17  ;;  %vm6327_vm6 = vweird.f32 %v7378_v33  ;;  %6469 = vmatpush.msrb.mxu3 %v6432_v32 }
0x1756   :  { %v11526_v58 = vsel %vm6316_vm5, %v6318_v24, %v6314_v41  ;;  %7379 = vrcp.f32 %v11523_v51  ;;  %vm6328_vm8 = vmor %vm6326_vm7, %vm6327_vm6  ;;  %vm6341_vm12 = vweird.f32 %v11523_v51  ;;  %v6399_v41 = vmul.f32 1.442695, %v6393_v39 }
0x1757   :  { %v6367_v36 = vmul.f32 %v6363_v5, %v11507_v11  ;;  %v6323_v47 = vsub.f32 1.0, %v6322_v25  ;;  %v6352_v31 = vmul.f32 1.0614054, %v11526_v58  ;;  %7381 = vpow2.f32 %v6395_v42  ;;  %6470 = vmatpush.msrb.mxu3 %v6431_v23 }
0x1758   :  { %7383 = vpow2.f32 %v6397_v1  ;;  %v6271_v5 = vmul.f32 0.5, %v11479_v12 }
0x1759   :  { %v6371_v63 = vadd.f32 -0.28449672, %v6367_v36  ;;  %v6324_v40 = vmul.f32 %v7378_v33, %v6323_v47  ;;  %v6356_v19 = vadd.f32 -1.4531521, %v6352_v31  ;;  %7385 = vpow2.f32 %v6399_v41 }
0x175b   :  { %v6375_v49 = vmul.f32 %v6371_v63, %v11507_v11  ;;  %v6325_v6 = vadd.f32 %v7378_v33, %v6324_v40  ;;  %v6360_v59 = vmul.f32 %v6356_v19, %v11526_v58  ;;  %v6390_v40 = vsub.f32 0.0, %v11515_v43 }
0x175c   :  { %v7380_v38 = vpop.eup %7379 }
0x175d   :  { %v6379_v15 = vadd.f32 0.2548296, %v6375_v49  ;;  %v6329_v30 = vsel %vm6328_vm8, %v7378_v33, %v6325_v6  ;;  %v6364_v27 = vadd.f32 1.4214138, %v6360_v59  ;;  %v6337_v50 = vmul.f32 %v7380_v38, %v11523_v51  ;;  %v7382_v14 = vpop.eup %7381 }
0x175e   :  { %v6334_v57 = vsel %vm6331_vm9, %v6333_v53, %v6329_v30  ;;  %v6345_v33 = vand.u32 2147483647, %v11523_v51  ;;  %vm6342_vm10 = vweird.f32 %v7380_v38  ;;  %v7384_v47 = vpop.eup %7383  ;;  %v6394_v16 = vmul.f32 %v6390_v40, %v11515_v43 }
0x175f   :  { %v6383_v22 = vmul.f32 %v6379_v15, %v11507_v11  ;;  %v6353_v2 = vmul.f32 1.0614054, %v6334_v57  ;;  %v6368_v20 = vmul.f32 %v6364_v27, %v11526_v58  ;;  %v6338_v60 = vsub.f32 1.0, %v6337_v50  ;;  %vm6343_vm14 = vmor %vm6341_vm12, %vm6342_vm10  ;;  %v7386_v30 = vpop.eup %7385 }
0x1760   :  { %v6347_v11 = vand.u32 2147483648, %v11523_v51  ;;  %vm6346_vm1 = vcmp.eq.f32.partialorder %v6345_v33, 8.507059e+37  ;;  %v6272_v27 = vmul.f32 0.5, %v11485_v52 }
0x1761   :  { %v6403_v37 = vmul.f32 %v7382_v14, %v6383_v22  ;;  %v6357_v61 = vadd.f32 -1.4531521, %v6353_v2  ;;  %v6372_v21 = vadd.f32 -0.28449672, %v6368_v20  ;;  %v6339_v10 = vmul.f32 %v7380_v38, %v6338_v60 }
0x1762   :  { %v6348_v36 = vor.u32 1.1754944e-38, %v6347_v11 }
0x1763   :  { %v6407_v17 = vsub.f32 1.0, %v6403_v37  ;;  %v6361_v8 = vmul.f32 %v6357_v61, %v6334_v57  ;;  %v6376_v24 = vmul.f32 %v6372_v21, %v11526_v58  ;;  %v6340_v42 = vadd.f32 %v7380_v38, %v6339_v10 }
0x1764   :  { %v6273_v37 = vmul.f32 0.5, %v11494_v3  ;;  %v7019_v3 = vld [vmem:[#allocation2] ss:$0 sm:$0xff] }
0x1765   :  { %v6415_v25 = vsub.f32 0.0, %v6407_v17  ;;  %v6365_v55 = vadd.f32 1.4214138, %v6361_v8  ;;  %v6380_v18 = vadd.f32 0.2548296, %v6376_v24  ;;  %v6344_v0 = vsel %vm6343_vm14, %v7380_v38, %v6340_v42 }
0x1766   :  { %v6349_v63 = vsel %vm6346_vm1, %v6348_v36, %v6344_v0  ;;  %v6401_v38 = vmul.f32 1.442695, %v6394_v16 }
0x1767   :  { %v6419_v29 = vsel %vm6411_vm13, %v6415_v25, %v6407_v17  ;;  %v6369_v31 = vmul.f32 %v6365_v55, %v6334_v57  ;;  %v6384_v12 = vmul.f32 %v6380_v18, %v11526_v58  ;;  %v6354_v9 = vmul.f32 1.0614054, %v6349_v63 }
0x1768   :  { %v6423_v28 = vadd.f32 1.0, %v6419_v29  ;;  %7387 = vpow2.f32 %v6401_v38  ;;  %v6274_v17 = vmul.f32 0.5, %v11505_v34 }
0x1769   :  { %v6373_v56 = vadd.f32 -0.28449672, %v6369_v31  ;;  %v6404_v19 = vmul.f32 %v7384_v47, %v6384_v12  ;;  %v6358_v49 = vadd.f32 -1.4531521, %v6354_v9 }
0x176a   :  { %v6427_v51 = vmul.f32 %v6423_v28, %v6271_v5 }
0x176b   :  { %v6377_v35 = vmul.f32 %v6373_v56, %v6334_v57  ;;  %v6408_v6 = vsub.f32 1.0, %v6404_v19  ;;  %v6362_v53 = vmul.f32 %v6358_v49, %v6349_v63 }
0x176c   :  { %6924 = vmatmul.msk.f32.vlgmr.msrb.gmra.mxu3 %vm4932_vm15, %v6427_v51 }
0x176d   :  { %v6381_v59 = vadd.f32 0.2548296, %v6377_v35  ;;  %v6416_v15 = vsub.f32 0.0, %v6408_v6  ;;  %v6366_v1 = vadd.f32 1.4214138, %v6362_v53 }
0x176e   :  { %v7388_v52 = vpop.eup %7387 }
0x176f   :  { %v6385_v58 = vmul.f32 %v6381_v59, %v6334_v57  ;;  %v6420_v46 = vsel %vm6412_vm0, %v6416_v15, %v6408_v6  ;;  %v6370_v2 = vmul.f32 %v6366_v1, %v6349_v63  ;;  %vm6643_vm0 = vcmask 74752  }
0x1770   :  { %v6424_v48 = vadd.f32 1.0, %v6420_v46 }
0x1771   :  { %v6405_v22 = vmul.f32 %v7386_v30, %v6385_v58  ;;  %v6374_v43 = vadd.f32 -0.28449672, %v6370_v2 }
0x1772   :  { %v6428_v50 = vmul.f32 %v6424_v48, %v6272_v27 }
0x1773   :  { %v6409_v32 = vsub.f32 1.0, %v6405_v22  ;;  %v6378_v20 = vmul.f32 %v6374_v43, %v6349_v63 }
0x1774   :  { %6925 = vmatmul.msk.f32.gmra.mxu3 %vm4932_vm15, %v6428_v50 }
0x1775   :  { %v6417_v14 = vsub.f32 0.0, %v6409_v32  ;;  %v6382_v57 = vadd.f32 0.2548296, %v6378_v20 }
0x1777   :  { %v6421_v44 = vsel %vm6413_vm2, %v6417_v14, %v6409_v32  ;;  %v6386_v60 = vmul.f32 %v6382_v57, %v6349_v63 }
0x1778   :  { %v6425_v61 = vadd.f32 1.0, %v6421_v44 }
0x1779   :  { %v6406_v21 = vmul.f32 %v7388_v52, %v6386_v60 }
0x177a   :  { %v6429_v23 = vmul.f32 %v6425_v61, %v6273_v37 }
0x177b   :  { %v6410_v39 = vsub.f32 1.0, %v6406_v21 }
0x177c   :  { %6926 = vmatmul.msk.f32.gmra.mxu3 %vm4932_vm15, %v6429_v23 }
0x177d   :  { %v6418_v33 = vsub.f32 0.0, %v6410_v39 }
0x177f   :  { %v6422_v11 = vsel %vm6414_vm3, %v6418_v33, %v6410_v39 }
0x1780   :  { %v6426_v8 = vadd.f32 1.0, %v6422_v11 }
0x1782   :  { %v6430_v4 = vmul.f32 %v6426_v8, %v6274_v17 }
0x1784   :  { %6927 = vmatmul.msk.f32.gmra.mxu3 %vm4932_vm15, %v6430_v4 }
0x17ef   :  { %v6472_v10 = vpop.f32.mrf.mxu3 }
0x17f0   :  { %v6473_v29 = vadd.f32 %v7019_v3, %v6472_v10 }
0x17f7   :  { %v6475_v5 = vpop.f32.mrf.mxu3 }
0x17f8   :  { %v6476_v24 = vadd.f32 %v7019_v3, %v6475_v5 }
0x17fa   :  { %v6485_v25 = vadd.f32 %v6476_v24, %v11422_v62  ;;  %v6484_v62 = vadd.f32 %v6473_v29, %v11416_v7 }
0x17fc   :  { %v6493_v55 = vsel %vm2547_vm11, %v6485_v25, 0.0  ;;  %v6490_v0 = vsel %vm2547_vm11, %v6484_v62, 0.0 }
0x17fd   :  { %6494 = vadd.xlane.f32.xlu1 %v6493_v55 }
0x17ff   :  { %v6478_v42 = vpop.f32.mrf.mxu3 }
0x1800   :  { %v6479_v18 = vadd.f32 %v7019_v3, %v6478_v42 }
0x1802   :  { %v6486_v13 = vadd.f32 %v6479_v18, %v11428_v26 }
0x1804   :  { %v6496_v41 = vsel %vm2547_vm11, %v6486_v13, 0.0 }
0x1805   :  { %6497 = vadd.xlane.f32.xlu0 %v6496_v41 }
0x1807   :  { %v6481_v34 = vpop.f32.mrf.mxu3 }
0x1808   :  { %v6482_v36 = vadd.f32 %v7019_v3, %v6481_v34 }
0x180a   :  { %v6487_v47 = vadd.f32 %v6482_v36, %v11433_v54  ;;  %v7020_v36 = vld [vmem:[%s11848_s11] ss:$0 sm:$0xff] }
0x180c   :  { %v6499_v31 = vsel %vm2547_vm11, %v6487_v47, 0.0 }
0x180d   :  { %6500 = vadd.xlane.f32.xlu2 %v6499_v31 }
0x1815   :  { %6491 = vadd.xlane.f32.xlu2 %v6490_v0 }
0x1870   :  { %v6495_v28 = vpop.xlane.xlu1 %6494 }
0x1871   :  { %v6503_v12 = vmul.f32 %v6495_v28, %v11104_v45 }
0x1873   :  { %v11575_v26 = vsub.f32 %v6485_v25, %v6503_v12 }
0x1875   :  { %v6511_v63 = vmul.f32 %v11575_v26, %v11575_v26 }
0x1877   :  { %v6517_v40 = vsel %vm2547_vm11, %v6511_v63, 0.0 }
0x1878   :  { %6518 = vadd.xlane.f32.xlu2 %v6517_v40  ;;  %v6498_v54 = vpop.xlane.xlu0 %6497 }
0x1879   :  { %v6504_v56 = vmul.f32 %v6498_v54, %v11104_v45 }
0x187b   :  { %v11581_v9 = vsub.f32 %v6486_v13, %v6504_v56 }
0x187d   :  { %v6512_v7 = vmul.f32 %v11581_v9, %v11581_v9 }
0x187f   :  { %v6520_v51 = vsel %vm2547_vm11, %v6512_v7, 0.0 }
0x1880   :  { %6521 = vadd.xlane.f32.xlu1 %v6520_v51  ;;  %v6501_v19 = vpop.xlane.xlu2 %6500 }
0x1881   :  { %v6505_v35 = vmul.f32 %v6501_v19, %v11104_v45  ;;  %v6588_v19 = vld [vmem:[%s7736_s27] sm:$0x3]  ;;  %s6650_s27 = sshll.u32 %s7529_s16, 4  ;;  %s6651_s27 = int_to_ptr.vmem [resolvable:$true] %s6650_s27 }
0x1883   :  { %v6509_v49 = vsub.f32 %v6487_v47, %v6505_v35  ;;  %v6615_v35 = vld [vmem:[%s7741_s4 + $0x18] sm:$0xff] }
0x1885   :  { %v6513_v6 = vmul.f32 %v6509_v49, %v6509_v49 }
0x1887   :  { %v6523_v16 = vsel %vm2547_vm11, %v6513_v6, 0.0  ;;  %v6613_v6 = vld [vmem:[%s7741_s4 + $0x8] sm:$0xff] }
0x1888   :  { %v6492_v59 = vpop.xlane.xlu2 %6491  ;;  %6524 = vadd.xlane.f32.xlu0 %v6523_v16  ;;  %v6612_v16 = vld [vmem:[%s7741_s4] sm:$0xff] }
0x1889   :  { %v6502_v53 = vmul.f32 %v6492_v59, %v11104_v45 }
0x188b   :  { %v11589_v15 = vsub.f32 %v6484_v62, %v6502_v53  ;;  %v7021_v62 = vld [vmem:[%s11848_s11 + $0x1] ss:$0 sm:$0xff]  ;;  %v7022_v53 = vld [vmem:[#allocation5] ss:$0 sm:$0xff] }
0x188d   :  { %v6510_v58 = vmul.f32 %v11589_v15, %v11589_v15 }
0x188f   :  { %v6514_v1 = vsel %vm2547_vm11, %v6510_v58, 0.0 }
0x1890   :  { %6515 = vadd.xlane.f32.xlu0 %v6514_v1 }
0x18eb   :  { %v6519_v30 = vpop.xlane.xlu2 %6518 }
0x18ec   :  { %v6527_v46 = vmul.f32 %v6519_v30, %v11104_v45 }
0x18ee   :  { %v6531_v38 = vadd.f32 1e-05, %v6527_v46 }
0x18f0   :  { %7389 = vrsqrt.f32 %v6531_v38  ;;  %vm6550_vm7 = vweird.f32 %v6531_v38 }
0x18f3   :  { %v6522_v27 = vpop.xlane.xlu1 %6521 }
0x18f4   :  { %v6528_v48 = vmul.f32 %v6522_v27, %v11104_v45 }
0x18f6   :  { %v6532_v22 = vadd.f32 1e-05, %v6528_v48  ;;  %v7390_v2 = vpop.eup %7389 }
0x18f7   :  { %v6545_v50 = vmul.f32 %v7390_v2, %v6531_v38  ;;  %vm6551_vm4 = vweird.f32 %v7390_v2 }
0x18f8   :  { %7391 = vrsqrt.f32 %v6532_v22  ;;  %vm6560_vm5 = vweird.f32 %v6532_v22  ;;  %vm6552_vm9 = vmor %vm6550_vm7, %vm6551_vm4 }
0x18f9   :  { %v6546_v57 = vmul.f32 %v7390_v2, %v6545_v50 }
0x18fb   :  { %v6525_v32 = vpop.xlane.xlu0 %6524  ;;  %v6547_v60 = vmul.f32 0.5, %v6546_v57 }
0x18fc   :  { %v6529_v43 = vmul.f32 %v6525_v32, %v11104_v45 }
0x18fd   :  { %v6548_v11 = vsub.f32 1.5, %v6547_v60 }
0x18fe   :  { %v7392_v14 = vpop.eup %7391  ;;  %v6533_v44 = vadd.f32 1e-05, %v6529_v43 }
0x18ff   :  { %v6555_v20 = vmul.f32 %v7392_v14, %v6532_v22  ;;  %vm6561_vm15 = vweird.f32 %v7392_v14  ;;  %v6549_v10 = vmul.f32 %v7390_v2, %v6548_v11 }
0x1900   :  { %7393 = vrsqrt.f32 %v6533_v44  ;;  %vm6562_vm6 = vmor %vm6560_vm5, %vm6561_vm15  ;;  %vm6570_vm10 = vweird.f32 %v6533_v44 }
0x1901   :  { %v6556_v37 = vmul.f32 %v7392_v14, %v6555_v20  ;;  %v6553_v25 = vsel %vm6552_vm9, %v7390_v2, %v6549_v10 }
0x1902   :  { %v6575_v47 = vmul.f32 %v6553_v25, %v11575_v26 }
0x1903   :  { %v6557_v61 = vmul.f32 0.5, %v6556_v37  ;;  %v6516_v52 = vpop.xlane.xlu0 %6515 }
0x1904   :  { %v6526_v23 = vmul.f32 %v6516_v52, %v11104_v45  ;;  %v6580_v63 = vmul.f32 %v7020_v36, %v6575_v47 }
0x1905   :  { %v6558_v21 = vsub.f32 1.5, %v6557_v61 }
0x1906   :  { %v7394_v39 = vpop.eup %7393  ;;  %v6530_v33 = vadd.f32 1e-05, %v6526_v23  ;;  %v6585_v26 = vadd.f32 %v7021_v62, %v6580_v63 }
0x1907   :  { %v6565_v17 = vmul.f32 %v7394_v39, %v6533_v44  ;;  %v6559_v8 = vmul.f32 %v7392_v14, %v6558_v21  ;;  %vm6571_vm8 = vweird.f32 %v7394_v39 }
0x1908   :  { %7395 = vrsqrt.f32 %v6530_v33  ;;  %vm6572_vm12 = vmor %vm6570_vm10, %vm6571_vm8  ;;  %vm6540_vm14 = vweird.f32 %v6530_v33 }
0x1909   :  { %v6566_v4 = vmul.f32 %v7394_v39, %v6565_v17  ;;  %v6563_v5 = vsel %vm6562_vm6, %v7392_v14, %v6559_v8 }
0x190a   :  { %v6576_v18 = vmul.f32 %v6563_v5, %v11581_v9 }
0x190b   :  { %v6567_v3 = vmul.f32 0.5, %v6566_v4 }
0x190c   :  { %v6581_v0 = vmul.f32 %v7020_v36, %v6576_v18 }
0x190d   :  { %v6568_v24 = vsub.f32 1.5, %v6567_v3 }
0x190e   :  { %v7396_v45 = vpop.eup %7395  ;;  %v6586_v54 = vadd.f32 %v7021_v62, %v6581_v0 }
0x190f   :  { %v6569_v55 = vmul.f32 %v7394_v39, %v6568_v24  ;;  %v6535_v42 = vmul.f32 %v7396_v45, %v6530_v33  ;;  %vm6541_vm13 = vweird.f32 %v7396_v45 }
0x1910   :  { %vm6542_vm1 = vmor %vm6540_vm14, %vm6541_vm13 }
0x1911   :  { %v6573_v13 = vsel %vm6572_vm12, %v7394_v39, %v6569_v55  ;;  %v6536_v41 = vmul.f32 %v7396_v45, %v6535_v42 }
0x1912   :  { %v6577_v34 = vmul.f32 %v6573_v13, %v6509_v49  ;;  %v6614_v49 = vld [vmem:[%s7741_s4 + $0x10] sm:$0xff]  ;;  %s7465_s4 = scalar_lea.hbm %s7464_s5, 2 }
0x1913   :  { %v6537_v29 = vmul.f32 0.5, %v6536_v41  ;;  %p7466_p10 = scmp.ne.s32.totalorder %s7464_s5, %s7465_s4  ;;  %p7469_p12 = scmp.lt.s32.totalorder %s7467_s9, %s7465_s4 }
0x1914   :  { %v6582_v31 = vmul.f32 %v7020_v36, %v6577_v34 }
0x1915   :  { %v6538_v28 = vsub.f32 1.5, %v6537_v29  ;;  %p7470_p13 = por %p7469_p12, %p7468_p11 }
0x1916   :  { %v6587_v12 = vadd.f32 %v7021_v62, %v6582_v31 }
0x1917   :  { %v6539_v40 = vmul.f32 %v7396_v45, %v6538_v28  ;;  %p7471_p0 = pnand %p7470_p13, %p7466_p10 }
0x1918   :  { %6604 = vmatpush.msra.mxu0 %v6587_v12 }
0x1919   :  { %v6543_v56 = vsel %vm6542_vm1, %v7396_v45, %v6539_v40 }
0x191a   :  { %6605 = vmatpush.msra.mxu0 %v6586_v54  ;;  %v6574_v9 = vmul.f32 %v6543_v56, %v11589_v15 }
0x191c   :  { %6606 = vmatpush.msra.mxu0 %v6585_v26  ;;  %v6579_v7 = vmul.f32 %v7020_v36, %v6574_v9 }
0x191e   :  { %v6584_v51 = vadd.f32 %v7021_v62, %v6579_v7 }
0x1920   :  { %6607 = vmatpush.msra.mxu0 %v6584_v51 }
0x1921   :  { %6928 = vmatmul.msk.f32.vlgmr.msra.gmra.mxu0 %vm2547_vm11, %v6588_v19 }
0x1922   :  { %6635 = vmatpush.msrb.mxu0 %v6615_v35 }
0x1924   :  { %6636 = vmatpush.msrb.mxu0 %v6614_v49 }
0x1926   :  { %6637 = vmatpush.msrb.mxu0 %v6613_v6 }
0x1928   :  { %6638 = vmatpush.msrb.mxu0 %v6612_v16 }
0x199e   :  { %v6609_v59 = vpop.f32.mrf.mxu0 }
0x199f   :  { %6929 = vmatmul.msk.f32.vlgmr.msrb.gmra.mxu0 %vm2547_vm11, %v6609_v59 }
0x1a1c   :  { %v6640_v15 = vpop.f32.mrf.mxu0 }
0x1a1d   :  { %v6641_v58 = vadd.f32 %v7022_v53, %v6640_v15 }
0x1a1f   :  { %6644 = vst.msk [vmem:[#allocation7] sm:$0x3] %vm6643_vm0, %v6641_v58 }
0x1a20   :  { %7474 = shalt.err (!%p7471_p0)
}
0x1a21   :  { %6655 = dma.vmem_to_hbm [thread:$0]  %s6651_s27, 32, %s6653_s15, [#allocation4]  }
0x1a22   :  { %7479 = dma.done.wait [#allocation4], 32  }
0x1a23   :  { %7480 = vsyncadd [#allocation4], 4294967264 }
0x1a24   :  { %6660 = vsyncpa [#allocation3], 1 }
0x1a25   :  { %6661 = vsyncpa [#allocation6], 1 }
0x1a26   :  { %6662 = vsyncpa [#allocation4], 1 }

</bundles_post_ra>
